<compile_context>
chip_gen: v5e
topology: v5e:2x2
jax: 0.10.0
libtpu: 0.0.40
codegen_flags: <defaults>
</compile_context>

<pallas_src>
import functools

import jax
import jax.numpy as jnp
import numpy as np
from jax.experimental import pallas as pl
from jax.experimental.pallas import tpu as pltpu


def _round_up(v, m):
    return (v + m - 1) // m * m


def _safe_recip(d):
    # Guard against duplicate knots (e.g. after a grid update): 1/0 -> 0.
    safe = jnp.where(d == 0, 1.0, d)
    return jnp.where(d == 0, 0.0, 1.0 / safe)


# ----------------------------------------------------------------------------
# Pallas kernel: packed-lane Cox-de Boor + fused (spline | SiLU) contraction.
# ----------------------------------------------------------------------------
def kan_linear_kernel(x_ref, coef_ref, w_ref, o_ref, *, spline_order,
                      in_features, lanes):
    """One (tb, lanes) batch tile.

    Packed lane layout: lane = j*in_features + f.
      lanes [0, n0*in)        : degree-0 ... order-k basis blocks (j fast over in)
      lanes [K*in, (K+1)*in)  : SiLU(x) block, fused as an "extra basis"
      remaining lanes         : zero padding (coef rows are 0 there)
    """
    x = x_ref[...]                          # (tb, lanes) f32, x tiled over j
    coef = coef_ref[...]                    # (rows_pad, lanes) f32 lane tables

    g_lo = coef[0:1, :]                     # grid[f, j]        (1e30 on pad lanes)
    g_hi = coef[1:2, :]                     # grid[f, j+1]
    silu_mask = coef[2:3, :]                # 1.0 on the SiLU lane block

    # Degree-0 bases: half-open interval [g_j, g_{j+1}) (matches PyTorch; x equal
    # to the last knot yields all-zero spline bases, same as the reference).
    slab = jnp.logical_and(x >= g_lo, x < g_hi).astype(jnp.float32)
    d_left = x - g_lo                       # hoisted: level independent

    shift = lanes - in_features             # roll that maps lane l -> l + in (bases[j+1])
    row = 3
    for _ in range(spline_order):
        a = coef[row:row + 1, :]            # 1/(g[j+k]   - g[j])      (0 where invalid)
        d_hi = coef[row + 1:row + 2, :]     # g[j+k+1]
        nb = coef[row + 2:row + 3, :]       # -1/(g[j+k+1] - g[j+1])   (0 where invalid)
        row += 3
        upper = pltpu.roll(slab, shift, axis=1)            # bases[j+1] (XLU slot)
        slab = (d_left * a) * slab + ((x - d_hi) * nb) * upper

    # Fuse the base branch: SiLU(x) becomes an extra lane block of the slab.
    slab = slab + silu_mask * (x * jax.nn.sigmoid(x))

    # Single fused MXU contraction: (tb, lanes) @ (lanes, out_pad).
    o_ref[...] = jnp.dot(slab.astype(w_ref.dtype), w_ref[...],
                         preferred_element_type=jnp.float32).astype(o_ref.dtype)


# ----------------------------------------------------------------------------
# Wrapper: parameter prep (glue) + pallas_call with chip-aware batch tiling.
# ----------------------------------------------------------------------------
def kan_linear(x, grid, base_weight, spline_weight, spline_scaler,
               *, grid_size, spline_order, tb=None,
               weight_dtype=jnp.bfloat16):
    assert spline_order >= 1
    B, in_features = x.shape
    out_features = base_weight.shape[0]
    K = grid_size + spline_order
    n_knots = grid.shape[1]
    assert n_knots == grid_size + 2 * spline_order + 1
    n0 = n_knots - 1                                   # degree-0 basis count

    lanes = _round_up(max(n0, K + 1) * in_features, 128)
    out_pad = _round_up(out_features, 128)

    # ---- chip-aware tiling / VMEM budget ----
    kind = ""
    vmem_cap = 128 * 1024 * 1024
    try:
        kind = jax.devices()[0].device_kind.lower()
    except Exception:
        pass
    try:
        vmem_cap = int(getattr(pltpu.get_tpu_info(), "vmem_capacity_bytes",
                               vmem_cap))
    except Exception:
        pass
    two_tc = ("v7" in kind) or (vmem_cap <= 80 * 1024 * 1024)
    if tb is None:
        if two_tc:
            tb = 128          # >=2 grid steps at B>=256 feeds both TensorCores
        elif "v6" in kind:
            tb = 256          # single TC, 256-wide MXU: one big step for B=256
        else:
            tb = 128          # v5e: 4x128x128 MXU already filled at 128 rows
    tb = max(8, min(tb, _round_up(B, 8)))
    B_pad = _round_up(B, tb)

    # ---- glue: packed-lane tables (not the hot path) ----
    f32 = jnp.float32
    xg = jnp.asarray(grid, f32)                        # (in, n_knots)

    def pack_rows(mat_jin, pad_value=0.0):
        # (n_j, in) -> (1, lanes) with lane = j*in + f; pad lanes get pad_value.
        flat = mat_jin.reshape(1, -1)
        return jnp.pad(flat, ((0, 0), (0, lanes - flat.shape[1])),
                       constant_values=pad_value)

    # Pad lanes: finite sentinels (never +/-inf -> avoids NaN via inf*0) that
    # make the degree-0 interval empty; recursion coefs are 0 there anyway.
    g_lo = pack_rows(xg[:, 0:n0].T, pad_value=1e30)
    g_hi = pack_rows(xg[:, 1:n0 + 1].T, pad_value=-1e30)
    silu_mask = jnp.zeros((1, lanes), f32)
    silu_mask = silu_mask.at[0, K * in_features:(K + 1) * in_features].set(1.0)

    rows = [g_lo, g_hi, silu_mask]
    for k in range(1, spline_order + 1):
        nk = n0 - k                                    # valid output bases at level k
        a_k = _safe_recip(xg[:, k:k + nk] - xg[:, 0:nk]).T            # (nk, in)
        d_k = xg[:, k + 1:k + 1 + nk].T                               # g[j+k+1]
        b_k = -_safe_recip(xg[:, k + 1:k + 1 + nk] - xg[:, 1:1 + nk]).T
        rows += [pack_rows(a_k), pack_rows(d_k), pack_rows(b_k)]
    coef = jnp.concatenate(rows, axis=0)
    rows_pad = _round_up(coef.shape[0], 8)
    coef = jnp.pad(coef, ((0, rows_pad - coef.shape[0]), (0, 0)))

    # Fused weight: rows [j*in+f] = scaled spline weight, rows [K*in+f] = base_weight.T
    sw = (jnp.asarray(spline_weight, f32)
          * jnp.asarray(spline_scaler, f32)[:, :, None])              # (out, in, K)
    sw = jnp.transpose(sw, (2, 1, 0)).reshape(K * in_features, out_features)
    bw = jnp.asarray(base_weight, f32).T                              # (in, out)
    w_core = jnp.concatenate([sw, bw], axis=0)                        # ((K+1)*in, out)
    w = jnp.zeros((lanes, out_pad), f32)
    w = w.at[:(K + 1) * in_features, :out_features].set(w_core)
    w = w.astype(weight_dtype)

    # Packed activations: x tiled over the j blocks (lane = j*in + f).
    xf = jnp.asarray(x, f32)
    x_tiled = jnp.tile(xf, (1, n0))                                   # (B, n0*in)
    x_packed = jnp.pad(x_tiled,
                       ((0, B_pad - B), (0, lanes - n0 * in_features)))

    kernel = functools.partial(kan_linear_kernel, spline_order=spline_order,
                               in_features=in_features, lanes=lanes)

    # Advisory cost estimate for XLA scheduling.
    wbytes = jnp.dtype(weight_dtype).itemsize
    flops = (2 * B_pad * lanes * out_pad                # fused contraction
             + (7 * spline_order + 8) * B_pad * lanes)  # recursion + SiLU
    bytes_accessed = (4 * B_pad * lanes + 4 * B_pad * out_pad
                      + wbytes * lanes * out_pad + 4 * rows_pad * lanes)
    cost = pl.CostEstimate(flops=int(flops), transcendentals=int(B_pad * lanes),
                           bytes_accessed=int(bytes_accessed))

    # VMEM budget: double-buffered x/out, single-buffered constants, headroom
    # for the recursion's spill slabs.  Cap at 48 MiB on v7x (64 MiB physical),
    # allow up to ~100 MiB on v5e/v6e (128 MiB physical).
    resident = (2 * 4 * tb * lanes + 2 * 4 * tb * out_pad
                + 4 * rows_pad * lanes + wbytes * lanes * out_pad)
    upper = (48 if two_tc else 100) * 1024 * 1024
    vmem_limit = int(min(upper, max(32 * 1024 * 1024,
                                    2 * resident + 8 * 1024 * 1024)))

    def _run(single_buffer_consts):
        def const_spec(shape):
            if single_buffer_consts:
                return pl.BlockSpec(shape, lambda i: (0, 0),
                                    pipeline_mode=pl.Buffered(1))
            return pl.BlockSpec(shape, lambda i: (0, 0))

        return pl.pallas_call(
            kernel,
            out_shape=jax.ShapeDtypeStruct((B_pad, out_pad), x.dtype),
            grid_spec=pltpu.PrefetchScalarGridSpec(
                num_scalar_prefetch=0,
                grid=(B_pad // tb,),
                in_specs=[
                    pl.BlockSpec((tb, lanes), lambda i: (i, 0)),
                    const_spec((rows_pad, lanes)),
                    const_spec((lanes, out_pad)),
                ],
                out_specs=pl.BlockSpec((tb, out_pad), lambda i: (i, 0)),
            ),
            compiler_params=pltpu.CompilerParams(
                dimension_semantics=("parallel",),
                vmem_limit_bytes=vmem_limit),
            cost_estimate=cost,
        )(x_packed, coef, w)

    try:
        out_padded = _run(True)
    except Exception:
        # Fallback if pipeline_mode=pl.Buffered(1) is unsupported in this jax.
        out_padded = _run(False)

    return out_padded[:B, :out_features]


# ----------------------------------------------------------------------------
# Pure-JAX reference (mirrors the PyTorch forward) for correctness checks.
# ----------------------------------------------------------------------------
def kan_linear_ref(x, grid, base_weight, spline_weight, spline_scaler,
                   *, spline_order):
    xe = x[:, :, None]
    bases = jnp.logical_and(xe >= grid[:, :-1], xe < grid[:, 1:]).astype(x.dtype)
    for k in range(1, spline_order + 1):
        bases = ((xe - grid[:, :-(k + 1)])
                 / (grid[:, k:-1] - grid[:, :-(k + 1)]) * bases[:, :, :-1]
                 + (grid[:, k + 1:] - xe)
                 / (grid[:, k + 1:] - grid[:, 1:-k]) * bases[:, :, 1:])
    base_out = (x * jax.nn.sigmoid(x)) @ base_weight.T
    sw = spline_weight * spline_scaler[:, :, None]
    spline_out = bases.reshape(x.shape[0], -1) @ sw.reshape(sw.shape[0], -1).T
    return base_out + spline_out


if __name__ == "__main__":
    # Small, forward-consistent shapes (B=256 gives 2 parallel grid steps at
    # tb=128 on v7x, or one 256-row step on v6e).
    batch, in_features, out_features = 256, 32, 16
    grid_size, spline_order = 5, 3
    grid_range = (-1.0, 1.0)
    K = grid_size + spline_order

    # KAN knot grid (same for every input feature, expanded like the buffer).
    h = (grid_range[1] - grid_range[0]) / grid_size
    knots = (jnp.arange(-spline_order, grid_size + spline_order + 1,
                        dtype=jnp.float32) * h + grid_range[0])      # (12,)
    grid = jnp.broadcast_to(knots, (in_features, knots.shape[0]))    # (in, 12)

    # Deterministic synthetic parameters (shapes from __init__).
    key = jax.random.PRNGKey(0)
    k_x, k_bw, k_sw, k_sc = jax.random.split(key, 4)
    x = jax.random.normal(k_x, (batch, in_features), dtype=jnp.float32) * 0.7
    base_weight = jax.random.uniform(
        k_bw, (out_features, in_features), jnp.float32, -0.3, 0.3)
    spline_weight = jax.random.normal(
        k_sw, (out_features, in_features, K), jnp.float32) * 0.05
    spline_scaler = jax.random.uniform(
        k_sc, (out_features, in_features), jnp.float32, -0.5, 0.5)
    # TODO(synk): curve2coeff (torch.linalg.lstsq) init is not reproduced;
    # synthetic-deterministic weights do not change the forward semantics.

    ref = kan_linear_ref(x, grid, base_weight, spline_weight, spline_scaler,
                         spline_order=spline_order)

    # f32-weight path: tight semantics check.
    out_f32 = kan_linear(x, grid, base_weight, spline_weight, spline_scaler,
                         grid_size=grid_size, spline_order=spline_order,
                         weight_dtype=jnp.float32)
    out_f32 = jax.block_until_ready(out_f32)
    np.testing.assert_allclose(np.asarray(out_f32), np.asarray(ref),
                               rtol=5e-5, atol=5e-5)

    # bf16-weight path (performance default): loose check vs f32 reference.
    out_bf16 = kan_linear(x, grid, base_weight, spline_weight, spline_scaler,
                          grid_size=grid_size, spline_order=spline_order,
                          weight_dtype=jnp.bfloat16)
    out_bf16 = jax.block_until_ready(out_bf16)
    np.testing.assert_allclose(np.asarray(out_bf16), np.asarray(ref),
                               rtol=5e-2, atol=5e-2)

    print("KERNEL_OK")
</pallas_src>

<mosaic_0001>
module attributes {stable_mosaic.version = 11 : i64} {
  func.func @kan_linear_kernel(%arg0: i32, %arg1: memref<128x384xf32, #tpu.memory_space<vmem>>, %arg2: memref<16x384xf32, #tpu.memory_space<vmem>>, %arg3: memref<384x128xf32, #tpu.memory_space<vmem>>, %arg4: memref<128x128xf32, #tpu.memory_space<vmem>>) attributes {dimension_semantics = [#tpu.dimension_semantics<parallel>], iteration_bounds = array<i64: 2>, scalar_prefetch = 0 : i64, scratch_operands = 0 : i64, tpu.core_type = #tpu.core_type<tc>, window_params = [{transform_indices = @transform_0, window_bounds = array<i64: 128, 384>}, {pipeline_mode = #tpu.pipeline_mode<synchronous>, transform_indices = @transform_1, window_bounds = array<i64: 16, 384>}, {pipeline_mode = #tpu.pipeline_mode<synchronous>, transform_indices = @transform_2, window_bounds = array<i64: 384, 128>}, {transform_indices = @transform_3, window_bounds = array<i64: 128, 128>}]} {
    %c0 = arith.constant 0 : index
    %c0_0 = arith.constant 0 : index
    %0 = vector.load %arg1[%c0, %c0_0] : memref<128x384xf32, #tpu.memory_space<vmem>>, vector<128x384xf32>
    %c0_1 = arith.constant 0 : index
    %c0_2 = arith.constant 0 : index
    %1 = vector.load %arg2[%c0_1, %c0_2] : memref<16x384xf32, #tpu.memory_space<vmem>>, vector<16x384xf32>
    %2 = vector.extract_strided_slice %1 {offsets = [0, 0], sizes = [1, 384], strides = [1, 1]} : vector<16x384xf32> to vector<1x384xf32>
    %3 = vector.extract_strided_slice %1 {offsets = [1, 0], sizes = [1, 384], strides = [1, 1]} : vector<16x384xf32> to vector<1x384xf32>
    %4 = vector.extract_strided_slice %1 {offsets = [2, 0], sizes = [1, 384], strides = [1, 1]} : vector<16x384xf32> to vector<1x384xf32>
    %5 = vector.broadcast %2 : vector<1x384xf32> to vector<128x384xf32>
    %6 = arith.cmpf oge, %0, %5 : vector<128x384xf32>
    %7 = vector.broadcast %3 : vector<1x384xf32> to vector<128x384xf32>
    %8 = arith.cmpf olt, %0, %7 : vector<128x384xf32>
    %9 = arith.andi %6, %8 : vector<128x384xi1>
    %10 = arith.extui %9 : vector<128x384xi1> to vector<128x384xi32>
    %11 = arith.sitofp %10 : vector<128x384xi32> to vector<128x384xf32>
    %12 = vector.broadcast %2 : vector<1x384xf32> to vector<128x384xf32>
    %13 = arith.subf %0, %12 : vector<128x384xf32>
    %14 = vector.extract_strided_slice %1 {offsets = [3, 0], sizes = [1, 384], strides = [1, 1]} : vector<16x384xf32> to vector<1x384xf32>
    %15 = vector.extract_strided_slice %1 {offsets = [4, 0], sizes = [1, 384], strides = [1, 1]} : vector<16x384xf32> to vector<1x384xf32>
    %16 = vector.extract_strided_slice %1 {offsets = [5, 0], sizes = [1, 384], strides = [1, 1]} : vector<16x384xf32> to vector<1x384xf32>
    %c352_i32 = arith.constant 352 : i32
    %17 = tpu.dynamic_rotate %11 by %c352_i32 dim 1 : vector<128x384xf32>, i32 -> vector<128x384xf32>
    %18 = vector.broadcast %14 : vector<1x384xf32> to vector<128x384xf32>
    %19 = arith.mulf %13, %18 : vector<128x384xf32>
    %20 = arith.mulf %19, %11 : vector<128x384xf32>
    %21 = vector.broadcast %15 : vector<1x384xf32> to vector<128x384xf32>
    %22 = arith.subf %0, %21 : vector<128x384xf32>
    %23 = vector.broadcast %16 : vector<1x384xf32> to vector<128x384xf32>
    %24 = arith.mulf %22, %23 : vector<128x384xf32>
    %25 = arith.mulf %24, %17 : vector<128x384xf32>
    %26 = arith.addf %20, %25 : vector<128x384xf32>
    %27 = vector.extract_strided_slice %1 {offsets = [6, 0], sizes = [1, 384], strides = [1, 1]} : vector<16x384xf32> to vector<1x384xf32>
    %28 = vector.extract_strided_slice %1 {offsets = [7, 0], sizes = [1, 384], strides = [1, 1]} : vector<16x384xf32> to vector<1x384xf32>
    %29 = vector.extract_strided_slice %1 {offsets = [8, 0], sizes = [1, 384], strides = [1, 1]} : vector<16x384xf32> to vector<1x384xf32>
    %c352_i32_3 = arith.constant 352 : i32
    %30 = tpu.dynamic_rotate %26 by %c352_i32_3 dim 1 : vector<128x384xf32>, i32 -> vector<128x384xf32>
    %31 = vector.broadcast %27 : vector<1x384xf32> to vector<128x384xf32>
    %32 = arith.mulf %13, %31 : vector<128x384xf32>
    %33 = arith.mulf %32, %26 : vector<128x384xf32>
    %34 = vector.broadcast %28 : vector<1x384xf32> to vector<128x384xf32>
    %35 = arith.subf %0, %34 : vector<128x384xf32>
    %36 = vector.broadcast %29 : vector<1x384xf32> to vector<128x384xf32>
    %37 = arith.mulf %35, %36 : vector<128x384xf32>
    %38 = arith.mulf %37, %30 : vector<128x384xf32>
    %39 = arith.addf %33, %38 : vector<128x384xf32>
    %40 = vector.extract_strided_slice %1 {offsets = [9, 0], sizes = [1, 384], strides = [1, 1]} : vector<16x384xf32> to vector<1x384xf32>
    %41 = vector.extract_strided_slice %1 {offsets = [10, 0], sizes = [1, 384], strides = [1, 1]} : vector<16x384xf32> to vector<1x384xf32>
    %42 = vector.extract_strided_slice %1 {offsets = [11, 0], sizes = [1, 384], strides = [1, 1]} : vector<16x384xf32> to vector<1x384xf32>
    %c352_i32_4 = arith.constant 352 : i32
    %43 = tpu.dynamic_rotate %39 by %c352_i32_4 dim 1 : vector<128x384xf32>, i32 -> vector<128x384xf32>
    %44 = vector.broadcast %40 : vector<1x384xf32> to vector<128x384xf32>
    %45 = arith.mulf %13, %44 : vector<128x384xf32>
    %46 = arith.mulf %45, %39 : vector<128x384xf32>
    %47 = vector.broadcast %41 : vector<1x384xf32> to vector<128x384xf32>
    %48 = arith.subf %0, %47 : vector<128x384xf32>
    %49 = vector.broadcast %42 : vector<1x384xf32> to vector<128x384xf32>
    %50 = arith.mulf %48, %49 : vector<128x384xf32>
    %51 = arith.mulf %50, %43 : vector<128x384xf32>
    %52 = arith.addf %46, %51 : vector<128x384xf32>
    %53 = arith.negf %0 : vector<128x384xf32>
    %54 = math.exp %53 : vector<128x384xf32>
    %cst = arith.constant 1.000000e+00 : f32
    %55 = vector.broadcast %cst : f32 to vector<128x384xf32>
    %56 = arith.addf %55, %54 : vector<128x384xf32>
    %57 = arith.divf %55, %56 : vector<128x384xf32>
    %58 = arith.mulf %0, %57 : vector<128x384xf32>
    %59 = vector.broadcast %4 : vector<1x384xf32> to vector<128x384xf32>
    %60 = arith.mulf %59, %58 : vector<128x384xf32>
    %61 = arith.addf %52, %60 : vector<128x384xf32>
    %c0_5 = arith.constant 0 : index
    %c0_6 = arith.constant 0 : index
    %62 = vector.load %arg3[%c0_5, %c0_6] : memref<384x128xf32, #tpu.memory_space<vmem>>, vector<384x128xf32>
    %cst_7 = arith.constant dense<0.000000e+00> : vector<128x128xf32>
    %63 = tpu.matmul %61, %62, %cst_7 {dimension_numbers = #tpu.dot_dimension_numbers<[1], [0], [0], [1], [0, 0, 1, 1], [], []>} : vector<128x384xf32>, vector<384x128xf32>, vector<128x128xf32> -> vector<128x128xf32>
    %c0_8 = arith.constant 0 : index
    %c0_9 = arith.constant 0 : index
    %64 = vector.load %arg4[%c0_8, %c0_9] : memref<128x128xf32, #tpu.memory_space<vmem>>, vector<128x128xf32>
    tpu.vector_store %arg4[%c0_8, %c0_9], %63 {strides = array<i32>} : memref<128x128xf32, #tpu.memory_space<vmem>>, vector<128x128xf32>,
    return
  }
  func.func @transform_0(%arg0: i32) -> (i32, i32) {
    %c0_i32 = arith.constant 0 : i32
    %c0_i32_0 = arith.constant 0 : i32
    return %arg0, %c0_i32 : i32, i32
  }
  func.func @transform_1(%arg0: i32) -> (i32, i32) {
    %c0_i32 = arith.constant 0 : i32
    %c0_i32_0 = arith.constant 0 : i32
    %c0_i32_1 = arith.constant 0 : i32
    return %c0_i32, %c0_i32_0 : i32, i32
  }
  func.func @transform_2(%arg0: i32) -> (i32, i32) {
    %c0_i32 = arith.constant 0 : i32
    %c0_i32_0 = arith.constant 0 : i32
    %c0_i32_1 = arith.constant 0 : i32
    return %c0_i32, %c0_i32_0 : i32, i32
  }
  func.func @transform_3(%arg0: i32) -> (i32, i32) {
    %c0_i32 = arith.constant 0 : i32
    %c0_i32_0 = arith.constant 0 : i32
    return %arg0, %c0_i32 : i32, i32
  }
}

module attributes {stable_mosaic.version = 11 : i64} {
  func.func @kan_linear_kernel(%arg0: i32, %arg1: memref<128x384xf32, #tpu.memory_space<vmem>>, %arg2: memref<16x384xf32, #tpu.memory_space<vmem>>, %arg3: memref<384x128xf32, #tpu.memory_space<vmem>>, %arg4: memref<128x128xf32, #tpu.memory_space<vmem>>) attributes {dimension_semantics = [#tpu.dimension_semantics<parallel>], iteration_bounds = array<i64: 2>, scalar_prefetch = 0 : i64, scratch_operands = 0 : i64, tpu.core_type = #tpu.core_type<tc>, window_params = [{transform_indices = @transform_0, window_bounds = array<i64: 128, 384>}, {pipeline_mode = #tpu.pipeline_mode<synchronous>, transform_indices = @transform_1, window_bounds = array<i64: 16, 384>}, {pipeline_mode = #tpu.pipeline_mode<synchronous>, transform_indices = @transform_2, window_bounds = array<i64: 384, 128>}, {transform_indices = @transform_3, window_bounds = array<i64: 128, 128>}]} {
    %c0 = arith.constant 0 : index
    %c0_0 = arith.constant 0 : index
    %0 = vector.load %arg1[%c0, %c0_0] : memref<128x384xf32, #tpu.memory_space<vmem>>, vector<128x384xf32>
    %c0_1 = arith.constant 0 : index
    %c0_2 = arith.constant 0 : index
    %1 = vector.load %arg2[%c0_1, %c0_2] : memref<16x384xf32, #tpu.memory_space<vmem>>, vector<16x384xf32>
    %2 = vector.extract_strided_slice %1 {offsets = [0, 0], sizes = [1, 384], strides = [1, 1]} : vector<16x384xf32> to vector<1x384xf32>
    %3 = vector.extract_strided_slice %1 {offsets = [1, 0], sizes = [1, 384], strides = [1, 1]} : vector<16x384xf32> to vector<1x384xf32>
    %4 = vector.extract_strided_slice %1 {offsets = [2, 0], sizes = [1, 384], strides = [1, 1]} : vector<16x384xf32> to vector<1x384xf32>
    %5 = vector.broadcast %2 : vector<1x384xf32> to vector<128x384xf32>
    %6 = arith.cmpf oge, %0, %5 : vector<128x384xf32>
    %7 = vector.broadcast %3 : vector<1x384xf32> to vector<128x384xf32>
    %8 = arith.cmpf olt, %0, %7 : vector<128x384xf32>
    %9 = arith.andi %6, %8 : vector<128x384xi1>
    %10 = arith.extui %9 : vector<128x384xi1> to vector<128x384xi32>
    %11 = arith.sitofp %10 : vector<128x384xi32> to vector<128x384xf32>
    %12 = vector.broadcast %2 : vector<1x384xf32> to vector<128x384xf32>
    %13 = arith.subf %0, %12 : vector<128x384xf32>
    %14 = vector.extract_strided_slice %1 {offsets = [3, 0], sizes = [1, 384], strides = [1, 1]} : vector<16x384xf32> to vector<1x384xf32>
    %15 = vector.extract_strided_slice %1 {offsets = [4, 0], sizes = [1, 384], strides = [1, 1]} : vector<16x384xf32> to vector<1x384xf32>
    %16 = vector.extract_strided_slice %1 {offsets = [5, 0], sizes = [1, 384], strides = [1, 1]} : vector<16x384xf32> to vector<1x384xf32>
    %c352_i32 = arith.constant 352 : i32
    %17 = tpu.dynamic_rotate %11 by %c352_i32 dim 1 : vector<128x384xf32>, i32 -> vector<128x384xf32>
    %18 = vector.broadcast %14 : vector<1x384xf32> to vector<128x384xf32>
    %19 = arith.mulf %13, %18 : vector<128x384xf32>
    %20 = arith.mulf %19, %11 : vector<128x384xf32>
    %21 = vector.broadcast %15 : vector<1x384xf32> to vector<128x384xf32>
    %22 = arith.subf %0, %21 : vector<128x384xf32>
    %23 = vector.broadcast %16 : vector<1x384xf32> to vector<128x384xf32>
    %24 = arith.mulf %22, %23 : vector<128x384xf32>
    %25 = arith.mulf %24, %17 : vector<128x384xf32>
    %26 = arith.addf %20, %25 : vector<128x384xf32>
    %27 = vector.extract_strided_slice %1 {offsets = [6, 0], sizes = [1, 384], strides = [1, 1]} : vector<16x384xf32> to vector<1x384xf32>
    %28 = vector.extract_strided_slice %1 {offsets = [7, 0], sizes = [1, 384], strides = [1, 1]} : vector<16x384xf32> to vector<1x384xf32>
    %29 = vector.extract_strided_slice %1 {offsets = [8, 0], sizes = [1, 384], strides = [1, 1]} : vector<16x384xf32> to vector<1x384xf32>
    %c352_i32_3 = arith.constant 352 : i32
    %30 = tpu.dynamic_rotate %26 by %c352_i32_3 dim 1 : vector<128x384xf32>, i32 -> vector<128x384xf32>
    %31 = vector.broadcast %27 : vector<1x384xf32> to vector<128x384xf32>
    %32 = arith.mulf %13, %31 : vector<128x384xf32>
    %33 = arith.mulf %32, %26 : vector<128x384xf32>
    %34 = vector.broadcast %28 : vector<1x384xf32> to vector<128x384xf32>
    %35 = arith.subf %0, %34 : vector<128x384xf32>
    %36 = vector.broadcast %29 : vector<1x384xf32> to vector<128x384xf32>
    %37 = arith.mulf %35, %36 : vector<128x384xf32>
    %38 = arith.mulf %37, %30 : vector<128x384xf32>
    %39 = arith.addf %33, %38 : vector<128x384xf32>
    %40 = vector.extract_strided_slice %1 {offsets = [9, 0], sizes = [1, 384], strides = [1, 1]} : vector<16x384xf32> to vector<1x384xf32>
    %41 = vector.extract_strided_slice %1 {offsets = [10, 0], sizes = [1, 384], strides = [1, 1]} : vector<16x384xf32> to vector<1x384xf32>
    %42 = vector.extract_strided_slice %1 {offsets = [11, 0], sizes = [1, 384], strides = [1, 1]} : vector<16x384xf32> to vector<1x384xf32>
    %c352_i32_4 = arith.constant 352 : i32
    %43 = tpu.dynamic_rotate %39 by %c352_i32_4 dim 1 : vector<128x384xf32>, i32 -> vector<128x384xf32>
    %44 = vector.broadcast %40 : vector<1x384xf32> to vector<128x384xf32>
    %45 = arith.mulf %13, %44 : vector<128x384xf32>
    %46 = arith.mulf %45, %39 : vector<128x384xf32>
    %47 = vector.broadcast %41 : vector<1x384xf32> to vector<128x384xf32>
    %48 = arith.subf %0, %47 : vector<128x384xf32>
    %49 = vector.broadcast %42 : vector<1x384xf32> to vector<128x384xf32>
    %50 = arith.mulf %48, %49 : vector<128x384xf32>
    %51 = arith.mulf %50, %43 : vector<128x384xf32>
    %52 = arith.addf %46, %51 : vector<128x384xf32>
    %53 = arith.negf %0 : vector<128x384xf32>
    %54 = math.exp %53 : vector<128x384xf32>
    %cst = arith.constant 1.000000e+00 : f32
    %55 = vector.broadcast %cst : f32 to vector<128x384xf32>
    %56 = arith.addf %55, %54 : vector<128x384xf32>
    %57 = arith.divf %55, %56 : vector<128x384xf32>
    %58 = arith.mulf %0, %57 : vector<128x384xf32>
    %59 = vector.broadcast %4 : vector<1x384xf32> to vector<128x384xf32>
    %60 = arith.mulf %59, %58 : vector<128x384xf32>
    %61 = arith.addf %52, %60 : vector<128x384xf32>
    %c0_5 = arith.constant 0 : index
    %c0_6 = arith.constant 0 : index
    %62 = vector.load %arg3[%c0_5, %c0_6] : memref<384x128xf32, #tpu.memory_space<vmem>>, vector<384x128xf32>
    %cst_7 = arith.constant dense<0.000000e+00> : vector<128x128xf32>
    %63 = tpu.matmul %61, %62, %cst_7 {dimension_numbers = #tpu.dot_dimension_numbers<[1], [0], [0], [1], [0, 0, 1, 1], [], []>} : vector<128x384xf32>, vector<384x128xf32>, vector<128x128xf32> -> vector<128x128xf32>
    %c0_8 = arith.constant 0 : index
    %c0_9 = arith.constant 0 : index
    %64 = vector.load %arg4[%c0_8, %c0_9] : memref<128x128xf32, #tpu.memory_space<vmem>>, vector<128x128xf32>
    tpu.vector_store %arg4[%c0_8, %c0_9], %63 {strides = array<i32>} : memref<128x128xf32, #tpu.memory_space<vmem>>, vector<128x128xf32>,
    return
  }
  func.func @transform_0(%arg0: i32) -> (i32, i32) {
    %c0_i32 = arith.constant 0 : i32
    %c0_i32_0 = arith.constant 0 : i32
    return %arg0, %c0_i32 : i32, i32
  }
  func.func @transform_1(%arg0: i32) -> (i32, i32) {
    %c0_i32 = arith.constant 0 : i32
    %c0_i32_0 = arith.constant 0 : i32
    %c0_i32_1 = arith.constant 0 : i32
    return %c0_i32, %c0_i32_0 : i32, i32
  }
  func.func @transform_2(%arg0: i32) -> (i32, i32) {
    %c0_i32 = arith.constant 0 : i32
    %c0_i32_0 = arith.constant 0 : i32
    %c0_i32_1 = arith.constant 0 : i32
    return %c0_i32, %c0_i32_0 : i32, i32
  }
  func.func @transform_3(%arg0: i32) -> (i32, i32) {
    %c0_i32 = arith.constant 0 : i32
    %c0_i32_0 = arith.constant 0 : i32
    return %arg0, %c0_i32 : i32, i32
  }
}

</mosaic_0001>

<bundles_post_ra>
// kernel: tpu_custom_call.1
= control target key start
LH: loop header
LB: loop body
LE: loop exit
PB: predicated region body
PF: predicated region fallthrough
CT: control target
= control target key end

     0   :  { %8 = vsyncpa [#allocation3], 0  ;;  %s9033_s0 = inlined_call_operand.hbm [shape: f32[256,384], index: 0, kind: input, shape index: {}]   ;;  %s9034_s1 = inlined_call_operand.hbm [shape: f32[16,384], index: 1, kind: input, shape index: {}]   ;;  %s9035_s2 = inlined_call_operand.hbm [shape: f32[384,128], index: 2, kind: input, shape index: {}]   ;;  %s9036_s3 = inlined_call_operand.hbm [shape: f32[256,128], index: 3, kind: output, shape index: {}]  }
   0x1   :  { %10 = vsyncpa [#allocation3 + $0x1], 0 }
   0x2   :  { %11 = vsyncpa [#allocation6], 0 }
   0x3   :  { %12 = vsyncpa [#allocation4], 0 }
   0x4   :  { %14 = vsyncpa [#allocation4 + $0x1], 0  ;;  %s4183_s12 = smov 0   ;;  %s4185_s13 = smov 0  }
   0x5   :  { %s4187_s14 = smov 0   ;;  %s4189_s15 = smov 0  }
   0x6 LB: > { %s4204_s16 = sadd.s32 4294967295, %s4151_s15   ;;  %s3327_s17 = sadd.s32 4294967294, %s4151_s15   ;;  %s4151_s15 = sphi %s4189_s15, %s10186_s15   ;;  %s4147_s14 = sphi %s4187_s14, %s10185_s14   ;;  %s4143_s13 = sphi %s4185_s13, %s10184_s13   ;;  %s4139_s12 = sphi %s4183_s12, %s10183_s12  }
   0x7   : > { %p40_p0 = scmp.ne.s32.totalorder %s4143_s13, %s4139_s12  ;;  %p41_p1 = scmp.eq.s32.totalorder %s4204_s16, 0 }
   0x8   : > { %p106_p2 = scmp.eq.s32.totalorder %s4204_s16, 1  ;;  %p112_p3 = scmp.eq.s32.totalorder %s3327_s17, 1 }
   0x9   : > { %p4213_p4 = por %p41_p1, %p40_p0  ;;  %p3328_p5 = scmp.ge.s32.totalorder %s4151_s15, 1 }
   0xa   : > { %p4218_p6 = por %p112_p3, %p40_p0  ;;  %p119_p7 = scmp.lt.s32.totalorder %s4151_s15, 3 }
   0xb   : > { %s130_s22 = sshll.u32 %s9034_s1, 4  ;;  %s4153_s24 = smov [#allocation5]   ;;  %s131_s22 = int_to_ptr.hbm [resolvable:$true] %s130_s22 }
   0xc   : > { %p4226_p8 = pnand %p3328_p5, %p119_p7  ;;  %s132_s25 = sshll.u32 %s4153_s24, 4  ;;  %s133_s25 = int_to_ptr.vmem [resolvable:$true] %s132_s25 }
   0xd   : > { %s144_s28 = sshll.u32 %s9035_s2, 4  ;;  %s9037_s29 = smov 384   ;;  %s145_s28 = int_to_ptr.hbm [resolvable:$true] %s144_s28 }
   0xe   : > { %p3504_p9 = pneg %p4226_p8  ;;  %s4155_s30 = smov 24  }
   0xf   : > { %s4156_s4 = smov [#allocation7]   ;;  %s4157_s6 = smov 128  }
  0x10   : > { %p3505_p10 = pnand %p3504_p9, %p41_p1  ;;  %s146_s5 = sshll.u32 %s4156_s4, 4  ;;  %s147_s5 = int_to_ptr.vmem [resolvable:$true] %s146_s5 }
  0x11   : > { %s4158_s7 = smov 8   ;;  %s4242_s8 = sadd.s32 1, %s4151_s15  }
  0x12   : > { %3507 = dma.hbm_to_vmem [thread:$0]  (!%p3505_p10), %s131_s22, 768, %s133_s25, [#allocation6], %s9037_s29, %s9037_s29, %s4155_s30  }
  0x13   : > { %3510 = dma.hbm_to_vmem [thread:$0]  (!%p3505_p10), %s145_s28, 6144, %s147_s5, [#allocation6], %s4157_s6, %s4157_s6, %s4158_s7  }
  0x14   : > { %s24_s9 = ssub.s32 %s4151_s15, %s4242_s8  ;;  %s27_s10 = sadd.s32 1, %s4147_s14 }
  0x15   : > { %p25_p12 = scmp.eq.s32.totalorder %s24_s9, 0  ;;  %p34_p13 = scmp.ne.s32.totalorder %s4147_s14, %s4143_s13 }
  0x16   : > { %p35_p0 = scmp.eq.s32.totalorder %s4151_s15, 0  ;;  %p3521_p7 = scmp.lt.s32.totalorder %s4151_s15, 2 }
  0x17   : > { %s4251_s11 = scalar_select %p25_p12, %s4147_s14, %s27_s10  }
  0x18   : > { %p36_p3 = por %p35_p0, %p34_p13  ;;  %p4255_p5 = por %p106_p2, %p34_p13 }
  0x19   : > { %s160_s20 = sand.u32 1, %s4147_s14   ;;  %s3490_s22 = smul.u32 384, %s4151_s15 }
  0x1a   : > { %s3489_s21 = smul.u32 384, %s160_s20  ;;  %p4262_p9 = pnand %p3521_p7, %p36_p3 }
  0x1b   : > { %s170_s27 = scalar_lea.hbm %s9033_s0, %s3490_s22  ;;  %s161_s6 = scalar_lea.sflag [#allocation3], %s160_s20 }
  0x1c   : > { %s164_s28 = scalar_lea.vmem [#allocation2], %s3489_s21  ;;  %s171_s5 = sshll.u32 %s170_s27, 4  ;;  %s172_s5 = int_to_ptr.hbm [resolvable:$true] %s171_s5 }
  0x1d   : > { %s173_s4 = sshll.u32 %s164_s28, 4  ;;  %s4051_s7 = sshra.s32 %s172_s5, 4  ;;  %s174_s4 = int_to_ptr.vmem [resolvable:$true] %s173_s4  ;;  %s4052_s7 = int_to_ptr.hbm [resolvable:$true] %s4051_s7 }
  0x1e   : > { %s4053_s9 = scalar_lea.hbm %s4052_s7, 384  ;;  %p4055_p10 = pneg %p4262_p9 }
  0x1f   : > { %p4054_p2 = scmp.ne.s32.totalorder %s4052_s7, %s4053_s9  ;;  %s4058_s25 = scalar_lea.hbm %s9033_s0, 768 }
  0x20   : > { %p4059_p0 = scmp.lt.s32.totalorder %s4052_s7, %s9033_s0  ;;  %p4060_p3 = scmp.lt.s32.totalorder %s4058_s25, %s4053_s9 }
  0x21   : > { %p4056_p12 = pnand %p4055_p10, %p4054_p2 }
  0x22   : > { %p4061_p7 = por %p4060_p3, %p4059_p0 }
  0x23   : > { %p4057_p13 = pneg %p4056_p12 }
  0x25   : > { %p4062_p11 = pnand %p4061_p7, %p4057_p13 }
  0x27   : > { %4065 = shalt.err (!%p4062_p11)
}
  0x28   : > { %s9388_s20 = smov 384   ;;  %185 = sbr.rel (%p4226_p8) target bundleno = 925 (0x39d), region = 32 }
  0x29   : > { %3514 = dma.hbm_to_vmem [thread:$0]  (!%p4262_p9), %s172_s5, 6144, %s174_s4, %s161_s6, %s9388_s20, %s9388_s20, %s4155_s30  }
  0x2d   : > { %s4285_s29 = sand.u32 1, %s4143_s13  }
  0x2e   : > { %s3491_s21 = smul.u32 384, %s4285_s29  ;;  %s188_s27 = scalar_lea.sflag [#allocation3], %s4285_s29 }
  0x30   : > { %s4289_s28 = scalar_lea.vmem [#allocation2], %s3491_s21 }
  0x31   : > { %4126 = dma.done.wait (%p4213_p4), %s188_s27, 6144  }
  0x32   : > { %4128 = vsyncadd (%p4213_p4), %s188_s27, 4294961152 }
  0x33   : > { %4130 = dma.done.wait (%p41_p1), [#allocation6], 6912  }
  0x34   : > { %4132 = vsyncadd (%p41_p1), [#allocation6], 4294960384  ;;  %v4300_v0 = vld [vmem:[%s4289_s28 + $0xc0] sm:$0xff]  ;;  %v4303_v1 = vld [vmem:[%s4289_s28 + $0xd8] sm:$0xff]  ;;  %v9041_v8 = vmov 0.0   ;;  %s4160_s18 = smov 96  }
  0x35   : > { %v4305_v2 = vld [vmem:[#allocation5] sm:$0xff]  ;;  %v4317_v6 = vld [vmem:[%s4289_s28 + $0x78] sm:$0xff]  ;;  %v257_v15 = vld [vmem:[%s4289_s28 + $0xf0] sm:$0xff]  ;;  %s3338_s23 = sshll.u32 %s4285_s29, 7  ;;  %s3440_s24 = sshll.u32 %s4204_s16, 7 }
  0x36   : > { %v4308_v3 = vperm.slane %v4305_v2, 0  ;;  %v4311_v4 = vperm.slane %v4305_v2, 1  ;;  %v4314_v5 = vld [vmem:[%s4289_s28 + $0x60] sm:$0xff]  ;;  %v4345_v11 = vld [vmem:[%s4289_s28 + $0x18] sm:$0xff]  ;;  %v260_v16 = vld [vmem:[%s4289_s28 + $0x108] sm:$0xff]  ;;  %s8788_s30 = scalar_lea.vmem [#allocation8], %s3338_s23  ;;  %s3231_s6 = scalar_lea.hbm %s9036_s3, %s3440_s24 }
  0x37   : > { %v4332_v7 = vld [vmem:[%s4289_s28] sm:$0xff]  ;;  %v245_v18 = vld [vmem:[%s4289_s28 + $0x90] sm:$0xff]  ;;  %v248_v19 = vld [vmem:[%s4289_s28 + $0xa8] sm:$0xff]  ;;  %s3232_s7 = sshll.u32 %s8788_s30, 4  ;;  %s3234_s9 = sshll.u32 %s3231_s6, 4  ;;  %s3233_s7 = int_to_ptr.vmem [resolvable:$true] %s3232_s7  ;;  %s3235_s9 = int_to_ptr.hbm [resolvable:$true] %s3234_s9 }
  0x38   : > { %9389 = vst [vmem:[#allocation12_spill] sm:$0xff] %v4308_v3  ;;  %vm308_vm0 = vcmp.ge.f32.partialorder %v4300_v0, %v4308_v3  ;;  %vm311_vm1 = vcmp.ge.f32.partialorder %v4303_v1, %v4308_v3  ;;  %vm359_vm2 = vcmp.lt.f32.partialorder %v4300_v0, %v4311_v4  ;;  %vm362_vm3 = vcmp.lt.f32.partialorder %v4303_v1, %v4311_v4  ;;  %v4382_v22 = vld [vmem:[%s4289_s28 + $0x30] sm:$0xff]  ;;  %v4385_v23 = vld [vmem:[%s4289_s28 + $0x48] sm:$0xff]  ;;  %v4424_v32 = vld [vmem:[%s4289_s28 + $0x120] sm:$0xff]  ;;  %s3220_s10 = scalar_lea.sflag [#allocation4], %s4285_s29  ;;  %s4095_s25 = sshra.s32 %s3235_s9, 4  ;;  %s4096_s25 = int_to_ptr.hbm [resolvable:$true] %s4095_s25 }
  0x39   : > { %vm407_vm4 = vmand %vm308_vm0, %vm359_vm2  ;;  %vm296_vm5 = vcmp.ge.f32.partialorder %v4314_v5, %v4308_v3  ;;  %vm299_vm6 = vcmp.ge.f32.partialorder %v4317_v6, %v4308_v3  ;;  %vm347_vm8 = vcmp.lt.f32.partialorder %v4314_v5, %v4311_v4  ;;  %vm350_vm9 = vcmp.lt.f32.partialorder %v4317_v6, %v4311_v4  ;;  %9392 = vst [vmem:[#allocation15_spill] sm:$0xff] %v4382_v22  ;;  %v4395_v26 = vld [vmem:[%s4289_s28 + $0x150] sm:$0xff]  ;;  %v4402_v28 = vld [vmem:[%s4289_s28 + $0x168] sm:$0xff]  ;;  %s4097_s26 = scalar_lea.hbm %s4096_s25, 128  ;;  %s4101_s20 = scalar_lea.hbm %s9036_s3, 256 }
  0x3a   : > { %vm410_vm7 = vmand %vm311_vm1, %vm362_vm3  ;;  %v4335_v9 = vsel %vm407_vm4, 1.0, %v9041_v8  ;;  %vm284_vm12 = vcmp.ge.f32.partialorder %v4332_v7, %v4308_v3  ;;  %vm287_vm13 = vcmp.ge.f32.partialorder %v4345_v11, %v4308_v3  ;;  %vm335_vm14 = vcmp.lt.f32.partialorder %v4332_v7, %v4311_v4  ;;  %9393 = vst [vmem:[#allocation16_spill] sm:$0xff] %v4385_v23  ;;  %v4412_v30 = vld [vmem:[#allocation5 + $0x8] sm:$0xff]  ;;  %v4427_v33 = vld [vmem:[%s4289_s28 + $0x138] sm:$0xff]  ;;  %p4098_p1 = scmp.ne.s32.totalorder %s4096_s25, %s4097_s26  ;;  %p4102_p11 = scmp.lt.s32.totalorder %s4096_s25, %s9036_s3 }
  0x3b   : > { %9390 = vst [vmem:[#allocation13_spill] sm:$0xff] %v4335_v9  ;;  %v4342_v10 = vsel %vm410_vm7, 1.0, %v9041_v8  ;;  %vm395_vm10 = vmand %vm296_vm5, %vm347_vm8  ;;  %vm338_vm15 = vcmp.lt.f32.partialorder %v4345_v11, %v4311_v4  ;;  %vm314_vm2 = vcmp.ge.f32.partialorder %v257_v15, %v4308_v3  ;;  %vm317_vm3 = vcmp.ge.f32.partialorder %v260_v16, %v4308_v3  ;;  %v4440_v35 = vld [vmem:[%s4289_s28 + $0x8] sm:$0xff]  ;;  %v4443_v36 = vld [vmem:[%s4289_s28 + $0x20] sm:$0xff]  ;;  %p4103_p9 = scmp.lt.s32.totalorder %s4101_s20, %s4097_s26 }
  0x3c   : > { %9391 = vst [vmem:[#allocation14_spill] sm:$0xff] %v4342_v10  ;;  %v3587_v12 = vpack.i.bf16 %v4342_v10, %v4335_v9  ;;  %vm398_vm11 = vmand %vm299_vm6, %vm350_vm9  ;;  %v4350_v13 = vsel %vm395_vm10, 1.0, %v9041_v8  ;;  %vm365_vm4 = vcmp.lt.f32.partialorder %v257_v15, %v4311_v4  ;;  %vm368_vm5 = vcmp.lt.f32.partialorder %v260_v16, %v4311_v4  ;;  %v4472_v42 = vld [vmem:[%s4289_s28 + $0x68] sm:$0xff]  ;;  %v243_v45 = vld [vmem:[%s4289_s28 + $0x80] sm:$0xff]  ;;  %p4099_p4 = pnand %p4098_p1, %p4255_p5 }
  0x3d   : > { %v4355_v14 = vsel %vm398_vm11, 1.0, %v9041_v8  ;;  %vm383_vm0 = vmand %vm284_vm12, %vm335_vm14  ;;  %vm302_vm8 = vcmp.ge.f32.partialorder %v245_v18, %v4308_v3  ;;  %vm305_vm9 = vcmp.ge.f32.partialorder %v248_v19, %v4308_v3  ;;  %9395 = vst [vmem:[#allocation18_spill] sm:$0xff] %v4395_v26  ;;  %vm353_vm10 = vcmp.lt.f32.partialorder %v245_v18, %v4311_v4  ;;  %v246_v48 = vld [vmem:[%s4289_s28 + $0x98] sm:$0xff]  ;;  %v249_v50 = vld [vmem:[%s4289_s28 + $0xb0] sm:$0xff]  ;;  %p4104_p2 = por %p4103_p9, %p4102_p11 }
  0x3e   : > { %3588 = vrot.lane.b32.xlu2 %v3587_v12, %s4160_s18  ;;  %v3577_v17 = vpack.i.bf16 %v4355_v14, %v4350_v13  ;;  %vm386_vm1 = vmand %vm287_vm13, %vm338_vm15  ;;  %v4372_v20 = vsel %vm383_vm0, 1.0, %v9041_v8  ;;  %9397 = vst [vmem:[#allocation20_spill] sm:$0xff] %v4402_v28  ;;  %vm356_vm11 = vcmp.lt.f32.partialorder %v248_v19, %v4311_v4  ;;  %vm290_vm13 = vcmp.ge.f32.partialorder %v4382_v22, %v4308_v3  ;;  %v4522_v52 = vld [vmem:[%s4289_s28 + $0x38] sm:$0xff]  ;;  %v4525_v53 = vld [vmem:[%s4289_s28 + $0x50] sm:$0xff]  ;;  %p4100_p8 = pneg %p4099_p4 }
  0x3f   : > { %v4378_v21 = vsel %vm386_vm1, 1.0, %v9041_v8  ;;  %vm413_vm6 = vmand %vm314_vm2, %vm365_vm4  ;;  %vm293_vm14 = vcmp.ge.f32.partialorder %v4385_v23, %v4308_v3  ;;  %vm341_vm0 = vcmp.lt.f32.partialorder %v4382_v22, %v4311_v4  ;;  %vm344_vm1 = vcmp.lt.f32.partialorder %v4385_v23, %v4311_v4  ;;  %9404 = vst [vmem:[#allocation27_spill] sm:$0xff] %v4472_v42  ;;  %v4543_v56 = vld [vmem:[#allocation5 + $0x10] sm:$0xff]  ;;  %v4589_v12 = vld [vmem:[%s4289_s28 + $0x28] sm:$0xff] }
  0x40   : > { %3578 = vrot.lane.b32.xlu1 %v3577_v17, %s4160_s18  ;;  %v3567_v24 = vpack.i.bf16 %v4378_v21, %v4372_v20  ;;  %vm416_vm7 = vmand %vm317_vm3, %vm368_vm5  ;;  %v4390_v25 = vsel %vm413_vm6, 1.0, %v9041_v8  ;;  %vm326_vm2 = vcmp.ge.f32.partialorder %v4395_v26, %v4308_v3  ;;  %vm329_vm4 = vcmp.ge.f32.partialorder %v4402_v28, %v4308_v3  ;;  %9409 = vst [vmem:[#allocation30_spill] sm:$0xff] %v4525_v53  ;;  %v4568_v60 = vld [vmem:[%s4289_s28 + $0x10] sm:$0xff]  ;;  %v4608_v18 = vld [vmem:[%s4289_s28 + $0x140] sm:$0xff]  ;;  %p4105_p10 = pnand %p4104_p2, %p4100_p8 }
  0x41   : > { %9394 = vst [vmem:[#allocation17_spill] sm:$0xff] %v4390_v25  ;;  %v4398_v27 = vsel %vm416_vm7, 1.0, %v9041_v8  ;;  %vm401_vm12 = vmand %vm302_vm8, %vm353_vm10  ;;  %vm377_vm5 = vcmp.lt.f32.partialorder %v4395_v26, %v4311_v4  ;;  %vm380_vm6 = vcmp.lt.f32.partialorder %v4402_v28, %v4311_v4  ;;  %v4454_v39 = vperm.slane %v4412_v30, 0  ;;  %v4571_v61 = vld [vmem:[%s4289_s28 + $0x130] sm:$0xff]  ;;  %v4683_v59 = vld [vmem:[%s4289_s28 + $0x58] sm:$0xff] }
  0x42   : > { %9396 = vst [vmem:[#allocation19_spill] sm:$0xff] %v4398_v27  ;;  %3568 = vrot.lane.b32.xlu0 %v3567_v24, %s4160_s18  ;;  %v3592_v29 = vpack.i.bf16 %v4398_v27, %v4390_v25  ;;  %vm404_vm15 = vmand %vm305_vm9, %vm356_vm11  ;;  %v4415_v31 = vsel %vm401_vm12, 1.0, %v9041_v8  ;;  %v4457_v40 = vperm.slane %v4412_v30, 1  ;;  %vm320_vm9 = vcmp.ge.f32.partialorder %v4424_v32, %v4308_v3  ;;  %v4689_v24 = vld [vmem:[%s4289_s28 + $0x170] sm:$0xff]  ;;  %v4769_v25 = vld [vmem:[%s4289_s28 + $0xa0] sm:$0xff] }
  0x43   : > { %9398 = vst [vmem:[#allocation21_spill] sm:$0xff] %v4415_v31  ;;  %v4431_v34 = vsel %vm404_vm15, 1.0, %v9041_v8  ;;  %vm389_vm3 = vmand %vm290_vm13, %vm341_vm0  ;;  %vm323_vm10 = vcmp.ge.f32.partialorder %v4427_v33, %v4308_v3  ;;  %vm371_vm11 = vcmp.lt.f32.partialorder %v4424_v32, %v4311_v4  ;;  %vm285_vm13 = vcmp.ge.f32.partialorder %v4440_v35, %v4454_v39 }
  0x44   : > { %9399 = vst [vmem:[#allocation22_spill] sm:$0xff] %v4431_v34  ;;  %v3582_v37 = vpack.i.bf16 %v4431_v34, %v4415_v31  ;;  %vm392_vm7 = vmand %vm293_vm14, %vm344_vm1  ;;  %v4451_v38 = vsel %vm389_vm3, 1.0, %v9041_v8  ;;  %vm288_vm14 = vcmp.ge.f32.partialorder %v4443_v36, %v4454_v39  ;;  %vm336_vm15 = vcmp.lt.f32.partialorder %v4440_v35, %v4457_v40  ;;  %v4703_v34 = vld [vmem:[%s4289_s28 + $0x160] sm:$0xff] }
  0x45   : > { %9400 = vst [vmem:[#allocation23_spill] sm:$0xff] %v4451_v38  ;;  %v4460_v41 = vsel %vm392_vm7, 1.0, %v9041_v8  ;;  %vm425_vm8 = vmand %vm326_vm2, %vm377_vm5  ;;  %vm339_vm0 = vcmp.lt.f32.partialorder %v4443_v36, %v4457_v40  ;;  %vm374_vm1 = vcmp.lt.f32.partialorder %v4427_v33, %v4311_v4  ;;  %vm348_vm7 = vcmp.lt.f32.partialorder %v4472_v42, %v4457_v40 }
  0x46   : > { %3593 = vrot.lane.b32.xlu2 %v3592_v29, %s4160_s18  ;;  %9401 = vst [vmem:[#allocation24_spill] sm:$0xff] %v4454_v39  ;;  %v3572_v43 = vpack.i.bf16 %v4460_v41, %v4451_v38  ;;  %vm428_vm12 = vmand %vm329_vm4, %vm380_vm6  ;;  %v4484_v44 = vsel %vm425_vm8, 1.0, %v9041_v8  ;;  %vm297_vm4 = vcmp.ge.f32.partialorder %v4472_v42, %v4454_v39  ;;  %vm300_vm6 = vcmp.ge.f32.partialorder %v243_v45, %v4454_v39  ;;  %v252_v29 = vld [vmem:[%s4289_s28 + $0xc8] sm:$0xff] }
  0x47   : > { %9402 = vst [vmem:[#allocation25_spill] sm:$0xff] %v4457_v40  ;;  %v4492_v46 = vsel %vm428_vm12, 1.0, %v9041_v8  ;;  %vm4503_vm2 = vmand %vm320_vm9, %vm371_vm11  ;;  %vm351_vm8 = vcmp.lt.f32.partialorder %v243_v45, %v4457_v40  ;;  %vm303_vm11 = vcmp.ge.f32.partialorder %v246_v48, %v4454_v39  ;;  %vm354_vm12 = vcmp.lt.f32.partialorder %v246_v48, %v4457_v40  ;;  %v4654_v45 = vld [vmem:[%s4289_s28 + $0x128] sm:$0xff] }
  0x48   : > { %9403 = vst [vmem:[#allocation26_spill] sm:$0xff] %v4460_v41  ;;  %3583 = vrot.lane.b32.xlu1 %v3582_v37, %s4160_s18  ;;  %v3602_v49 = vpack.i.bf16 %v4492_v46, %v4484_v44  ;;  %vm384_vm3 = vmand %vm285_vm13, %vm336_vm15  ;;  %v4539_v55 = vsel %vm4503_vm2, 1.0, %v9041_v8  ;;  %vm306_vm13 = vcmp.ge.f32.partialorder %v249_v50, %v4454_v39  ;;  %vm342_vm2 = vcmp.lt.f32.partialorder %v4522_v52, %v4457_v40 }
  0x49   : > { %9405 = vst [vmem:[#allocation28_spill] sm:$0xff] %v4484_v44  ;;  %vm387_vm5 = vmand %vm288_vm14, %vm339_vm0  ;;  %v4515_v51 = vsel %vm384_vm3, 1.0, %v9041_v8  ;;  %vm357_vm14 = vcmp.lt.f32.partialorder %v249_v50, %v4457_v40  ;;  %vm291_vm0 = vcmp.ge.f32.partialorder %v4522_v52, %v4454_v39  ;;  %v4583_v63 = vperm.slane %v4543_v56, 0 }
  0x4a   : > { %9406 = vst [vmem:[#allocation29_spill] sm:$0xff] %v4492_v46  ;;  %3573 = vrot.lane.b32.xlu0 %v3572_v43, %s4160_s18  ;;  %v4528_v54 = vsel %vm387_vm5, 1.0, %v9041_v8  ;;  %vm422_vm9 = vmand %vm323_vm10, %vm374_vm1  ;;  %vm294_vm1 = vcmp.ge.f32.partialorder %v4525_v53, %v4454_v39  ;;  %v4586_v4 = vperm.slane %v4543_v56, 1  ;;  %v4731_v43 = vld [vmem:[%s4289_s28 + $0x148] sm:$0xff]  ;;  %v5047_v44 = vsub.f32 %v4654_v45, %v4454_v39 }
  0x4b   : > { %v3607_v57 = vpack.i.bf16 %v4528_v54, %v4515_v51  ;;  %v4548_v58 = vsel %vm422_vm9, 1.0, %v9041_v8  ;;  %vm4553_vm10 = vmand %vm297_vm4, %vm348_vm7  ;;  %vm345_vm4 = vcmp.lt.f32.partialorder %v4525_v53, %v4457_v40  ;;  %9412 = vst [vmem:[#allocation31_spill] sm:$0xff] %v4583_v63  ;;  %vm286_vm7 = vcmp.ge.f32.partialorder %v4568_v60, %v4583_v63  ;;  %v255_v53 = vld [vmem:[%s4289_s28 + $0xe0] sm:$0xff] }
  0x4c   : > { %vm399_vm15 = vmand %vm300_vm6, %vm351_vm8  ;;  %v3597_v62 = vpack.i.bf16 %v4548_v58, %v4539_v55  ;;  %9413 = vst [vmem:[#allocation32_spill] sm:$0xff] %v4586_v4  ;;  %v4595_v15 = vsel %vm4553_vm10, 1.0, %v9041_v8  ;;  %vm322_vm8 = vcmp.ge.f32.partialorder %v4571_v61, %v4583_v63  ;;  %vm337_vm9 = vcmp.lt.f32.partialorder %v4568_v60, %v4586_v4 }
  0x4d   : > { %vm402_vm3 = vmand %vm303_vm11, %vm354_vm12  ;;  %9414 = vst [vmem:[#allocation33_spill] sm:$0xff] %v4595_v15  ;;  %v4598_v16 = vsel %vm399_vm15, 1.0, %v9041_v8  ;;  %vm373_vm12 = vcmp.lt.f32.partialorder %v4571_v61, %v4586_v4  ;;  %vm289_vm10 = vcmp.ge.f32.partialorder %v4589_v12, %v4583_v63  ;;  %vm340_vm15 = vcmp.lt.f32.partialorder %v4589_v12, %v4586_v4 }
  0x4e   : > { %3608 = vrot.lane.b32.xlu2 %v3607_v57, %s4160_s18  ;;  %9415 = vst [vmem:[#allocation34_spill] sm:$0xff] %v4598_v16  ;;  %vm405_vm5 = vmand %vm306_vm13, %vm357_vm14  ;;  %v4605_v17 = vsel %vm402_vm3, 1.0, %v9041_v8  ;;  %vm324_vm14 = vcmp.ge.f32.partialorder %v4608_v18, %v4454_v39  ;;  %v3617_v47 = vpack.i.bf16 %v4598_v16, %v4595_v15  ;;  %vm309_vm3 = vcmp.ge.f32.partialorder %v252_v29, %v4454_v39  ;;  %v4676_v57 = vld [vmem:[%s4289_s28 + $0x40] sm:$0xff]  ;;  %v4762_v15 = vld [vmem:[%s4289_s28 + $0x88] sm:$0xff] }
  0x4f   : > { %9416 = vst [vmem:[#allocation35_spill] sm:$0xff] %v4605_v17  ;;  %v4611_v19 = vsel %vm405_vm5, 1.0, %v9041_v8  ;;  %vm4619_vm6 = vmand %vm291_vm0, %vm342_vm2  ;;  %vm375_vm0 = vcmp.lt.f32.partialorder %v4608_v18, %v4457_v40  ;;  %v5115_v26 = vsub.f32 %v4568_v60, %v4583_v63 }
  0x50   : > { %3603 = vrot.lane.b32.xlu1 %v3602_v49, %s4160_s18  ;;  %9417 = vst [vmem:[#allocation36_spill] sm:$0xff] %v4611_v19  ;;  %vm393_vm11 = vmand %vm294_vm1, %vm345_vm4  ;;  %v3622_v37 = vpack.i.bf16 %v4611_v19, %v4605_v17  ;;  %v4661_v48 = vsel %vm4619_vm6, 1.0, %v9041_v8  ;;  %vm360_vm4 = vcmp.lt.f32.partialorder %v252_v29, %v4457_v40  ;;  %vm321_vm6 = vcmp.ge.f32.partialorder %v4654_v45, %v4454_v39  ;;  %v4745_v19 = vld [vmem:[%s4289_s28 + $0x158] sm:$0xff] }
  0x51   : > { %vm4643_vm13 = vmand %vm286_vm7, %vm337_vm9  ;;  %9422 = vst [vmem:[#allocation37_spill] sm:$0xff] %v4661_v48  ;;  %v4664_v49 = vsel %vm393_vm11, 1.0, %v9041_v8  ;;  %vm372_vm7 = vcmp.lt.f32.partialorder %v4654_v45, %v4457_v40  ;;  %vm292_vm9 = vcmp.ge.f32.partialorder %v4676_v57, %v4583_v63  ;;  %vm343_vm11 = vcmp.lt.f32.partialorder %v4676_v57, %v4586_v4 }
  0x52   : > { %3598 = vrot.lane.b32.xlu0 %v3597_v62, %s4160_s18  ;;  %9423 = vst [vmem:[#allocation38_spill] sm:$0xff] %v4664_v49  ;;  %vm4669_vm1 = vmand %vm322_vm8, %vm373_vm12  ;;  %v3612_v62 = vpack.i.bf16 %v4664_v49, %v4661_v48  ;;  %v9437_v17 = vmov 0.0   ;;  %v4775_v49 = vld [vmem:[%s4289_s28 + $0xb8] sm:$0xff] }
  0x53   : > { %vm388_vm2 = vmand %vm289_vm10, %vm340_vm15  ;;  %9426 = vst [vmem:[#allocation39_spill] sm:$0xff] %v4676_v57  ;;  %vm295_vm10 = vcmp.ge.f32.partialorder %v4683_v59, %v4583_v63  ;;  %vm330_vm15 = vcmp.ge.f32.partialorder %v4689_v24, %v4454_v39 }
  0x54   : > { %vm423_vm5 = vmand %vm324_vm14, %vm375_vm0  ;;  %9427 = vst [vmem:[#allocation40_spill] sm:$0xff] %v4683_v59  ;;  %v4693_v29 = vsel %vm388_vm2, 1.0, %v9041_v8  ;;  %vm346_vm14 = vcmp.lt.f32.partialorder %v4683_v59, %v4586_v4  ;;  %vm328_vm0 = vcmp.ge.f32.partialorder %v4703_v34, %v4583_v63 }
  0x55   : > { %9428 = vst [vmem:[#allocation41_spill] sm:$0xff] %v4689_v24  ;;  %v4696_v27 = vsel %vm423_vm5, 1.0, %v9041_v8  ;;  %vm4698_vm8 = vmand %vm309_vm3, %vm360_vm4  ;;  %vm325_vm5 = vcmp.ge.f32.partialorder %v4731_v43, %v4583_v63 }
  0x56   : > { %3623 = vrot.lane.b32.xlu2 %v3622_v37, %s4160_s18  ;;  %9429 = vst [vmem:[#allocation42_spill] sm:$0xff] %v4693_v29  ;;  %v4712_v37 = vsel %vm4643_vm13, 1.0, %v9041_v8  ;;  %vm420_vm12 = vmand %vm321_vm6, %vm372_vm7  ;;  %vm381_vm13 = vcmp.lt.f32.partialorder %v4689_v24, %v4457_v40  ;;  %v3637_v50 = vpack.i.bf16 %v4693_v29, %v4696_v27  ;;  %v4752_v31 = vsel %vm4698_vm8, 1.0, %v9437_v17 }
  0x57   : > { %9430 = vst [vmem:[#allocation43_spill] sm:$0xff] %v4696_v27  ;;  %vm4740_vm2 = vmand %vm292_vm9, %vm343_vm11  ;;  %v4755_v16 = vsel %vm420_vm12, 1.0, %v9437_v17  ;;  %vm376_vm6 = vcmp.lt.f32.partialorder %v4731_v43, %v4586_v4  ;;  %vm327_vm9 = vcmp.ge.f32.partialorder %v4745_v19, %v4454_v39  ;;  %vm378_vm8 = vcmp.lt.f32.partialorder %v4745_v19, %v4457_v40 }
  0x58   : > { %3618 = vrot.lane.b32.xlu1 %v3617_v47, %s4160_s18  ;;  %9433 = vst [vmem:[#allocation44_spill] sm:$0xff] %v4703_v34  ;;  %v4717_v47 = vsel %vm4669_vm1, 1.0, %v9041_v8  ;;  %vm379_vm1 = vcmp.lt.f32.partialorder %v4703_v34, %v4586_v4  ;;  %vm394_vm3 = vmand %vm295_vm10, %vm346_vm14  ;;  %v3627_v42 = vpack.i.bf16 %v4755_v16, %v4752_v31  ;;  %vm301_vm12 = vcmp.ge.f32.partialorder %v4762_v15, %v4583_v63  ;;  %v4813_v8 = vld [vmem:[%s4289_s28 + $0x70] sm:$0xff] }
  0x59   : > { %9436 = vst [vmem:[#allocation45_spill] sm:$0xff] %v4745_v19  ;;  %vm429_vm4 = vmand %vm330_vm15, %vm381_vm13  ;;  %v4779_v41 = vsel %vm394_vm3, 1.0, %v9437_v17  ;;  %vm352_vm10 = vcmp.lt.f32.partialorder %v4762_v15, %v4586_v4  ;;  %vm304_vm15 = vcmp.ge.f32.partialorder %v4769_v25, %v4583_v63  ;;  %vm355_vm13 = vcmp.lt.f32.partialorder %v4769_v25, %v4586_v4 }
  0x5a   : > { %3613 = vrot.lane.b32.xlu0 %v3612_v62, %s4160_s18  ;;  %v3632_v62 = vpack.i.bf16 %v4717_v47, %v4712_v37  ;;  %9438 = vst [vmem:[#allocation46_spill] sm:$0xff] %v4752_v31  ;;  %vm427_vm7 = vmand %vm328_vm0, %vm379_vm1  ;;  %v4782_v24 = vsel %vm429_vm4, 1.0, %v9437_v17  ;;  %vm307_vm0 = vcmp.ge.f32.partialorder %v4775_v49, %v4583_v63  ;;  %vm358_vm1 = vcmp.lt.f32.partialorder %v4775_v49, %v4586_v4 }
  0x5b   : > { %9439 = vst [vmem:[#allocation47_spill] sm:$0xff] %v4762_v15  ;;  %vm4784_vm11 = vmand %vm325_vm5, %vm376_vm6  ;;  %v3652_v31 = vpack.i.bf16 %v4779_v41, %v4782_v24  ;;  %vm363_vm3 = vcmp.lt.f32.partialorder %v255_v53, %v4457_v40  ;;  %v4825_v15 = vld [vmem:[%s4289_s28 + $0x178] sm:$0xff]  ;;  %v5151_v29 = vsub.f32 %v4427_v33, %v4308_v3 }
  0x5c   : > { %9440 = vst [vmem:[#allocation48_spill] sm:$0xff] %v4769_v25  ;;  %vm426_vm14 = vmand %vm327_vm9, %vm378_vm8  ;;  %vm349_vm9 = vcmp.lt.f32.partialorder %v4813_v8, %v4586_v4  ;;  %v4884_v25 = vld [vmem:[%s4289_s28 + $0xe8] sm:$0xff] }
  0x5d   : > { %9441 = vst [vmem:[#allocation49_spill] sm:$0xff] %v4775_v49  ;;  %vm4820_vm4 = vmand %vm301_vm12, %vm352_vm10  ;;  %vm331_vm12 = vcmp.ge.f32.partialorder %v4825_v15, %v4583_v63 }
  0x5e   : > { %3638 = vrot.lane.b32.xlu2 %v3637_v50, %s4160_s18  ;;  %9442 = vst [vmem:[#allocation50_spill] sm:$0xff] %v4779_v41  ;;  %v4796_v50 = vsel %vm4740_vm2, 1.0, %v9437_v17  ;;  %vm312_vm2 = vcmp.ge.f32.partialorder %v255_v53, %v4454_v39  ;;  %vm403_vm5 = vmand %vm304_vm15, %vm355_vm13  ;;  %v4849_v53 = vld [vmem:[%s4289_s28 + $0xf8] sm:$0xff] }
  0x5f   : > { %9443 = vst [vmem:[#allocation51_spill] sm:$0xff] %v4782_v24  ;;  %v4835_v24 = vsel %vm426_vm14, 1.0, %v9437_v17  ;;  %vm406_vm6 = vmand %vm307_vm0, %vm358_vm1  ;;  %vm315_vm15 = vcmp.ge.f32.partialorder %v4849_v53, %v4454_v39  ;;  %vm366_vm13 = vcmp.lt.f32.partialorder %v4849_v53, %v4457_v40 }
  0x60   : > { %3633 = vrot.lane.b32.xlu1 %v3632_v62, %s4160_s18  ;;  %9446 = vst [vmem:[#allocation52_spill] sm:$0xff] %v4796_v50  ;;  %v4799_v62 = vsel %vm427_vm7, 1.0, %v9437_v17  ;;  %vm298_vm7 = vcmp.ge.f32.partialorder %v4813_v8, %v4583_v63  ;;  %vm411_vm8 = vmand %vm312_vm2, %vm363_vm3  ;;  %v4856_v41 = vsel %vm406_vm6, 1.0, %v9437_v17  ;;  %vm313_vm6 = vcmp.ge.f32.partialorder %v4884_v25, %v4583_v63 }
  0x61   : > { %9447 = vst [vmem:[#allocation53_spill] sm:$0xff] %v4799_v62  ;;  %v3647_v49 = vpack.i.bf16 %v4799_v62, %v4796_v50  ;;  %vm397_vm10 = vmand %vm298_vm7, %vm349_vm9  ;;  %v4859_v50 = vld [vmem:[%s4289_s28 + $0x100] sm:$0xff]  ;;  %vm364_vm7 = vcmp.lt.f32.partialorder %v4884_v25, %v4586_v4 }
  0x62   : > { %9448 = vst [vmem:[#allocation54_spill] sm:$0xff] %v4813_v8  ;;  %3628 = vrot.lane.b32.xlu0 %v3627_v42, %s4160_s18  ;;  %v4832_v42 = vsel %vm4784_vm11, 1.0, %v9437_v17  ;;  %vm382_vm11 = vcmp.lt.f32.partialorder %v4825_v15, %v4586_v4  ;;  %v4853_v8 = vsel %vm403_vm5, 1.0, %v9437_v17  ;;  %vm316_vm0 = vcmp.ge.f32.partialorder %v4859_v50, %v4583_v63  ;;  %vm414_vm2 = vmand %vm315_vm15, %vm366_vm13 }
  0x63   : > { %9451 = vst [vmem:[#allocation55_spill] sm:$0xff] %v4825_v15  ;;  %v3642_v46 = vpack.i.bf16 %v4835_v24, %v4832_v42  ;;  %v4867_v15 = vsel %vm411_vm8, 1.0, %v9437_v17  ;;  %vm430_vm14 = vmand %vm331_vm12, %vm382_vm11  ;;  %vm367_vm1 = vcmp.lt.f32.partialorder %v4859_v50, %v4586_v4 }
  0x64   : > { %9452 = vst [vmem:[#allocation56_spill] sm:$0xff] %v4835_v24  ;;  %v3667_v24 = vpack.i.bf16 %v4856_v41, %v4853_v8  ;;  %v4892_v40 = vsel %vm430_vm14, 1.0, %v9437_v17  ;;  %vm415_vm5 = vmand %vm316_vm0, %vm367_vm1 }
  0x65   : > { %9453 = vst [vmem:[#allocation57_spill] sm:$0xff] %v4849_v53  ;;  %v4889_v53 = vsel %vm397_vm10, 1.0, %v9437_v17  ;;  %vm412_vm8 = vmand %vm313_vm6, %vm364_vm7 }
  0x66   : > { %3653 = vrot.lane.b32.xlu2 %v3652_v31, %s4160_s18  ;;  %9454 = vst [vmem:[#allocation58_spill] sm:$0xff] %v4853_v8  ;;  %v4864_v31 = vsel %vm4820_vm4, 1.0, %v9437_v17 }
  0x67   : > { %9455 = vst [vmem:[#allocation59_spill] sm:$0xff] %v4856_v41  ;;  %v3662_v23 = vpack.i.bf16 %v4864_v31, %v4867_v15  ;;  %v4919_v41 = vsel %vm412_vm8, 1.0, %v9437_v17 }
  0x68   : > { %3648 = vrot.lane.b32.xlu1 %v3647_v49, %s4160_s18  ;;  %9456 = vst [vmem:[#allocation60_spill] sm:$0xff] %v4859_v50  ;;  %v4874_v49 = vld [vmem:[%s4289_s28 + $0xd0] sm:$0xff]  ;;  %v4910_v50 = vsel %vm415_vm5, 1.0, %v9437_v17 }
  0x69   : > { %9457 = vst [vmem:[#allocation61_spill] sm:$0xff] %v4864_v31  ;;  %vm310_vm3 = vcmp.ge.f32.partialorder %v4874_v49, %v4583_v63  ;;  %vm361_vm4 = vcmp.lt.f32.partialorder %v4874_v49, %v4586_v4 }
  0x6a   : > { %9458 = vst [vmem:[#allocation62_spill] sm:$0xff] %v4867_v15  ;;  %3643 = vrot.lane.b32.xlu0 %v3642_v46, %s4160_s18  ;;  %v3657_v46 = vpack.i.bf16 %v4889_v53, %v4892_v40  ;;  %vm409_vm9 = vmand %vm310_vm3, %vm361_vm4  ;;  %v4907_v15 = vsel %vm414_vm2, 1.0, %v9437_v17 }
  0x6b   : > { %9459 = vst [vmem:[#allocation63_spill] sm:$0xff] %v4874_v49 }
  0x6c   : > { %9460 = vst [vmem:[#allocation64_spill] sm:$0xff] %v4884_v25  ;;  %v3677_v25 = vpack.i.bf16 %v4910_v50, %v4907_v15 }
  0x6d   : > { %9461 = vst [vmem:[#allocation65_spill] sm:$0xff] %v4889_v53 }
  0x6e   : > { %9462 = vst [vmem:[#allocation66_spill] sm:$0xff] %v4892_v40  ;;  %3668 = vrot.lane.b32.xlu2 %v3667_v24, %s4160_s18  ;;  %v4916_v24 = vsel %vm409_vm9, 1.0, %v9437_v17  ;;  %v4935_v17 = vperm.slane %v4305_v2, 3 }
  0x6f   : > { %9463 = vst [vmem:[#allocation67_spill] sm:$0xff] %v4907_v15  ;;  %v4930_v15 = vperm.slane %v4305_v2, 4 }
  0x70   : > { %3663 = vrot.lane.b32.xlu1 %v3662_v23, %s4160_s18  ;;  %9464 = vst [vmem:[#allocation68_spill] sm:$0xff] %v4910_v50  ;;  %v3672_v23 = vpack.i.bf16 %v4919_v41, %v4916_v24 }
  0x71   : > { %9465 = vst [vmem:[#allocation69_spill] sm:$0xff] %v4916_v24  ;;  %v4948_v24 = vperm.slane %v4305_v2, 5 }
  0x72   : > { %3658 = vrot.lane.b32.xlu0 %v3657_v46, %s4160_s18  ;;  %9466 = vst [vmem:[#allocation70_spill] sm:$0xff] %v4919_v41  ;;  %v671_v46 = vlaneseq  ;;  %v4939_v41 = vsub.f32 %v4332_v7, %v4308_v3 }
  0x73   : > { %9468 = vst [vmem:[#allocation72_spill] sm:$0xff] %v4930_v15 }
  0x74   : > { %9469 = vst [vmem:[#allocation73_spill] sm:$0xff] %v4935_v17  ;;  %v725_v31 = vmul.f32 %v4935_v17, %v4939_v41 }
  0x75   : > { %9470 = vst [vmem:[#allocation74_spill] sm:$0xff] %v4939_v41 }
  0x76   : > { %9472 = vst [vmem:[#allocation76_spill] sm:$0xff] %v4948_v24  ;;  %v773_v19 = vmul.f32 %v4372_v20, %v725_v31 }
  0x77   : > { %9492 = vst [vmem:[#allocation94_spill] sm:$0xff] %v5047_v44 }
  0x78   : > { %3678 = vrot.lane.b32.xlu1 %v3677_v25, %s4160_s18  ;;  %9504 = vst [vmem:[#allocation105_spill] sm:$0xff] %v5115_v26 }
  0x79   : > { %9507 = vst [vmem:[#allocation107_spill] sm:$0xff] %v5151_v29 }
  0x7a   : > { %3673 = vrot.lane.b32.xlu0 %v3672_v23, %s4160_s18  ;;  %v4943_v23 = vand.u32 127, %v671_v46 }
  0x7c   : > { %vm673_vm12 = vcmp.lt.s32.totalorder %v4943_v23, 96 }
  0x98   : > { %v4925_v49 = vpop.permute.xlu2 %3588 }
  0xa0   : > { %v4927_v8 = vpop.permute.xlu2 %3593 }
  0xa1   : > { %9467 = vst [vmem:[#allocation71_spill] sm:$0xff] %v4927_v8  ;;  %v824_v8 = vsub.f32 %v4332_v7, %v4930_v15 }
  0xa3   : > { %v875_v40 = vmul.f32 %v4948_v24, %v824_v8 }
  0xa8   : > { %v4932_v50 = vpop.permute.xlu2 %3608 }
  0xa9   : > { %v9107_v4 = vunpack.i.l.bf16 %v4932_v50 }
  0xb0   : > { %v4959_v59 = vpop.permute.xlu2 %3623 }
  0xb1   : > { %9473 = vst [vmem:[#allocation77_spill] sm:$0xff] %v4959_v59  ;;  %v9109_v7 = vunpack.i.h.bf16 %v4959_v59  ;;  %v9106_v41 = vunpack.i.l.bf16 %v4959_v59 }
  0xb2   : > { %v4941_v25 = vpop.permute.xlu1 %3578 }
  0xb3   : > { %9471 = vst [vmem:[#allocation75_spill] sm:$0xff] %v4941_v25  ;;  %v9489_v28 = vunpack.i.h.bf16 %v4941_v25 }
  0xb4   : > { %v4954_v53 = vpop.permute.xlu0 %3568 }
  0xb5   : > { %v9104_v46 = vunpack.i.l.bf16 %v4954_v53 }
  0xb7   : > { %v690_v2 = vsel %vm673_vm12, %v9104_v46, %v9107_v4  ;;  %v5006_v4 = vperm.slane %v4412_v30, 4 }
  0xb8   : > { %v923_v62 = vmul.f32 %v875_v40, %v690_v2 }
  0xb9   : > { %9482 = vst [vmem:[#allocation86_spill] sm:$0xff] %v5006_v4 }
  0xba   : > { %v4969_v38 = vpop.permute.xlu1 %3583  ;;  %v4973_v31 = vadd.f32 %v923_v62, %v773_v19 }
  0xbb   : > { %9474 = vst [vmem:[#allocation78_spill] sm:$0xff] %v4969_v38  ;;  %v9108_v8 = vunpack.i.h.bf16 %v4969_v38  ;;  %v9105_v20 = vunpack.i.l.bf16 %v4969_v38  ;;  %v5021_v38 = vperm.slane %v4412_v30, 3 }
  0xbc   : > { %9475 = vst [vmem:[#allocation79_spill] sm:$0xff] %v4973_v31  ;;  %v4991_v2 = vpop.permute.xlu0 %3573  ;;  %1019 = vrot.lane.b32.xlu2 %v4973_v31, %s4160_s18 }
  0xbd   : > { %v4981_v46 = vsel %vm673_vm12, %v9105_v20, %v9106_v41  ;;  %v4989_v40 = vsel %vm673_vm12, %v9108_v8, %v9109_v7  ;;  %9478 = vst [vmem:[#allocation82_spill] sm:$0xff] %v4991_v2  ;;  %v5001_v20 = vsub.f32 %v4303_v1, %v4308_v3  ;;  %v9122_v7 = vunpack.i.l.bf16 %v4941_v25 }
  0xbe   : > { %9476 = vst [vmem:[#allocation80_spill] sm:$0xff] %v4981_v46  ;;  %v5014_v46 = vsub.f32 %v4314_v5, %v4308_v3  ;;  %v5018_v1 = vsub.f32 %v4440_v35, %v4454_v39  ;;  %v5025_v8 = vsub.f32 %v4424_v32, %v4308_v3  ;;  %v825_v2 = vsub.f32 %v4440_v35, %v5006_v4 }
  0xbf   : > { %9477 = vst [vmem:[#allocation81_spill] sm:$0xff] %v4989_v40  ;;  %v860_v25 = vsub.f32 %v4424_v32, %v4930_v15  ;;  %v762_v32 = vmul.f32 %v5021_v38, %v5047_v44  ;;  %v5099_v44 = vsub.f32 %v4571_v61, %v4583_v63 }
  0xc0   : > { %9480 = vst [vmem:[#allocation84_spill] sm:$0xff] %v5001_v20  ;;  %v5070_v35 = vmul.f32 %v4935_v17, %v5014_v46 }
  0xc1   : > { %9483 = vst [vmem:[#allocation87_spill] sm:$0xff] %v5014_v46  ;;  %v5086_v46 = vperm.slane %v4543_v56, 4  ;;  %v911_v10 = vmul.f32 %v4948_v24, %v860_v25 }
  0xc2   : > { %v4995_v19 = vpop.permute.xlu1 %3603  ;;  %9484 = vst [vmem:[#allocation88_spill] sm:$0xff] %v5018_v1 }
  0xc3   : > { %9479 = vst [vmem:[#allocation83_spill] sm:$0xff] %v4995_v19  ;;  %v862_v34 = vsub.f32 %v4571_v61, %v5086_v46 }
  0xc4   : > { %v4997_v62 = vpop.permute.xlu0 %3598  ;;  %9485 = vst [vmem:[#allocation89_spill] sm:$0xff] %v5021_v38 }
  0xc5   : > { %9486 = vst [vmem:[#allocation90_spill] sm:$0xff] %v5025_v8 }
  0xc6   : > { %9498 = vst [vmem:[#allocation100_spill] sm:$0xff] %v5086_v46 }
  0xc7   : > { %9501 = vst [vmem:[#allocation103_spill] sm:$0xff] %v5099_v44 }
  0xca   : > { %v5003_v41 = vpop.permute.xlu1 %3618 }
  0xcb   : > { %9481 = vst [vmem:[#allocation85_spill] sm:$0xff] %v5003_v41  ;;  %v9123_v31 = vunpack.i.l.bf16 %v5003_v41  ;;  %v9488_v59 = vunpack.i.h.bf16 %v5003_v41  ;;  %v5080_v41 = vsub.f32 %v4345_v11, %v4308_v3 }
  0xcc   : > { %v5043_v57 = vpop.permute.xlu0 %3613 }
  0xcd   : > { %v5033_v40 = vsel %vm673_vm12, %v9122_v7, %v9123_v31  ;;  %v5041_v9 = vsel %vm673_vm12, %v9489_v28, %v9488_v59  ;;  %9491 = vst [vmem:[#allocation93_spill] sm:$0xff] %v5043_v57  ;;  %v5052_v7 = vperm.slane %v4412_v30, 5  ;;  %v5056_v31 = vsub.f32 %v4300_v0, %v4308_v3 }
  0xce   : > { %9487 = vst [vmem:[#allocation91_spill] sm:$0xff] %v5033_v40  ;;  %v5060_v28 = vmul.f32 %v4935_v17, %v5001_v20  ;;  %v5064_v59 = vsub.f32 %v4317_v6, %v4308_v3  ;;  %v726_v30 = vmul.f32 %v5021_v38, %v5018_v1  ;;  %v761_v0 = vmul.f32 %v4935_v17, %v5025_v8 }
  0xcf   : > { %9490 = vst [vmem:[#allocation92_spill] sm:$0xff] %v5041_v9  ;;  %v861_v20 = vsub.f32 %v4654_v45, %v5006_v4  ;;  %v876_v8 = vmul.f32 %v5052_v7, %v825_v2  ;;  %v5094_v45 = vperm.slane %v4543_v56, 5  ;;  %v810_v9 = vmul.f32 %v4755_v16, %v762_v32 }
  0xd0   : > { %9493 = vst [vmem:[#allocation95_spill] sm:$0xff] %v5052_v7  ;;  %v774_v48 = vmul.f32 %v4515_v51, %v726_v30  ;;  %v809_v2 = vmul.f32 %v4539_v55, %v761_v0  ;;  %v826_v51 = vsub.f32 %v4568_v60, %v5086_v46  ;;  %v3600_v55 = vunpack.i.l.bf16 %v4997_v62  ;;  %v5122_v30 = vpop.permute.xlu2 %3638 }
  0xd1   : > { %9494 = vst [vmem:[#allocation96_spill] sm:$0xff] %v5056_v31  ;;  %v5091_v31 = vperm.slane %v4543_v56, 3  ;;  %v912_v22 = vmul.f32 %v5052_v7, %v861_v20  ;;  %v9502_v56 = vunpack.i.l.bf16 %v4932_v50  ;;  %v913_v16 = vmul.f32 %v5094_v45, %v862_v34 }
  0xd2   : > { %9495 = vst [vmem:[#allocation97_spill] sm:$0xff] %v5060_v28  ;;  %v3634_v28 = vpop.permute.xlu1 %3633  ;;  %v5129_v32 = vsub.f32 %v4443_v36, %v4454_v39  ;;  %v828_v60 = vsub.f32 %v4443_v36, %v5006_v4 }
  0xd3   : > { %9496 = vst [vmem:[#allocation98_spill] sm:$0xff] %v5064_v59  ;;  %v3635_v27 = vunpack.i.l.bf16 %v3634_v28  ;;  %v3636_v1 = vunpack.i.h.bf16 %v3634_v28  ;;  %v763_v0 = vmul.f32 %v5091_v31, %v5099_v44 }
  0xd4   : > { %9497 = vst [vmem:[#allocation99_spill] sm:$0xff] %v5080_v41  ;;  %v5110_v25 = vpop.permute.xlu0 %3628 }
  0xd5   : > { %9499 = vst [vmem:[#allocation101_spill] sm:$0xff] %v5091_v31  ;;  %v674_v19 = vsel %vm673_vm12, %v9502_v56, %v3635_v27  ;;  %v3631_v61 = vunpack.i.h.bf16 %v5110_v25  ;;  %v9154_v20 = vunpack.i.l.bf16 %v5110_v25  ;;  %v718_v57 = vsel %vm673_vm12, %v3636_v1, %v3600_v55 }
  0xd6   : > { %9500 = vst [vmem:[#allocation102_spill] sm:$0xff] %v5094_v45  ;;  %v924_v28 = vmul.f32 %v876_v8, %v674_v19  ;;  %v9506_v8 = vunpack.i.l.bf16 %v4925_v49 }
  0xd7   : > { %9503 = vst [vmem:[#allocation104_spill] sm:$0xff] %v5110_v25  ;;  %v686_v56 = vsel %vm673_vm12, %v3631_v61, %v3636_v1  ;;  %v702_v34 = vsel %vm673_vm12, %v3600_v55, %v3631_v61  ;;  %v3641_v25 = vunpack.i.h.bf16 %v5122_v30  ;;  %v863_v61 = vsub.f32 %v4427_v33, %v4930_v15 }
  0xd8   : > { %9505 = vst [vmem:[#allocation106_spill] sm:$0xff] %v5129_v32  ;;  %v5141_v19 = vsel %vm673_vm12, %v9506_v8, %v9154_v20  ;;  %v5145_v44 = vadd.f32 %v924_v28, %v774_v48  ;;  %v959_v36 = vmul.f32 %v911_v10, %v702_v34  ;;  %v960_v40 = vmul.f32 %v912_v22, %v686_v56 }
  0xd9   : > { %v727_v8 = vmul.f32 %v5091_v31, %v5115_v26  ;;  %v877_v48 = vmul.f32 %v5094_v45, %v826_v51  ;;  %v729_v22 = vmul.f32 %v5021_v38, %v5129_v32  ;;  %v879_v55 = vmul.f32 %v5052_v7, %v828_v60 }
  0xda   : > { %1051 = vrot.lane.b32.xlu1 %v5145_v44, %s4160_s18  ;;  %v5161_v1 = vadd.f32 %v959_v36, %v809_v2  ;;  %v5163_v10 = vadd.f32 %v960_v40, %v810_v9  ;;  %v9508_v28 = vunpack.i.h.bf16 %v4932_v50  ;;  %v9509_v34 = vunpack.i.l.bf16 %v4954_v53 }
  0xdb   : > { %v811_v33 = vmul.f32 %v4717_v47, %v763_v0  ;;  %v961_v2 = vmul.f32 %v913_v16, %v718_v57  ;;  %v728_v9 = vmul.f32 %v4935_v17, %v5080_v41  ;;  %v3601_v60 = vunpack.i.h.bf16 %v4997_v62 }
  0xdc   : > { %v675_v56 = vsel %vm673_vm12, %v9508_v28, %v3641_v25  ;;  %v706_v51 = vsel %vm673_vm12, %v3635_v27, %v9509_v34  ;;  %v5181_v36 = vpop.permute.xlu0 %3643  ;;  %1043 = vrot.lane.b32.xlu0 %v5161_v1, %s4160_s18  ;;  %1075 = vrot.lane.b32.xlu2 %v5163_v10, %s4160_s18  ;;  %v827_v27 = vsub.f32 %v4345_v11, %v4930_v15  ;;  %v3571_v57 = vunpack.i.h.bf16 %v4954_v53 }
  0xdd   : > { %v5192_v47 = vsub.f32 %v4731_v43, %v4583_v63  ;;  %v865_v62 = vsub.f32 %v4731_v43, %v5086_v46  ;;  %v5198_v0 = vsub.f32 %v4589_v12, %v4583_v63  ;;  %v775_v16 = vmul.f32 %v4712_v37, %v727_v8 }
  0xde   : > { %v925_v28 = vmul.f32 %v877_v48, %v706_v51  ;;  %v777_v34 = vmul.f32 %v4528_v54, %v729_v22  ;;  %v927_v20 = vmul.f32 %v879_v55, %v675_v56  ;;  %v3645_v11 = vunpack.i.l.bf16 %v5181_v36 }
  0xdf   : > { %9510 = vst [vmem:[#allocation108_spill] sm:$0xff] %v5192_v47  ;;  %v5203_v53 = vadd.f32 %v961_v2, %v811_v33  ;;  %v764_v40 = vmul.f32 %v4935_v17, %v5151_v29  ;;  %v914_v32 = vmul.f32 %v4948_v24, %v863_v61  ;;  %v740_v43 = vmul.f32 %v4935_v17, %v5064_v59  ;;  %v5240_v2 = vpop.permute.xlu1 %3648 }
  0xe0   : > { %9511 = vst [vmem:[#allocation109_spill] sm:$0xff] %v5198_v0  ;;  %v9513_v41 = vunpack.i.l.bf16 %v5122_v30  ;;  %v878_v54 = vmul.f32 %v4948_v24, %v827_v27  ;;  %v829_v8 = vsub.f32 %v4589_v12, %v5086_v46  ;;  %v785_v48 = vmul.f32 %v4350_v13, %v5070_v35 }
  0xe1   : > { %9512 = vst [vmem:[#allocation110_spill] sm:$0xff] %v5203_v53  ;;  %v776_v22 = vmul.f32 %v4378_v21, %v728_v9  ;;  %v9514_v61 = vunpack.i.h.bf16 %v4932_v50  ;;  %v5228_v56 = vadd.f32 %v925_v28, %v775_v16  ;;  %v5230_v51 = vadd.f32 %v927_v20, %v777_v34 }
  0xe2   : > { %v703_v37 = vsel %vm673_vm12, %v3601_v60, %v9513_v41  ;;  %1107 = vrot.lane.b32.xlu1 %v5203_v53, %s4160_s18  ;;  %v766_v41 = vmul.f32 %v5091_v31, %v5192_v47  ;;  %v916_v12 = vmul.f32 %v5094_v45, %v865_v62  ;;  %v730_v13 = vmul.f32 %v5091_v31, %v5198_v0  ;;  %v9536_v47 = vld [vmem:[#allocation97_spill] sm:$0xff]  ;;  %v9537_v53 = vld [vmem:[#allocation14_spill] sm:$0xff] }
  0xe3   : > { %v691_v55 = vsel %vm673_vm12, %v3571_v57, %v9514_v61  ;;  %9515 = vst [vmem:[#allocation111_spill] sm:$0xff] %v5230_v51  ;;  %v719_v21 = vsel %vm673_vm12, %v3645_v11, %v3601_v60  ;;  %v812_v50 = vmul.f32 %v4548_v58, %v764_v40  ;;  %v962_v35 = vmul.f32 %v914_v32, %v703_v37  ;;  %v9520_v61 = vld [vmem:[#allocation91_spill] sm:$0xff] }
  0xe4   : > { %v836_v33 = vsub.f32 %v4314_v5, %v4930_v15  ;;  %1083 = vrot.lane.b32.xlu0 %v5228_v56, %s4160_s18  ;;  %1053 = vrot.lane.b32.xlu2 %v5230_v51, %s4160_s18  ;;  %v926_v20 = vmul.f32 %v878_v54, %v691_v55  ;;  %v880_v9 = vmul.f32 %v5094_v45, %v829_v8 }
  0xe5   : > { %v5249_v60 = vsub.f32 %v4522_v52, %v4454_v39  ;;  %v707_v58 = vsel %vm673_vm12, %v3641_v25, %v3571_v57  ;;  %v814_v5 = vmul.f32 %v4832_v42, %v766_v41  ;;  %v831_v32 = vsub.f32 %v4522_v52, %v5006_v4  ;;  %v9519_v52 = vld [vmem:[#allocation42_spill] sm:$0xff] }
  0xe6   : > { %v887_v40 = vmul.f32 %v4948_v24, %v836_v33  ;;  %v964_v27 = vmul.f32 %v916_v12, %v719_v21  ;;  %v5259_v62 = vsub.f32 %v4608_v18, %v4454_v39  ;;  %v864_v16 = vsub.f32 %v4608_v18, %v5006_v4  ;;  %v9521_v18 = vld [vmem:[#allocation93_spill] sm:$0xff] }
  0xe7   : > { %9516 = vst [vmem:[#allocation112_spill] sm:$0xff] %v5249_v60  ;;  %v839_v28 = vsub.f32 %v4317_v6, %v4930_v15  ;;  %v788_v25 = vmul.f32 %v4355_v14, %v740_v43  ;;  %v9159_v42 = vunpack.i.l.bf16 %v5240_v2  ;;  %v5267_v57 = vadd.f32 %v962_v35, %v812_v50  ;;  %v9522_v14 = vld [vmem:[#allocation18_spill] sm:$0xff] }
  0xe8   : > { %9517 = vst [vmem:[#allocation113_spill] sm:$0xff] %v5259_v62  ;;  %v778_v34 = vmul.f32 %v9519_v52, %v730_v13  ;;  %v5270_v37 = vadd.f32 %v926_v20, %v776_v22  ;;  %v928_v54 = vmul.f32 %v880_v9, %v707_v58  ;;  %v732_v8 = vmul.f32 %v5021_v38, %v5249_v60  ;;  %v9526_v58 = vld [vmem:[#allocation92_spill] sm:$0xff] }
  0xe9   : > { %9518 = vst [vmem:[#allocation114_spill] sm:$0xff] %v5267_v57  ;;  %v935_v55 = vmul.f32 %v887_v40, %v9520_v61  ;;  %v3615_v41 = vunpack.i.l.bf16 %v9521_v18  ;;  %v882_v6 = vmul.f32 %v5052_v7, %v831_v32  ;;  %v5281_v43 = vsub.f32 %v9522_v14, %v4308_v3  ;;  %v9527_v32 = vld [vmem:[#allocation83_spill] sm:$0xff]  ;;  %v9531_v61 = vld [vmem:[#allocation44_spill] sm:$0xff] }
  0xea   : > { %1045 = vrot.lane.b32.xlu1 %v5267_v57, %s4160_s18  ;;  %v890_v22 = vmul.f32 %v4948_v24, %v839_v28  ;;  %v5284_v12 = vadd.f32 %v964_v27, %v814_v5  ;;  %v765_v13 = vmul.f32 %v5021_v38, %v5259_v62  ;;  %v915_v21 = vmul.f32 %v5052_v7, %v864_v16  ;;  %v9528_v16 = vld [vmem:[#allocation15_spill] sm:$0xff] }
  0xeb   : > { %9523 = vst [vmem:[#allocation42_spill] sm:$0xff] %v5281_v43  ;;  %v866_v50 = vsub.f32 %v9522_v14, %v4930_v15  ;;  %v676_v35 = vsel %vm673_vm12, %v3615_v41, %v9159_v42  ;;  %v9525_v33 = vunpack.i.l.bf16 %v5122_v30  ;;  %v5299_v9 = vadd.f32 %v935_v55, %v785_v48  ;;  %v9530_v48 = vld [vmem:[#allocation37_spill] sm:$0xff] }
  0xec   : > { %9524 = vst [vmem:[#allocation91_spill] sm:$0xff] %v5284_v12  ;;  %v938_v5 = vmul.f32 %v890_v22, %v9526_v58  ;;  %v3605_v40 = vunpack.i.l.bf16 %v9527_v32  ;;  %1021 = vrot.lane.b32.xlu0 %v5270_v37, %s4160_s18  ;;  %1109 = vrot.lane.b32.xlu2 %v5284_v12, %s4160_s18  ;;  %v5310_v30 = vsub.f32 %v9528_v16, %v4308_v3  ;;  %v9533_v22 = vld [vmem:[#allocation43_spill] sm:$0xff] }
  0xed   : > { %v687_v20 = vsel %vm673_vm12, %v9525_v33, %v3645_v11  ;;  %v830_v11 = vsub.f32 %v9528_v16, %v4930_v15  ;;  %v780_v28 = vmul.f32 %v9530_v48, %v732_v8  ;;  %v767_v52 = vmul.f32 %v4935_v17, %v5281_v43  ;;  %v9535_v48 = vld [vmem:[#allocation96_spill] sm:$0xff] }
  0xee   : > { %9529 = vst [vmem:[#allocation93_spill] sm:$0xff] %v5310_v30  ;;  %v5319_v55 = vsub.f32 %v9531_v61, %v4583_v63  ;;  %v868_v14 = vsub.f32 %v9531_v61, %v5086_v46  ;;  %v813_v33 = vmul.f32 %v9533_v22, %v765_v13  ;;  %v963_v58 = vmul.f32 %v915_v21, %v687_v20  ;;  %v9539_v13 = vld [vmem:[#allocation82_spill] sm:$0xff]  ;;  %v9543_v22 = vld [vmem:[#allocation39_spill] sm:$0xff] }
  0xef   : > { %v930_v42 = vmul.f32 %v882_v6, %v676_v35  ;;  %v5324_v27 = vadd.f32 %v938_v5, %v788_v25  ;;  %v3651_v16 = vunpack.i.h.bf16 %v5240_v2  ;;  %v5327_v12 = vadd.f32 %v928_v54, %v778_v34  ;;  %v9540_v54 = vld [vmem:[#allocation28_spill] sm:$0xff] }
  0xf0   : > { %9532 = vst [vmem:[#allocation18_spill] sm:$0xff] %v5319_v55  ;;  %v917_v8 = vmul.f32 %v4948_v24, %v866_v50  ;;  %v749_v59 = vmul.f32 %v4935_v17, %v9535_v48  ;;  %v5334_v60 = vmul.f32 %v9537_v53, %v9536_v47  ;;  %v9538_v61 = vunpack.i.h.bf16 %v5181_v36  ;;  %v5349_v53 = vpop.permute.xlu2 %3653 }
  0xf1   : > { %9534 = vst [vmem:[#allocation92_spill] sm:$0xff] %v5324_v27  ;;  %v731_v25 = vmul.f32 %v4935_v17, %v5310_v30  ;;  %v3575_v34 = vunpack.i.l.bf16 %v9539_v13  ;;  %v815_v21 = vmul.f32 %v9540_v54, %v767_v52  ;;  %v881_v50 = vmul.f32 %v4948_v24, %v830_v11 }
  0xf2   : > { %v704_v6 = vsel %vm673_vm12, %v3605_v40, %v9538_v61  ;;  %1085 = vrot.lane.b32.xlu1 %v5327_v12, %s4160_s18  ;;  %v769_v47 = vmul.f32 %v5091_v31, %v5319_v55  ;;  %v5351_v35 = vadd.f32 %v963_v58, %v813_v33  ;;  %v5353_v20 = vadd.f32 %v930_v42, %v780_v28  ;;  %v9545_v33 = vld [vmem:[#allocation13_spill] sm:$0xff] }
  0xf3   : > { %v919_v5 = vmul.f32 %v5094_v45, %v868_v14  ;;  %v5358_v61 = vsub.f32 %v9543_v22, %v4583_v63  ;;  %v692_v52 = vsel %vm673_vm12, %v3575_v34, %v3615_v41  ;;  %v720_v11 = vsel %vm673_vm12, %v3651_v16, %v3605_v40  ;;  %v9546_v41 = vld [vmem:[#allocation20_spill] sm:$0xff] }
  0xf4   : > { %9541 = vst [vmem:[#allocation83_spill] sm:$0xff] %v5351_v35  ;;  %v965_v54 = vmul.f32 %v917_v8, %v704_v6  ;;  %v832_v48 = vsub.f32 %v9543_v22, %v5086_v46  ;;  %v5367_v58 = vmul.f32 %v9545_v33, %v749_v59  ;;  %1077 = vrot.lane.b32.xlu0 %v5351_v35, %s4160_s18  ;;  %v9548_v8 = vld [vmem:[#allocation23_spill] sm:$0xff]  ;;  %v9549_v6 = vld [vmem:[#allocation53_spill] sm:$0xff]  ;;  %v9550_v33 = vld [vmem:[#allocation40_spill] sm:$0xff] }
  0xf5   : > { %9542 = vst [vmem:[#allocation15_spill] sm:$0xff] %v5353_v20  ;;  %1055 = vrot.lane.b32.xlu2 %v5353_v20, %s4160_s18  ;;  %v5376_v28 = vsub.f32 %v9546_v41, %v4308_v3  ;;  %v869_v40 = vsub.f32 %v9546_v41, %v4930_v15  ;;  %v779_v59 = vmul.f32 %v9548_v8, %v731_v25  ;;  %v9552_v20 = vld [vmem:[#allocation45_spill] sm:$0xff]  ;;  %v9180_v41 = vunpack.i.h.bf16 %v9527_v32 }
  0xf6   : > { %9544 = vst [vmem:[#allocation37_spill] sm:$0xff] %v5358_v61  ;;  %v817_v22 = vmul.f32 %v9549_v6, %v769_v47  ;;  %v5385_v42 = vsub.f32 %v9550_v33, %v4583_v63  ;;  %v929_v55 = vmul.f32 %v881_v50, %v692_v52  ;;  %v967_v51 = vmul.f32 %v919_v5, %v720_v11 }
  0xf7   : > { %9547 = vst [vmem:[#allocation44_spill] sm:$0xff] %v5376_v28  ;;  %v5389_v43 = vsub.f32 %v9552_v20, %v4454_v39  ;;  %v867_v30 = vsub.f32 %v9552_v20, %v5006_v4  ;;  %v5394_v14 = vadd.f32 %v965_v54, %v815_v21  ;;  %v733_v25 = vmul.f32 %v5091_v31, %v5358_v61 }
  0xf8   : > { %9551 = vst [vmem:[#allocation43_spill] sm:$0xff] %v5385_v42  ;;  %v883_v47 = vmul.f32 %v5094_v45, %v832_v48  ;;  %v9555_v8 = vunpack.i.l.bf16 %v5240_v2  ;;  %v770_v5 = vmul.f32 %v4935_v17, %v5376_v28  ;;  %v920_v52 = vmul.f32 %v4948_v24, %v869_v40  ;;  %v9556_v48 = vld [vmem:[#allocation16_spill] sm:$0xff] }
  0xf9   : > { %9553 = vst [vmem:[#allocation97_spill] sm:$0xff] %v5389_v43  ;;  %v835_v20 = vsub.f32 %v9550_v33, %v5086_v46  ;;  %v3576_v21 = vunpack.i.h.bf16 %v9539_v13  ;;  %v5413_v11 = vsub.f32 %v9556_v48, %v4308_v3  ;;  %v833_v2 = vsub.f32 %v9556_v48, %v4930_v15 }
  0xfa   : > { %9554 = vst [vmem:[#allocation14_spill] sm:$0xff] %v5394_v14  ;;  %v708_v50 = vsel %vm673_vm12, %v9555_v8, %v3575_v34  ;;  %1047 = vrot.lane.b32.xlu1 %v5394_v14, %s4160_s18  ;;  %v736_v34 = vmul.f32 %v5091_v31, %v5385_v42  ;;  %v5419_v54 = vadd.f32 %v929_v55, %v779_v59  ;;  %v9560_v33 = vunpack.i.l.bf16 %v5349_v53  ;;  %v9562_v59 = vld [vmem:[#allocation52_spill] sm:$0xff] }
  0xfb   : > { %9557 = vst [vmem:[#allocation82_spill] sm:$0xff] %v5413_v11  ;;  %v5421_v40 = vadd.f32 %v967_v51, %v817_v22  ;;  %v768_v13 = vmul.f32 %v5021_v38, %v5389_v43  ;;  %v918_v6 = vmul.f32 %v5052_v7, %v867_v30  ;;  %v9561_v48 = vunpack.i.h.bf16 %v5181_v36  ;;  %v5439_v30 = vpop.permute.xlu1 %3663  ;;  %v9563_v36 = vld [vmem:[#allocation30_spill] sm:$0xff]  ;;  %v9567_v14 = vld [vmem:[#allocation56_spill] sm:$0xff] }
  0xfc   : > { %9558 = vst [vmem:[#allocation28_spill] sm:$0xff] %v5419_v54  ;;  %v705_v8 = vsel %vm673_vm12, %v9180_v41, %v9560_v33  ;;  %v781_v51 = vmul.f32 %v9562_v59, %v733_v25  ;;  %v931_v22 = vmul.f32 %v883_v47, %v708_v50  ;;  %v3656_v42 = vunpack.i.h.bf16 %v5349_v53  ;;  %1023 = vrot.lane.b32.xlu0 %v5419_v54, %s4160_s18  ;;  %v9565_v47 = vld [vmem:[#allocation29_spill] sm:$0xff] }
  0xfd   : > { %9559 = vst [vmem:[#allocation39_spill] sm:$0xff] %v5421_v40  ;;  %v688_v55 = vsel %vm673_vm12, %v9561_v48, %v3651_v16  ;;  %v3616_v28 = vunpack.i.h.bf16 %v9521_v18  ;;  %1111 = vrot.lane.b32.xlu2 %v5421_v40, %s4160_s18  ;;  %v5447_v33 = vsub.f32 %v9563_v36, %v4454_v39  ;;  %v3879_v16 = vld [vmem:[%s4289_s28 + $0xc0] sm:$0xff]  ;;  %v818_v50 = vmul.f32 %v9565_v47, %v770_v5 }
  0xfe   : > { %v848_v25 = vsub.f32 %v3879_v16, %v4930_v15  ;;  %v834_v18 = vsub.f32 %v9563_v36, %v5006_v4  ;;  %v9566_v48 = vld [vmem:[#allocation50_spill] sm:$0xff]  ;;  %v886_v41 = vmul.f32 %v5094_v45, %v835_v20  ;;  %v816_v43 = vmul.f32 %v9567_v14, %v768_v13  ;;  %v3659_v13 = vpop.permute.xlu0 %3658 }
  0xff   : > { %9564 = vst [vmem:[#allocation13_spill] sm:$0xff] %v5447_v33  ;;  %v784_v59 = vmul.f32 %v9566_v48, %v736_v34  ;;  %v966_v61 = vmul.f32 %v918_v6, %v688_v55  ;;  %v968_v40 = vmul.f32 %v920_v52, %v705_v8  ;;  %v9190_v35 = vunpack.i.l.bf16 %v5439_v30  ;;  %v9568_v8 = vld [vmem:[#allocation41_spill] sm:$0xff] }
 0x100   : > { %v899_v54 = vmul.f32 %v4948_v24, %v848_v25  ;;  %v5459_v57 = vadd.f32 %v931_v22, %v781_v51  ;;  %v734_v5 = vmul.f32 %v4935_v17, %v5413_v11  ;;  %v884_v36 = vmul.f32 %v4948_v24, %v833_v2  ;;  %v3880_v51 = vld [vmem:[%s4289_s28 + $0xd8] sm:$0xff] }
 0x101   : > { %v709_v34 = vsel %vm673_vm12, %v3656_v42, %v3576_v21  ;;  %v693_v14 = vsel %vm673_vm12, %v3576_v21, %v3616_v28  ;;  %v735_v52 = vmul.f32 %v5021_v38, %v5447_v33  ;;  %v885_v6 = vmul.f32 %v5052_v7, %v834_v18  ;;  %v9572_v18 = vld [vmem:[#allocation26_spill] sm:$0xff] }
 0x102   : > { %v947_v20 = vmul.f32 %v899_v54, %v5141_v19  ;;  %1087 = vrot.lane.b32.xlu1 %v5459_v57, %s4160_s18  ;;  %v5476_v2 = vsub.f32 %v9568_v8, %v4454_v39  ;;  %v870_v55 = vsub.f32 %v9568_v8, %v5006_v4  ;;  %v851_v21 = vsub.f32 %v3880_v51, %v4930_v15 }
 0x103   : > { %v677_v22 = vsel %vm673_vm12, %v3616_v28, %v3656_v42  ;;  %v5484_v19 = vadd.f32 %v966_v61, %v816_v43  ;;  %v5486_v54 = vadd.f32 %v968_v40, %v818_v50  ;;  %v9571_v25 = vunpack.i.h.bf16 %v4925_v49  ;;  %v9573_v43 = vld [vmem:[#allocation38_spill] sm:$0xff]  ;;  %v9574_v28 = vld [vmem:[#allocation55_spill] sm:$0xff] }
 0x104   : > { %9569 = vst [vmem:[#allocation20_spill] sm:$0xff] %v5476_v2  ;;  %v5489_v16 = vadd.f32 %v947_v20, %v5367_v58  ;;  %v782_v48 = vmul.f32 %v9572_v18, %v734_v5  ;;  %v932_v8 = vmul.f32 %v884_v36, %v693_v14  ;;  %v902_v51 = vmul.f32 %v4948_v24, %v851_v21 }
 0x105   : > { %v699_v47 = vsel %vm673_vm12, %v9571_v25, %v9190_v35  ;;  %v3660_v42 = vunpack.i.l.bf16 %v3659_v13  ;;  %1079 = vrot.lane.b32.xlu0 %v5484_v19, %s4160_s18  ;;  %1049 = vrot.lane.b32.xlu2 %v5486_v54, %s4160_s18  ;;  %v783_v61 = vmul.f32 %v9573_v43, %v735_v52  ;;  %v934_v58 = vmul.f32 %v886_v41, %v709_v34  ;;  %v9577_v41 = vld [vmem:[#allocation27_spill] sm:$0xff] }
 0x106   : > { %9570 = vst [vmem:[#allocation23_spill] sm:$0xff] %v5489_v16  ;;  %v5506_v40 = vsub.f32 %v9574_v28, %v4583_v63  ;;  %v933_v50 = vmul.f32 %v885_v6, %v677_v22  ;;  %v771_v5 = vmul.f32 %v5021_v38, %v5476_v2  ;;  %v921_v36 = vmul.f32 %v5052_v7, %v870_v55  ;;  %v9579_v43 = vld [vmem:[#allocation51_spill] sm:$0xff] }
 0x107   : > { %v871_v14 = vsub.f32 %v9574_v28, %v5086_v46  ;;  %v9576_v20 = vunpack.i.l.bf16 %v5349_v53  ;;  %v5519_v34 = vsub.f32 %v9577_v41, %v4454_v39  ;;  %v837_v52 = vsub.f32 %v9577_v41, %v5006_v4 }
 0x108   : > { %9575 = vst [vmem:[#allocation53_spill] sm:$0xff] %v5506_v40  ;;  %v950_v6 = vmul.f32 %v902_v51, %v699_v47  ;;  %v3661_v22 = vunpack.i.h.bf16 %v3659_v13  ;;  %v5523_v25 = vadd.f32 %v932_v8, %v782_v48  ;;  %v5530_v53 = vadd.f32 %v933_v50, %v783_v61  ;;  %v9580_v48 = vld [vmem:[#allocation85_spill] sm:$0xff]  ;;  %v9584_v50 = vld [vmem:[#allocation54_spill] sm:$0xff] }
 0x109   : > { %v689_v21 = vsel %vm673_vm12, %v9576_v20, %v3660_v42  ;;  %9578 = vst [vmem:[#allocation40_spill] sm:$0xff] %v5519_v34  ;;  %v5532_v18 = vadd.f32 %v934_v58, %v784_v59  ;;  %v819_v28 = vmul.f32 %v9579_v43, %v771_v5  ;;  %v772_v41 = vmul.f32 %v5091_v31, %v5506_v40  ;;  %v5653_v40 = vld [vmem:[%s4289_s28 + $0x98] sm:$0xff] }
 0x10a   : > { %v5526_v55 = vadd.f32 %v950_v6, %v5334_v60  ;;  %1025 = vrot.lane.b32.xlu1 %v5523_v25, %s4160_s18  ;;  %v969_v20 = vmul.f32 %v921_v36, %v689_v21  ;;  %v922_v13 = vmul.f32 %v5094_v45, %v871_v14  ;;  %v738_v47 = vmul.f32 %v5021_v38, %v5519_v34  ;;  %v9587_v21 = vld [vmem:[#allocation33_spill] sm:$0xff] }
 0x10b   : > { %v888_v60 = vmul.f32 %v5052_v7, %v837_v52  ;;  %v9581_v8 = vunpack.i.l.bf16 %v9580_v48  ;;  %v9582_v59 = vunpack.i.h.bf16 %v9527_v32  ;;  %v5557_v5 = vsub.f32 %v9584_v50, %v4583_v63  ;;  %v9586_v32 = vld [vmem:[#allocation66_spill] sm:$0xff]  ;;  %9611 = vst [vmem:[#allocation85_spill] sm:$0xff] %v5653_v40 }
 0x10c   : > { %v5553_v58 = vadd.f32 %v969_v20, %v819_v28  ;;  %v838_v36 = vsub.f32 %v9584_v50, %v5086_v46  ;;  %v820_v14 = vmul.f32 %v9586_v32, %v772_v41  ;;  %v786_v52 = vmul.f32 %v9587_v21, %v738_v47  ;;  %v9588_v20 = vld [vmem:[#allocation75_spill] sm:$0xff] }
 0x10d   : > { %v678_v51 = vsel %vm673_vm12, %v9581_v8, %v3661_v22  ;;  %v721_v61 = vsel %vm673_vm12, %v3660_v42, %v9582_v59  ;;  %1057 = vrot.lane.b32.xlu0 %v5530_v53, %s4160_s18  ;;  %1089 = vrot.lane.b32.xlu2 %v5532_v18, %s4160_s18  ;;  %9585 = vst [vmem:[#allocation16_spill] sm:$0xff] %v5557_v5  ;;  %v9589_v8 = vunpack.i.l.bf16 %v9588_v20  ;;  %v9592_v47 = vld [vmem:[#allocation47_spill] sm:$0xff]  ;;  %v3666_v50 = vunpack.i.h.bf16 %v5439_v30 }
 0x10e   : > { %9583 = vst [vmem:[#allocation45_spill] sm:$0xff] %v5553_v58  ;;  %v970_v42 = vmul.f32 %v922_v13, %v721_v61  ;;  %v936_v6 = vmul.f32 %v888_v60, %v678_v51  ;;  %v739_v43 = vmul.f32 %v5091_v31, %v5557_v5  ;;  %v889_v28 = vmul.f32 %v5094_v45, %v838_v36  ;;  %v5583_v61 = vld [vmem:[%s4289_s28 + $0x110] sm:$0xff]  ;;  %v9595_v36 = vld [vmem:[#allocation65_spill] sm:$0xff] }
 0x10f   : > { %v710_v59 = vsel %vm673_vm12, %v3661_v22, %v9589_v8  ;;  %v5578_v60 = vsub.f32 %v9592_v47, %v4583_v63  ;;  %v841_v51 = vsub.f32 %v9592_v47, %v5086_v46  ;;  %9594 = vst [vmem:[#allocation50_spill] sm:$0xff] %v5583_v61  ;;  %v262_v22 = vld [vmem:[%s4289_s28 + $0x118] sm:$0xff]  ;;  %vm318_vm11 = vcmp.ge.f32.partialorder %v5583_v61, %v4454_v39  ;;  %v9599_v8 = vld [vmem:[#allocation32_spill] sm:$0xff] }
 0x110   : > { %v5572_v41 = vadd.f32 %v970_v42, %v820_v14  ;;  %v5574_v13 = vadd.f32 %v936_v6, %v786_v52  ;;  %v787_v32 = vmul.f32 %v9595_v36, %v739_v43  ;;  %v937_v14 = vmul.f32 %v889_v28, %v710_v59  ;;  %v5593_v42 = vld [vmem:[%s4289_s28 + $0x80] sm:$0xff]  ;;  %v9598_v6 = vld [vmem:[#allocation25_spill] sm:$0xff]  ;;  %v3669_v36 = vpop.permute.xlu2 %3668 }
 0x111   : > { %9593 = vst [vmem:[#allocation29_spill] sm:$0xff] %v5578_v60  ;;  %v5597_v21 = vsub.f32 %v5593_v42, %v4454_v39  ;;  %v840_v52 = vsub.f32 %v5593_v42, %v5006_v4  ;;  %vm369_vm10 = vcmp.lt.f32.partialorder %v5583_v61, %v9598_v6  ;;  %v742_v43 = vmul.f32 %v5091_v31, %v5578_v60  ;;  %v9619_v60 = vld [vmem:[#allocation21_spill] sm:$0xff] }
 0x112   : > { %1081 = vrot.lane.b32.xlu1 %v5553_v58, %s4160_s18  ;;  %9590 = vst [vmem:[#allocation52_spill] sm:$0xff] %v5572_v41  ;;  %v892_v28 = vmul.f32 %v5094_v45, %v841_v51  ;;  %vm319_vm14 = vcmp.ge.f32.partialorder %v262_v22, %v4583_v63  ;;  %vm370_vm15 = vcmp.lt.f32.partialorder %v262_v22, %v9599_v8  ;;  %v9600_v59 = vunpack.i.h.bf16 %v9588_v20  ;;  %vm417_vm13 = vmand %vm318_vm11, %vm369_vm10  ;;  %v9602_v8 = vld [vmem:[#allocation61_spill] sm:$0xff] }
 0x113   : > { %9591 = vst [vmem:[#allocation30_spill] sm:$0xff] %v5574_v13  ;;  %v9601_v6 = vunpack.i.h.bf16 %v9580_v48  ;;  %v5620_v51 = vadd.f32 %v937_v14, %v787_v32  ;;  %v741_v22 = vmul.f32 %v5021_v38, %v5597_v21  ;;  %v891_v20 = vmul.f32 %v5052_v7, %v840_v52  ;;  %vm418_vm0 = vmand %vm319_vm14, %vm370_vm15 }
 0x114   : > { %9596 = vst [vmem:[#allocation56_spill] sm:$0xff] %v5593_v42  ;;  %v711_v47 = vsel %vm673_vm12, %v3666_v50, %v9600_v59  ;;  %v790_v59 = vmul.f32 %v9602_v8, %v742_v43  ;;  %v5627_v42 = vld [vmem:[%s4289_s28 + $0x90] sm:$0xff]  ;;  %v3670_v32 = vunpack.i.l.bf16 %v3669_v36  ;;  %v9605_v14 = vmov 0.0   ;;  %v9610_v8 = vld [vmem:[#allocation34_spill] sm:$0xff] }
 0x115   : > { %1113 = vrot.lane.b32.xlu0 %v5572_v41, %s4160_s18  ;;  %1059 = vrot.lane.b32.xlu2 %v5574_v13, %s4160_s18  ;;  %9597 = vst [vmem:[#allocation41_spill] sm:$0xff] %v5597_v21  ;;  %v679_v35 = vsel %vm673_vm12, %v9601_v6, %v3666_v50  ;;  %v940_v61 = vmul.f32 %v892_v28, %v711_v47  ;;  %v5640_v52 = vsel %vm417_vm13, 1.0, %v9605_v14  ;;  %v5643_v43 = vsel %vm418_vm0, 1.0, %v9605_v14  ;;  %v9608_v28 = vld [vmem:[#allocation48_spill] sm:$0xff] }
 0x116   : > { %9603 = vst [vmem:[#allocation26_spill] sm:$0xff] %v5627_v42  ;;  %v5631_v48 = vsub.f32 %v5627_v42, %v4308_v3  ;;  %v842_v50 = vsub.f32 %v5627_v42, %v4930_v15  ;;  %v5647_v47 = vsub.f32 %v9608_v28, %v4583_v63  ;;  %v844_v6 = vsub.f32 %v9608_v28, %v5086_v46 }
 0x117   : > { %9606 = vst [vmem:[#allocation55_spill] sm:$0xff] %v5640_v52  ;;  %v789_v42 = vmul.f32 %v9610_v8, %v741_v22  ;;  %v939_v41 = vmul.f32 %v891_v20, %v679_v35  ;;  %v5657_v58 = vsub.f32 %v5653_v40, %v4454_v39  ;;  %v843_v14 = vsub.f32 %v5653_v40, %v5006_v4  ;;  %v9614_v22 = vld [vmem:[#allocation77_spill] sm:$0xff]  ;;  %v9616_v40 = vld [vmem:[#allocation78_spill] sm:$0xff] }
 0x118   : > { %9604 = vst [vmem:[#allocation38_spill] sm:$0xff] %v5631_v48  ;;  %v5661_v2 = vadd.f32 %v940_v61, %v790_v59  ;;  %v743_v21 = vmul.f32 %v4935_v17, %v5631_v48  ;;  %v893_v28 = vmul.f32 %v4948_v24, %v842_v50  ;;  %v3682_v35 = vpack.i.bf16 %v5643_v43, %v5640_v52 }
 0x119   : > { %9607 = vst [vmem:[#allocation27_spill] sm:$0xff] %v5643_v43  ;;  %v9615_v20 = vunpack.i.l.bf16 %v9614_v22  ;;  %v745_v61 = vmul.f32 %v5091_v31, %v5647_v47  ;;  %v895_v59 = vmul.f32 %v5094_v45, %v844_v6  ;;  %v9617_v48 = vunpack.i.l.bf16 %v9616_v40 }
 0x11a   : > { %1027 = vrot.lane.b32.xlu1 %v5299_v9, %s4160_s18  ;;  %9609 = vst [vmem:[#allocation51_spill] sm:$0xff] %v5647_v47  ;;  %v5681_v43 = vadd.f32 %v939_v41, %v789_v42  ;;  %v744_v52 = vmul.f32 %v5021_v38, %v5657_v58  ;;  %v5689_v47 = vld [vmem:[%s4289_s28 + $0xb0] sm:$0xff]  ;;  %v3671_v41 = vunpack.i.h.bf16 %v3669_v36  ;;  %v9623_v42 = vld [vmem:[#allocation58_spill] sm:$0xff] }
 0x11b   : > { %9612 = vst [vmem:[#allocation54_spill] sm:$0xff] %v5657_v58  ;;  %v680_v8 = vsel %vm673_vm12, %v9615_v20, %v3670_v32  ;;  %v712_v50 = vsel %vm673_vm12, %v3670_v32, %v9617_v48  ;;  %v894_v20 = vmul.f32 %v5052_v7, %v843_v14  ;;  %v5693_v6 = vsub.f32 %v5689_v47, %v4454_v39  ;;  %v9627_v58 = vld [vmem:[#allocation49_spill] sm:$0xff] }
 0x11c   : > { %9613 = vst [vmem:[#allocation66_spill] sm:$0xff] %v5661_v2  ;;  %v846_v48 = vsub.f32 %v5689_v47, %v5006_v4  ;;  %v793_v32 = vmul.f32 %v9623_v42, %v745_v61  ;;  %v9630_v42 = vunpack.i.h.bf16 %v9614_v22 }
 0x11d   : > { %1091 = vrot.lane.b32.xlu0 %v5620_v51, %s4160_s18  ;;  %1029 = vrot.lane.b32.xlu2 %v5324_v27, %s4160_s18  ;;  %9618 = vst [vmem:[#allocation33_spill] sm:$0xff] %v5681_v43  ;;  %v9620_v27 = vld [vmem:[#allocation80_spill] sm:$0xff]  ;;  %v942_v36 = vmul.f32 %v894_v20, %v680_v8  ;;  %v9631_v8 = vunpack.i.h.bf16 %v9616_v40 }
 0x11e   : > { %v941_v13 = vmul.f32 %v893_v28, %v9620_v27  ;;  %9621 = vst [vmem:[#allocation75_spill] sm:$0xff] %v5689_v47  ;;  %v9626_v28 = vld [vmem:[#allocation35_spill] sm:$0xff] }
 0x11f   : > { %9622 = vst [vmem:[#allocation47_spill] sm:$0xff] %v5693_v6  ;;  %v792_v47 = vmul.f32 %v9626_v28, %v744_v52  ;;  %v681_v52 = vsel %vm673_vm12, %v9630_v42, %v3671_v41  ;;  %v713_v20 = vsel %vm673_vm12, %v3671_v41, %v9631_v8  ;;  %v3674_v28 = vpop.permute.xlu0 %3673  ;;  %v9633_v41 = vld [vmem:[#allocation36_spill] sm:$0xff] }
 0x121   : > { %v5737_v22 = vadd.f32 %v942_v36, %v792_v47  ;;  %v9636_v47 = vld [vmem:[#allocation22_spill] sm:$0xff]  ;;  %v9637_v36 = vld [vmem:[#allocation81_spill] sm:$0xff] }
 0x122   : > { %1093 = vrot.lane.b32.xlu1 %v5661_v2, %s4160_s18  ;;  %v791_v2 = vmul.f32 %v9619_v60, %v743_v21  ;;  %v943_v60 = vmul.f32 %v895_v59, %v712_v50  ;;  %v5702_v21 = vld [vmem:[%s4289_s28 + $0xa8] sm:$0xff]  ;;  %v747_v59 = vmul.f32 %v5021_v38, %v5693_v6  ;;  %v897_v50 = vmul.f32 %v5052_v7, %v846_v48 }
 0x123   : > { %9624 = vst [vmem:[#allocation65_spill] sm:$0xff] %v5702_v21  ;;  %v5706_v27 = vsub.f32 %v5702_v21, %v4308_v3  ;;  %v845_v14 = vsub.f32 %v5702_v21, %v4930_v15  ;;  %v9634_v21 = vld [vmem:[#allocation63_spill] sm:$0xff] }
 0x124   : > { %v5717_v61 = vadd.f32 %v941_v13, %v791_v2  ;;  %v5735_v13 = vadd.f32 %v943_v60, %v793_v32  ;;  %v795_v42 = vmul.f32 %v9633_v41, %v747_v59  ;;  %v945_v8 = vmul.f32 %v897_v50, %v681_v52  ;;  %v5755_v59 = vpop.permute.xlu2 %1019  ;;  %v9638_v50 = vld [vmem:[#allocation59_spill] sm:$0xff] }
 0x125   : > { %1061 = vrot.lane.b32.xlu0 %v5681_v43, %s4160_s18  ;;  %3683 = vrot.lane.b32.xlu2 %v3682_v35, %s4160_s18  ;;  %9625 = vst [vmem:[#allocation25_spill] sm:$0xff] %v5706_v27  ;;  %v5713_v43 = vsub.f32 %v9627_v58, %v4583_v63  ;;  %v847_v35 = vsub.f32 %v9627_v58, %v5086_v46  ;;  %v3675_v32 = vunpack.i.l.bf16 %v3674_v28 }
 0x126   : > { %9629 = vst [vmem:[#allocation61_spill] sm:$0xff] %v5717_v61  ;;  %v746_v2 = vmul.f32 %v4935_v17, %v5706_v27  ;;  %v896_v58 = vmul.f32 %v4948_v24, %v845_v14  ;;  %v5745_v6 = vsub.f32 %v9634_v21, %v4583_v63  ;;  %v850_v14 = vsub.f32 %v9634_v21, %v5086_v46 }
 0x127   : > { %9628 = vst [vmem:[#allocation32_spill] sm:$0xff] %v5713_v43  ;;  %v748_v40 = vmul.f32 %v5091_v31, %v5713_v43  ;;  %v898_v48 = vmul.f32 %v5094_v45, %v847_v35  ;;  %v5767_v43 = vadd.f32 %v945_v8, %v795_v42 }
 0x128   : > { %9632 = vst [vmem:[#allocation48_spill] sm:$0xff] %v5735_v13  ;;  %v794_v60 = vmul.f32 %v9636_v47, %v746_v2  ;;  %v944_v35 = vmul.f32 %v896_v58, %v9637_v36  ;;  %v751_v2 = vmul.f32 %v5091_v31, %v5745_v6  ;;  %v901_v58 = vmul.f32 %v5094_v45, %v850_v14  ;;  %v9643_v36 = vld [vmem:[#allocation104_spill] sm:$0xff] }
 0x129   : > { %9635 = vst [vmem:[#allocation34_spill] sm:$0xff] %v5745_v6  ;;  %v796_v52 = vmul.f32 %v9638_v50, %v748_v40  ;;  %v946_v41 = vmul.f32 %v898_v48, %v713_v20  ;;  %v9642_v47 = vunpack.i.l.bf16 %v4925_v49  ;;  %v9644_v14 = vunpack.i.l.bf16 %v9643_v36 }
 0x12a   : > { %1031 = vrot.lane.b32.xlu1 %v5717_v61, %s4160_s18  ;;  %v5759_v61 = vld [vmem:[%s4289_s28 + $0xc8] sm:$0xff]  ;;  %9641 = vst [vmem:[#allocation21_spill] sm:$0xff] %v5767_v43  ;;  %v5778_v40 = vadd.f32 %v944_v35, %v794_v60  ;;  %v3676_v60 = vunpack.i.h.bf16 %v3674_v28  ;;  %v9646_v35 = vld [vmem:[#allocation64_spill] sm:$0xff]  ;;  %v3679_v28 = vpop.permute.xlu1 %3678 }
 0x12b   : > { %9639 = vst [vmem:[#allocation77_spill] sm:$0xff] %v5759_v61  ;;  %v5763_v21 = vsub.f32 %v5759_v61, %v4454_v39  ;;  %v714_v20 = vsel %vm673_vm12, %v3675_v32, %v9642_v47  ;;  %v5780_v48 = vadd.f32 %v946_v41, %v796_v52  ;;  %v682_v50 = vsel %vm673_vm12, %v9644_v14, %v3675_v32  ;;  %v9648_v32 = vld [vmem:[#allocation46_spill] sm:$0xff] }
 0x12c   : > { %v949_v6 = vmul.f32 %v901_v58, %v714_v20  ;;  %v5796_v52 = vsub.f32 %v9646_v35, %v4583_v63 }
 0x12d   : > { %1095 = vrot.lane.b32.xlu0 %v5735_v13, %s4160_s18  ;;  %1063 = vrot.lane.b32.xlu2 %v5737_v22, %s4160_s18  ;;  %9640 = vst [vmem:[#allocation78_spill] sm:$0xff] %v5763_v21  ;;  %v849_v13 = vsub.f32 %v5759_v61, %v5006_v4  ;;  %v750_v42 = vmul.f32 %v5021_v38, %v5763_v21  ;;  %v9645_v61 = vld [vmem:[#allocation69_spill] sm:$0xff] }
 0x12e   : > { %v799_v47 = vmul.f32 %v9645_v61, %v751_v2  ;;  %9647 = vst [vmem:[#allocation80_spill] sm:$0xff] %v5796_v52  ;;  %v3887_v2 = vld [vmem:[%s4289_s28 + $0xe0] sm:$0xff] }
 0x12f   : > { %v900_v8 = vmul.f32 %v5052_v7, %v849_v13  ;;  %v853_v13 = vsub.f32 %v9646_v35, %v5086_v46  ;;  %v798_v36 = vmul.f32 %v9648_v32, %v750_v42  ;;  %v5805_v58 = vsub.f32 %v3887_v2, %v4454_v39 }
 0x130   : > { %v852_v20 = vsub.f32 %v3887_v2, %v5006_v4  ;;  %v5808_v14 = vadd.f32 %v949_v6, %v799_v47  ;;  %v754_v35 = vmul.f32 %v5091_v31, %v5796_v52  ;;  %v9651_v42 = vunpack.i.h.bf16 %v4925_v49 }
 0x131   : > { %v948_v61 = vmul.f32 %v900_v8, %v682_v50  ;;  %9649 = vst [vmem:[#allocation58_spill] sm:$0xff] %v5805_v58  ;;  %v904_v21 = vmul.f32 %v5094_v45, %v853_v13  ;;  %v753_v6 = vmul.f32 %v5021_v38, %v5805_v58  ;;  %v9653_v32 = vunpack.i.l.bf16 %v5439_v30  ;;  %v9654_v13 = vld [vmem:[#allocation60_spill] sm:$0xff] }
 0x132   : > { %1065 = vrot.lane.b32.xlu1 %v5767_v43, %s4160_s18  ;;  %9650 = vst [vmem:[#allocation35_spill] sm:$0xff] %v5808_v14  ;;  %v715_v8 = vsel %vm673_vm12, %v3676_v60, %v9651_v42  ;;  %v903_v47 = vmul.f32 %v5052_v7, %v852_v20  ;;  %v856_v49 = vsub.f32 %v9654_v13, %v5086_v46  ;;  %v9658_v20 = vld [vmem:[#allocation71_spill] sm:$0xff]  ;;  %v9660_v46 = vld [vmem:[#allocation62_spill] sm:$0xff]  ;;  %v5850_v43 = vld [vmem:[%s4289_s28 + $0xf0] sm:$0xff] }
 0x133   : > { %v5819_v50 = vadd.f32 %v948_v61, %v798_v36  ;;  %v683_v2 = vsel %vm673_vm12, %v9653_v32, %v3676_v60  ;;  %v3681_v36 = vunpack.i.h.bf16 %v3679_v28  ;;  %v9656_v61 = vld [vmem:[#allocation57_spill] sm:$0xff]  ;;  %v3595_v42 = vunpack.i.l.bf16 %v9658_v20  ;;  %v9659_v32 = vld [vmem:[#allocation70_spill] sm:$0xff]  ;;  %9661 = vst [vmem:[#allocation22_spill] sm:$0xff] %v5850_v43 }
 0x134   : > { %v5840_v30 = vsub.f32 %v9656_v61, %v4454_v39  ;;  %v855_v60 = vsub.f32 %v9656_v61, %v5006_v4  ;;  %v952_v58 = vmul.f32 %v904_v21, %v715_v8  ;;  %v801_v52 = vmul.f32 %v9660_v46, %v753_v6  ;;  %v9683_v4 = vld [vmem:[#allocation79_spill] sm:$0xff] }
 0x135   : > { %1033 = vrot.lane.b32.xlu0 %v5778_v40, %s4160_s18  ;;  %1097 = vrot.lane.b32.xlu2 %v5780_v48, %s4160_s18  ;;  %9652 = vst [vmem:[#allocation49_spill] sm:$0xff] %v5819_v50  ;;  %v854_v39 = vsub.f32 %v5850_v43, %v4930_v15  ;;  %v3680_v61 = vunpack.i.l.bf16 %v3679_v28  ;;  %v907_v21 = vmul.f32 %v5094_v45, %v856_v49  ;;  %v3889_v28 = vld [vmem:[#allocation5] sm:$0xff] }
 0x136   : > { %v5800_v41 = vpop.permute.xlu2 %1075  ;;  %9657 = vst [vmem:[#allocation63_spill] sm:$0xff] %v5840_v30  ;;  %v756_v46 = vmul.f32 %v5021_v38, %v5840_v30  ;;  %v906_v8 = vmul.f32 %v5052_v7, %v855_v60  ;;  %v5879_v60 = vld [vmem:[#allocation5 + $0x18] sm:$0xff]  ;;  %v9667_v30 = vld [vmem:[#allocation68_spill] sm:$0xff] }
 0x137   : > { %v684_v6 = vsel %vm673_vm12, %v3680_v61, %v3681_v36  ;;  %9666 = vst [vmem:[#allocation64_spill] sm:$0xff] %v5879_v60 }
 0x13a   : > { %1099 = vrot.lane.b32.xlu1 %v5808_v14, %s4160_s18  ;;  %v5830_v14 = vsub.f32 %v9654_v13, %v4583_v63  ;;  %v802_v63 = vmul.f32 %v9659_v32, %v754_v35  ;;  %v716_v35 = vsel %vm673_vm12, %v3681_v36, %v3595_v42  ;;  %v700_v36 = vsel %vm673_vm12, %v3595_v42, %v3680_v61  ;;  %v9670_v61 = vld [vmem:[#allocation17_spill] sm:$0xff] }
 0x13c   : > { %9655 = vst [vmem:[#allocation36_spill] sm:$0xff] %v5830_v14  ;;  %v757_v20 = vmul.f32 %v5091_v31, %v5830_v14  ;;  %v955_v31 = vmul.f32 %v907_v21, %v716_v35  ;;  %v5897_v21 = vperm.slane %v3889_v28, 6 }
 0x13d   : > { %1067 = vrot.lane.b32.xlu0 %v5819_v50, %s4160_s18  ;;  %1035 = vrot.lane.b32.xlu2 %v5489_v16, %s4160_s18  ;;  %v951_v50 = vmul.f32 %v903_v47, %v683_v2  ;;  %v5854_v16 = vsub.f32 %v5850_v43, %v4308_v3  ;;  %v5870_v47 = vperm.slane %v3889_v28, 7  ;;  %v5872_v2 = vadd.f32 %v952_v58, %v802_v63  ;;  %v9668_v63 = vld [vmem:[#allocation67_spill] sm:$0xff]  ;;  %v5917_v28 = vld [vmem:[#allocation5 + $0x20] sm:$0xff] }
 0x13e   : > { %v5846_v13 = vpop.permute.xlu2 %1053  ;;  %v905_v43 = vmul.f32 %v4948_v24, %v854_v39  ;;  %v805_v45 = vmul.f32 %v9667_v30, %v757_v20  ;;  %v954_v58 = vmul.f32 %v906_v8, %v684_v6  ;;  %v5890_v39 = vperm.slane %v5879_v60, 0  ;;  %9671 = vst [vmem:[#allocation60_spill] sm:$0xff] %v5897_v21  ;;  %v5904_v24 = vld [vmem:[%s4289_s28 + $0x120] sm:$0xff]  ;;  %v3892_v6 = vld [vmem:[#allocation5 + $0x8] sm:$0xff] }
 0x13f   : > { %9662 = vst [vmem:[#allocation81_spill] sm:$0xff] %v5854_v16  ;;  %v5874_v49 = vadd.f32 %v951_v50, %v801_v52  ;;  %v755_v32 = vmul.f32 %v4935_v17, %v5854_v16  ;;  %v804_v52 = vmul.f32 %v9668_v63, %v756_v46  ;;  %v3890_v50 = vld [vmem:[%s4289_s28] sm:$0xff]  ;;  %v1301_v46 = vsub.f32 %v5904_v24, %v5870_v47 }
 0x140   : > { %9663 = vst [vmem:[#allocation59_spill] sm:$0xff] %v5870_v47  ;;  %v1265_v7 = vsub.f32 %v3890_v50, %v5870_v47  ;;  %v953_v20 = vmul.f32 %v905_v43, %v700_v36  ;;  %v5899_v35 = vadd.f32 %v955_v31, %v805_v45  ;;  %v9677_v31 = vld [vmem:[#allocation74_spill] sm:$0xff]  ;;  %v3893_v50 = vld [vmem:[#allocation5 + $0x10] sm:$0xff] }
 0x141   : > { %9664 = vst [vmem:[#allocation104_spill] sm:$0xff] %v5872_v2  ;;  %v803_v30 = vmul.f32 %v9670_v61, %v755_v32  ;;  %v5901_v38 = vadd.f32 %v954_v58, %v804_v52  ;;  %v5911_v32 = vperm.slane %v3892_v6, 7  ;;  %v1166_v45 = vmul.f32 %v5897_v21, %v9677_v31  ;;  %v9678_v63 = vld [vmem:[#allocation90_spill] sm:$0xff] }
 0x142   : > { %1037 = vrot.lane.b32.xlu1 %v5526_v55, %s4160_s18  ;;  %9665 = vst [vmem:[#allocation69_spill] sm:$0xff] %v5874_v49  ;;  %v1316_v8 = vmul.f32 %v5890_v39, %v1265_v7  ;;  %v1202_v52 = vmul.f32 %v5897_v21, %v9678_v63  ;;  %v1352_v58 = vmul.f32 %v5890_v39, %v1301_v46  ;;  %v5929_v61 = vperm.slane %v3893_v50, 7 }
 0x143   : > { %9669 = vst [vmem:[#allocation46_spill] sm:$0xff] %v5890_v39  ;;  %v5913_v43 = vadd.f32 %v953_v20, %v803_v30  ;;  %v5931_v20 = vld [vmem:[#allocation5 + $0x28] sm:$0xff]  ;;  %v5938_v63 = vperm.slane %v3892_v6, 6  ;;  %v1214_v46 = vmul.f32 %v1166_v45, %v9683_v4  ;;  %v9686_v45 = vld [vmem:[#allocation94_spill] sm:$0xff]  ;;  %v5959_v14 = vperm.slane %v3893_v50, 6 }
 0x144   : > { %9672 = vst [vmem:[#allocation57_spill] sm:$0xff] %v5899_v35  ;;  %v5952_v6 = vperm.slane %v5931_v20, 0 }
 0x145   : > { %1101 = vrot.lane.b32.xlu0 %v5872_v2, %s4160_s18  ;;  %1069 = vrot.lane.b32.xlu2 %v5874_v49, %s4160_s18  ;;  %9673 = vst [vmem:[#allocation70_spill] sm:$0xff] %v5901_v38  ;;  %v3895_v49 = vld [vmem:[%s4289_s28 + $0x8] sm:$0xff]  ;;  %v1203_v2 = vmul.f32 %v5938_v63, %v9686_v45  ;;  %v1176_v16 = vmul.f32 %v5938_v63, %v5447_v33 }
 0x146   : > { %v5894_v42 = vpop.permute.xlu2 %1109  ;;  %9674 = vst [vmem:[#allocation62_spill] sm:$0xff] %v5904_v24  ;;  %v3894_v24 = vld [vmem:[%s4289_s28 + $0x128] sm:$0xff]  ;;  %v1266_v15 = vsub.f32 %v3895_v49, %v5911_v32 }
 0x147   : > { %9675 = vst [vmem:[#allocation68_spill] sm:$0xff] %v5911_v32  ;;  %v1302_v31 = vsub.f32 %v3894_v24, %v5911_v32 }
 0x148   : > { %9676 = vst [vmem:[#allocation67_spill] sm:$0xff] %v5913_v43 }
 0x149   : > { %9679 = vst [vmem:[#allocation17_spill] sm:$0xff] %v5929_v61 }
 0x14a   : > { %1103 = vrot.lane.b32.xlu1 %v5899_v35, %s4160_s18  ;;  %9680 = vst [vmem:[#allocation115_spill] sm:$0xff] %v5931_v20  ;;  %v3896_v35 = vld [vmem:[%s4289_s28 + $0x10] sm:$0xff] }
 0x14b   : > { %9682 = vst [vmem:[#allocation117_spill] sm:$0xff] %v5938_v63 }
 0x14c   : > { %v1052_v36 = vpop.permute.xlu1 %1051  ;;  %9685 = vst [vmem:[#allocation118_spill] sm:$0xff] %v5952_v6 }
 0x14d   : > { %1071 = vrot.lane.b32.xlu0 %v5901_v38, %s4160_s18  ;;  %1039 = vrot.lane.b32.xlu2 %v5913_v43, %s4160_s18  ;;  %v1131_v7 = vsel %vm673_vm12, %v5755_v59, %v1052_v36  ;;  %v5936_v38 = vperm.slane %v5917_v28, 0  ;;  %v1267_v43 = vsub.f32 %v3896_v35, %v5929_v61  ;;  %9687 = vst [vmem:[#allocation119_spill] sm:$0xff] %v5959_v14 }
 0x14e   : > { %v1364_v30 = vmul.f32 %v1316_v8, %v1131_v7  ;;  %v1044_v60 = vpop.permute.xlu0 %1043  ;;  %v1250_v7 = vmul.f32 %v1202_v52, %v5161_v1 }
 0x14f   : > { %9681 = vst [vmem:[#allocation116_spill] sm:$0xff] %v5936_v38  ;;  %v5940_v17 = vpop.permute.xlu2 %1055  ;;  %v1143_v8 = vsel %vm673_vm12, %v1044_v60, %v5800_v41  ;;  %v1353_v4 = vmul.f32 %v5936_v38, %v1302_v31  ;;  %v1317_v49 = vmul.f32 %v5936_v38, %v1266_v15  ;;  %v1318_v31 = vmul.f32 %v5952_v6, %v1267_v43 }
 0x150   : > { %v1400_v24 = vmul.f32 %v1352_v58, %v1143_v8  ;;  %v5949_v3 = vadd.f32 %v1364_v30, %v1214_v46  ;;  %v9689_v58 = vld [vmem:[#allocation88_spill] sm:$0xff]  ;;  %v1168_v46 = vmul.f32 %v5959_v14, %v5115_v26  ;;  %v1251_v8 = vmul.f32 %v1203_v2, %v5163_v10  ;;  %v3897_v10 = vld [vmem:[%s4289_s28 + $0x18] sm:$0xff] }
 0x151   : > { %v1167_v30 = vmul.f32 %v5938_v63, %v9689_v58  ;;  %v1268_v2 = vsub.f32 %v3897_v10, %v5870_v47 }
 0x152   : > { %9684 = vst [vmem:[#allocation79_spill] sm:$0xff] %v5949_v3  ;;  %v5961_v1 = vadd.f32 %v1400_v24, %v1250_v7 }
 0x154   : > { %9688 = vst [vmem:[#allocation120_spill] sm:$0xff] %v5961_v1  ;;  %v1108_v52 = vpop.permute.xlu1 %1107  ;;  %1484 = vrot.lane.b32.xlu1 %v5961_v1, %s4160_s18  ;;  %v9707_v1 = vld [vmem:[#allocation37_spill] sm:$0xff] }
 0x155   : > { %1460 = vrot.lane.b32.xlu0 %v5949_v3, %s4160_s18  ;;  %v1127_v35 = vsel %vm673_vm12, %v5800_v41, %v1108_v52  ;;  %v5977_v15 = vsel %vm673_vm12, %v1108_v52, %v1044_v60  ;;  %v1215_v41 = vmul.f32 %v1167_v30, %v5145_v44 }
 0x156   : > { %v1401_v50 = vmul.f32 %v1353_v4, %v1127_v35  ;;  %v1084_v7 = vpop.permute.xlu0 %1083  ;;  %v1216_v4 = vmul.f32 %v1168_v46, %v5228_v56  ;;  %v6010_v56 = vld [vmem:[%s4289_s28 + $0x28] sm:$0xff] }
 0x157   : > { %v5981_v24 = vpop.permute.xlu2 %1111  ;;  %v1115_v26 = vsel %vm673_vm12, %v1052_v36, %v1084_v7  ;;  %v1147_v3 = vsel %vm673_vm12, %v1084_v7, %v5755_v59  ;;  %9694 = vst [vmem:[#allocation124_spill] sm:$0xff] %v6010_v56  ;;  %v3899_v7 = vld [vmem:[%s4289_s28 + $0x138] sm:$0xff] }
 0x158   : > { %v5989_v60 = vadd.f32 %v1401_v50, %v1251_v8  ;;  %v1365_v52 = vmul.f32 %v1317_v49, %v1115_v26  ;;  %v1366_v43 = vmul.f32 %v1318_v31, %v1147_v3  ;;  %v1319_v3 = vmul.f32 %v5890_v39, %v1268_v2  ;;  %v9693_v26 = vld [vmem:[#allocation99_spill] sm:$0xff] }
 0x159   : > { %v1169_v44 = vmul.f32 %v5897_v21, %v9693_v26  ;;  %v1270_v49 = vsub.f32 %v6010_v56, %v5929_v61  ;;  %v1171_v2 = vmul.f32 %v5959_v14, %v5198_v0  ;;  %v1205_v56 = vmul.f32 %v5897_v21, %v5151_v29  ;;  %v9696_v29 = vld [vmem:[#allocation114_spill] sm:$0xff] }
 0x15a   : > { %9690 = vst [vmem:[#allocation121_spill] sm:$0xff] %v5989_v60  ;;  %1516 = vrot.lane.b32.xlu2 %v5989_v60, %s4160_s18  ;;  %v5996_v36 = vadd.f32 %v1365_v52, %v1215_v41  ;;  %v5998_v59 = vadd.f32 %v1366_v43, %v1216_v4  ;;  %v1304_v41 = vsub.f32 %v3899_v7, %v5870_v47  ;;  %v3900_v52 = vld [vmem:[%s4289_s28 + $0x140] sm:$0xff]  ;;  %v9718_v60 = vld [vmem:[#allocation43_spill] sm:$0xff] }
 0x15b   : > { %v1217_v8 = vmul.f32 %v1169_v44, %v5270_v37  ;;  %v1305_v43 = vsub.f32 %v3900_v52, %v5911_v32  ;;  %v1321_v4 = vmul.f32 %v5952_v6, %v1270_v49  ;;  %v1206_v37 = vmul.f32 %v5938_v63, %v5259_v62  ;;  %v3901_v62 = vld [vmem:[%s4289_s28 + $0x20] sm:$0xff] }
 0x15c   : > { %9691 = vst [vmem:[#allocation122_spill] sm:$0xff] %v5996_v36  ;;  %v6000_v35 = vpop.permute.xlu1 %1045  ;;  %1492 = vrot.lane.b32.xlu1 %v5996_v36, %s4160_s18  ;;  %v1355_v49 = vmul.f32 %v5890_v39, %v1304_v41  ;;  %v1219_v52 = vmul.f32 %v1171_v2, %v5327_v12  ;;  %v1253_v0 = vmul.f32 %v1205_v56, %v9696_v29  ;;  %v3902_v29 = vld [vmem:[%s4289_s28 + $0x30] sm:$0xff] }
 0x15d   : > { %9692 = vst [vmem:[#allocation123_spill] sm:$0xff] %v5998_v59  ;;  %1524 = vrot.lane.b32.xlu0 %v5998_v59, %s4160_s18  ;;  %v1269_v26 = vsub.f32 %v3901_v62, %v5911_v32  ;;  %v1271_v12 = vsub.f32 %v3902_v29, %v5870_v47  ;;  %v1177_v45 = vmul.f32 %v5959_v14, %v9718_v60  ;;  %v6439_v60 = vld [vmem:[#allocation7 + $0xf0] sm:$0xff] }
 0x15e   : > { %v1022_v30 = vpop.permute.xlu0 %1021 }
 0x15f   : > { %v6014_v46 = vpop.permute.xlu2 %1049  ;;  %v1132_v31 = vsel %vm673_vm12, %v1022_v30, %v5846_v13  ;;  %v1320_v2 = vmul.f32 %v5936_v38, %v1269_v26  ;;  %v3903_v26 = vld [vmem:[%s4289_s28 + $0x130] sm:$0xff] }
 0x160   : > { %v1367_v50 = vmul.f32 %v1319_v3, %v1132_v31  ;;  %v1356_v31 = vmul.f32 %v5936_v38, %v1305_v43  ;;  %v9697_v43 = vld [vmem:[#allocation83_spill] sm:$0xff] }
 0x162   : > { %v6025_v10 = vadd.f32 %v1367_v50, %v1217_v8 }
 0x164   : > { %9695 = vst [vmem:[#allocation125_spill] sm:$0xff] %v6025_v10  ;;  %v1086_v3 = vpop.permute.xlu1 %1085  ;;  %1462 = vrot.lane.b32.xlu2 %v6025_v10, %s4160_s18 }
 0x165   : > { %v1148_v44 = vsel %vm673_vm12, %v1086_v3, %v1022_v30 }
 0x166   : > { %v1369_v50 = vmul.f32 %v1321_v4, %v1148_v44  ;;  %v1078_v8 = vpop.permute.xlu0 %1077  ;;  %v1254_v4 = vmul.f32 %v1206_v37, %v9697_v43  ;;  %v1116_v37 = vsel %vm673_vm12, %v5846_v13, %v1086_v3  ;;  %v9702_v13 = vld [vmem:[#allocation106_spill] sm:$0xff] }
 0x167   : > { %v6039_v7 = vpop.permute.xlu2 %1089  ;;  %v1128_v30 = vsel %vm673_vm12, %v1078_v8, %v5894_v42  ;;  %v1144_v41 = vsel %vm673_vm12, %v6000_v35, %v1078_v8  ;;  %v1170_v3 = vmul.f32 %v5938_v63, %v9702_v13  ;;  %v9705_v13 = vld [vmem:[#allocation111_spill] sm:$0xff] }
 0x168   : > { %v1403_v44 = vmul.f32 %v1355_v49, %v1144_v41  ;;  %v1404_v10 = vmul.f32 %v1356_v31, %v1128_v30  ;;  %v6052_v59 = vadd.f32 %v1369_v50, %v1219_v52  ;;  %v9701_v49 = vld [vmem:[#allocation93_spill] sm:$0xff]  ;;  %v1303_v31 = vsub.f32 %v3903_v26, %v5929_v61  ;;  %v3904_v50 = vld [vmem:[%s4289_s28 + $0x40] sm:$0xff] }
 0x169   : > { %v1273_v8 = vsub.f32 %v3904_v50, %v5929_v61  ;;  %v1368_v41 = vmul.f32 %v1320_v2, %v1116_v37  ;;  %v1218_v2 = vmul.f32 %v1170_v3, %v9705_v13 }
 0x16a   : > { %9698 = vst [vmem:[#allocation114_spill] sm:$0xff] %v6052_v59  ;;  %v6056_v62 = vadd.f32 %v1404_v10, %v1254_v4  ;;  %v6058_v56 = vadd.f32 %v1403_v44, %v1253_v0  ;;  %v1322_v10 = vmul.f32 %v5890_v39, %v1271_v12  ;;  %v1172_v0 = vmul.f32 %v5897_v21, %v9701_v49  ;;  %v9703_v4 = vld [vmem:[#allocation42_spill] sm:$0xff]  ;;  %v9704_v12 = vld [vmem:[#allocation28_spill] sm:$0xff] }
 0x16b   : > { %v1208_v44 = vmul.f32 %v5897_v21, %v9703_v4  ;;  %v1354_v49 = vmul.f32 %v5952_v6, %v1303_v31  ;;  %v1324_v37 = vmul.f32 %v5952_v6, %v1273_v8  ;;  %v3908_v4 = vld [vmem:[%s4289_s28 + $0x38] sm:$0xff] }
 0x16c   : > { %9699 = vst [vmem:[#allocation83_spill] sm:$0xff] %v6056_v62  ;;  %v6061_v36 = vpop.permute.xlu1 %1047  ;;  %1526 = vrot.lane.b32.xlu2 %v6052_v59, %s4160_s18  ;;  %1518 = vrot.lane.b32.xlu1 %v6056_v62, %s4160_s18  ;;  %v1220_v26 = vmul.f32 %v1172_v0, %v9704_v12  ;;  %v3905_v62 = vld [vmem:[%s4289_s28 + $0x150] sm:$0xff]  ;;  %v3906_v59 = vld [vmem:[%s4289_s28 + $0x158] sm:$0xff] }
 0x16d   : > { %9700 = vst [vmem:[#allocation126_spill] sm:$0xff] %v6058_v56  ;;  %1486 = vrot.lane.b32.xlu0 %v6058_v56, %s4160_s18  ;;  %v1307_v56 = vsub.f32 %v3905_v62, %v5870_v47  ;;  %v1308_v50 = vsub.f32 %v3906_v59, %v5911_v32  ;;  %v9709_v62 = vld [vmem:[#allocation97_spill] sm:$0xff]  ;;  %v9710_v59 = vld [vmem:[#allocation103_spill] sm:$0xff] }
 0x16e   : > { %v1024_v52 = vpop.permute.xlu0 %1023  ;;  %v1209_v12 = vmul.f32 %v5938_v63, %v9709_v62  ;;  %v1204_v31 = vmul.f32 %v5959_v14, %v9710_v59  ;;  %v9712_v62 = vld [vmem:[#allocation112_spill] sm:$0xff] }
 0x16f   : > { %v6081_v30 = vpop.permute.xlu2 %1059  ;;  %v1133_v43 = vsel %vm673_vm12, %v1024_v52, %v5940_v17  ;;  %v1358_v3 = vmul.f32 %v5890_v39, %v1307_v56  ;;  %v1359_v8 = vmul.f32 %v5936_v38, %v1308_v50  ;;  %v1272_v50 = vsub.f32 %v3908_v4, %v5911_v32 }
 0x170   : > { %v1370_v29 = vmul.f32 %v1322_v10, %v1133_v43  ;;  %v1174_v10 = vmul.f32 %v5959_v14, %v9707_v1  ;;  %v6100_v43 = vadd.f32 %v1368_v41, %v1218_v2  ;;  %v9711_v41 = vld [vmem:[#allocation14_spill] sm:$0xff]  ;;  %v1173_v1 = vmul.f32 %v5938_v63, %v9712_v62 }
 0x172   : > { %v6096_v58 = vadd.f32 %v1370_v29, %v1220_v26  ;;  %9708 = vst [vmem:[#allocation111_spill] sm:$0xff] %v6100_v43  ;;  %v1256_v29 = vmul.f32 %v1208_v44, %v9711_v41  ;;  %v1402_v26 = vmul.f32 %v1354_v49, %v5977_v15  ;;  %v1222_v15 = vmul.f32 %v1174_v10, %v5459_v57  ;;  %v9714_v49 = vld [vmem:[#allocation44_spill] sm:$0xff]  ;;  %v3909_v57 = vld [vmem:[%s4289_s28 + $0x48] sm:$0xff] }
 0x173   : > { %v1274_v10 = vsub.f32 %v3909_v57, %v5870_v47  ;;  %v6186_v57 = vmul.f32 %v1176_v16, %v5530_v53  ;;  %v9725_v53 = vld [vmem:[#allocation30_spill] sm:$0xff] }
 0x174   : > { %9706 = vst [vmem:[#allocation28_spill] sm:$0xff] %v6096_v58  ;;  %v1088_v0 = vpop.permute.xlu1 %1087  ;;  %1464 = vrot.lane.b32.xlu1 %v6096_v58, %s4160_s18  ;;  %v1175_v58 = vmul.f32 %v5897_v21, %v5413_v11 }
 0x175   : > { %v1149_v13 = vsel %vm673_vm12, %v1088_v0, %v1024_v52  ;;  %1494 = vrot.lane.b32.xlu0 %v6100_v43, %s4160_s18  ;;  %v3907_v52 = vld [vmem:[%s4289_s28 + $0x148] sm:$0xff]  ;;  %v9715_v43 = vld [vmem:[#allocation110_spill] sm:$0xff] }
 0x176   : > { %v1372_v2 = vmul.f32 %v1324_v37, %v1149_v13  ;;  %v1306_v56 = vsub.f32 %v3907_v52, %v5929_v61  ;;  %v1211_v37 = vmul.f32 %v5897_v21, %v9714_v49  ;;  %v1257_v52 = vmul.f32 %v1209_v12, %v5484_v19  ;;  %v9717_v49 = vld [vmem:[#allocation15_spill] sm:$0xff] }
 0x177   : > { %v1080_v44 = vpop.permute.xlu0 %1079  ;;  %v6124_v41 = vpop.permute.xlu2 %1029  ;;  %v1252_v4 = vmul.f32 %v1204_v31, %v9715_v43  ;;  %v1117_v31 = vsel %vm673_vm12, %v5940_v17, %v1088_v0  ;;  %v9723_v17 = vld [vmem:[#allocation108_spill] sm:$0xff] }
 0x178   : > { %9713 = vst [vmem:[#allocation14_spill] sm:$0xff] %v6124_v41  ;;  %v1129_v13 = vsel %vm673_vm12, %v1080_v44, %v5981_v24  ;;  %v1145_v11 = vsel %vm673_vm12, %v6061_v36, %v1080_v44  ;;  %v6137_v20 = vadd.f32 %v1372_v2, %v1222_v15  ;;  %v1221_v41 = vmul.f32 %v1173_v1, %v9717_v49 }
 0x179   : > { %v1406_v62 = vmul.f32 %v1358_v3, %v1145_v11  ;;  %v1407_v59 = vmul.f32 %v1359_v8, %v1129_v13  ;;  %v6146_v44 = vadd.f32 %v1402_v26, %v1252_v4  ;;  %v1357_v19 = vmul.f32 %v5952_v6, %v1306_v56  ;;  %v9722_v8 = vld [vmem:[#allocation87_spill] sm:$0xff] }
 0x17a   : > { %9716 = vst [vmem:[#allocation110_spill] sm:$0xff] %v6137_v20  ;;  %v1323_v11 = vmul.f32 %v5936_v38, %v1272_v50  ;;  %v1160_v1 = vsel %vm673_vm12, %v5894_v42, %v6000_v35  ;;  %v1178_v26 = vmul.f32 %v5897_v21, %v9722_v8  ;;  %v1180_v2 = vmul.f32 %v5959_v14, %v5557_v5  ;;  %v9724_v50 = vld [vmem:[#allocation98_spill] sm:$0xff] }
 0x17b   : > { %9719 = vst [vmem:[#allocation15_spill] sm:$0xff] %v6146_v44  ;;  %v6150_v43 = vadd.f32 %v1406_v62, %v1256_v29  ;;  %v6152_v12 = vadd.f32 %v1407_v59, %v1257_v52  ;;  %v1325_v42 = vmul.f32 %v5890_v39, %v1274_v10  ;;  %v1179_v35 = vmul.f32 %v5938_v63, %v5519_v34  ;;  %v3910_v59 = vld [vmem:[%s4289_s28 + $0x168] sm:$0xff]  ;;  %v3911_v10 = vld [vmem:[%s4289_s28 + $0x58] sm:$0xff]  ;;  %v9740_v34 = vld [vmem:[#allocation54_spill] sm:$0xff] }
 0x17c   : > { %v1026_v3 = vpop.permute.xlu1 %1025  ;;  %1528 = vrot.lane.b32.xlu1 %v6137_v20, %s4160_s18  ;;  %v1207_v0 = vmul.f32 %v5959_v14, %v9723_v17  ;;  %v1223_v62 = vmul.f32 %v1175_v58, %v5523_v25  ;;  %v1310_v29 = vsub.f32 %v3910_v59, %v5870_v47  ;;  %v1259_v56 = vmul.f32 %v1211_v37, %v5486_v54 }
 0x17d   : > { %9720 = vst [vmem:[#allocation127_spill] sm:$0xff] %v6150_v43  ;;  %1488 = vrot.lane.b32.xlu2 %v6150_v43, %s4160_s18  ;;  %1520 = vrot.lane.b32.xlu0 %v6152_v12, %s4160_s18  ;;  %v1181_v15 = vmul.f32 %v5897_v21, %v9724_v50  ;;  %v1405_v49 = vmul.f32 %v1357_v19, %v1160_v1  ;;  %v9726_v1 = vld [vmem:[#allocation91_spill] sm:$0xff]  ;;  %v9735_v50 = vld [vmem:[#allocation38_spill] sm:$0xff] }
 0x17e   : > { %9721 = vst [vmem:[#allocation128_spill] sm:$0xff] %v6152_v12  ;;  %v1371_v13 = vmul.f32 %v1323_v11, %v1117_v31  ;;  %v6183_v4 = vmul.f32 %v1177_v45, %v5532_v18  ;;  %v1276_v25 = vsub.f32 %v3911_v10, %v5929_v61  ;;  %v6193_v54 = vmul.f32 %v1178_v26, %v5299_v9  ;;  %v3912_v18 = vld [vmem:[%s4289_s28 + $0x170] sm:$0xff]  ;;  %v9728_v26 = vld [vmem:[#allocation29_spill] sm:$0xff] }
 0x17f   : > { %v1058_v52 = vpop.permute.xlu0 %1057  ;;  %v6196_v37 = vmul.f32 %v1180_v2, %v5620_v51  ;;  %v6198_v11 = vpop.permute.xlu2 %3683  ;;  %v1311_v16 = vsub.f32 %v3912_v18, %v5911_v32  ;;  %v6203_v45 = vmul.f32 %v1179_v35, %v9725_v53  ;;  %v1255_v31 = vmul.f32 %v1207_v0, %v9726_v1  ;;  %v9727_v10 = vld [vmem:[#allocation92_spill] sm:$0xff]  ;;  %v9729_v2 = vld [vmem:[#allocation41_spill] sm:$0xff] }
 0x180   : > { %v1134_v58 = vsel %vm673_vm12, %v1026_v3, %v1058_v52  ;;  %v1361_v59 = vmul.f32 %v5890_v39, %v1310_v29  ;;  %v6208_v9 = vmul.f32 %v1181_v15, %v9727_v10  ;;  %v1183_v51 = vmul.f32 %v5959_v14, %v9728_v26  ;;  %v9732_v18 = vld [vmem:[#allocation20_spill] sm:$0xff]  ;;  %v9734_v10 = vld [vmem:[#allocation51_spill] sm:$0xff] }
 0x181   : > { %v1373_v19 = vmul.f32 %v1325_v42, %v1134_v58  ;;  %v1182_v42 = vmul.f32 %v5938_v63, %v9729_v2  ;;  %v6214_v58 = vadd.f32 %v1371_v13, %v1221_v41  ;;  %v1212_v35 = vmul.f32 %v5938_v63, %v9732_v18  ;;  %v3913_v15 = vld [vmem:[%s4289_s28 + $0x50] sm:$0xff]  ;;  %v9737_v18 = vld [vmem:[#allocation66_spill] sm:$0xff] }
 0x182   : > { %v6220_v0 = vadd.f32 %v1405_v49, %v1255_v31  ;;  %v1327_v29 = vmul.f32 %v5952_v6, %v1276_v25  ;;  %v1275_v53 = vsub.f32 %v3913_v15, %v5911_v32  ;;  %v1186_v12 = vmul.f32 %v5959_v14, %v9734_v10  ;;  %v9736_v25 = vld [vmem:[#allocation18_spill] sm:$0xff] }
 0x183   : > { %9730 = vst [vmem:[#allocation30_spill] sm:$0xff] %v6214_v58  ;;  %v6216_v17 = vadd.f32 %v1373_v19, %v1223_v62  ;;  %v1184_v41 = vmul.f32 %v5897_v21, %v9735_v50  ;;  %v1150_v62 = vsel %vm673_vm12, %v6039_v7, %v1026_v3  ;;  %v1362_v13 = vmul.f32 %v5936_v38, %v1311_v16  ;;  %v3914_v15 = vld [vmem:[%s4289_s28 + $0x60] sm:$0xff]  ;;  %v9738_v16 = vld [vmem:[#allocation45_spill] sm:$0xff] }
 0x184   : > { %9733 = vst [vmem:[#allocation92_spill] sm:$0xff] %v6220_v0  ;;  %v1082_v1 = vpop.permute.xlu1 %1081  ;;  %v1210_v19 = vmul.f32 %v5959_v14, %v9736_v25  ;;  %v1277_v3 = vsub.f32 %v3914_v15, %v5870_v47  ;;  %v6245_v50 = vmul.f32 %v1183_v51, %v9737_v18  ;;  %v1187_v10 = vmul.f32 %v5897_v21, %v5706_v27  ;;  %v9739_v25 = vld [vmem:[#allocation33_spill] sm:$0xff] }
 0x185   : > { %9731 = vst [vmem:[#allocation91_spill] sm:$0xff] %v6216_v17  ;;  %1496 = vrot.lane.b32.xlu2 %v6214_v58, %s4160_s18  ;;  %v1146_v49 = vsel %vm673_vm12, %v6014_v46, %v1082_v1  ;;  %1466 = vrot.lane.b32.xlu0 %v6216_v17, %s4160_s18  ;;  %v1260_v26 = vmul.f32 %v1212_v35, %v9738_v16  ;;  %v3915_v17 = vld [vmem:[%s4289_s28 + $0x160] sm:$0xff]  ;;  %v3916_v16 = vld [vmem:[%s4289_s28 + $0x70] sm:$0xff] }
 0x186   : > { %v1409_v31 = vmul.f32 %v1361_v59, %v1146_v49  ;;  %v6253_v8 = vmul.f32 %v1182_v42, %v9739_v25  ;;  %v1185_v59 = vmul.f32 %v5938_v63, %v9740_v34  ;;  %v9741_v49 = vld [vmem:[#allocation32_spill] sm:$0xff]  ;;  %v1375_v5 = vmul.f32 %v1327_v29, %v1150_v62 }
 0x187   : > { %v6249_v2 = vpop.permute.xlu0 %1113  ;;  %v1189_v15 = vmul.f32 %v5959_v14, %v9741_v49  ;;  %v1326_v51 = vmul.f32 %v5936_v38, %v1275_v53  ;;  %v1309_v35 = vsub.f32 %v3915_v17, %v5929_v61  ;;  %v1118_v42 = vsel %vm673_vm12, %v1058_v52, %v6039_v7  ;;  %v9743_v53 = vld [vmem:[#allocation48_spill] sm:$0xff]  ;;  %v9745_v17 = vld [vmem:[#allocation47_spill] sm:$0xff]  ;;  %v6283_v34 = vpop.permute.xlu2 %1063 }
 0x188   : > { %v1130_v18 = vsel %vm673_vm12, %v1082_v1, %v6249_v2  ;;  %v6263_v27 = vadd.f32 %v1409_v31, %v1259_v56  ;;  %v1279_v49 = vsub.f32 %v3916_v16, %v5929_v61  ;;  %v1328_v29 = vmul.f32 %v5890_v39, %v1277_v3  ;;  %v9744_v56 = vld [vmem:[#allocation61_spill] sm:$0xff]  ;;  %v9747_v52 = vld [vmem:[#allocation39_spill] sm:$0xff] }
 0x189   : > { %v1410_v25 = vmul.f32 %v1362_v13, %v1130_v18  ;;  %v6276_v1 = vmul.f32 %v1186_v12, %v9743_v53  ;;  %v6279_v62 = vmul.f32 %v1184_v41, %v9744_v56  ;;  %v1188_v31 = vmul.f32 %v5938_v63, %v9745_v17  ;;  %v9748_v18 = vld [vmem:[#allocation53_spill] sm:$0xff] }
 0x18a   : > { %9742 = vst [vmem:[#allocation66_spill] sm:$0xff] %v6263_v27  ;;  %1490 = vrot.lane.b32.xlu1 %v6263_v27, %s4160_s18  ;;  %v1258_v13 = vmul.f32 %v1210_v19, %v9747_v52  ;;  %v1213_v16 = vmul.f32 %v5959_v14, %v9748_v18  ;;  %v9749_v27 = vld [vmem:[#allocation96_spill] sm:$0xff]  ;;  %v1374_v12 = vmul.f32 %v1326_v51, %v1118_v42  ;;  %v3920_v17 = vld [vmem:[%s4289_s28 + $0x178] sm:$0xff] }
 0x18b   : > { %v6285_v7 = vadd.f32 %v1410_v25, %v1260_v26  ;;  %v1190_v3 = vmul.f32 %v5897_v21, %v9749_v27  ;;  %v6293_v41 = vadd.f32 %v1375_v5, %v6183_v4  ;;  %v6296_v56 = vmul.f32 %v1187_v10, %v5778_v40  ;;  %v9751_v4 = vld [vmem:[#allocation21_spill] sm:$0xff]  ;;  %v9754_v52 = vld [vmem:[#allocation52_spill] sm:$0xff] }
 0x18c   : > { %v1028_v53 = vpop.permute.xlu1 %1027  ;;  %v6299_v26 = vmul.f32 %v1185_v59, %v5737_v22  ;;  %v1360_v19 = vmul.f32 %v5952_v6, %v1309_v35  ;;  %v1330_v42 = vmul.f32 %v5952_v6, %v1279_v49  ;;  %v6309_v5 = vmul.f32 %v1189_v15, %v5780_v48  ;;  %v9752_v59 = vld [vmem:[#allocation84_spill] sm:$0xff]  ;;  %v3917_v48 = vld [vmem:[%s4289_s28 + $0x68] sm:$0xff] }
 0x18d   : > { %9746 = vst [vmem:[#allocation45_spill] sm:$0xff] %v6285_v7  ;;  %1522 = vrot.lane.b32.xlu2 %v6285_v7, %s4160_s18  ;;  %v1135_v51 = vsel %vm673_vm12, %v1028_v53, %v6081_v30  ;;  %v1161_v22 = vsel %vm673_vm12, %v5981_v24, %v6061_v36  ;;  %1530 = vrot.lane.b32.xlu0 %v6293_v41, %s4160_s18  ;;  %v6323_v49 = vperm.slane %v5917_v28, 1  ;;  %v9755_v36 = vld [vmem:[#allocation23_spill] sm:$0xff] }
 0x18e   : > { %9750 = vst [vmem:[#allocation33_spill] sm:$0xff] %v6293_v41  ;;  %v1376_v40 = vmul.f32 %v1328_v29, %v1135_v51  ;;  %v6318_v10 = vmul.f32 %v1188_v31, %v9751_v4  ;;  %v1193_v35 = vmul.f32 %v5897_v21, %v9752_v59  ;;  %v1278_v15 = vsub.f32 %v3917_v48, %v5911_v32  ;;  %v9758_v51 = vld [vmem:[#allocation78_spill] sm:$0xff] }
 0x18f   : > { %9753 = vst [vmem:[#allocation48_spill] sm:$0xff] %v6323_v49  ;;  %v1092_v25 = vpop.permute.xlu0 %1091  ;;  %v6328_v24 = vmul.f32 %v1213_v16, %v9754_v52  ;;  %v6331_v18 = vmul.f32 %v1190_v3, %v9755_v36  ;;  %v6336_v31 = vadd.f32 %v1374_v12, %v6186_v57  ;;  %v1191_v28 = vmul.f32 %v5938_v63, %v9758_v51  ;;  %v9759_v4 = vld [vmem:[#allocation34_spill] sm:$0xff]  ;;  %v3918_v52 = vld [vmem:[%s4289_s28 + $0x78] sm:$0xff]  ;;  %v2975_v36 = vld [vmem:[#allocation7 + $0x78] sm:$0xff] }
 0x190   : > { %v1151_v29 = vsel %vm673_vm12, %v1092_v25, %v1028_v53  ;;  %v1192_v59 = vmul.f32 %v5959_v14, %v9759_v4  ;;  %v1408_v48 = vmul.f32 %v1360_v19, %v1161_v22  ;;  %v6343_v16 = vadd.f32 %v1376_v40, %v6193_v54  ;;  %v2974_v53 = vld [vmem:[#allocation7 + $0x70] sm:$0xff]  ;;  %3441 = vmatpush.msra.mxu3 %v2975_v36  ;;  %v9762_v12 = vld [vmem:[#allocation80_spill] sm:$0xff]  ;;  %v2973_v4 = vld [vmem:[#allocation7 + $0x68] sm:$0xff] }
 0x191   : > { %9756 = vst [vmem:[#allocation61_spill] sm:$0xff] %v6331_v18  ;;  %v1378_v27 = vmul.f32 %v1330_v42, %v1151_v29  ;;  %v1280_v3 = vsub.f32 %v3918_v52, %v5870_v47  ;;  %v6350_v57 = vmul.f32 %v1193_v35, %v5526_v55  ;;  %v1195_v19 = vmul.f32 %v5959_v14, %v9762_v12  ;;  %v9763_v42 = vld [vmem:[#allocation81_spill] sm:$0xff]  ;;  %v9764_v22 = vld [vmem:[#allocation94_spill] sm:$0xff]  ;;  %v9766_v51 = vld [vmem:[#allocation36_spill] sm:$0xff] }
 0x192   : > { %9757 = vst [vmem:[#allocation39_spill] sm:$0xff] %v6336_v31  ;;  %1498 = vrot.lane.b32.xlu1 %v6336_v31, %s4160_s18  ;;  %v1196_v54 = vmul.f32 %v5897_v21, %v9763_v42  ;;  %v1644_v40 = vmul.f32 %v6323_v49, %v9764_v22  ;;  %v1329_v29 = vmul.f32 %v5936_v38, %v1278_v15  ;;  %v3919_v12 = vld [vmem:[%s4289_s28 + $0x88] sm:$0xff]  ;;  %v9767_v15 = vld [vmem:[#allocation49_spill] sm:$0xff]  ;;  %v9789_v41 = vld [vmem:[#allocation50_spill] sm:$0xff] }
 0x193   : > { %9760 = vst [vmem:[#allocation21_spill] sm:$0xff] %v6343_v16  ;;  %v6360_v52 = vadd.f32 %v1378_v27, %v6196_v37  ;;  %3008 = vmatpush.msra.mxu0 %v2975_v36  ;;  %v1198_v55 = vmul.f32 %v5959_v14, %v9766_v51  ;;  %v1119_v35 = vsel %vm673_vm12, %v6081_v30, %v1092_v25  ;;  %v9769_v27 = vld [vmem:[#allocation35_spill] sm:$0xff]  ;;  %v6377_v36 = vpop.permute.xlu2 %1097  ;;  %v9771_v25 = vld [vmem:[#allocation58_spill] sm:$0xff] }
 0x194   : > { %9761 = vst [vmem:[#allocation52_spill] sm:$0xff] %v6350_v57  ;;  %v1282_v42 = vsub.f32 %v3919_v12, %v5929_v61  ;;  %v6369_v7 = vpop.permute.xlu1 %1093  ;;  %3442 = vmatpush.msra.mxu3 %v2974_v53  ;;  %v6372_v22 = vmul.f32 %v1191_v28, %v9767_v15  ;;  %v6375_v37 = vmul.f32 %v1192_v59, %v9769_v27  ;;  %v2972_v59 = vld [vmem:[#allocation7 + $0x60] sm:$0xff] }
 0x195   : > { %9765 = vst [vmem:[#allocation23_spill] sm:$0xff] %v6360_v52  ;;  %1468 = vrot.lane.b32.xlu2 %v6343_v16, %s4160_s18  ;;  %v1331_v51 = vmul.f32 %v5890_v39, %v1280_v3  ;;  %v6382_v30 = vadd.f32 %v1408_v48, %v1258_v13  ;;  %3009 = vmatpush.msra.mxu0 %v2974_v53  ;;  %v9772_v15 = vld [vmem:[#allocation104_spill] sm:$0xff]  ;;  %v9774_v16 = vld [vmem:[#allocation67_spill] sm:$0xff]  ;;  %v9776_v13 = vld [vmem:[#allocation121_spill] sm:$0xff] }
 0x196   : > { %9768 = vst [vmem:[#allocation94_spill] sm:$0xff] %v6372_v22  ;;  %v1194_v12 = vmul.f32 %v5938_v63, %v9771_v25  ;;  %v1312_v28 = vsub.f32 %v3920_v17, %v5929_v61  ;;  %1532 = vrot.lane.b32.xlu0 %v6360_v52, %s4160_s18  ;;  %3443 = vmatpush.msra.mxu3 %v2973_v4  ;;  %v9778_v25 = vld [vmem:[#allocation56_spill] sm:$0xff]  ;;  %v9779_v17 = vld [vmem:[#allocation57_spill] sm:$0xff] }
 0x197   : > { %9770 = vst [vmem:[#allocation49_spill] sm:$0xff] %v6382_v30  ;;  %v6391_v27 = vmul.f32 %v1195_v19, %v9772_v15  ;;  %v6394_v3 = vmul.f32 %v1196_v54, %v9774_v16  ;;  %v6397_v48 = vmul.f32 %v1644_v40, %v9776_v13  ;;  %v1377_v53 = vmul.f32 %v1329_v29, %v1119_v35  ;;  %v6401_v14 = vpop.permute.xlu0 %1061  ;;  %v9781_v19 = vld [vmem:[#allocation14_spill] sm:$0xff]  ;;  %v3921_v54 = vld [vmem:[%s4289_s28 + $0x108] sm:$0xff]  ;;  %v9782_v40 = vld [vmem:[#allocation12_spill] sm:$0xff] }
 0x198   : > { %v1281_v21 = vsub.f32 %v9778_v25, %v5911_v32  ;;  %3010 = vmatpush.msra.mxu0 %v2973_v4  ;;  %v6404_v52 = vmul.f32 %v1198_v55, %v9779_v17  ;;  %v1333_v31 = vmul.f32 %v5952_v6, %v1282_v42  ;;  %v1136_v16 = vsel %vm673_vm12, %v9781_v19, %v6401_v14  ;;  %v9784_v29 = vld [vmem:[#allocation72_spill] sm:$0xff]  ;;  %v2971_v55 = vld [vmem:[#allocation7 + $0x58] sm:$0xff] }
 0x199   : > { %9773 = vst [vmem:[#allocation35_spill] sm:$0xff] %v6391_v27  ;;  %v6413_v15 = vsub.f32 %v3921_v54, %v9782_v40  ;;  %v857_v35 = vsub.f32 %v3921_v54, %v9784_v29  ;;  %3444 = vmatpush.msra.mxu3 %v2972_v59  ;;  %v3685_v25 = vunpack.i.l.bf16 %v6198_v11  ;;  %v1152_v4 = vsel %vm673_vm12, %v6369_v7, %v9781_v19  ;;  %v6421_v13 = vld [vmem:[#allocation7 + $0xf8] sm:$0xff]  ;;  %v9788_v29 = vld [vmem:[#allocation24_spill] sm:$0xff]  ;;  %v9791_v19 = vld [vmem:[#allocation86_spill] sm:$0xff] }
 0x19a   : > { %9775 = vst [vmem:[#allocation104_spill] sm:$0xff] %v6394_v3  ;;  %v1379_v42 = vmul.f32 %v1331_v51, %v1136_v16  ;;  %v6423_v17 = vld [vmem:[#allocation7 + $0x178] sm:$0xff]  ;;  %3011 = vmatpush.msra.mxu0 %v2972_v59  ;;  %v1363_v54 = vmul.f32 %v5952_v6, %v1312_v28  ;;  %1548 = vrot.lane.b32.xlu1 %v6146_v44, %s4160_s18  ;;  %v6437_v16 = vld [vmem:[#allocation7 + $0x50] sm:$0xff]  ;;  %v3686_v44 = vunpack.i.h.bf16 %v6198_v11 }
 0x19b   : > { %9777 = vst [vmem:[#allocation67_spill] sm:$0xff] %v6397_v48  ;;  %v9786_v48 = vld [vmem:[#allocation69_spill] sm:$0xff]  ;;  %v6433_v33 = vsub.f32 %v9789_v41, %v9788_v29  ;;  %v858_v51 = vsub.f32 %v9789_v41, %v9791_v19  ;;  %3445 = vmatpush.msra.mxu3 %v2971_v55  ;;  %v9792_v59 = vld [vmem:[#allocation71_spill] sm:$0xff]  ;;  %v6446_v28 = vadd.f32 %v1377_v53, %v6203_v45  ;;  %v6453_v41 = vld [vmem:[#allocation7 + $0x170] sm:$0xff]  ;;  %v6496_v3 = vpop.permute.xlu2 %1035 }
 0x19c   : > { %9780 = vst [vmem:[#allocation121_spill] sm:$0xff] %v6404_v52  ;;  %v6426_v40 = vmul.f32 %v1194_v12, %v9786_v48  ;;  %v3596_v12 = vunpack.i.h.bf16 %v9792_v59  ;;  %v6443_v48 = vmul.f32 %v5936_v38, %v1281_v21  ;;  %v6449_v20 = vadd.f32 %v1379_v42, %v6208_v9  ;;  %3073 = vmatpush.msra.mxu1 %v6421_v13  ;;  %v9796_v19 = vld [vmem:[#allocation115_spill] sm:$0xff]  ;;  %v6458_v59 = vpop.permute.xlu1 %1031  ;;  %v9797_v21 = vld [vmem:[#allocation73_spill] sm:$0xff]  ;;  %v9798_v45 = vld [vmem:[#allocation76_spill] sm:$0xff] }
 0x19d   : > { %9783 = vst [vmem:[#allocation56_spill] sm:$0xff] %v6413_v15  ;;  %3138 = vmatpush.msra.mxu2 %v6423_v17  ;;  %v1381_v29 = vmul.f32 %v1333_v31, %v1152_v4  ;;  %v6456_v58 = vperm.slane %v9796_v19, 1  ;;  %v758_v43 = vmul.f32 %v9797_v21, %v6413_v15  ;;  %v908_v53 = vmul.f32 %v9798_v45, %v857_v35  ;;  %v6464_v9 = vld [vmem:[#allocation7 + $0x48] sm:$0xff]  ;;  %v9799_v4 = vld [vmem:[#allocation26_spill] sm:$0xff]  ;;  %v9803_v15 = vld [vmem:[#allocation95_spill] sm:$0xff] }
 0x19e   : > { %9785 = vst [vmem:[#allocation57_spill] sm:$0xff] %v6423_v17  ;;  %3446 = vmatpush.msra.mxu3 %v6437_v16  ;;  %v6466_v42 = vld [vmem:[#allocation7 + $0xe8] sm:$0xff]  ;;  %3012 = vmatpush.msra.mxu0 %v2971_v55  ;;  %v701_v31 = vsel %vm673_vm12, %v3596_v12, %v3685_v25  ;;  %v1283_v19 = vsub.f32 %v9799_v4, %v5870_v47  ;;  %v6492_v17 = vld [vmem:[#allocation7 + $0xe0] sm:$0xff] }
 0x19f   : > { %9787 = vst [vmem:[#allocation14_spill] sm:$0xff] %v6426_v40  ;;  %1500 = vrot.lane.b32.xlu2 %v6446_v28, %s4160_s18  ;;  %v9800_v35 = vld [vmem:[#allocation85_spill] sm:$0xff]  ;;  %3074 = vmatpush.msra.mxu1 %v6439_v60  ;;  %v1162_v11 = vsel %vm673_vm12, %v6249_v2, %v6014_v46  ;;  %v909_v4 = vmul.f32 %v9803_v15, %v858_v51  ;;  %v6498_v46 = vpop.permute.xlu0 %1095  ;;  %v6507_v51 = vld [vmem:[#allocation7 + $0x160] sm:$0xff]  ;;  %v9811_v40 = vld [vmem:[#allocation19_spill] sm:$0xff] }
 0x1a0   : > { %9790 = vst [vmem:[#allocation12_spill] sm:$0xff] %v6433_v33  ;;  %v1284_v21 = vsub.f32 %v9800_v35, %v5911_v32  ;;  %v6478_v45 = vld [vmem:[#allocation7 + $0x168] sm:$0xff]  ;;  %1470 = vrot.lane.b32.xlu0 %v6449_v20, %s4160_s18  ;;  %3139 = vmatpush.msra.mxu2 %v6453_v41  ;;  %v6490_v35 = vld [vmem:[#allocation7 + $0x40] sm:$0xff]  ;;  %v685_v52 = vsel %vm673_vm12, %v3685_v25, %v3686_v44 }
 0x1a1   : > { %9793 = vst [vmem:[#allocation72_spill] sm:$0xff] %v6446_v28  ;;  %v9802_v55 = vld [vmem:[#allocation89_spill] sm:$0xff]  ;;  %3447 = vmatpush.msra.mxu3 %v6464_v9  ;;  %3075 = vmatpush.msra.mxu1 %v6466_v42  ;;  %v806_v57 = vmul.f32 %v9811_v40, %v758_v43  ;;  %v956_v22 = vmul.f32 %v908_v53, %v701_v31  ;;  %v9814_v40 = vld [vmem:[#allocation55_spill] sm:$0xff]  ;;  %v6537_v31 = vld [vmem:[#allocation7 + $0x30] sm:$0xff] }
 0x1a2   : > { %9794 = vst [vmem:[#allocation69_spill] sm:$0xff] %v6449_v20  ;;  %v759_v28 = vmul.f32 %v9802_v55, %v6433_v33  ;;  %v3922_v2 = vld [vmem:[%s4289_s28 + $0x118] sm:$0xff]  ;;  %v9804_v20 = vld [vmem:[#allocation31_spill] sm:$0xff]  ;;  %v9806_v55 = vld [vmem:[#allocation100_spill] sm:$0xff]  ;;  %3140 = vmatpush.msra.mxu2 %v6478_v45  ;;  %v717_v43 = vsel %vm673_vm12, %v3686_v44, %v3596_v12  ;;  %v957_v53 = vmul.f32 %v909_v4, %v685_v52 }
 0x1a3   : > { %9795 = vst [vmem:[#allocation24_spill] sm:$0xff] %v6453_v41  ;;  %v6502_v27 = vsub.f32 %v3922_v2, %v9804_v20  ;;  %v859_v15 = vsub.f32 %v3922_v2, %v9806_v55  ;;  %v9808_v33 = vld [vmem:[#allocation103_spill] sm:$0xff]  ;;  %v6514_v41 = vadd.f32 %v1381_v29, %v6245_v50  ;;  %v1411_v20 = vmul.f32 %v1363_v54, %v1162_v11  ;;  %v3923_v55 = vld [vmem:[%s4289_s28 + $0xa0] sm:$0xff]  ;;  %v9815_v11 = vld [vmem:[#allocation101_spill] sm:$0xff] }
 0x1a4   : > { %9801 = vst [vmem:[#allocation50_spill] sm:$0xff] %v6478_v45  ;;  %v6511_v25 = vmul.f32 %v6456_v58, %v9808_v33  ;;  %v6519_v2 = vmul.f32 %v5890_v39, %v1283_v19  ;;  %v1285_v18 = vsub.f32 %v3923_v55, %v5929_v61  ;;  %3448 = vmatpush.msra.mxu3 %v6490_v35  ;;  %v6525_v33 = vld [vmem:[#allocation7 + $0x38] sm:$0xff]  ;;  %v6547_v44 = vld [vmem:[#allocation7 + $0xd0] sm:$0xff]  ;;  %v9818_v12 = vld [vmem:[#allocation64_spill] sm:$0xff] }
 0x1a5   : > { %9805 = vst [vmem:[#allocation86_spill] sm:$0xff] %v6502_v27  ;;  %3076 = vmatpush.msra.mxu1 %v6492_v17  ;;  %v6527_v50 = vld [vmem:[#allocation7 + $0xd8] sm:$0xff]  ;;  %1534 = vrot.lane.b32.xlu1 %v6514_v41, %s4160_s18  ;;  %v807_v54 = vmul.f32 %v9814_v40, %v759_v28  ;;  %v6540_v19 = vmul.f32 %v5936_v38, %v1284_v21  ;;  %v6550_v52 = vperm.slane %v9818_v12, 1  ;;  %v6556_v40 = vpop.permute.xlu1 %1065 }
 0x1a6   : > { %9807 = vst [vmem:[#allocation71_spill] sm:$0xff] %v6507_v51  ;;  %v6529_v29 = vld [vmem:[#allocation7 + $0x158] sm:$0xff]  ;;  %3141 = vmatpush.msra.mxu2 %v6507_v51  ;;  %v760_v55 = vmul.f32 %v9815_v11, %v6502_v27  ;;  %3449 = vmatpush.msra.mxu3 %v6525_v33  ;;  %v6552_v28 = vadd.f32 %v956_v22, %v806_v57  ;;  %v9823_v22 = vld [vmem:[#allocation65_spill] sm:$0xff] }
 0x1a7   : > { %9809 = vst [vmem:[#allocation115_spill] sm:$0xff] %v6511_v25  ;;  %v9816_v25 = vld [vmem:[#allocation102_spill] sm:$0xff]  ;;  %3077 = vmatpush.msra.mxu1 %v6527_v50  ;;  %v9820_v4 = vld [vmem:[#allocation75_spill] sm:$0xff]  ;;  %3013 = vmatpush.msra.mxu0 %v6437_v16  ;;  %v1120_v57 = vsel %vm673_vm12, %v6401_v14, %v6369_v7  ;;  %v1286_v12 = vsub.f32 %v9823_v22, %v5870_v47  ;;  %v6575_v16 = vld [vmem:[#allocation7 + $0xc8] sm:$0xff] }
 0x1a8   : > { %9810 = vst [vmem:[#allocation73_spill] sm:$0xff] %v6514_v41  ;;  %v910_v45 = vmul.f32 %v9816_v25, %v859_v15  ;;  %v1287_v21 = vsub.f32 %v9820_v4, %v5911_v32  ;;  %3142 = vmatpush.msra.mxu2 %v6529_v29  ;;  %v6560_v15 = vld [vmem:[#allocation7 + $0x150] sm:$0xff]  ;;  %v9822_v25 = vld [vmem:[#allocation63_spill] sm:$0xff]  ;;  %1550 = vrot.lane.b32.xlu2 %v6220_v0, %s4160_s18  ;;  %v6573_v4 = vld [vmem:[#allocation7 + $0x28] sm:$0xff] }
 0x1a9   : > { %9812 = vst [vmem:[#allocation76_spill] sm:$0xff] %v6527_v50  ;;  %v1197_v11 = vmul.f32 %v5938_v63, %v9822_v25  ;;  %3450 = vmatpush.msra.mxu3 %v6537_v31  ;;  %v6578_v41 = vadd.f32 %v1411_v20, %v6328_v24  ;;  %v1336_v25 = vmul.f32 %v5952_v6, %v1285_v18  ;;  %v3924_v14 = vld [vmem:[%s4289_s28 + $0xb8] sm:$0xff]  ;;  %v6590_v63 = vpop.permute.xlu0 %1033  ;;  %v9828_v27 = vld [vmem:[#allocation27_spill] sm:$0xff]  ;;  %v6595_v18 = vld [vmem:[#allocation7 + $0x20] sm:$0xff] }
 0x1aa   : > { %9813 = vst [vmem:[#allocation26_spill] sm:$0xff] %v6529_v29  ;;  %1041 = vrot.lane.b32.xlu0 %v6552_v28, %s4160_s18  ;;  %v1288_v7 = vsub.f32 %v3924_v14, %v5929_v61  ;;  %v6585_v0 = vadd.f32 %v957_v53, %v807_v54  ;;  %3078 = vmatpush.msra.mxu1 %v6547_v44  ;;  %v6588_v22 = vld [vmem:[#allocation7 + $0x148] sm:$0xff]  ;;  %v9829_v20 = vld [vmem:[#allocation90_spill] sm:$0xff] }
 0x1ab   : > { %9817 = vst [vmem:[#allocation85_spill] sm:$0xff] %v6547_v44  ;;  %v808_v29 = vmul.f32 %v9828_v27, %v760_v55  ;;  %v958_v24 = vmul.f32 %v910_v45, %v717_v43  ;;  %3143 = vmatpush.msra.mxu2 %v6560_v15  ;;  %3014 = vmatpush.msra.mxu0 %v6464_v9  ;;  %v6605_v27 = vld [vmem:[#allocation7 + $0xc0] sm:$0xff]  ;;  %v9832_v9 = vld [vmem:[#allocation70_spill] sm:$0xff]  ;;  %v6616_v55 = vpop.permute.xlu2 %1069  ;;  %v3931_v44 = vld [vmem:[%s4289_s28 + $0xf8] sm:$0xff] }
 0x1ac   : > { %9819 = vst [vmem:[#allocation89_spill] sm:$0xff] %v6552_v28  ;;  %v1643_v54 = vmul.f32 %v6550_v52, %v9829_v20  ;;  %v1380_v53 = vmul.f32 %v6443_v48, %v1120_v57  ;;  %v6601_v14 = vmul.f32 %v5936_v38, %v1287_v21  ;;  %3451 = vmatpush.msra.mxu3 %v6573_v4  ;;  %v6607_v45 = vld [vmem:[#allocation7 + $0x140] sm:$0xff]  ;;  %v6625_v28 = vld [vmem:[#allocation7 + $0x18] sm:$0xff] }
 0x1ad   : > { %9821 = vst [vmem:[#allocation95_spill] sm:$0xff] %v6560_v15  ;;  %3079 = vmatpush.msra.mxu1 %v6575_v16  ;;  %v6610_v43 = vmul.f32 %v1197_v11, %v9832_v9  ;;  %v1137_v48 = vsel %vm673_vm12, %v6458_v59, %v6283_v34  ;;  %v6619_v21 = vmul.f32 %v5890_v39, %v1286_v12  ;;  %v3925_v57 = vld [vmem:[%s4289_s28 + $0xd0] sm:$0xff]  ;;  %v3926_v11 = vld [vmem:[%s4289_s28 + $0xc0] sm:$0xff]  ;;  %v9834_v15 = vld [vmem:[#allocation77_spill] sm:$0xff] }
 0x1ae   : > { %9824 = vst [vmem:[#allocation31_spill] sm:$0xff] %v6575_v16  ;;  %v1291_v20 = vsub.f32 %v3925_v57, %v5929_v61  ;;  %3144 = vmatpush.msra.mxu2 %v6588_v22  ;;  %3015 = vmatpush.msra.mxu0 %v6490_v35  ;;  %v1289_v9 = vsub.f32 %v3926_v11, %v5870_v47  ;;  %v6634_v12 = vld [vmem:[#allocation7 + $0xb8] sm:$0xff]  ;;  %v9836_v57 = vld [vmem:[#allocation74_spill] sm:$0xff] }
 0x1af   : > { %9825 = vst [vmem:[#allocation100_spill] sm:$0xff] %v6578_v41  ;;  %1073 = vrot.lane.b32.xlu1 %v6585_v0, %s4160_s18  ;;  %v1290_v51 = vsub.f32 %v9834_v15, %v5911_v32  ;;  %3452 = vmatpush.msra.mxu3 %v6595_v18  ;;  %v6639_v35 = vmul.f32 %v5952_v6, %v1288_v7  ;;  %v6645_v11 = vld [vmem:[#allocation7 + $0x138] sm:$0xff] }
 0x1b0   : > { %9826 = vst [vmem:[#allocation103_spill] sm:$0xff] %v6585_v0  ;;  %3080 = vmatpush.msra.mxu1 %v6605_v27  ;;  %3145 = vmatpush.msra.mxu2 %v6607_v45  ;;  %v9839_v0 = vld [vmem:[#allocation120_spill] sm:$0xff]  ;;  %v1382_v16 = vmul.f32 %v6519_v2, %v1137_v48  ;;  %v6656_v7 = vadd.f32 %v1380_v53, %v6253_v8  ;;  %v6670_v8 = vld [vmem:[#allocation7 + $0xb0] sm:$0xff] }
 0x1b1   : > { %9827 = vst [vmem:[#allocation19_spill] sm:$0xff] %v6588_v22  ;;  %v1607_v22 = vmul.f32 %v6550_v52, %v9836_v57  ;;  %v6648_v15 = vmul.f32 %v1643_v54, %v9839_v0  ;;  %v1153_v57 = vsel %vm673_vm12, %v6498_v46, %v6458_v59  ;;  %3016 = vmatpush.msra.mxu0 %v6525_v33  ;;  %v6672_v59 = vld [vmem:[#allocation7 + $0x130] sm:$0xff]  ;;  %v9844_v2 = vld [vmem:[#allocation88_spill] sm:$0xff]  ;;  %v9845_v54 = vld [vmem:[#allocation105_spill] sm:$0xff] }
 0x1b2   : > { %9830 = vst [vmem:[#allocation55_spill] sm:$0xff] %v6605_v27  ;;  %3453 = vmatpush.msra.mxu3 %v6625_v28  ;;  %v6667_v0 = vmul.f32 %v5952_v6, %v1291_v20  ;;  %3081 = vmatpush.msra.mxu1 %v6634_v12  ;;  %v1608_v33 = vmul.f32 %v6323_v49, %v9844_v2  ;;  %v6692_v49 = vpop.permute.xlu0 %1067 }
 0x1b3   : > { %9831 = vst [vmem:[#allocation101_spill] sm:$0xff] %v6607_v45  ;;  %v1609_v53 = vmul.f32 %v6456_v58, %v9845_v54  ;;  %1502 = vrot.lane.b32.xlu0 %v6656_v7, %s4160_s18  ;;  %v6681_v48 = vmul.f32 %v5890_v39, %v1289_v9  ;;  %v6684_v20 = vmul.f32 %v5936_v38, %v1290_v51  ;;  %v9846_v45 = vld [vmem:[#allocation79_spill] sm:$0xff]  ;;  %v3927_v54 = vld [vmem:[%s4289_s28 + $0xd8] sm:$0xff] }
 0x1b4   : > { %9833 = vst [vmem:[#allocation102_spill] sm:$0xff] %v6610_v43  ;;  %v6641_v43 = vadd.f32 %v958_v24, %v808_v29  ;;  %v6658_v29 = vpop.permute.xlu1 %1099  ;;  %v6662_v24 = vld [vmem:[#allocation7 + $0x10] sm:$0xff]  ;;  %3146 = vmatpush.msra.mxu2 %v6645_v11  ;;  %v1384_v2 = vmul.f32 %v1336_v25, %v1153_v57  ;;  %3017 = vmatpush.msra.mxu0 %v6537_v31  ;;  %v6700_v51 = vld [vmem:[#allocation7 + $0xa8] sm:$0xff] }
 0x1b5   : > { %9835 = vst [vmem:[#allocation64_spill] sm:$0xff] %v6634_v12  ;;  %v3928_v12 = vld [vmem:[%s4289_s28 + $0xe0] sm:$0xff]  ;;  %3454 = vmatpush.msra.mxu3 %v6662_v24  ;;  %v6707_v25 = vadd.f32 %v1382_v16, %v6279_v62  ;;  %3082 = vmatpush.msra.mxu1 %v6670_v8  ;;  %v6713_v31 = vld [vmem:[#allocation7 + $0x128] sm:$0xff]  ;;  %v6723_v62 = vld [vmem:[#allocation7 + $0xa0] sm:$0xff]  ;;  %v1296_v50 = vsub.f32 %v3931_v44, %v5911_v32 }
 0x1b6   : > { %9837 = vst [vmem:[#allocation75_spill] sm:$0xff] %v6641_v43  ;;  %1105 = vrot.lane.b32.xlu2 %v6641_v43, %s4160_s18  ;;  %v6687_v43 = vld [vmem:[#allocation7 + $0x8] sm:$0xff]  ;;  %v1293_v9 = vsub.f32 %v3928_v12, %v5911_v32  ;;  %3147 = vmatpush.msra.mxu2 %v6672_v59  ;;  %v1122_v12 = vsel %vm673_vm12, %v6556_v40, %v6377_v36  ;;  %v6863_v32 = vld [vmem:[%s4289_s28 + $0x8] sm:$0xff] }
 0x1b7   : > { %9838 = vst [vmem:[#allocation65_spill] sm:$0xff] %v6645_v11  ;;  %3018 = vmatpush.msra.mxu0 %v6573_v4  ;;  %3455 = vmatpush.msra.mxu3 %v6687_v43  ;;  %v1386_v44 = vmul.f32 %v6601_v14, %v1122_v12  ;;  %v6798_v12 = vld [vmem:[#allocation7 + $0x90] sm:$0xff] }
 0x1b8   : > { %9840 = vst [vmem:[#allocation27_spill] sm:$0xff] %v6648_v15  ;;  %v6690_v15 = vmul.f32 %v1607_v22, %v9846_v45  ;;  %v1121_v22 = vsel %vm673_vm12, %v6283_v34, %v6498_v46  ;;  %v3929_v45 = vld [vmem:[%s4289_s28 + $0xe8] sm:$0xff]  ;;  %v6721_v34 = vld [vmem:[#allocation7] sm:$0xff]  ;;  %v9850_v46 = vld [vmem:[#allocation62_spill] sm:$0xff]  ;;  %1472 = vrot.lane.b32.xlu1 %v6707_v25, %s4160_s18  ;;  %3083 = vmatpush.msra.mxu1 %v6700_v51 }
 0x1b9   : > { %9841 = vst [vmem:[#allocation90_spill] sm:$0xff] %v6656_v7  ;;  %v1292_v7 = vsub.f32 %v3927_v54, %v5870_v47  ;;  %v1294_v57 = vsub.f32 %v3929_v45, %v5929_v61  ;;  %v3423_v16 = vmul.f32 -1.442695, %v9850_v46  ;;  %v9851_v54 = vld [vmem:[#allocation122_spill] sm:$0xff]  ;;  %v6741_v46 = vld [vmem:[#allocation7 + $0x120] sm:$0xff]  ;;  %3148 = vmatpush.msra.mxu2 %v6713_v31  ;;  %3019 = vmatpush.msra.mxu0 %v6595_v18  ;;  %v6767_v18 = vld [vmem:[#allocation7 + $0x98] sm:$0xff] }
 0x1ba   : > { %9842 = vst [vmem:[#allocation70_spill] sm:$0xff] %v6670_v8  ;;  %v6727_v45 = vmul.f32 %v1608_v33, %v9851_v54  ;;  %v9853_v8 = vld [vmem:[#allocation22_spill] sm:$0xff]  ;;  %v1383_v33 = vmul.f32 %v6540_v19, %v1121_v22  ;;  %v1138_v19 = vsel %vm673_vm12, %v6590_v63, %v6556_v40  ;;  %3456 = vmatpush.msra.mxu3 %v6721_v34 }
 0x1bb   : > { %9843 = vst [vmem:[#allocation77_spill] sm:$0xff] %v6672_v59  ;;  %v9852_v59 = vld [vmem:[#allocation123_spill] sm:$0xff]  ;;  %v1295_v27 = vsub.f32 %v9853_v8, %v5870_v47  ;;  %v6750_v54 = vmul.f32 %v5890_v39, %v1292_v7  ;;  %3687 = vpow2.f32 %v3423_v16  ;;  %3084 = vmatpush.msra.mxu1 %v6723_v62  ;;  %v6774_v40 = vmul.f32 %v5936_v38, %v1293_v9  ;;  %v6800_v16 = vld [vmem:[#allocation7 + $0x110] sm:$0xff] }
 0x1bc   : > { %9847 = vst [vmem:[#allocation74_spill] sm:$0xff] %v6690_v15  ;;  %v6730_v11 = vmul.f32 %v1609_v53, %v9852_v59  ;;  %v3930_v15 = vld [vmem:[%s4289_s28 + $0x100] sm:$0xff]  ;;  %v6744_v59 = vpop.permute.xlu2 %1039  ;;  %v6747_v53 = vadd.f32 %v1384_v2, %v6276_v1  ;;  %v1154_v1 = vsel %vm673_vm12, %v6377_v36, %v6590_v63  ;;  %v6769_v7 = vld [vmem:[#allocation7 + $0x118] sm:$0xff]  ;;  %v6777_v14 = vmul.f32 %v5952_v6, %v1294_v57  ;;  %v3932_v63 = vld [vmem:[#allocation5 + $0x18] sm:$0xff] }
 0x1bd   : > { %9848 = vst [vmem:[#allocation120_spill] sm:$0xff] %v6707_v25  ;;  %v1297_v4 = vsub.f32 %v3930_v15, %v5929_v61  ;;  %v6763_v15 = vpop.permute.xlu1 %1037  ;;  %v6779_v36 = vperm.slane %v3932_v63, 2  ;;  %3149 = vmatpush.msra.mxu2 %v6741_v46  ;;  %v9858_v8 = vld [vmem:[#allocation99_spill] sm:$0xff]  ;;  %1552 = vrot.lane.b32.xlu0 %v6382_v30, %s4160_s18  ;;  %v6792_v9 = vmul.f32 %v5890_v39, %v1295_v27  ;;  %v6804_v30 = vpop.permute.xlu0 %1101  ;;  %v6809_v27 = vld [vmem:[%s4289_s28] sm:$0xff] }
 0x1be   : > { %9849 = vst [vmem:[#allocation88_spill] sm:$0xff] %v6713_v31  ;;  %1536 = vrot.lane.b32.xlu2 %v6747_v53, %s4160_s18  ;;  %v6784_v2 = vmul.f32 %v6550_v52, %v9858_v8  ;;  %v6795_v57 = vmul.f32 %v5936_v38, %v1296_v50  ;;  %3020 = vmatpush.msra.mxu0 %v6625_v28  ;;  %v3387_v50 = vmul.f32 -1.442695, %v6809_v27  ;;  %v9860_v28 = vld [vmem:[#allocation109_spill] sm:$0xff]  ;;  %v9865_v38 = vld [vmem:[#allocation107_spill] sm:$0xff] }
 0x1bf   : > { %9854 = vst [vmem:[#allocation105_spill] sm:$0xff] %v6741_v46  ;;  %v6789_v22 = vmul.f32 %v5952_v6, %v1297_v4  ;;  %v1385_v8 = vmul.f32 %v6619_v21, %v1138_v19  ;;  %v1387_v25 = vmul.f32 %v6639_v35, %v1154_v1  ;;  %3085 = vmatpush.msra.mxu1 %v6767_v18  ;;  %v6822_v35 = vperm.slane %v3932_v63, 3  ;;  %v6825_v19 = vld [vmem:[#allocation7 + $0x88] sm:$0xff] }
 0x1c0   : > { %9855 = vst [vmem:[#allocation79_spill] sm:$0xff] %v6747_v53  ;;  %3150 = vmatpush.msra.mxu2 %v6769_v7  ;;  %v6814_v4 = vmul.f32 %v6456_v58, %v9860_v28  ;;  %v6817_v53 = vadd.f32 %v1383_v33, %v6299_v26  ;;  %v6820_v21 = vadd.f32 %v1386_v44, %v6318_v10  ;;  %v6827_v1 = vld [vmem:[#allocation7 + $0x108] sm:$0xff]  ;;  %v6843_v33 = vld [vmem:[%s4289_s28 + $0x120] sm:$0xff]  ;;  %3689 = vpow2.f32 %v3387_v50  ;;  %v6860_v28 = vld [vmem:[#allocation7 + $0x80] sm:$0xff] }
 0x1c1   : > { %9856 = vst [vmem:[#allocation62_spill] sm:$0xff] %v6769_v7  ;;  %3021 = vmatpush.msra.mxu0 %v6662_v24  ;;  %v6831_v39 = vmul.f32 %v6550_v52, %v9865_v38  ;;  %3457 = vmatpush.msrb.mxu3 %v6421_v13  ;;  %v3688_v26 = vpop.eup %3687  ;;  %v1155_v10 = vsel %vm673_vm12, %v6658_v29, %v6496_v3  ;;  %v3388_v50 = vmul.f32 -1.442695, %v6863_v32 }
 0x1c2   : > { %9857 = vst [vmem:[#allocation122_spill] sm:$0xff] %v6779_v36  ;;  %v1123_v24 = vsel %vm673_vm12, %v6692_v49, %v6658_v29  ;;  %v1742_v38 = vsub.f32 %v6843_v33, %v6779_v36  ;;  %3086 = vmatpush.msra.mxu1 %v6798_v12  ;;  %3151 = vmatpush.msra.mxu2 %v6800_v16  ;;  %v6855_v44 = vadd.f32 1.0, %v3688_v26  ;;  %v3935_v29 = vld [vmem:[#allocation5 + $0x20] sm:$0xff]  ;;  %v3937_v26 = vld [vmem:[#allocation5 + $0x28] sm:$0xff] }
 0x1c3   : > { %9859 = vst [vmem:[#allocation123_spill] sm:$0xff] %v6800_v16  ;;  %v1139_v13 = vsel %vm673_vm12, %v6496_v3, %v6692_v49  ;;  %1504 = vrot.lane.b32.xlu1 %v6817_v53, %s4160_s18  ;;  %v6857_v63 = vperm.slane %v3935_v29, 2  ;;  %3022 = vmatpush.msra.mxu0 %v6687_v43  ;;  %v6869_v49 = vadd.f32 %v1385_v8, %v6296_v56  ;;  %v6876_v6 = vperm.slane %v3937_v26, 3  ;;  %v6880_v43 = vld [vmem:[#allocation7 + $0x100] sm:$0xff] }
 0x1c4   : > { %9861 = vst [vmem:[#allocation22_spill] sm:$0xff] %v6817_v53  ;;  %v6866_v47 = vpop.permute.xlu2 %1516  ;;  %v6872_v3 = vadd.f32 %v1387_v25, %v6309_v5  ;;  %v6874_v53 = vperm.slane %v3937_v26, 2  ;;  %3087 = vmatpush.msra.mxu1 %v6825_v19  ;;  %3152 = vmatpush.msra.mxu2 %v6827_v1  ;;  %v1390_v61 = vmul.f32 %v6667_v0, %v1155_v10  ;;  %3691 = vrcp.f32 %v6855_v44 }
 0x1c5   : > { %9862 = vst [vmem:[#allocation99_spill] sm:$0xff] %v6820_v21  ;;  %v1140_v56 = vsel %vm673_vm12, %v6763_v15, %v6616_v55  ;;  %v1124_v5 = vsel %vm673_vm12, %v6616_v55, %v6804_v30  ;;  %3023 = vmatpush.msra.mxu0 %v6721_v34  ;;  %3458 = vmatpush.msrb.mxu3 %v6439_v60  ;;  %v1104_v8 = vpop.permute.xlu1 %1103  ;;  %3693 = vpow2.f32 %v3388_v50  ;;  %v6906_v55 = vld [vmem:[%s4289_s28 + $0x10] sm:$0xff]  ;;  %vm2638_vm1 = vweird.f32 %v6855_v44 }
 0x1c6   : > { %9863 = vst [vmem:[#allocation109_spill] sm:$0xff] %v6822_v35  ;;  %v1388_v25 = vmul.f32 %v6681_v48, %v1139_v13  ;;  %v1389_v0 = vmul.f32 %v6684_v20, %v1123_v24  ;;  %1474 = vrot.lane.b32.xlu2 %v6869_v49, %s4160_s18  ;;  %v1706_v10 = vsub.f32 %v6809_v27, %v6779_v36  ;;  %v6910_v20 = vperm.slane %v3935_v29, 3  ;;  %v3690_v24 = vpop.eup %3689  ;;  %v9872_v29 = vld [vmem:[#allocation124_spill] sm:$0xff] }
 0x1c7   : > { %9864 = vst [vmem:[#allocation129_spill] sm:$0xff] %v6827_v1  ;;  %3088 = vmatpush.msra.mxu1 %v6860_v28  ;;  %1538 = vrot.lane.b32.xlu0 %v6872_v3, %s4160_s18  ;;  %v1707_v60 = vsub.f32 %v6863_v32, %v6857_v63  ;;  %v1708_v48 = vsub.f32 %v6906_v55, %v6874_v53  ;;  %v3389_v34 = vmul.f32 -1.442695, %v6906_v55  ;;  %v6927_v16 = vadd.f32 1.0, %v3690_v24 }
 0x1c8   : > { %9866 = vst [vmem:[#allocation107_spill] sm:$0xff] %v6857_v63  ;;  %3153 = vmatpush.msra.mxu2 %v6880_v43  ;;  %v1391_v13 = vmul.f32 %v6750_v54, %v1140_v56  ;;  %v1156_v50 = vsel %vm673_vm12, %v6804_v30, %v6763_v15  ;;  %v1392_v26 = vmul.f32 %v6774_v40, %v1124_v5  ;;  %v9874_v54 = vld [vmem:[#allocation61_spill] sm:$0xff]  ;;  %v9876_v30 = vld [vmem:[#allocation94_spill] sm:$0xff] }
 0x1c9   : > { %9867 = vst [vmem:[#allocation130_spill] sm:$0xff] %v6866_v47  ;;  %3459 = vmatpush.msrb.mxu3 %v6466_v42  ;;  %v6925_v1 = vadd.f32 %v1390_v61, %v6375_v37  ;;  %3695 = vpow2.f32 %v3389_v34  ;;  %v6930_v56 = vadd.f32 %v1388_v25, %v9874_v54  ;;  %v6933_v15 = vadd.f32 %v1389_v0, %v9876_v30 }
 0x1ca   : > { %9868 = vst [vmem:[#allocation131_spill] sm:$0xff] %v6869_v49  ;;  %v1072_v49 = vpop.permute.xlu0 %1071  ;;  %v6936_v40 = vmul.f32 %v6822_v35, %v1706_v10  ;;  %v6941_v5 = vpop.eup %3691  ;;  %v1393_v61 = vmul.f32 %v6777_v14, %v1156_v50  ;;  %v6947_v37 = vmul.f32 %v6910_v20, %v1707_v60  ;;  %v6950_v25 = vmul.f32 %v6876_v6, %v1708_v48  ;;  %v9878_v10 = vld [vmem:[#allocation52_spill] sm:$0xff]  ;;  %v9880_v14 = vld [vmem:[#allocation14_spill] sm:$0xff]  ;;  %v3940_v50 = vld [vmem:[#allocation5 + $0x8] sm:$0xff] }
 0x1cb   : > { %9869 = vst [vmem:[#allocation132_spill] sm:$0xff] %v6872_v3  ;;  %v1793_v3 = vmul.f32 %v6822_v35, %v1742_v38  ;;  %v3939_v38 = vld [vmem:[#allocation5] sm:$0xff]  ;;  %3460 = vmatpush.msrb.mxu3 %v6492_v17  ;;  %1554 = vrot.lane.b32.xlu1 %v6578_v41, %s4160_s18  ;;  %3697 = vrcp.f32 %v6927_v16  ;;  %v3694_v0 = vpop.eup %3693  ;;  %v6954_v34 = vadd.f32 %v1391_v13, %v9878_v10  ;;  %v6961_v54 = vperm.slane %v3940_v50, 2  ;;  %v9882_v60 = vld [vmem:[#allocation76_spill] sm:$0xff] }
 0x1cc   : > { %9870 = vst [vmem:[#allocation133_spill] sm:$0xff] %v6880_v43  ;;  %v6938_v42 = vperm.slane %v3939_v38, 2  ;;  %v2634_v17 = vmul.f32 %v6941_v5, %v6855_v44  ;;  %v6959_v24 = vadd.f32 %v1392_v26, %v9880_v14  ;;  %v1141_v48 = vsel %vm673_vm12, %v6744_v59, %v1072_v49  ;;  %v6971_v10 = vpop.permute.xlu2 %1462  ;;  %v6978_v14 = vld [vmem:[%s4289_s28 + $0x28] sm:$0xff] }
 0x1cd   : > { %9871 = vst [vmem:[#allocation134_spill] sm:$0xff] %v6910_v20  ;;  %3461 = vmatpush.msrb.mxu3 %v9882_v60  ;;  %v2642_v30 = vand.u32 2147483647, %v6855_v44  ;;  %v2644_v13 = vand.u32 2147483648, %v6855_v44  ;;  %v6969_v38 = vadd.f32 1.0, %v3694_v0  ;;  %vm2639_vm2 = vweird.f32 %v6941_v5  ;;  %v9883_v60 = vld [vmem:[#allocation85_spill] sm:$0xff]  ;;  %v6994_v46 = vpop.permute.xlu1 %1484 }
 0x1ce   : > { %9873 = vst [vmem:[#allocation124_spill] sm:$0xff] %v6925_v1  ;;  %1506 = vrot.lane.b32.xlu2 %v6820_v21, %s4160_s18  ;;  %v2635_v26 = vsub.f32 1.0, %v2634_v17  ;;  %v3392_v50 = vmul.f32 -1.442695, %v6978_v14  ;;  %v1157_v0 = vsel %vm673_vm12, %v1104_v8, %v6744_v59  ;;  %v1125_v41 = vsel %vm673_vm12, %v1072_v49, %v1104_v8  ;;  %v9884_v17 = vld [vmem:[#allocation35_spill] sm:$0xff]  ;;  %vm7012_vm3 = vmor %vm2638_vm1, %vm2639_vm2 }
 0x1cf   : > { %9875 = vst [vmem:[#allocation61_spill] sm:$0xff] %v6930_v56  ;;  %3462 = vmatpush.msrb.mxu3 %v9883_v60  ;;  %v3696_v43 = vpop.eup %3695  ;;  %1476 = vrot.lane.b32.xlu0 %v6930_v56, %s4160_s18  ;;  %v6990_v21 = vadd.f32 %v1393_v61, %v9884_v17  ;;  %3699 = vrcp.f32 %v6969_v38  ;;  %v1394_v7 = vmul.f32 %v6792_v9, %v1141_v48  ;;  %v9887_v59 = vld [vmem:[#allocation31_spill] sm:$0xff]  ;;  %vm7016_vm4 = vcmp.eq.f32.partialorder %v2642_v30, 8.507059e+37 }
 0x1d0   : > { %9877 = vst [vmem:[#allocation94_spill] sm:$0xff] %v6933_v15  ;;  %v2636_v60 = vmul.f32 %v6941_v5, %v2635_v26  ;;  %v6997_v31 = vadd.f32 1.0, %v3696_v43  ;;  %3701 = vpow2.f32 %v3392_v50  ;;  %v1584_v8 = vsel %vm673_vm12, %v6994_v46, %v6866_v47  ;;  %v9892_v44 = vld [vmem:[#allocation55_spill] sm:$0xff]  ;;  %v9899_v43 = vld [vmem:[#allocation70_spill] sm:$0xff] }
 0x1d1   : > { %9879 = vst [vmem:[#allocation52_spill] sm:$0xff] %v6954_v34  ;;  %3463 = vmatpush.msrb.mxu3 %v9887_v59  ;;  %v7000_v49 = vpop.eup %3697  ;;  %v2645_v48 = vor.u32 1.1754944e-38, %v2644_v13  ;;  %v2102_v26 = vand.u32 2147483647, %v6927_v16  ;;  %v1841_v50 = vmul.f32 %v1793_v3, %v1584_v8  ;;  %v2104_v56 = vand.u32 2147483648, %v6927_v16  ;;  %v9893_v13 = vld [vmem:[#allocation104_spill] sm:$0xff] }
 0x1d2   : > { %9881 = vst [vmem:[#allocation14_spill] sm:$0xff] %v6959_v24  ;;  %v7006_v61 = vpop.permute.xlu0 %1460  ;;  %v2637_v17 = vadd.f32 %v6941_v5, %v2636_v60  ;;  %v2094_v59 = vmul.f32 %v7000_v49, %v6927_v16  ;;  %v1396_v47 = vmul.f32 %v6789_v22, %v1157_v0  ;;  %v7028_v30 = vmul.f32 %v6795_v57, %v1125_v41  ;;  %v9895_v0 = vld [vmem:[#allocation64_spill] sm:$0xff]  ;;  %v9896_v57 = vld [vmem:[#allocation27_spill] sm:$0xff] }
 0x1d3   : > { %9885 = vst [vmem:[#allocation76_spill] sm:$0xff] %v6990_v21  ;;  %3464 = vmatpush.msrb.mxu3 %v9892_v44  ;;  %1540 = vrot.lane.b32.xlu1 %v6925_v1, %s4160_s18  ;;  %vm2098_vm5 = vweird.f32 %v6927_v16  ;;  %3703 = vrcp.f32 %v6997_v31  ;;  %v7038_v60 = vadd.f32 %v1394_v7, %v9893_v13  ;;  %v2117_v22 = vand.u32 2147483647, %v6969_v38 }
 0x1d4   : > { %9886 = vst [vmem:[#allocation85_spill] sm:$0xff] %v6994_v46  ;;  %v2641_v3 = vsel %vm7012_vm3, %v6941_v5, %v2637_v17  ;;  %v2095_v8 = vsub.f32 1.0, %v2094_v59  ;;  %v1889_v44 = vadd.f32 %v1841_v50, %v9896_v57  ;;  %vm2099_vm6 = vweird.f32 %v7000_v49  ;;  %v7105_v46 = vld [vmem:[%s4289_s28 + $0x138] sm:$0xff] }
 0x1d5   : > { %9894 = vst [vmem:[#allocation35_spill] sm:$0xff] %v7038_v60  ;;  %3465 = vmatpush.msrb.mxu3 %v9895_v0  ;;  %v7042_v41 = vpop.eup %3699  ;;  %v2646_v1 = vsel %vm7016_vm4, %v2645_v48, %v2641_v3  ;;  %vm7048_vm7 = vcmp.eq.f32.partialorder %v2102_v26, 8.507059e+37  ;;  %v2105_v59 = vor.u32 1.1754944e-38, %v2104_v56  ;;  %vm2113_vm9 = vweird.f32 %v6969_v38  ;;  %v9900_v26 = vld [vmem:[#allocation121_spill] sm:$0xff]  ;;  %vm7076_vm8 = vmor %vm2098_vm5, %vm2099_vm6 }
 0x1d6   : > { %v3702_v7 = vpop.eup %3701  ;;  %1508 = vrot.lane.b32.xlu2 %v6933_v15, %s4160_s18  ;;  %v2849_v5 = vmul.f32 %v6843_v33, %v2646_v1  ;;  %v2096_v17 = vmul.f32 %v7000_v49, %v2095_v8  ;;  %v2109_v50 = vmul.f32 %v7042_v41, %v6969_v38  ;;  %v2119_v48 = vand.u32 2147483648, %v6969_v38  ;;  %v7068_v1 = vpop.permute.xlu2 %1526 }
 0x1d7   : > { %3466 = vmatpush.msrb.mxu3 %v9899_v43  ;;  %1478 = vrot.lane.b32.xlu0 %v6954_v34, %s4160_s18  ;;  %v7064_v3 = vadd.f32 %v1396_v47, %v9900_v26  ;;  %v7066_v13 = vadd.f32 1.0, %v3702_v7  ;;  %v1493_v33 = vpop.permute.xlu1 %1492  ;;  %vm7080_vm11 = vcmp.eq.f32.partialorder %v2117_v22, 8.507059e+37  ;;  %vm2114_vm10 = vweird.f32 %v7042_v41 }
 0x1d8   : > { %v2900_v56 = vmul.f32 %v6938_v42, %v2849_v5  ;;  %v2097_v8 = vadd.f32 %v7000_v49, %v2096_v17  ;;  %v2110_v57 = vsub.f32 1.0, %v2109_v50  ;;  %v1572_v5 = vsel %vm673_vm12, %v7006_v61, %v1493_v33  ;;  %vm7117_vm14 = vmor %vm2113_vm9, %vm2114_vm10 }
 0x1d9   : > { %9901 = vst [vmem:[#allocation31_spill] sm:$0xff] %v7064_v3  ;;  %3467 = vmatpush.msrb.mxu3 %v6700_v51  ;;  %v7085_v7 = vpop.eup %3703  ;;  %v2132_v16 = vand.u32 2147483647, %v6997_v31  ;;  %3705 = vrcp.f32 %v7066_v13  ;;  %v1805_v22 = vmul.f32 %v6936_v40, %v1572_v5  ;;  %v2134_v43 = vand.u32 2147483648, %v6997_v31 }
 0x1da   : > { %v1525_v17 = vpop.permute.xlu0 %1524  ;;  %v2948_v50 = vadd.f32 %v2900_v56, %v1889_v44  ;;  %v2101_v26 = vsel %vm7076_vm8, %v7000_v49, %v2097_v8  ;;  %v2111_v34 = vmul.f32 %v7042_v41, %v2110_v57  ;;  %v2120_v15 = vor.u32 1.1754944e-38, %v2119_v48  ;;  %v9908_v56 = vld [vmem:[#allocation74_spill] sm:$0xff]  ;;  %v9921_v8 = vld [vmem:[#allocation48_spill] sm:$0xff] }
 0x1db   : > { %v1556_v51 = vsel %vm673_vm12, %v1493_v33, %v1525_v17  ;;  %3468 = vmatpush.msrb.mxu3 %v6723_v62  ;;  %1542 = vrot.lane.b32.xlu1 %v6990_v21, %s4160_s18  ;;  %v3426_v40 = vmul.f32 -1.442695, %v7105_v46  ;;  %v1588_v44 = vsel %vm673_vm12, %v1525_v17, %v7006_v61  ;;  %v2106_v62 = vsel %vm7048_vm7, %v2105_v59, %v2101_v26  ;;  %v9967_v21 = vld [vmem:[#allocation91_spill] sm:$0xff] }
 0x1dc   : > { %3060 = vmatmul.f32.vlgmr.msra.gmra.mxu3 %v2948_v50  ;;  %v2124_v48 = vmul.f32 %v7085_v7, %v6997_v31  ;;  %vm2128_vm15 = vweird.f32 %v6997_v31  ;;  %v1806_v33 = vmul.f32 %v6947_v37, %v1556_v51  ;;  %v1853_v61 = vadd.f32 %v1805_v22, %v9908_v56 }
 0x1dd   : > { %v2813_v9 = vmul.f32 %v6809_v27, %v2106_v62  ;;  %v2112_v59 = vadd.f32 %v7042_v41, %v2111_v34  ;;  %3469 = vmatpush.msrb.mxu3 %v6767_v18  ;;  %vm2129_vm13 = vweird.f32 %v7085_v7  ;;  %vm7132_vm0 = vcmp.eq.f32.partialorder %v2132_v16, 8.507059e+37  ;;  %v9915_v62 = vld [vmem:[#allocation102_spill] sm:$0xff] }
 0x1de   : > { %1510 = vrot.lane.b32.xlu2 %v6959_v24, %s4160_s18  ;;  %v2125_v38 = vsub.f32 1.0, %v2124_v48  ;;  %v2135_v0 = vor.u32 1.1754944e-38, %v2134_v43  ;;  %vm2173_vm1 = vweird.f32 %v7066_v13  ;;  %3707 = vpow2.f32 %v3426_v40  ;;  %v7145_v57 = vpop.permute.xlu2 %1488  ;;  %vm7157_vm2 = vmor %vm2128_vm15, %vm2129_vm13  ;;  %v3943_v43 = vld [vmem:[#allocation5 + $0x10] sm:$0xff] }
 0x1df   : > { %v3706_v37 = vpop.eup %3705  ;;  %1480 = vrot.lane.b32.xlu0 %v7038_v60, %s4160_s18  ;;  %v2864_v27 = vmul.f32 %v6938_v42, %v2813_v9  ;;  %v2116_v18 = vsel %vm7117_vm14, %v7042_v41, %v2112_v59  ;;  %3470 = vmatpush.msrb.mxu3 %v6798_v12  ;;  %v1807_v34 = vmul.f32 %v6950_v25, %v1588_v44  ;;  %v7170_v26 = vperm.slane %v3943_v43, 2  ;;  %v9928_v43 = vld [vmem:[#allocation50_spill] sm:$0xff] }
 0x1e0   : > { %9911 = vst [vmem:[#allocation55_spill] sm:$0xff] %v7145_v57  ;;  %v2121_v5 = vsel %vm7080_vm11, %v2120_v15, %v2116_v18  ;;  %v2126_v17 = vmul.f32 %v7085_v7, %v2125_v38  ;;  %v2169_v16 = vmul.f32 %v3706_v37, %v7066_v13  ;;  %v1854_v41 = vadd.f32 %v1806_v33, %v6727_v45  ;;  %v9920_v38 = vld [vmem:[#allocation106_spill] sm:$0xff]  ;;  %v9922_v18 = vld [vmem:[#allocation113_spill] sm:$0xff] }
 0x1e1   : > { %v2912_v22 = vadd.f32 %v2864_v27, %v1853_v61  ;;  %v2814_v50 = vmul.f32 %v6863_v32, %v2121_v5  ;;  %v2179_v15 = vand.u32 2147483648, %v7066_v13  ;;  %3471 = vmatpush.msrb.mxu3 %v6825_v19  ;;  %vm2174_vm3 = vweird.f32 %v3706_v37  ;;  %v7175_v19 = vld [vmem:[%s4289_s28 + $0x20] sm:$0xff]  ;;  %v7209_v27 = vld [vmem:[%s4289_s28 + $0x18] sm:$0xff]  ;;  %v9923_v5 = vld [vmem:[#allocation24_spill] sm:$0xff] }
 0x1e2   : > { %v2127_v25 = vadd.f32 %v7085_v7, %v2126_v17  ;;  %v2170_v47 = vsub.f32 1.0, %v2169_v16  ;;  %v2177_v45 = vand.u32 2147483647, %v7066_v13  ;;  %v9914_v32 = vsub.f32 %v9872_v29, %v6874_v53  ;;  %vm7192_vm4 = vmor %vm2173_vm1, %vm2174_vm3 }
 0x1e3   : > { %3024 = vmatmul.f32.vlgmr.msra.gmra.mxu0 %v2912_v22  ;;  %v2865_v31 = vmul.f32 %v6961_v54, %v2814_v50  ;;  %1544 = vrot.lane.b32.xlu1 %v7064_v3, %s4160_s18  ;;  %v3391_v40 = vmul.f32 -1.442695, %v7175_v19  ;;  %v1855_v44 = vadd.f32 %v1807_v34, %v6730_v11  ;;  %v7184_v49 = vadd.f32 %v7028_v30, %v9915_v62  ;;  %v9919_v30 = vld [vmem:[#allocation57_spill] sm:$0xff]  ;;  %v7231_v62 = vpop.permute.xlu0 %1486  ;;  %v9931_v11 = vld [vmem:[#allocation114_spill] sm:$0xff] }
 0x1e4   : > { %v1762_v51 = vmul.f32 %v6876_v6, %v9914_v32  ;;  %v2131_v29 = vsel %vm7157_vm2, %v7085_v7, %v2127_v25  ;;  %v2171_v48 = vmul.f32 %v3706_v37, %v2170_v47  ;;  %3472 = vmatpush.msrb.mxu3 %v6860_v28  ;;  %v3708_v33 = vpop.eup %3707  ;;  %v2180_v7 = vor.u32 1.1754944e-38, %v2179_v15  ;;  %v9925_v15 = vld [vmem:[#allocation42_spill] sm:$0xff]  ;;  %v9926_v47 = vld [vmem:[#allocation112_spill] sm:$0xff]  ;;  %v9927_v32 = vld [vmem:[#allocation37_spill] sm:$0xff] }
 0x1e5   : > { %9916 = vst [vmem:[#allocation104_spill] sm:$0xff] %v7184_v49  ;;  %v2913_v56 = vadd.f32 %v2865_v31, %v1854_v41  ;;  %v2136_v61 = vsel %vm7132_vm0, %v2135_v0, %v2131_v29  ;;  %3709 = vpow2.f32 %v3391_v40  ;;  %vm2178_vm5 = vcmp.eq.f32.partialorder %v2177_v45, 8.507059e+37  ;;  %v9924_v41 = vld [vmem:[#allocation93_spill] sm:$0xff] }
 0x1e6   : > { %3473 = vmatpush.msra.mxu3 %v9919_v30  ;;  %v2815_v9 = vmul.f32 %v6906_v55, %v2136_v61  ;;  %1512 = vrot.lane.b32.xlu2 %v7184_v49, %s4160_s18  ;;  %v2172_v28 = vadd.f32 %v3706_v37, %v2171_v48  ;;  %v7200_v59 = vadd.f32 1.0, %v3708_v33  ;;  %v1589_v13 = vsel %vm673_vm12, %v7068_v1, %v6971_v10  ;;  %v7216_v16 = vpop.permute.xlu2 %1496  ;;  %v9929_v33 = vld [vmem:[#allocation15_spill] sm:$0xff]  ;;  %v9951_v3 = vld [vmem:[#allocation65_spill] sm:$0xff] }
 0x1e7   : > { %3089 = vmatmul.f32.vlgmr.msra.gmra.mxu1 %v2913_v56  ;;  %v1611_v0 = vmul.f32 %v9921_v8, %v9920_v38  ;;  %v3390_v55 = vmul.f32 -1.442695, %v7209_v27  ;;  %v1647_v34 = vmul.f32 %v9921_v8, %v9922_v18  ;;  %v1613_v50 = vmul.f32 %v6550_v52, %v9924_v41  ;;  %v9930_v56 = vld [vmem:[#allocation115_spill] sm:$0xff]  ;;  %v9938_v41 = vld [vmem:[#allocation28_spill] sm:$0xff] }
 0x1e8   : > { %3474 = vmatpush.msra.mxu3 %v9923_v5  ;;  %v2866_v17 = vmul.f32 %v7170_v26, %v2815_v9  ;;  %v2176_v22 = vsel %vm7192_vm4, %v3706_v37, %v2172_v28  ;;  %3711 = vrcp.f32 %v7200_v59  ;;  %v1649_v25 = vmul.f32 %v6550_v52, %v9925_v15  ;;  %v9932_v9 = vld [vmem:[#allocation125_spill] sm:$0xff]  ;;  %v9936_v5 = vld [vmem:[#allocation127_spill] sm:$0xff] }
 0x1e9   : > { %v2181_v12 = vsel %vm2178_vm5, %v2180_v7, %v2176_v22  ;;  %v1614_v45 = vmul.f32 %v9921_v8, %v9926_v47  ;;  %v1615_v31 = vmul.f32 %v6456_v58, %v9927_v32  ;;  %v1810_v40 = vmul.f32 %v1762_v51, %v1589_v13  ;;  %v9935_v13 = vld [vmem:[#allocation111_spill] sm:$0xff]  ;;  %v7272_v32 = vpop.permute.xlu1 %1518 }
 0x1ea   : > { %3475 = vmatpush.msra.mxu3 %v9928_v43  ;;  %v2914_v37 = vadd.f32 %v2866_v17, %v1855_v44  ;;  %v2818_v29 = vmul.f32 %v6978_v14, %v2181_v12  ;;  %3713 = vpow2.f32 %v3390_v55  ;;  %v7235_v61 = vmul.f32 %v9930_v56, %v9929_v33  ;;  %v9933_v44 = vld [vmem:[#allocation71_spill] sm:$0xff]  ;;  %v9934_v14 = vld [vmem:[#allocation126_spill] sm:$0xff] }
 0x1eb   : > { %v3710_v48 = vpop.eup %3709  ;;  %v1660_v7 = vmul.f32 %v6814_v4, %v9931_v11  ;;  %v1745_v30 = vsub.f32 %v7105_v46, %v6779_v36  ;;  %v7243_v51 = vmul.f32 %v6784_v2, %v9932_v9  ;;  %v7248_v28 = vmul.f32 %v6831_v39, %v9934_v14  ;;  %v7256_v4 = vld [vmem:[%s4289_s28 + $0x150] sm:$0xff]  ;;  %v9937_v2 = vld [vmem:[#allocation30_spill] sm:$0xff]  ;;  %v9939_v39 = vld [vmem:[#allocation83_spill] sm:$0xff] }
 0x1ec   : > { %3476 = vmatpush.msra.mxu3 %v9933_v44  ;;  %3154 = vmatmul.f32.vlgmr.msra.gmra.mxu2 %v2914_v37  ;;  %v7251_v38 = vmul.f32 %v1611_v0, %v9935_v13  ;;  %v7253_v55 = vadd.f32 1.0, %v3710_v48  ;;  %v3429_v18 = vmul.f32 -1.442695, %v7256_v4  ;;  %v7260_v17 = vmul.f32 %v1649_v25, %v9936_v5  ;;  %v9940_v0 = vld [vmem:[#allocation26_spill] sm:$0xff]  ;;  %v9942_v33 = vld [vmem:[#allocation95_spill] sm:$0xff] }
 0x1ed   : > { %v7263_v22 = vmul.f32 %v1614_v45, %v9937_v2  ;;  %v7266_v12 = vmul.f32 %v1613_v50, %v9938_v41  ;;  %v7269_v15 = vmul.f32 %v1647_v34, %v9939_v39  ;;  %v1858_v43 = vadd.f32 %v1810_v40, %v1660_v7  ;;  %v9941_v25 = vld [vmem:[#allocation110_spill] sm:$0xff]  ;;  %v9944_v14 = vld [vmem:[#allocation19_spill] sm:$0xff]  ;;  %v9946_v41 = vld [vmem:[#allocation13_spill] sm:$0xff] }
 0x1ee   : > { %3477 = vmatpush.msra.mxu3 %v9940_v0  ;;  %v3712_v47 = vpop.eup %3711  ;;  %v2869_v37 = vmul.f32 %v7170_v26, %v2818_v29  ;;  %3715 = vrcp.f32 %v7253_v55  ;;  %v7277_v45 = vmul.f32 %v1615_v31, %v9941_v25  ;;  %v1796_v50 = vmul.f32 %v6822_v35, %v1745_v30  ;;  %v7284_v11 = vpop.permute.xlu2 %1522  ;;  %v7291_v29 = vld [vmem:[%s4289_s28 + $0x38] sm:$0xff]  ;;  %v9945_v5 = vld [vmem:[#allocation43_spill] sm:$0xff] }
 0x1ef   : > { %v2679_v48 = vmul.f32 %v3712_v47, %v7200_v59  ;;  %v1709_v34 = vsub.f32 %v7209_v27, %v6779_v36  ;;  %3717 = vpow2.f32 %v3429_v18  ;;  %9943 = vst [vmem:[#allocation64_spill] sm:$0xff] %v7284_v11  ;;  %vm2683_vm6 = vweird.f32 %v7200_v59 }
 0x1f0   : > { %3478 = vmatpush.msra.mxu3 %v9942_v33  ;;  %v3714_v56 = vpop.eup %3713  ;;  %v2689_v40 = vand.u32 2147483648, %v7200_v59  ;;  %v1710_v31 = vsub.f32 %v7175_v19, %v6857_v63  ;;  %v3394_v7 = vmul.f32 -1.442695, %v7291_v29  ;;  %vm2684_vm7 = vweird.f32 %v3712_v47 }
 0x1f1   : > { %v2680_v30 = vsub.f32 1.0, %v2679_v48  ;;  %v2687_v9 = vand.u32 2147483647, %v7200_v59  ;;  %v7295_v44 = vadd.f32 1.0, %v3714_v56  ;;  %v2917_v13 = vadd.f32 %v2869_v37, %v1858_v43  ;;  %v9947_v48 = vld [vmem:[#allocation82_spill] sm:$0xff]  ;;  %v9948_v37 = vld [vmem:[#allocation101_spill] sm:$0xff]  ;;  %vm7320_vm9 = vmor %vm2683_vm6, %vm2684_vm7 }
 0x1f2   : > { %3479 = vmatpush.msra.mxu3 %v9944_v14  ;;  %v1585_v18 = vsel %vm673_vm12, %v7231_v62, %v7272_v32  ;;  %v7304_v2 = vmul.f32 %v6456_v58, %v9945_v5  ;;  %v7308_v39 = vmul.f32 %v9921_v8, %v9946_v41  ;;  %v1760_v25 = vmul.f32 %v6822_v35, %v1709_v34  ;;  %v1495_v14 = vpop.permute.xlu0 %1494 }
 0x1f3   : > { %v2681_v0 = vmul.f32 %v3712_v47, %v2680_v30  ;;  %3719 = vrcp.f32 %v7295_v44  ;;  %v7314_v43 = vmul.f32 %v6550_v52, %v9947_v48  ;;  %v2690_v30 = vor.u32 1.1754944e-38, %v2689_v40 }
 0x1f4   : > { %3480 = vmatpush.msra.mxu3 %v9948_v37  ;;  %v3716_v33 = vpop.eup %3715  ;;  %3157 = vmatmul.f32.gmra.mxu2 %v2917_v13  ;;  %v1761_v34 = vmul.f32 %v6910_v20, %v1710_v31  ;;  %v1748_v5 = vsub.f32 %v7256_v4, %v6779_v36  ;;  %3721 = vpow2.f32 %v3394_v7  ;;  %v1844_v48 = vmul.f32 %v1796_v50, %v1585_v18 }
 0x1f5   : > { %v3718_v41 = vpop.eup %3717  ;;  %v2682_v37 = vadd.f32 %v3712_v47, %v2681_v0  ;;  %vm2688_vm8 = vcmp.eq.f32.partialorder %v2687_v9, 8.507059e+37  ;;  %v2154_v13 = vmul.f32 %v3716_v33, %v7253_v55  ;;  %vm2158_vm11 = vweird.f32 %v7253_v55  ;;  %v9952_v9 = vld [vmem:[#allocation77_spill] sm:$0xff]  ;;  %v7374_v0 = vld [vmem:[%s4289_s28 + $0x40] sm:$0xff] }
 0x1f6   : > { %3481 = vmatpush.msra.mxu3 %v9951_v3  ;;  %v2162_v59 = vand.u32 2147483647, %v7253_v55  ;;  %v2164_v40 = vand.u32 2147483648, %v7253_v55  ;;  %v7332_v31 = vadd.f32 1.0, %v3718_v41  ;;  %v1557_v50 = vsel %vm673_vm12, %v1495_v14, %v7068_v1  ;;  %v7340_v3 = vpop.permute.xlu1 %1464  ;;  %v7344_v60 = vpop.permute.xlu2 %1468 }
 0x1f7   : > { %v2686_v49 = vsel %vm7320_vm9, %v3712_v47, %v2682_v37  ;;  %v2155_v7 = vsub.f32 1.0, %v2154_v13  ;;  %vm2159_vm10 = vweird.f32 %v3716_v33  ;;  %v7347_v41 = vmul.f32 %v6822_v35, %v1748_v5 }
 0x1f8   : > { %3482 = vmatpush.msra.mxu3 %v9952_v9  ;;  %v2691_v18 = vsel %vm2688_vm8, %v2690_v30, %v2686_v49  ;;  %3723 = vrcp.f32 %v7332_v31  ;;  %v1892_v1 = vadd.f32 %v1844_v48, %v7248_v28  ;;  %v1573_v37 = vsel %vm673_vm12, %v6971_v10, %v1495_v14  ;;  %v9953_v30 = vld [vmem:[#allocation88_spill] sm:$0xff]  ;;  %vm7359_vm14 = vmor %vm2158_vm11, %vm2159_vm10 }
 0x1f9   : > { %v3720_v47 = vpop.eup %3719  ;;  %v2852_v56 = vmul.f32 %v7105_v46, %v2691_v18  ;;  %v2156_v49 = vmul.f32 %v3716_v33, %v2155_v7  ;;  %v1809_v9 = vmul.f32 %v1761_v34, %v1557_v50  ;;  %v2165_v28 = vor.u32 1.1754944e-38, %v2164_v40  ;;  %v9956_v34 = vld [vmem:[#allocation105_spill] sm:$0xff] }
 0x1fa   : > { %3483 = vmatpush.msra.mxu3 %v9953_v30  ;;  %v3722_v13 = vpop.eup %3721  ;;  %v2139_v46 = vmul.f32 %v3720_v47, %v7295_v44  ;;  %v2147_v48 = vand.u32 2147483647, %v7295_v44  ;;  %vm2163_vm15 = vcmp.eq.f32.partialorder %v2162_v59, 8.507059e+37  ;;  %v2149_v7 = vand.u32 2147483648, %v7295_v44  ;;  %v9957_v59 = vld [vmem:[#allocation62_spill] sm:$0xff] }
 0x1fb   : > { %v2903_v10 = vmul.f32 %v6938_v42, %v2852_v56  ;;  %v2157_v14 = vadd.f32 %v3716_v33, %v2156_v49  ;;  %v1808_v50 = vmul.f32 %v1760_v25, %v1573_v37  ;;  %vm2143_vm13 = vweird.f32 %v7295_v44 }
 0x1fc   : > { %3484 = vmatpush.msra.mxu3 %v9956_v34  ;;  %v2140_v55 = vsub.f32 1.0, %v2139_v46  ;;  %vm2144_vm0 = vweird.f32 %v3720_v47  ;;  %v7371_v30 = vadd.f32 1.0, %v3722_v13  ;;  %v3395_v56 = vmul.f32 -1.442695, %v7374_v0 }
 0x1fd   : > { %v2951_v18 = vadd.f32 %v2903_v10, %v1892_v1  ;;  %v2161_v40 = vsel %vm7359_vm14, %v3716_v33, %v2157_v14  ;;  %v1857_v34 = vadd.f32 %v1809_v9, %v7251_v38  ;;  %vm7379_vm1 = vcmp.eq.f32.partialorder %v2147_v48, 8.507059e+37  ;;  %v7384_v1 = vpop.permute.xlu0 %1520  ;;  %vm7389_vm2 = vmor %vm2143_vm13, %vm2144_vm0  ;;  %v9963_v10 = vld [vmem:[#allocation123_spill] sm:$0xff] }
 0x1fe   : > { %3485 = vmatpush.msra.mxu3 %v9957_v59  ;;  %v3724_v49 = vpop.eup %3723  ;;  %v2166_v25 = vsel %vm2163_vm15, %v2165_v28, %v2161_v40  ;;  %v2141_v37 = vmul.f32 %v3720_v47, %v2140_v55  ;;  %9960 = vst [vmem:[#allocation27_spill] sm:$0xff] %v7384_v1  ;;  %v2150_v5 = vor.u32 1.1754944e-38, %v2149_v7  ;;  %3725 = vrcp.f32 %v7371_v30  ;;  %v7395_v28 = vpop.permute.xlu2 %1500  ;;  %v9964_v40 = vld [vmem:[#allocation33_spill] sm:$0xff] }
 0x1ff   : > { %3063 = vmatmul.f32.gmra.mxu3 %v2951_v18  ;;  %v2817_v33 = vmul.f32 %v7175_v19, %v2166_v25  ;;  %v2724_v38 = vmul.f32 %v3724_v49, %v7332_v31  ;;  %vm2728_vm3 = vweird.f32 %v7332_v31  ;;  %v2732_v19 = vand.u32 2147483647, %v7332_v31  ;;  %v7402_v7 = vpop.permute.xlu1 %1528  ;;  %v9965_v25 = vld [vmem:[#allocation39_spill] sm:$0xff] }
 0x200   : > { %v2142_v9 = vadd.f32 %v3720_v47, %v2141_v37  ;;  %v2734_v48 = vand.u32 2147483648, %v7332_v31  ;;  %3486 = vmatpush.msra.mxu3 %v9963_v10  ;;  %vm2729_vm4 = vweird.f32 %v3724_v49  ;;  %3727 = vpow2.f32 %v3395_v56 }
 0x201   : > { %v2868_v44 = vmul.f32 %v6961_v54, %v2817_v33  ;;  %v2725_v14 = vsub.f32 1.0, %v2724_v38  ;;  %v1586_v55 = vsel %vm673_vm12, %v7145_v57, %v7384_v1  ;;  %v7412_v59 = vmul.f32 %v7304_v2, %v9964_v40  ;;  %v9966_v33 = vld [vmem:[#allocation129_spill] sm:$0xff]  ;;  %vm7429_vm5 = vmor %vm2728_vm3, %vm2729_vm4  ;;  %v9991_v57 = vld [vmem:[#allocation103_spill] sm:$0xff] }
 0x202   : > { %v2146_v18 = vsel %vm7389_vm2, %v3720_v47, %v2142_v9  ;;  %v7416_v37 = vmul.f32 %v7308_v39, %v9965_v25  ;;  %3487 = vmatpush.msra.mxu3 %v9966_v33  ;;  %v7423_v24 = vmul.f32 %v7314_v43, %v9967_v21  ;;  %v1856_v47 = vadd.f32 %v1808_v50, %v7243_v51 }
 0x203   : > { %v2916_v56 = vadd.f32 %v2868_v44, %v1857_v34  ;;  %v2151_v38 = vsel %vm7379_vm1, %v2150_v5, %v2146_v18  ;;  %v2726_v10 = vmul.f32 %v3724_v49, %v2725_v14  ;;  %v2735_v13 = vor.u32 1.1754944e-38, %v2734_v48  ;;  %v7434_v34 = vld [vmem:[%s4289_s28 + $0x30] sm:$0xff]  ;;  %v9970_v5 = vld [vmem:[#allocation133_spill] sm:$0xff] }
 0x204   : > { %v2816_v2 = vmul.f32 %v7209_v27, %v2151_v38  ;;  %v3393_v46 = vmul.f32 -1.442695, %v7434_v34  ;;  %3488 = vmatpush.msra.mxu3 %v9970_v5  ;;  %v3726_v9 = vpop.eup %3725  ;;  %v9971_v21 = vsub.f32 %v7291_v29, %v6857_v63  ;;  %v1847_v27 = vmul.f32 %v7347_v41, %v1586_v55  ;;  %v9972_v38 = vld [vmem:[#allocation86_spill] sm:$0xff]  ;;  %v9976_v5 = vld [vmem:[#allocation56_spill] sm:$0xff] }
 0x205   : > { %3092 = vmatmul.f32.gmra.mxu1 %v2916_v56  ;;  %v2727_v43 = vadd.f32 %v3724_v49, %v2726_v10  ;;  %vm2733_vm6 = vcmp.eq.f32.partialorder %v2732_v19, 8.507059e+37  ;;  %v2199_v50 = vmul.f32 %v3726_v9, %v7371_v30  ;;  %vm2203_vm7 = vweird.f32 %v7371_v30  ;;  %v9973_v10 = vld [vmem:[#allocation119_spill] sm:$0xff] }
 0x206   : > { %v1764_v51 = vmul.f32 %v6910_v20, %v9971_v21  ;;  %v2867_v31 = vmul.f32 %v6938_v42, %v2816_v2  ;;  %3729 = vpow2.f32 %v3393_v46  ;;  %v3728_v48 = vpop.eup %3727  ;;  %vm2204_vm9 = vweird.f32 %v3726_v9  ;;  %v9977_v21 = vld [vmem:[#allocation60_spill] sm:$0xff] }
 0x207   : > { %v2731_v44 = vsel %vm7429_vm5, %v3724_v49, %v2727_v43  ;;  %v2207_v14 = vand.u32 2147483647, %v7371_v30  ;;  %v2209_v18 = vand.u32 2147483648, %v7371_v30  ;;  %v2200_v55 = vsub.f32 1.0, %v2199_v50  ;;  %v7458_v49 = vpop.permute.xlu2 %1550  ;;  %v7463_v39 = vpop.permute.xlu1 %1490  ;;  %vm7477_vm8 = vmor %vm2203_vm7, %vm2204_vm9  ;;  %v9980_v30 = vld [vmem:[#allocation16_spill] sm:$0xff] }
 0x208   : > { %v2915_v40 = vadd.f32 %v2867_v31, %v1856_v47  ;;  %v2736_v41 = vsel %vm2733_vm6, %v2735_v13, %v2731_v44  ;;  %v7450_v19 = vadd.f32 1.0, %v3728_v48  ;;  %v1558_v25 = vsel %vm673_vm12, %v7216_v16, %v7402_v7  ;;  %9974 = vst [vmem:[#allocation70_spill] sm:$0xff] %v7463_v39  ;;  %v9975_v13 = vld [vmem:[#allocation44_spill] sm:$0xff]  ;;  %v7508_v31 = vld [vmem:[%s4289_s28 + $0x60] sm:$0xff] }
 0x209   : > { %v1895_v33 = vadd.f32 %v1847_v27, %v7260_v17  ;;  %v2855_v56 = vmul.f32 %v7256_v4, %v2736_v41  ;;  %v1201_v2 = vmul.f32 %v9973_v10, %v9972_v38  ;;  %v2201_v47 = vmul.f32 %v3726_v9, %v2200_v55 }
 0x20a   : > { %3027 = vmatmul.f32.gmra.mxu0 %v2915_v40  ;;  %3731 = vrcp.f32 %v7450_v19  ;;  %v1652_v46 = vmul.f32 %v6550_v52, %v9975_v13  ;;  %v1199_v43 = vmul.f32 %v9977_v21, %v9976_v5  ;;  %v1712_v4 = vsub.f32 %v7434_v34, %v6779_v36  ;;  %v9981_v13 = vld [vmem:[#allocation40_spill] sm:$0xff] }
 0x20b   : > { %v1714_v17 = vsub.f32 %v7374_v0, %v6874_v53  ;;  %v2906_v27 = vmul.f32 %v6938_v42, %v2855_v56  ;;  %v2210_v50 = vor.u32 1.1754944e-38, %v2209_v18  ;;  %v1812_v44 = vmul.f32 %v1764_v51, %v1558_v25 }
 0x20c   : > { %v3730_v48 = vpop.eup %3729  ;;  %v2202_v40 = vadd.f32 %v3726_v9, %v2201_v47  ;;  %vm2208_vm11 = vcmp.eq.f32.partialorder %v2207_v14, 8.507059e+37  ;;  %v7485_v41 = vsel %vm673_vm12, %v7458_v49, %v7231_v62  ;;  %v1621_v10 = vmul.f32 %v6456_v58, %v9980_v30  ;;  %v9982_v14 = vld [vmem:[#allocation66_spill] sm:$0xff]  ;;  %v9983_v47 = vld [vmem:[#allocation75_spill] sm:$0xff]  ;;  %v9984_v62 = vld [vmem:[#allocation89_spill] sm:$0xff] }
 0x20d   : > { %v2954_v55 = vadd.f32 %v2906_v27, %v1895_v33  ;;  %v7487_v56 = vadd.f32 1.0, %v3730_v48  ;;  %v1620_v18 = vmul.f32 %v9921_v8, %v9981_v13  ;;  %v7496_v25 = vmul.f32 %v1652_v46, %v9982_v14  ;;  %v9989_v14 = vld [vmem:[#allocation117_spill] sm:$0xff] }
 0x20e   : > { %v2206_v51 = vsel %vm7477_vm8, %v3726_v9, %v2202_v40  ;;  %v7499_v21 = vmul.f32 %v1201_v2, %v9983_v47  ;;  %v7502_v38 = vmul.f32 %v1199_v43, %v9984_v62  ;;  %v1763_v33 = vmul.f32 %v6822_v35, %v1712_v4  ;;  %v9985_v43 = vld [vmem:[#allocation87_spill] sm:$0xff] }
 0x20f   : > { %v1765_v27 = vmul.f32 %v6876_v6, %v1714_v17  ;;  %3066 = vmatmul.f32.gmra.mxu3 %v2954_v55  ;;  %v2211_v48 = vsel %vm2208_vm11, %v2210_v50, %v2206_v51  ;;  %3733 = vrcp.f32 %v7487_v56  ;;  %v1718_v9 = vsub.f32 %v7508_v31, %v6779_v36  ;;  %v9986_v17 = vld [vmem:[#allocation23_spill] sm:$0xff]  ;;  %v9987_v55 = vld [vmem:[#allocation72_spill] sm:$0xff] }
 0x210   : > { %v3732_v30 = vpop.eup %3731  ;;  %v1860_v2 = vadd.f32 %v1812_v44, %v7263_v22  ;;  %v2820_v46 = vmul.f32 %v7291_v29, %v2211_v48  ;;  %v1619_v40 = vmul.f32 %v6550_v52, %v9985_v43  ;;  %v7518_v50 = vmul.f32 %v1621_v10, %v9986_v17  ;;  %v9988_v51 = vld [vmem:[#allocation12_spill] sm:$0xff]  ;;  %v7537_v48 = vpop.permute.xlu0 %1466 }
 0x211   : > { %v2214_v4 = vmul.f32 %v3732_v30, %v7450_v19  ;;  %v7521_v13 = vmul.f32 %v1620_v18, %v9987_v55  ;;  %v1200_v47 = vmul.f32 %v9989_v14, %v9988_v51  ;;  %v1574_v22 = vsel %vm673_vm12, %v7340_v3, %v7216_v16  ;;  %v7540_v17 = vpop.permute.xlu1 %1498  ;;  %v7543_v55 = vld [vmem:[%s4289_s28 + $0x168] sm:$0xff] }
 0x212   : > { %v1590_v29 = vsel %vm673_vm12, %v7402_v7, %v7340_v3  ;;  %v2871_v44 = vmul.f32 %v6961_v54, %v2820_v46  ;;  %v2224_v10 = vand.u32 2147483648, %v7450_v19  ;;  %vm2218_vm10 = vweird.f32 %v7450_v19  ;;  %v9990_v7 = vld [vmem:[#allocation21_spill] sm:$0xff] }
 0x213   : > { %v2215_v62 = vsub.f32 1.0, %v2214_v4  ;;  %vm2219_vm14 = vweird.f32 %v3732_v30  ;;  %v2222_v18 = vand.u32 2147483647, %v7450_v19  ;;  %v1769_v43 = vmul.f32 %v6822_v35, %v1718_v9 }
 0x214   : > { %v2919_v16 = vadd.f32 %v2871_v44, %v1860_v2  ;;  %v3432_v3 = vmul.f32 -1.442695, %v7543_v55  ;;  %v7547_v46 = vmul.f32 %v1619_v40, %v9990_v7  ;;  %v1811_v14 = vmul.f32 %v1763_v33, %v1574_v22  ;;  %vm7559_vm15 = vmor %vm2218_vm10, %vm2219_vm14 }
 0x215   : > { %v3734_v4 = vpop.eup %3733  ;;  %v1813_v5 = vmul.f32 %v1765_v27, %v1590_v29  ;;  %v2216_v51 = vmul.f32 %v3732_v30, %v2215_v62  ;;  %v7550_v1 = vmul.f32 %v1200_v47, %v9991_v57  ;;  %v1576_v9 = vsel %vm673_vm12, %v7344_v60, %v7395_v28  ;;  %v7566_v47 = vld [vmem:[%s4289_s28 + $0x58] sm:$0xff] }
 0x216   : > { %3095 = vmatmul.f32.gmra.mxu1 %v2919_v16  ;;  %v2225_v40 = vor.u32 1.1754944e-38, %v2224_v10  ;;  %v2184_v33 = vmul.f32 %v3734_v4, %v7487_v56  ;;  %3735 = vpow2.f32 %v3432_v3  ;;  %vm2223_vm13 = vcmp.eq.f32.partialorder %v2222_v18, 8.507059e+37  ;;  %v7579_v3 = vld [vmem:[%s4289_s28 + $0x140] sm:$0xff] }
 0x217   : > { %v2217_v27 = vadd.f32 %v3732_v30, %v2216_v51  ;;  %v2194_v57 = vand.u32 2147483648, %v7487_v56  ;;  %v3398_v22 = vmul.f32 -1.442695, %v7566_v47  ;;  %vm2188_vm0 = vweird.f32 %v7487_v56 }
 0x218   : > { %v2185_v29 = vsub.f32 1.0, %v2184_v33  ;;  %vm2189_vm1 = vweird.f32 %v3734_v4  ;;  %v2192_v19 = vand.u32 2147483647, %v7487_v56  ;;  %v1861_v44 = vadd.f32 %v1813_v5, %v7277_v45  ;;  %v7596_v33 = vld [vmem:[%s4289_s28 + $0x48] sm:$0xff] }
 0x219   : > { %v2221_v10 = vsel %vm7559_vm15, %v3732_v30, %v2217_v27  ;;  %v1751_v51 = vsub.f32 %v7543_v55, %v6779_v36  ;;  %3737 = vpow2.f32 %v3398_v22  ;;  %v7576_v62 = vmul.f32 %v1769_v43, %v1576_v9  ;;  %vm7585_vm2 = vmor %vm2188_vm0, %vm2189_vm1 }
 0x21a   : > { %v2226_v18 = vsel %vm2223_vm13, %v2225_v40, %v2221_v10  ;;  %v2186_v16 = vmul.f32 %v3734_v4, %v2185_v29  ;;  %v1746_v56 = vsub.f32 %v7579_v3, %v6857_v63  ;;  %v1859_v5 = vadd.f32 %v1811_v14, %v7266_v12  ;;  %v1531_v29 = vpop.permute.xlu0 %1530  ;;  %v9999_v40 = vld [vmem:[#allocation85_spill] sm:$0xff] }
 0x21b   : > { %v2821_v45 = vmul.f32 %v7374_v0, %v2226_v18  ;;  %v2195_v7 = vor.u32 1.1754944e-38, %v2194_v57  ;;  %v1717_v43 = vsub.f32 %v7566_v47, %v6874_v53  ;;  %vm7591_vm3 = vcmp.eq.f32.partialorder %v2192_v19, 8.507059e+37  ;;  %v7601_v0 = vld [vmem:[%s4289_s28 + $0x130] sm:$0xff] }
 0x21c   : > { %v3736_v9 = vpop.eup %3735  ;;  %v2187_v2 = vadd.f32 %v3734_v4, %v2186_v16  ;;  %v1715_v12 = vsub.f32 %v7596_v33, %v6779_v36  ;;  %9998 = vst [vmem:[#allocation121_spill] sm:$0xff] %v7601_v0  ;;  %v1744_v14 = vsub.f32 %v7601_v0, %v6874_v53  ;;  %v1802_v57 = vmul.f32 %v6822_v35, %v1751_v51  ;;  %v1549_v36 = vpop.permute.xlu1 %1548 }
 0x21d   : > { %v2872_v27 = vmul.f32 %v7170_v26, %v2821_v45  ;;  %v1587_v22 = vsel %vm673_vm12, %v7463_v39, %v7284_v11  ;;  %v7611_v19 = vadd.f32 1.0, %v3736_v9  ;;  %v1797_v18 = vmul.f32 %v6910_v20, %v1746_v56  ;;  %v7621_v45 = vld [vmem:[%s4289_s28 + $0x50] sm:$0xff] }
 0x21e   : > { %v2191_v10 = vsel %vm7585_vm2, %v3734_v4, %v2187_v2  ;;  %v1569_v16 = vsel %vm673_vm12, %v7272_v32, %v7458_v49  ;;  %v1716_v51 = vsub.f32 %v7621_v45, %v6857_v63  ;;  %v1795_v4 = vmul.f32 %v6876_v6, %v1744_v14 }
 0x21f   : > { %v3738_v39 = vpop.eup %3737  ;;  %v2920_v9 = vadd.f32 %v2872_v27, %v1861_v44  ;;  %v2196_v30 = vsel %vm7591_vm3, %v2195_v7, %v2191_v10  ;;  %3739 = vrcp.f32 %v7611_v19  ;;  %v1768_v32 = vmul.f32 %v6876_v6, %v1717_v43 }
 0x220   : > { %v2819_v56 = vmul.f32 %v7434_v34, %v2196_v30  ;;  %v1766_v49 = vmul.f32 %v6822_v35, %v1715_v12  ;;  %v7632_v2 = vadd.f32 1.0, %v3738_v39  ;;  %v1591_v44 = vsel %vm673_vm12, %v1531_v29, %v7537_v48  ;;  %v7647_v12 = vld [vmem:[%s4289_s28 + $0x148] sm:$0xff] }
 0x221   : > { %3160 = vmatmul.f32.gmra.mxu2 %v2920_v9  ;;  %v1575_v7 = vsel %vm673_vm12, %v7537_v48, %v7540_v17  ;;  %v1600_v34 = vsel %vm673_vm12, %v1549_v36, %v9999_v40  ;;  %v3397_v43 = vmul.f32 -1.442695, %v7621_v45  ;;  %v1767_v27 = vmul.f32 %v6910_v20, %v1716_v51  ;;  %v7664_v35 = vld [vmem:[%s4289_s28 + $0x128] sm:$0xff] }
 0x222   : > { %v2870_v39 = vmul.f32 %v6938_v42, %v2819_v56  ;;  %3741 = vrcp.f32 %v7632_v2  ;;  %v7653_v10 = vmul.f32 %v1802_v57, %v1587_v22  ;;  %v7655_v48 = vmul.f32 %v1797_v18, %v1569_v16 }
 0x223   : > { %v1559_v9 = vsel %vm673_vm12, %v7540_v17, %v1531_v29  ;;  %v1843_v30 = vmul.f32 %v1795_v4, %v1600_v34  ;;  %v1816_v40 = vmul.f32 %v1768_v32, %v1591_v44  ;;  %v7660_v11 = vmul.f32 %v1766_v49, %v1575_v7  ;;  %v7674_v29 = vld [vmem:[%s4289_s28 + $0x68] sm:$0xff]  ;;  %v7679_v4 = vld [vmem:[%s4289_s28 + $0x70] sm:$0xff]  ;;  %v1533_v44 = vpop.permute.xlu0 %1532  ;;  %v10001_v7 = vld [vmem:[#allocation130_spill] sm:$0xff] }
 0x224   : > { %v2918_v56 = vadd.f32 %v2870_v39, %v1859_v5  ;;  %3743 = vpow2.f32 %v3397_v43  ;;  %v2779_v51 = vand.u32 2147483648, %v7611_v19  ;;  %v1743_v57 = vsub.f32 %v7664_v35, %v6857_v63 }
 0x225   : > { %v3740_v14 = vpop.eup %3739  ;;  %v3425_v22 = vmul.f32 -1.442695, %v7601_v0  ;;  %v7670_v18 = vadd.f32 %v1843_v30, %v7235_v61  ;;  %v1815_v17 = vmul.f32 %v1767_v27, %v1559_v9  ;;  %v1719_v16 = vsub.f32 %v7674_v29, %v6857_v63 }
 0x226   : > { %3030 = vmatmul.f32.gmra.mxu0 %v2918_v56  ;;  %v2769_v5 = vmul.f32 %v3740_v14, %v7611_v19  ;;  %v3401_v32 = vmul.f32 -1.442695, %v7679_v4  ;;  %vm2773_vm4 = vweird.f32 %v7611_v19  ;;  %v2777_v49 = vand.u32 2147483647, %v7611_v19 }
 0x227   : > { %10000 = vst [vmem:[#allocation74_spill] sm:$0xff] %v7670_v18  ;;  %v1720_v61 = vsub.f32 %v7679_v4, %v6874_v53  ;;  %v1568_v34 = vsel %vm673_vm12, %v10001_v7, %v1549_v36  ;;  %vm2774_vm5 = vweird.f32 %v3740_v14  ;;  %v3396_v27 = vmul.f32 -1.442695, %v7596_v33 }
 0x228   : > { %v3742_v43 = vpop.eup %3741  ;;  %v2770_v39 = vsub.f32 1.0, %v2769_v5  ;;  %3745 = vpow2.f32 %v3401_v32  ;;  %v2780_v9 = vor.u32 1.1754944e-38, %v2779_v51  ;;  %v1794_v56 = vmul.f32 %v6910_v20, %v1743_v57  ;;  %vm7696_vm7 = vmor %vm2773_vm4, %vm2774_vm5 }
 0x229   : > { %v2259_v30 = vmul.f32 %v3742_v43, %v7632_v2  ;;  %3747 = vpow2.f32 %v3425_v22  ;;  %vm2263_vm6 = vweird.f32 %v7632_v2  ;;  %v2269_v0 = vand.u32 2147483648, %v7632_v2 }
 0x22a   : > { %v3744_v18 = vpop.eup %3743  ;;  %v2771_v63 = vmul.f32 %v3740_v14, %v2770_v39  ;;  %3749 = vpow2.f32 %v3396_v27  ;;  %vm2264_vm9 = vweird.f32 %v3742_v43  ;;  %v2267_v51 = vand.u32 2147483647, %v7632_v2 }
 0x22b   : > { %v2260_v5 = vsub.f32 1.0, %v2259_v30  ;;  %v7701_v32 = vadd.f32 1.0, %v3744_v18  ;;  %vm2778_vm8 = vcmp.eq.f32.partialorder %v2777_v49, 8.507059e+37  ;;  %v1770_v22 = vmul.f32 %v6910_v20, %v1719_v16  ;;  %vm7716_vm11 = vmor %vm2263_vm6, %vm2264_vm9 }
 0x22c   : > { %v2772_v57 = vadd.f32 %v3740_v14, %v2771_v63  ;;  %v1560_v7 = vsel %vm673_vm12, %v7395_v28, %v1533_v44  ;;  %v1771_v19 = vmul.f32 %v6876_v6, %v1720_v61  ;;  %v1592_v27 = vsel %vm673_vm12, %v1533_v44, %v7344_v60 }
 0x22d   : > { %v2261_v39 = vmul.f32 %v3742_v43, %v2260_v5  ;;  %3751 = vrcp.f32 %v7701_v32  ;;  %v2270_v28 = vor.u32 1.1754944e-38, %v2269_v0  ;;  %v1842_v16 = vmul.f32 %v1794_v56, %v1568_v34  ;;  %v7735_v56 = vpop.permute.xlu0 %1470 }
 0x22e   : > { %v3746_v30 = vpop.eup %3745  ;;  %v2776_v63 = vsel %vm7696_vm7, %v3740_v14, %v2772_v57  ;;  %v3399_v49 = vmul.f32 -1.442695, %v7508_v31  ;;  %vm2268_vm10 = vcmp.eq.f32.partialorder %v2267_v51, 8.507059e+37  ;;  %v1898_v14 = vadd.f32 %v7653_v10, %v7496_v25 }
 0x22f   : > { %v3748_v61 = vpop.eup %3747  ;;  %v2781_v5 = vsel %vm2778_vm8, %v2780_v9, %v2776_v63  ;;  %v2262_v20 = vadd.f32 %v3742_v43, %v2261_v39  ;;  %v7721_v60 = vadd.f32 1.0, %v3746_v30  ;;  %v1864_v36 = vadd.f32 %v1816_v40, %v7412_v59  ;;  %v10006_v40 = vld [vmem:[#allocation67_spill] sm:$0xff] }
 0x230   : > { %v3750_v44 = vpop.eup %3749  ;;  %v2858_v2 = vmul.f32 %v7543_v55, %v2781_v5  ;;  %v7727_v57 = vmul.f32 %v1770_v22, %v1560_v7  ;;  %v1819_v34 = vmul.f32 %v1771_v19, %v1592_v27  ;;  %v7732_v9 = vadd.f32 %v1815_v17, %v7416_v37 }
 0x231   : > { %v2266_v0 = vsel %vm7716_vm11, %v3742_v43, %v2262_v20  ;;  %3753 = vrcp.f32 %v7721_v60  ;;  %v7738_v10 = vadd.f32 1.0, %v3748_v61  ;;  %v7742_v22 = vadd.f32 %v1842_v16, %v10006_v40 }
 0x232   : > { %v2909_v51 = vmul.f32 %v6938_v42, %v2858_v2  ;;  %v2271_v25 = vsel %vm2268_vm10, %v2270_v28, %v2266_v0  ;;  %3755 = vpow2.f32 %v3399_v49  ;;  %v7744_v20 = vadd.f32 1.0, %v3750_v44 }
 0x233   : > { %v3752_v59 = vpop.eup %3751  ;;  %v2824_v55 = vmul.f32 %v7566_v47, %v2271_v25  ;;  %v3400_v37 = vmul.f32 -1.442695, %v7674_v29  ;;  %v2252_v7 = vand.u32 2147483647, %v7701_v32  ;;  %v2254_v39 = vand.u32 2147483648, %v7701_v32  ;;  %v10013_v25 = vld [vmem:[#allocation17_spill] sm:$0xff] }
 0x234   : > { %v2957_v17 = vadd.f32 %v2909_v51, %v1898_v14  ;;  %v2244_v43 = vmul.f32 %v3752_v59, %v7701_v32  ;;  %v2312_v27 = vand.u32 2147483647, %v7721_v60  ;;  %v2314_v47 = vand.u32 2147483648, %v7721_v60  ;;  %v3961_v51 = vld [vmem:[%s4289_s28 + $0x118] sm:$0xff] }
 0x235   : > { %v2875_v19 = vmul.f32 %v7170_v26, %v2824_v55  ;;  %3757 = vrcp.f32 %v7744_v20  ;;  %vm2248_vm14 = vweird.f32 %v7701_v32  ;;  %vm2249_vm15 = vweird.f32 %v3752_v59  ;;  %v7782_v40 = vpop.permute.xlu0 %1041 }
 0x236   : > { %3069 = vmatmul.f32.gmra.mxu3 %v2957_v17  ;;  %3759 = vrcp.f32 %v7738_v10  ;;  %v2245_v30 = vsub.f32 1.0, %v2244_v43  ;;  %v7757_v28 = vadd.f32 %v1819_v34, %v7518_v50  ;;  %v7761_v16 = vadd.f32 %v7660_v11, %v7423_v24  ;;  %vm7768_vm0 = vmor %vm2248_vm14, %vm2249_vm15  ;;  %v7788_v43 = vpop.permute.xlu2 %1105 }
 0x237   : > { %v3754_v63 = vpop.eup %3753  ;;  %v2923_v18 = vadd.f32 %v2875_v19, %v1864_v36  ;;  %3761 = vpow2.f32 %v3400_v37  ;;  %vm7763_vm13 = vcmp.eq.f32.partialorder %v2252_v7, 8.507059e+37  ;;  %v2255_v44 = vor.u32 1.1754944e-38, %v2254_v39 }
 0x238   : > { %v3756_v49 = vpop.eup %3755  ;;  %v2246_v61 = vmul.f32 %v3752_v59, %v2245_v30  ;;  %v2304_v32 = vmul.f32 %v3754_v63, %v7721_v60  ;;  %vm2308_vm1 = vweird.f32 %v7721_v60  ;;  %vm7773_vm2 = vcmp.eq.f32.partialorder %v2312_v27, 8.507059e+37 }
 0x239   : > { %3163 = vmatmul.f32.gmra.mxu2 %v2923_v18  ;;  %v2315_v11 = vor.u32 1.1754944e-38, %v2314_v47  ;;  %v3424_v50 = vmul.f32 -1.442695, %v7664_v35  ;;  %vm2309_vm3 = vweird.f32 %v3754_v63  ;;  %vm2233_vm4 = vweird.f32 %v7744_v20 }
 0x23a   : > { %v2247_v2 = vadd.f32 %v3752_v59, %v2246_v61  ;;  %v2305_v36 = vsub.f32 1.0, %v2304_v32  ;;  %v2237_v34 = vand.u32 2147483647, %v7744_v20  ;;  %v1300_v55 = vsub.f32 %v3961_v51, %v10013_v25  ;;  %vm7799_vm5 = vmor %vm2308_vm1, %vm2309_vm3 }
 0x23b   : > { %v3758_v0 = vpop.eup %3757  ;;  %3763 = vpow2.f32 %v3424_v50  ;;  %v7784_v37 = vadd.f32 1.0, %v3756_v49  ;;  %v2239_v27 = vand.u32 2147483648, %v7744_v20  ;;  %v10016_v49 = vld [vmem:[#allocation118_spill] sm:$0xff]  ;;  %vm2668_vm1 = vweird.f32 %v7738_v10 }
 0x23c   : > { %v7786_v17 = vpop.eup %3759  ;;  %v2251_v7 = vsel %vm7768_vm0, %v3752_v59, %v2247_v2  ;;  %v2306_v39 = vmul.f32 %v3754_v63, %v2305_v36  ;;  %v2229_v19 = vmul.f32 %v3758_v0, %v7744_v20  ;;  %vm2234_vm6 = vweird.f32 %v3758_v0 }
 0x23d   : > { %v3762_v47 = vpop.eup %3761  ;;  %v2256_v30 = vsel %vm7763_vm13, %v2255_v44, %v2251_v7  ;;  %v1351_v61 = vmul.f32 %v10016_v49, %v1300_v55  ;;  %v1158_v59 = vsel %vm673_vm12, %v7788_v43, %v7782_v40  ;;  %v7809_v44 = vpop.permute.xlu1 %1534  ;;  %v7815_v60 = vmul.f32 %v7786_v17, %v7738_v10  ;;  %vm7830_vm7 = vmor %vm2233_vm4, %vm2234_vm6 }
 0x23e   : > { %v2823_v32 = vmul.f32 %v7621_v45, %v2256_v30  ;;  %v2307_v14 = vadd.f32 %v3754_v63, %v2306_v39  ;;  %v2230_v5 = vsub.f32 1.0, %v2229_v19  ;;  %v7811_v50 = vadd.f32 1.0, %v3762_v47  ;;  %v10026_v39 = vld [vmem:[#allocation59_spill] sm:$0xff] }
 0x23f   : > { %v1399_v2 = vmul.f32 %v1351_v61, %v1158_v59  ;;  %3765 = vrcp.f32 %v7784_v37  ;;  %v7819_v36 = vmul.f32 -1.442695, %v7579_v3  ;;  %vm7834_vm9 = vcmp.eq.f32.partialorder %v2237_v34, 8.507059e+37 }
 0x240   : > { %v2874_v51 = vmul.f32 %v6961_v54, %v2823_v32  ;;  %v2311_v45 = vsel %vm7799_vm5, %v3754_v63, %v2307_v14  ;;  %v2231_v25 = vmul.f32 %v3758_v0, %v2230_v5  ;;  %3767 = vrcp.f32 %v7811_v50 }
 0x241   : > { %v3764_v55 = vpop.eup %3763  ;;  %v2316_v7 = vsel %vm7773_vm2, %v2315_v11, %v2311_v45  ;;  %v2240_v47 = vor.u32 1.1754944e-38, %v2239_v27  ;;  %v2282_v63 = vand.u32 2147483647, %v7784_v37  ;;  %v2297_v20 = vand.u32 2147483647, %v7811_v50 }
 0x242   : > { %v2922_v30 = vadd.f32 %v2874_v51, %v7732_v9  ;;  %v2827_v18 = vmul.f32 %v7679_v4, %v2316_v7  ;;  %v2232_v24 = vadd.f32 %v3758_v0, %v2231_v25  ;;  %v7841_v11 = vadd.f32 1.0, %v3764_v55  ;;  %v3962_v7 = vld [vmem:[%s4289_s28 + $0x108] sm:$0xff] }
 0x243   : > { %v2299_v49 = vand.u32 2147483648, %v7811_v50  ;;  %v2284_v61 = vand.u32 2147483648, %v7784_v37  ;;  %v7847_v34 = vadd.f32 %v1399_v2, %v7499_v21  ;;  %v7854_v4 = vadd.f32 %v7727_v57, %v7521_v13 }
 0x244   : > { %3098 = vmatmul.f32.gmra.mxu1 %v2922_v30  ;;  %v2878_v27 = vmul.f32 %v7170_v26, %v2827_v18  ;;  %v2236_v9 = vsel %vm7830_vm7, %v3758_v0, %v2232_v24  ;;  %3769 = vrcp.f32 %v7841_v11  ;;  %v2665_v32 = vsub.f32 1.0, %v7815_v60 }
 0x245   : > { %10021 = vst [vmem:[#allocation102_spill] sm:$0xff] %v7847_v34  ;;  %v3766_v59 = vpop.eup %3765  ;;  %v2241_v14 = vsel %vm7834_vm9, %v2240_v47, %v2236_v9  ;;  %vm2278_vm8 = vweird.f32 %v7784_v37  ;;  %vm7861_vm11 = vcmp.eq.f32.partialorder %v2282_v63, 8.507059e+37  ;;  %1546 = vrot.lane.b32.xlu1 %v7847_v34, %s4160_s18  ;;  %vm2293_vm10 = vweird.f32 %v7811_v50  ;;  %v3963_v47 = vld [vmem:[%s4289_s28 + $0x110] sm:$0xff] }
 0x246   : > { %v3768_v0 = vpop.eup %3767  ;;  %v2926_v13 = vadd.f32 %v2878_v27, %v7757_v28  ;;  %v2822_v57 = vmul.f32 %v7596_v33, %v2241_v14  ;;  %v2274_v5 = vmul.f32 %v3766_v59, %v7784_v37  ;;  %vm7872_vm14 = vcmp.eq.f32.partialorder %v2297_v20, 8.507059e+37  ;;  %v1074_v33 = vpop.permute.xlu1 %1073  ;;  %v10027_v63 = vld [vmem:[#allocation68_spill] sm:$0xff] }
 0x247   : > { %v2289_v60 = vmul.f32 %v3768_v0, %v7811_v50  ;;  %v2300_v51 = vor.u32 1.1754944e-38, %v2299_v49  ;;  %v2285_v45 = vor.u32 1.1754944e-38, %v2284_v61  ;;  %vm2653_vm15 = vweird.f32 %v7841_v11 }
 0x248   : > { %3166 = vmatmul.f32.gmra.mxu2 %v2926_v13  ;;  %v2873_v25 = vmul.f32 %v6938_v42, %v2822_v57  ;;  %v2275_v28 = vsub.f32 1.0, %v2274_v5  ;;  %vm2279_vm13 = vweird.f32 %v3766_v59  ;;  %vm2294_vm0 = vweird.f32 %v3768_v0  ;;  %v10030_v13 = vld [vmem:[#allocation46_spill] sm:$0xff] }
 0x249   : > { %v2290_v55 = vsub.f32 1.0, %v2289_v60  ;;  %v1298_v19 = vsub.f32 %v3962_v7, %v10026_v39  ;;  %v1299_v30 = vsub.f32 %v3963_v47, %v10027_v63  ;;  %v2657_v20 = vand.u32 2147483647, %v7841_v11  ;;  %vm7890_vm2 = vmor %vm2278_vm8, %vm2279_vm13  ;;  %v10033_v60 = vld [vmem:[#allocation116_spill] sm:$0xff]  ;;  %v7919_v47 = vld [vmem:[%s4289_s28 + $0x88] sm:$0xff] }
 0x24a   : > { %v3770_v18 = vpop.eup %3769  ;;  %v2921_v24 = vadd.f32 %v2873_v25, %v7761_v16  ;;  %v2659_v49 = vand.u32 2147483648, %v7841_v11  ;;  %v2276_v61 = vmul.f32 %v3766_v59, %v2275_v28  ;;  %v1126_v57 = vsel %vm673_vm12, %v1074_v33, %v7788_v43  ;;  %vm7901_vm3 = vmor %vm2293_vm10, %vm2294_vm0 }
 0x24b   : > { %v2291_v27 = vmul.f32 %v3768_v0, %v2290_v55  ;;  %v2649_v9 = vmul.f32 %v3770_v18, %v7841_v11  ;;  %v1349_v16 = vmul.f32 %v10030_v13, %v1298_v19  ;;  %v1350_v25 = vmul.f32 %v10033_v60, %v1299_v30 }
 0x24c   : > { %3033 = vmatmul.f32.gmra.mxu0 %v2921_v24  ;;  %v2277_v37 = vadd.f32 %v3766_v59, %v2276_v61  ;;  %v7908_v28 = vadd.f32 %v7655_v48, %v7269_v15  ;;  %3771 = vpow2.f32 %v7819_v36  ;;  %vm2654_vm4 = vweird.f32 %v3770_v18 }
 0x24d   : > { %v2292_v55 = vadd.f32 %v3768_v0, %v2291_v27  ;;  %v2650_v7 = vsub.f32 1.0, %v2649_v9  ;;  %v1142_v43 = vsel %vm673_vm12, %v7782_v40, %v1074_v33  ;;  %v1865_v50 = vadd.f32 %v7576_v62, %v7547_v46  ;;  %vm7930_vm5 = vmor %vm2653_vm15, %vm2654_vm4  ;;  %v10046_v46 = vld [vmem:[#allocation90_spill] sm:$0xff] }
 0x24e   : > { %v2281_v39 = vsel %vm7890_vm2, %v3766_v59, %v2277_v37  ;;  %v1398_v19 = vmul.f32 %v1350_v25, %v1126_v57  ;;  %v3404_v15 = vmul.f32 -1.442695, %v7919_v47  ;;  %v2660_v63 = vor.u32 1.1754944e-38, %v2659_v49  ;;  %v7947_v49 = vld [vmem:[%s4289_s28 + $0x80] sm:$0xff]  ;;  %v7967_v57 = vpop.permute.xlu2 %1536  ;;  %v10042_v25 = vld [vmem:[#allocation41_spill] sm:$0xff] }
 0x24f   : > { %v2296_v48 = vsel %vm7901_vm3, %v3768_v0, %v2292_v55  ;;  %v2651_v36 = vmul.f32 %v3770_v18, %v2650_v7  ;;  %v2286_v30 = vsel %vm7861_vm11, %v2285_v45, %v2281_v39  ;;  %v1397_v59 = vmul.f32 %v1349_v16, %v1142_v43  ;;  %v10043_v7 = vld [vmem:[#allocation98_spill] sm:$0xff] }
 0x250   : > { %v2301_v40 = vsel %vm7872_vm14, %v2300_v51, %v2296_v48  ;;  %v2825_v62 = vmul.f32 %v7508_v31, %v2286_v30  ;;  %3773 = vpow2.f32 %v3404_v15  ;;  %v2666_v0 = vmul.f32 %v7786_v17, %v2665_v32  ;;  %v10044_v15 = vld [vmem:[#allocation73_spill] sm:$0xff] }
 0x251   : > { %v2826_v33 = vmul.f32 %v7674_v29, %v2301_v40  ;;  %v2652_v21 = vadd.f32 %v3770_v18, %v2651_v36  ;;  %vm2658_vm6 = vcmp.eq.f32.partialorder %v2657_v20, 8.507059e+37  ;;  %vm2669_vm7 = vweird.f32 %v7786_v17  ;;  %v10045_v36 = vld [vmem:[#allocation97_spill] sm:$0xff] }
 0x252   : > { %v3772_v45 = vpop.eup %3771  ;;  %v2672_v11 = vand.u32 2147483647, %v7738_v10  ;;  %v2876_v2 = vmul.f32 %v6938_v42, %v2825_v62  ;;  %v7941_v51 = vadd.f32 %v1398_v19, %v7550_v1  ;;  %v3403_v29 = vmul.f32 -1.442695, %v7947_v49  ;;  %vm7963_vm9 = vmor %vm2668_vm1, %vm2669_vm7 }
 0x253   : > { %v2877_v31 = vmul.f32 %v6961_v54, %v2826_v33  ;;  %v2656_v24 = vsel %vm7930_vm5, %v3770_v18, %v2652_v21  ;;  %v2085_v32 = vadd.f32 1.0, %v3772_v45  ;;  %v2674_v20 = vand.u32 2147483648, %v7738_v10  ;;  %v10047_v33 = vld [vmem:[#allocation69_spill] sm:$0xff] }
 0x254   : > { %10036 = vst [vmem:[#allocation57_spill] sm:$0xff] %v7941_v51  ;;  %v2661_v61 = vsel %vm2658_vm6, %v2660_v63, %v2656_v24  ;;  %v2924_v27 = vadd.f32 %v2876_v2, %v1865_v50  ;;  %1514 = vrot.lane.b32.xlu2 %v7941_v51, %s4160_s18  ;;  %v7954_v1 = vadd.f32 %v1397_v59, %v7502_v38  ;;  %vm2673_vm8 = vcmp.eq.f32.partialorder %v2672_v11, 8.507059e+37  ;;  %v8006_v45 = vld [vmem:[%s4289_s28 + $0x78] sm:$0xff]  ;;  %v8588_v51 = vld [vmem:[%s4289_s28 + $0xf0] sm:$0xff] }
 0x255   : > { %v2667_v9 = vadd.f32 %v7786_v17, %v2666_v0  ;;  %v2925_v14 = vadd.f32 %v2877_v31, %v7854_v4  ;;  %v2850_v18 = vmul.f32 %v7664_v35, %v2661_v61  ;;  %3775 = vrcp.f32 %v2085_v32  ;;  %v10040_v35 = vld [vmem:[#allocation29_spill] sm:$0xff]  ;;  %v10049_v61 = vld [vmem:[#allocation128_spill] sm:$0xff] }
 0x256   : > { %10037 = vst [vmem:[#allocation106_spill] sm:$0xff] %v7954_v1  ;;  %v3774_v13 = vpop.eup %3773  ;;  %3036 = vmatmul.f32.gmra.mxu0 %v2924_v27  ;;  %1482 = vrot.lane.b32.xlu0 %v7954_v1, %s4160_s18  ;;  %v1624_v4 = vmul.f32 %v6456_v58, %v10040_v35  ;;  %3777 = vpow2.f32 %v3403_v29  ;;  %v10041_v10 = vsub.f32 %v7647_v12, %v6874_v53  ;;  %v2675_v60 = vor.u32 1.1754944e-38, %v2674_v20  ;;  %v10048_v24 = vld [vmem:[#allocation121_spill] sm:$0xff] }
 0x257   : > { %3101 = vmatmul.f32.gmra.mxu1 %v2925_v14  ;;  %v2901_v38 = vmul.f32 %v6961_v54, %v2850_v18  ;;  %v7974_v5 = vadd.f32 1.0, %v3774_v13  ;;  %v1623_v55 = vmul.f32 %v9921_v8, %v10042_v25  ;;  %v1622_v43 = vmul.f32 %v6550_v52, %v10043_v7  ;;  %v8020_v14 = vpop.permute.xlu2 %1474  ;;  %v10054_v7 = vld [vmem:[#allocation107_spill] sm:$0xff] }
 0x258   : > { %v1798_v37 = vmul.f32 %v6876_v6, %v10041_v10  ;;  %v2671_v50 = vsel %vm7963_vm9, %v7786_v17, %v2667_v9  ;;  %v1723_v19 = vsub.f32 %v7919_v47, %v6874_v53  ;;  %v7992_v48 = vmul.f32 %v1624_v4, %v10044_v15  ;;  %v10056_v15 = vld [vmem:[#allocation122_spill] sm:$0xff] }
 0x259   : > { %v2949_v39 = vadd.f32 %v2901_v38, %v7742_v22  ;;  %3779 = vrcp.f32 %v7974_v5  ;;  %v1650_v63 = vmul.f32 %v9921_v8, %v10045_v36  ;;  %v2676_v17 = vsel %vm2673_vm8, %v2675_v60, %v2671_v50  ;;  %v1503_v60 = vpop.permute.xlu0 %1502  ;;  %v10055_v50 = vld [vmem:[#allocation51_spill] sm:$0xff] }
 0x25a   : > { %v7997_v30 = vmul.f32 %v1798_v37, %v7485_v41  ;;  %v8000_v22 = vmul.f32 %v1623_v55, %v10046_v46  ;;  %v2702_v59 = vand.u32 2147483647, %v2085_v32  ;;  %v2704_v0 = vand.u32 2147483648, %v2085_v32 }
 0x25b   : > { %v3776_v12 = vpop.eup %3775  ;;  %3125 = vmatmul.f32.vlgmr.msrb.gmra.mxu3 %v2949_v39  ;;  %v8003_v21 = vmul.f32 %v1622_v43, %v10047_v33  ;;  %v3402_v11 = vmul.f32 -1.442695, %v8006_v45  ;;  %vm2698_vm11 = vweird.f32 %v2085_v32  ;;  %v2851_v29 = vmul.f32 %v10048_v24, %v2676_v17 }
 0x25c   : > { %v2694_v40 = vmul.f32 %v3776_v12, %v2085_v32  ;;  %v3778_v62 = vpop.eup %3777  ;;  %vm2699_vm10 = vweird.f32 %v3776_v12  ;;  %v1774_v20 = vmul.f32 %v6876_v6, %v1723_v19  ;;  %v8014_v27 = vmul.f32 %v1650_v63, %v10049_v61  ;;  %v8043_v19 = vld [vmem:[%s4289_s28 + $0xa8] sm:$0xff] }
 0x25d   : > { %v8009_v41 = vadd.f32 1.0, %v3778_v62  ;;  %3781 = vpow2.f32 %v3402_v11  ;;  %v1593_v9 = vsel %vm673_vm12, %v7809_v44, %v7735_v56  ;;  %vm8024_vm14 = vmor %vm2698_vm11, %vm2699_vm10  ;;  %vm8028_vm15 = vcmp.eq.f32.partialorder %v2702_v59, 8.507059e+37  ;;  %v10061_v59 = vld [vmem:[#allocation109_spill] sm:$0xff] }
 0x25e   : > { %v2695_v2 = vsub.f32 1.0, %v2694_v40  ;;  %v2705_v38 = vor.u32 1.1754944e-38, %v2704_v0  ;;  %vm2353_vm13 = vweird.f32 %v7974_v5  ;;  %v2359_v35 = vand.u32 2147483648, %v7974_v5 }
 0x25f   : > { %v3780_v31 = vpop.eup %3779  ;;  %3783 = vrcp.f32 %v8009_v41  ;;  %v2357_v37 = vand.u32 2147483647, %v7974_v5  ;;  %v2902_v25 = vmul.f32 %v7170_v26, %v2851_v29  ;;  %v1822_v55 = vmul.f32 %v1774_v20, %v1593_v9 }
 0x260   : > { %v2696_v32 = vmul.f32 %v3776_v12, %v2695_v2  ;;  %v2349_v18 = vmul.f32 %v3780_v31, %v7974_v5  ;;  %vm2354_vm0 = vweird.f32 %v3780_v31  ;;  %v1722_v43 = vsub.f32 %v7947_v49, %v10054_v7  ;;  %v10059_v5 = vld [vmem:[#allocation134_spill] sm:$0xff] }
 0x261   : > { %v8040_v39 = vmul.f32 %v6456_v58, %v10055_v50  ;;  %v1727_v36 = vsub.f32 %v8043_v19, %v10056_v15  ;;  %v1721_v40 = vsub.f32 %v8006_v45, %v10056_v15  ;;  %vm8055_vm1 = vmor %vm2353_vm13, %vm2354_vm0  ;;  %v2360_v0 = vor.u32 1.1754944e-38, %v2359_v35 }
 0x262   : > { %v2697_v4 = vadd.f32 %v3776_v12, %v2696_v32  ;;  %v2350_v10 = vsub.f32 1.0, %v2349_v18  ;;  %v1561_v33 = vsel %vm673_vm12, %v1503_v60, %v7809_v44  ;;  %vm2358_vm2 = vcmp.eq.f32.partialorder %v2357_v37, 8.507059e+37  ;;  %v8084_v37 = vld [vmem:[%s4289_s28 + $0xa0] sm:$0xff] }
 0x263   : > { %v3782_v46 = vpop.eup %3781  ;;  %v1773_v61 = vmul.f32 %v10059_v5, %v1722_v43  ;;  %vm2338_vm3 = vweird.f32 %v8009_v41  ;;  %v2344_v18 = vand.u32 2147483648, %v8009_v41  ;;  %v2342_v16 = vand.u32 2147483647, %v8009_v41  ;;  %v10060_v43 = vld [vmem:[#allocation74_spill] sm:$0xff] }
 0x264   : > { %v2701_v63 = vsel %vm8024_vm14, %v3776_v12, %v2697_v4  ;;  %v2351_v17 = vmul.f32 %v3780_v31, %v2350_v10  ;;  %v8063_v12 = vld [vmem:[%s4289_s28 + $0x158] sm:$0xff]  ;;  %v8067_v20 = vadd.f32 1.0, %v3782_v46  ;;  %v1870_v4 = vadd.f32 %v1822_v55, %v7992_v48  ;;  %v8092_v46 = vpop.permute.xlu1 %1472 }
 0x265   : > { %v2706_v62 = vsel %vm8028_vm15, %v2705_v38, %v2701_v63  ;;  %v3430_v11 = vmul.f32 -1.442695, %v8063_v12  ;;  %v3784_v2 = vpop.eup %3783  ;;  %v8078_v38 = vpop.permute.xlu2 %1506  ;;  %v8088_v50 = vadd.f32 %v2902_v25, %v10060_v43  ;;  %v1821_v63 = vmul.f32 %v1773_v61, %v1561_v33 }
 0x266   : > { %v2853_v24 = vmul.f32 %v7579_v3, %v2706_v62  ;;  %v2352_v29 = vadd.f32 %v3780_v31, %v2351_v17  ;;  %v2334_v9 = vmul.f32 %v3784_v2, %v8009_v41  ;;  %vm2339_vm4 = vweird.f32 %v3784_v2 }
 0x267   : > { %3785 = vpow2.f32 %v3430_v11  ;;  %v1726_v17 = vsub.f32 %v8084_v37, %v6874_v53  ;;  %vm8099_vm5 = vmor %vm2338_vm3, %vm2339_vm4  ;;  %v2345_v25 = vor.u32 1.1754944e-38, %v2344_v18  ;;  %vm2343_vm6 = vcmp.eq.f32.partialorder %v2342_v16, 8.507059e+37 }
 0x268   : > { %v2904_v44 = vmul.f32 %v6961_v54, %v2853_v24  ;;  %v2356_v32 = vsel %vm8055_vm1, %v3780_v31, %v2352_v29  ;;  %3787 = vrcp.f32 %v8067_v20  ;;  %v2335_v13 = vsub.f32 1.0, %v2334_v9 }
 0x269   : > { %v2361_v3 = vsel %vm2358_vm2, %v2360_v0, %v2356_v32  ;;  %v3407_v31 = vmul.f32 -1.442695, %v8084_v37  ;;  %v1579_v0 = vsel %vm673_vm12, %v8020_v14, %v8078_v38  ;;  %v1577_v41 = vsel %vm673_vm12, %v7735_v56, %v1503_v60 }
 0x26a   : > { %v2952_v35 = vadd.f32 %v2904_v44, %v7908_v28  ;;  %v2830_v10 = vmul.f32 %v7919_v47, %v2361_v3  ;;  %v2336_v62 = vmul.f32 %v3784_v2, %v2335_v13  ;;  %v1778_v28 = vmul.f32 %v10061_v59, %v1727_v36  ;;  %v1553_v3 = vpop.permute.xlu0 %1552 }
 0x26b   : > { %3789 = vpow2.f32 %v3407_v31  ;;  %v1772_v36 = vmul.f32 %v10061_v59, %v1721_v40  ;;  %v1594_v29 = vsel %vm673_vm12, %v7967_v57, %v8092_v46  ;;  %v1777_v9 = vmul.f32 %v6876_v6, %v1726_v17 }
 0x26c   : > { %3128 = vmatmul.f32.gmra.mxu3 %v2952_v35  ;;  %v2881_v48 = vmul.f32 %v7170_v26, %v2830_v10  ;;  %v2337_v33 = vadd.f32 %v3784_v2, %v2336_v62  ;;  %v1869_v44 = vadd.f32 %v1821_v63, %v8000_v22  ;;  %vm2323_vm7 = vweird.f32 %v8067_v20  ;;  %v8132_v10 = vld [vmem:[%s4289_s28 + $0x160] sm:$0xff]  ;;  %v10064_v63 = vld [vmem:[#allocation79_spill] sm:$0xff] }
 0x26d   : > { %v3786_v55 = vpop.eup %3785  ;;  %v2329_v56 = vand.u32 2147483648, %v8067_v20  ;;  %v2327_v22 = vand.u32 2147483647, %v8067_v20  ;;  %v8127_v16 = vmul.f32 %v1778_v28, %v1579_v0  ;;  %v1820_v35 = vmul.f32 %v1772_v36, %v1577_v41  ;;  %v8155_v0 = vld [vmem:[%s4289_s28 + $0x98] sm:$0xff] }
 0x26e   : > { %v3788_v11 = vpop.eup %3787  ;;  %v2929_v24 = vadd.f32 %v2881_v48, %v1870_v4  ;;  %v8115_v61 = vadd.f32 1.0, %v3786_v55  ;;  %v2341_v40 = vsel %vm8099_vm5, %v3784_v2, %v2337_v33  ;;  %v1749_v4 = vsub.f32 %v8063_v12, %v10054_v7  ;;  %v10065_v48 = vld [vmem:[#allocation27_spill] sm:$0xff] }
 0x26f   : > { %v2319_v32 = vmul.f32 %v3788_v11, %v8067_v20  ;;  %v2346_v18 = vsel %vm2343_vm6, %v2345_v25, %v2341_v40  ;;  %vm2324_vm9 = vweird.f32 %v3788_v11  ;;  %v1750_v31 = vsub.f32 %v8132_v10, %v6874_v53 }
 0x270   : > { %3169 = vmatmul.f32.gmra.mxu2 %v2929_v24  ;;  %3791 = vrcp.f32 %v8115_v61  ;;  %v2829_v60 = vmul.f32 %v7947_v49, %v2346_v18  ;;  %v8139_v17 = vmul.f32 %v8040_v39, %v10064_v63  ;;  %v8143_v28 = vmul.f32 %v1777_v9, %v1594_v29  ;;  %vm8150_vm8 = vmor %vm2323_vm7, %vm2324_vm9  ;;  %v10068_v29 = vld [vmem:[#allocation55_spill] sm:$0xff] }
 0x271   : > { %v2320_v13 = vsub.f32 1.0, %v2319_v32  ;;  %v3790_v2 = vpop.eup %3789  ;;  %v1570_v47 = vsel %vm673_vm12, %v10065_v48, %v1553_v3  ;;  %v2330_v55 = vor.u32 1.1754944e-38, %v2329_v56  ;;  %v3406_v39 = vmul.f32 -1.442695, %v8155_v0  ;;  %v8168_v32 = vld [vmem:[%s4289_s28 + $0x90] sm:$0xff] }
 0x272   : > { %v2880_v49 = vmul.f32 %v6961_v54, %v2829_v60  ;;  %v8141_v62 = vadd.f32 1.0, %v3790_v2  ;;  %vm2328_vm11 = vcmp.eq.f32.partialorder %v2327_v22, 8.507059e+37  ;;  %v1800_v41 = vmul.f32 %v10059_v5, %v1749_v4 }
 0x273   : > { %v2321_v43 = vmul.f32 %v3788_v11, %v2320_v13  ;;  %v1801_v20 = vmul.f32 %v6876_v6, %v1750_v31  ;;  %v1602_v9 = vsel %vm673_vm12, %v1553_v3, %v10068_v29  ;;  %v1868_v40 = vadd.f32 %v1820_v35, %v8003_v21  ;;  %v10069_v31 = vld [vmem:[#allocation54_spill] sm:$0xff] }
 0x274   : > { %v2928_v36 = vadd.f32 %v2880_v49, %v1869_v44  ;;  %3793 = vrcp.f32 %v8141_v62  ;;  %v1724_v18 = vsub.f32 %v8168_v32, %v10056_v15  ;;  %vm2743_vm10 = vweird.f32 %v8115_v61 }
 0x275   : > { %v2322_v33 = vadd.f32 %v3788_v11, %v2321_v43  ;;  %3795 = vpow2.f32 %v3406_v39  ;;  %v2747_v13 = vand.u32 2147483647, %v8115_v61  ;;  %v2749_v3 = vand.u32 2147483648, %v8115_v61  ;;  %v10070_v43 = vld [vmem:[#allocation32_spill] sm:$0xff]  ;;  %v1505_v39 = vpop.permute.xlu1 %1504 }
 0x276   : > { %v3792_v24 = vpop.eup %3791  ;;  %3104 = vmatmul.f32.gmra.mxu1 %v2928_v36  ;;  %v1848_v35 = vmul.f32 %v1800_v41, %v1570_v47  ;;  %v1725_v4 = vsub.f32 %v8155_v0, %v10054_v7  ;;  %v1626_v49 = vmul.f32 %v9921_v8, %v10069_v31  ;;  %v1630_v63 = vmul.f32 %v6456_v58, %v10070_v43 }
 0x277   : > { %v2326_v44 = vsel %vm8150_vm8, %v3788_v11, %v2322_v33  ;;  %v2739_v56 = vmul.f32 %v3792_v24, %v8115_v61  ;;  %vm2744_vm14 = vweird.f32 %v3792_v24  ;;  %v8178_v11 = vld [vmem:[%s4289_s28 + $0xb8] sm:$0xff]  ;;  %vm8195_vm13 = vcmp.eq.f32.partialorder %v2747_v13, 8.507059e+37 }
 0x278   : > { %v2331_v60 = vsel %vm2328_vm11, %v2330_v55, %v2326_v44  ;;  %v3410_v2 = vmul.f32 -1.442695, %v8178_v11  ;;  %vm8191_vm15 = vmor %vm2743_vm10, %vm2744_vm14  ;;  %v2750_v33 = vor.u32 1.1754944e-38, %v2749_v3  ;;  %vm2398_vm0 = vweird.f32 %v8141_v62 }
 0x279   : > { %v2828_v21 = vmul.f32 %v8006_v45, %v2331_v60  ;;  %v2740_v22 = vsub.f32 1.0, %v2739_v56  ;;  %v1775_v45 = vmul.f32 %v10061_v59, %v1724_v18  ;;  %v2404_v56 = vand.u32 2147483648, %v8141_v62 }
 0x27a   : > { %v3794_v48 = vpop.eup %3793  ;;  %3797 = vpow2.f32 %v3410_v2  ;;  %v3405_v61 = vmul.f32 -1.442695, %v8168_v32  ;;  %v1776_v3 = vmul.f32 %v10059_v5, %v1725_v4  ;;  %v1578_v2 = vsel %vm673_vm12, %v8092_v46, %v1505_v39  ;;  %v10077_v46 = vld [vmem:[#allocation38_spill] sm:$0xff] }
 0x27b   : > { %v2879_v25 = vmul.f32 %v6938_v42, %v2828_v21  ;;  %v2741_v55 = vmul.f32 %v3792_v24, %v2740_v22  ;;  %v2394_v41 = vmul.f32 %v3794_v48, %v8141_v62  ;;  %v3796_v29 = vpop.eup %3795  ;;  %vm2399_vm1 = vweird.f32 %v3794_v48 }
 0x27c   : > { %v2402_v21 = vand.u32 2147483647, %v8141_v62  ;;  %v8204_v13 = vadd.f32 1.0, %v3796_v29  ;;  %v1562_v22 = vsel %vm673_vm12, %v1505_v39, %v7967_v57  ;;  %3799 = vpow2.f32 %v3405_v61  ;;  %vm8223_vm2 = vmor %vm2398_vm0, %vm2399_vm1  ;;  %v1539_v29 = vpop.permute.xlu0 %1538 }
 0x27d   : > { %v2927_v44 = vadd.f32 %v2879_v25, %v1868_v40  ;;  %v2742_v18 = vadd.f32 %v3792_v24, %v2741_v55  ;;  %v2395_v60 = vsub.f32 1.0, %v2394_v41  ;;  %v1896_v4 = vadd.f32 %v1848_v35, %v8014_v27 }
 0x27e   : > { %3801 = vrcp.f32 %v8204_v13  ;;  %v1625_v39 = vmul.f32 %v6550_v52, %v10077_v46  ;;  %v8229_v47 = vmul.f32 %v1801_v20, %v1602_v9  ;;  %vm2403_vm3 = vcmp.eq.f32.partialorder %v2402_v21, 8.507059e+37  ;;  %v10079_v9 = vld [vmem:[#allocation132_spill] sm:$0xff] }
 0x27f   : > { %3039 = vmatmul.f32.gmra.mxu0 %v2927_v44  ;;  %v2746_v40 = vsel %vm8191_vm15, %v3792_v24, %v2742_v18  ;;  %v2396_v43 = vmul.f32 %v3794_v48, %v2395_v60  ;;  %v2405_v24 = vor.u32 1.1754944e-38, %v2404_v56  ;;  %v8233_v27 = vmul.f32 %v1775_v45, %v1578_v2  ;;  %v10078_v44 = vld [vmem:[#allocation22_spill] sm:$0xff]  ;;  %v10080_v21 = vld [vmem:[#allocation120_spill] sm:$0xff] }
 0x280   : > { %v2751_v31 = vsel %vm8195_vm13, %v2750_v33, %v2746_v40  ;;  %v3798_v25 = vpop.eup %3797  ;;  %v1729_v62 = vsub.f32 %v8178_v11, %v6874_v53  ;;  %v1674_v20 = vmul.f32 %v1626_v49, %v10078_v44  ;;  %v8242_v18 = vmul.f32 %v1630_v63, %v10079_v9  ;;  %v10081_v49 = vld [vmem:[#allocation47_spill] sm:$0xff]  ;;  %v10082_v2 = vld [vmem:[#allocation20_spill] sm:$0xff] }
 0x281   : > { %v2856_v55 = vmul.f32 %v8063_v12, %v2751_v31  ;;  %v2397_v36 = vadd.f32 %v3794_v48, %v2396_v43  ;;  %v8231_v33 = vadd.f32 1.0, %v3798_v25  ;;  %v1824_v12 = vmul.f32 %v1776_v3, %v1562_v22  ;;  %v8262_v43 = vld [vmem:[%s4289_s28 + $0xb0] sm:$0xff] }
 0x282   : > { %v3800_v45 = vpop.eup %3799  ;;  %v1873_v61 = vadd.f32 %v8143_v28, %v8139_v17  ;;  %v8248_v3 = vmul.f32 %v1625_v39, %v10080_v21  ;;  %v8255_v63 = vmul.f32 %v9921_v8, %v10081_v49  ;;  %v8259_v31 = vmul.f32 %v9921_v8, %v10082_v2  ;;  %v8283_v44 = vld [vmem:[%s4289_s28 + $0x170] sm:$0xff] }
 0x283   : > { %v2907_v35 = vmul.f32 %v6961_v54, %v2856_v55  ;;  %v2401_v41 = vsel %vm8223_vm2, %v3794_v48, %v2397_v36  ;;  %3803 = vrcp.f32 %v8231_v33  ;;  %v8251_v40 = vadd.f32 1.0, %v3800_v45 }
 0x284   : > { %v2406_v60 = vsel %vm2403_vm3, %v2405_v24, %v2401_v41  ;;  %v3802_v22 = vpop.eup %3801  ;;  %v1728_v17 = vsub.f32 %v8262_v43, %v10054_v7  ;;  %v1780_v28 = vmul.f32 %v6876_v6, %v1729_v62  ;;  %v2387_v55 = vand.u32 2147483647, %v8204_v13 }
 0x285   : > { %v2955_v56 = vadd.f32 %v2907_v35, %v1896_v4  ;;  %v2833_v48 = vmul.f32 %v8084_v37, %v2406_v60  ;;  %v1595_v37 = vsel %vm673_vm12, %v1539_v29, %v8020_v14  ;;  %v2379_v25 = vmul.f32 %v3802_v22, %v8204_v13 }
 0x286   : > { %v2389_v57 = vand.u32 2147483648, %v8204_v13  ;;  %3805 = vrcp.f32 %v8251_v40  ;;  %vm2383_vm4 = vweird.f32 %v8204_v13  ;;  %vm2384_vm5 = vweird.f32 %v3802_v22 }
 0x287   : > { %3131 = vmatmul.f32.gmra.mxu3 %v2955_v56  ;;  %v2884_v4 = vmul.f32 %v7170_v26, %v2833_v48  ;;  %v2380_v24 = vsub.f32 1.0, %v2379_v25  ;;  %v3409_v46 = vmul.f32 -1.442695, %v8262_v43  ;;  %v1563_v14 = vsel %vm673_vm12, %v8078_v38, %v1539_v29  ;;  %vm8288_vm6 = vmor %vm2383_vm4, %vm2384_vm5  ;;  %v8326_v38 = vld [vmem:[%s4289_s28 + $0xc0] sm:$0xff] }
 0x288   : > { %v2447_v35 = vand.u32 2147483647, %v8231_v33  ;;  %v2449_v62 = vand.u32 2147483648, %v8231_v33  ;;  %v1828_v41 = vmul.f32 %v1780_v28, %v1595_v37  ;;  %v1752_v9 = vsub.f32 %v8283_v44, %v10054_v7 }
 0x289   : > { %v3804_v39 = vpop.eup %3803  ;;  %v2932_v36 = vadd.f32 %v2884_v4, %v1873_v61  ;;  %v2381_v13 = vmul.f32 %v3802_v22, %v2380_v24  ;;  %vm8292_vm7 = vcmp.eq.f32.partialorder %v2387_v55, 8.507059e+37  ;;  %v2390_v29 = vor.u32 1.1754944e-38, %v2389_v57 }
 0x28a   : > { %v2439_v45 = vmul.f32 %v3804_v39, %v8231_v33  ;;  %3807 = vpow2.f32 %v3409_v46  ;;  %v3433_v61 = vmul.f32 -1.442695, %v8283_v44  ;;  %vm2443_vm9 = vweird.f32 %v8231_v33 }
 0x28b   : > { %3172 = vmatmul.f32.gmra.mxu2 %v2932_v36  ;;  %v2382_v60 = vadd.f32 %v3802_v22, %v2381_v13  ;;  %vm2444_vm8 = vweird.f32 %v3804_v39  ;;  %v1872_v49 = vadd.f32 %v1824_v12, %v1674_v20  ;;  %vm8298_vm11 = vcmp.eq.f32.partialorder %v2447_v35, 8.507059e+37  ;;  %v10095_v12 = vld [vmem:[#allocation64_spill] sm:$0xff] }
 0x28c   : > { %v2440_v21 = vsub.f32 1.0, %v2439_v45  ;;  %v3806_v48 = vpop.eup %3805  ;;  %v2450_v28 = vor.u32 1.1754944e-38, %v2449_v62  ;;  %3809 = vpow2.f32 %v3433_v61  ;;  %vm2368_vm10 = vweird.f32 %v8251_v40  ;;  %vm8308_vm14 = vmor %vm2443_vm9, %vm2444_vm8  ;;  %v8318_v62 = vld [vmem:[%s4289_s28 + $0x178] sm:$0xff]  ;;  %v8322_v45 = vpop.permute.xlu1 %1554 }
 0x28d   : > { %v2386_v37 = vsel %vm8288_vm6, %v3802_v22, %v2382_v60  ;;  %v2364_v4 = vmul.f32 %v3806_v48, %v8251_v40  ;;  %vm2369_vm15 = vweird.f32 %v3806_v48  ;;  %v2372_v20 = vand.u32 2147483647, %v8251_v40 }
 0x28e   : > { %v2441_v25 = vmul.f32 %v3804_v39, %v2440_v21  ;;  %v2391_v33 = vsel %vm8292_vm7, %v2390_v29, %v2386_v37  ;;  %v2374_v55 = vand.u32 2147483648, %v8251_v40  ;;  %v3408_v46 = vmul.f32 -1.442695, %v8043_v19  ;;  %vm8340_vm13 = vmor %vm2368_vm10, %vm2369_vm15 }
 0x28f   : > { %v2832_v22 = vmul.f32 %v8155_v0, %v2391_v33  ;;  %v2365_v24 = vsub.f32 1.0, %v2364_v4  ;;  %v1779_v35 = vmul.f32 %v10059_v5, %v1728_v17  ;;  %v1876_v56 = vadd.f32 %v1828_v41, %v8242_v18  ;;  %v8349_v33 = vpop.permute.xlu0 %1476  ;;  %v10098_v18 = vld [vmem:[#allocation99_spill] sm:$0xff] }
 0x290   : > { %v2442_v57 = vadd.f32 %v3804_v39, %v2441_v25  ;;  %v3808_v36 = vpop.eup %3807  ;;  %v1730_v0 = vsub.f32 %v8326_v38, %v10056_v15  ;;  %vm8344_vm0 = vcmp.eq.f32.partialorder %v2372_v20, 8.507059e+37  ;;  %v2375_v25 = vor.u32 1.1754944e-38, %v2374_v55 }
 0x291   : > { %v2883_v29 = vmul.f32 %v6961_v54, %v2832_v22  ;;  %v2366_v17 = vmul.f32 %v3806_v48, %v2365_v24  ;;  %v8333_v60 = vadd.f32 1.0, %v3808_v36  ;;  %3811 = vpow2.f32 %v3408_v46  ;;  %v10097_v24 = vld [vmem:[#allocation108_spill] sm:$0xff] }
 0x292   : > { %v2446_v61 = vsel %vm8308_vm14, %v3804_v39, %v2442_v57  ;;  %v3810_v21 = vpop.eup %3809  ;;  %v1803_v40 = vmul.f32 %v10059_v5, %v1752_v9  ;;  %v1571_v20 = vsel %vm673_vm12, %v10095_v12, %v8322_v45  ;;  %v10096_v57 = vld [vmem:[#allocation25_spill] sm:$0xff]  ;;  %v1648_v9 = vmul.f32 %v6456_v58, %v10097_v24 }
 0x293   : > { %v2451_v37 = vsel %vm8298_vm11, %v2450_v28, %v2446_v61  ;;  %v2931_v39 = vadd.f32 %v2883_v29, %v1872_v49  ;;  %v2367_v2 = vadd.f32 %v3806_v48, %v2366_v17  ;;  %3813 = vrcp.f32 %v8333_v60  ;;  %v1509_v49 = vpop.permute.xlu2 %1508  ;;  %v8379_v17 = vld [vmem:[%s4289_s28 + $0xc8] sm:$0xff] }
 0x294   : > { %v2836_v4 = vmul.f32 %v8178_v11, %v2451_v37  ;;  %v8352_v28 = vmul.f32 %v1779_v35, %v1563_v14  ;;  %v8359_v55 = vadd.f32 1.0, %v3810_v21  ;;  %v1628_v14 = vmul.f32 %v6550_v52, %v10096_v57  ;;  %v10102_v57 = vld [vmem:[#allocation92_spill] sm:$0xff] }
 0x295   : > { %3107 = vmatmul.f32.gmra.mxu1 %v2931_v39  ;;  %v2371_v22 = vsel %vm8340_vm13, %v3806_v48, %v2367_v2  ;;  %v1781_v46 = vmul.f32 %v10061_v59, %v1730_v0  ;;  %v1580_v36 = vsel %vm673_vm12, %v8349_v33, %v1509_v49  ;;  %v1871_v48 = vadd.f32 %v8233_v27, %v8248_v3 }
 0x296   : > { %v2887_v11 = vmul.f32 %v7170_v26, %v2836_v4  ;;  %v2376_v35 = vsel %vm8344_vm0, %v2375_v25, %v2371_v22  ;;  %3815 = vrcp.f32 %v8359_v55  ;;  %v1731_v0 = vsub.f32 %v8379_v17, %v10054_v7  ;;  %v10099_v25 = vld [vmem:[#allocation45_spill] sm:$0xff]  ;;  %v8397_v4 = vld [vmem:[%s4289_s28 + $0xd0] sm:$0xff] }
 0x297   : > { %v2831_v61 = vmul.f32 %v8168_v32, %v2376_v35  ;;  %v3812_v21 = vpop.eup %3811  ;;  %v8383_v37 = vmul.f32 %v1803_v40, %v1571_v20  ;;  %v1677_v41 = vmul.f32 %v8255_v63, %v10098_v18  ;;  %v8389_v39 = vmul.f32 %v8259_v31, %v10099_v25  ;;  %v10101_v40 = vld [vmem:[#allocation131_spill] sm:$0xff]  ;;  %v1541_v20 = vpop.permute.xlu1 %1540 }
 0x298   : > { %v2935_v29 = vadd.f32 %v2887_v11, %v1876_v56  ;;  %v10100_v56 = vld [vmem:[#allocation18_spill] sm:$0xff]  ;;  %v1732_v2 = vsub.f32 %v8397_v4, %v6874_v53  ;;  %v8402_v12 = vmul.f32 %v1628_v14, %v10101_v40  ;;  %v8404_v63 = vadd.f32 1.0, %v3812_v21 }
 0x299   : > { %v8393_v27 = vmul.f32 %v6456_v58, %v10100_v56  ;;  %v3814_v32 = vpop.eup %3813  ;;  %v2882_v3 = vmul.f32 %v6938_v42, %v2831_v61  ;;  %v8406_v31 = vmul.f32 %v1781_v46, %v1580_v36  ;;  %v2434_v22 = vand.u32 2147483648, %v8333_v60 }
 0x29a   : > { %3175 = vmatmul.f32.gmra.mxu2 %v2935_v29  ;;  %v2424_v11 = vmul.f32 %v3814_v32, %v8333_v60  ;;  %v8411_v24 = vmul.f32 %v1648_v9, %v10102_v57  ;;  %v1782_v29 = vmul.f32 %v10059_v5, %v1731_v0  ;;  %vm2428_vm1 = vweird.f32 %v8333_v60 }
 0x29b   : > { %v2930_v35 = vadd.f32 %v2882_v3, %v1871_v48  ;;  %3817 = vrcp.f32 %v8404_v63  ;;  %vm2429_vm2 = vweird.f32 %v3814_v32  ;;  %v2432_v46 = vand.u32 2147483647, %v8333_v60 }
 0x29c   : > { %v3816_v14 = vpop.eup %3815  ;;  %v2425_v61 = vsub.f32 1.0, %v2424_v11  ;;  %v3412_v36 = vmul.f32 -1.442695, %v8379_v17  ;;  %v1783_v21 = vmul.f32 %v6876_v6, %v1732_v2  ;;  %v1564_v9 = vsel %vm673_vm12, %v1509_v49, %v1541_v20  ;;  %vm8426_vm3 = vmor %vm2428_vm1, %vm2429_vm2 }
 0x29d   : > { %3042 = vmatmul.f32.gmra.mxu0 %v2930_v35  ;;  %v2784_v48 = vmul.f32 %v3816_v14, %v8359_v55  ;;  %v2792_v0 = vand.u32 2147483647, %v8359_v55  ;;  %v2435_v25 = vor.u32 1.1754944e-38, %v2434_v22  ;;  %v2794_v56 = vand.u32 2147483648, %v8359_v55 }
 0x29e   : > { %v2426_v18 = vmul.f32 %v3814_v32, %v2425_v61  ;;  %3819 = vpow2.f32 %v3412_v36  ;;  %vm2788_vm4 = vweird.f32 %v8359_v55  ;;  %vm2789_vm5 = vweird.f32 %v3816_v14 }
 0x29f   : > { %v2785_v40 = vsub.f32 1.0, %v2784_v48  ;;  %v3413_v49 = vmul.f32 -1.442695, %v8397_v4  ;;  %v1596_v2 = vsel %vm673_vm12, %v1541_v20, %v8349_v33  ;;  %v8435_v11 = vmul.f32 %v1782_v29, %v1564_v9  ;;  %vm8444_vm9 = vmor %vm2788_vm4, %vm2789_vm5 }
 0x2a0   : > { %v2427_v22 = vadd.f32 %v3814_v32, %v2426_v18  ;;  %vm2433_vm6 = vcmp.eq.f32.partialorder %v2432_v46, 8.507059e+37  ;;  %v1875_v60 = vadd.f32 %v8352_v28, %v1677_v41  ;;  %vm8438_vm7 = vcmp.eq.f32.partialorder %v2792_v0, 8.507059e+37 }
 0x2a1   : > { %v3818_v57 = vpop.eup %3817  ;;  %v2786_v35 = vmul.f32 %v3816_v14, %v2785_v40  ;;  %3821 = vpow2.f32 %v3413_v49  ;;  %v2795_v33 = vor.u32 1.1754944e-38, %v2794_v56  ;;  %vm2413_vm8 = vweird.f32 %v8404_v63  ;;  %v10109_v56 = vld [vmem:[#allocation78_spill] sm:$0xff] }
 0x2a2   : > { %v2431_v55 = vsel %vm8426_vm3, %v3814_v32, %v2427_v22  ;;  %v2409_v20 = vmul.f32 %v3818_v57, %v8404_v63  ;;  %v2419_v41 = vand.u32 2147483648, %v8404_v63  ;;  %v3411_v46 = vmul.f32 -1.442695, %v8326_v38  ;;  %v10110_v22 = vld [vmem:[#allocation34_spill] sm:$0xff] }
 0x2a3   : > { %v2436_v29 = vsel %vm2433_vm6, %v2435_v25, %v2431_v55  ;;  %v2787_v28 = vadd.f32 %v3816_v14, %v2786_v35  ;;  %vm2414_vm11 = vweird.f32 %v3818_v57  ;;  %v2417_v32 = vand.u32 2147483647, %v8404_v63  ;;  %v10113_v63 = vld [vmem:[#allocation96_spill] sm:$0xff] }
 0x2a4   : > { %v3820_v9 = vpop.eup %3819  ;;  %v2835_v48 = vmul.f32 %v8262_v43, %v2436_v29  ;;  %v2410_v0 = vsub.f32 1.0, %v2409_v20  ;;  %v1632_v3 = vmul.f32 %v9921_v8, %v10109_v56  ;;  %3823 = vpow2.f32 %v3411_v46  ;;  %vm8470_vm10 = vmor %vm2413_vm8, %vm2414_vm11 }
 0x2a5   : > { %v2791_v18 = vsel %vm8444_vm9, %v3816_v14, %v2787_v28  ;;  %v8458_v40 = vadd.f32 1.0, %v3820_v9  ;;  %v1633_v35 = vmul.f32 %v6456_v58, %v10110_v22  ;;  %v1899_v14 = vadd.f32 %v8383_v37, %v8389_v39  ;;  %v8481_v39 = vld [vmem:[%s4289_s28 + $0xd8] sm:$0xff] }
 0x2a6   : > { %v2886_v25 = vmul.f32 %v6961_v54, %v2835_v48  ;;  %v2796_v49 = vsel %vm8438_vm7, %v2795_v33, %v2791_v18  ;;  %v2411_v43 = vmul.f32 %v3818_v57, %v2410_v0  ;;  %v2420_v29 = vor.u32 1.1754944e-38, %v2419_v41  ;;  %v8487_v41 = vpop.permute.xlu0 %1478  ;;  %v10114_v48 = vld [vmem:[#allocation94_spill] sm:$0xff] }
 0x2a7   : > { %v3822_v55 = vpop.eup %3821  ;;  %v2859_v36 = vmul.f32 %v8283_v44, %v2796_v49  ;;  %3825 = vrcp.f32 %v8458_v40  ;;  %vm2418_vm14 = vcmp.eq.f32.partialorder %v2417_v32, 8.507059e+37  ;;  %v8477_v46 = vmul.f32 %v1783_v21, %v1596_v2  ;;  %v10115_v21 = vld [vmem:[#allocation124_spill] sm:$0xff] }
 0x2a8   : > { %v2934_v61 = vadd.f32 %v2886_v25, %v1875_v60  ;;  %v2412_v33 = vadd.f32 %v3818_v57, %v2411_v43  ;;  %v8475_v28 = vadd.f32 1.0, %v3822_v55  ;;  %v1733_v44 = vsub.f32 %v8481_v39, %v10056_v15  ;;  %v10116_v25 = vld [vmem:[#allocation84_spill] sm:$0xff]  ;;  %v10117_v43 = vld [vmem:[#allocation58_spill] sm:$0xff] }
 0x2a9   : > { %v2910_v37 = vmul.f32 %v6961_v54, %v2859_v36  ;;  %v1631_v9 = vmul.f32 %v6550_v52, %v10113_v63  ;;  %v8492_v0 = vmul.f32 %v1632_v3, %v10114_v48  ;;  %v8495_v2 = vmul.f32 %v1633_v35, %v10115_v21  ;;  %v10118_v36 = vld [vmem:[#allocation80_spill] sm:$0xff]  ;;  %v8534_v63 = vld [vmem:[%s4289_s28 + $0xe8] sm:$0xff] }
 0x2aa   : > { %3110 = vmatmul.f32.gmra.mxu1 %v2934_v61  ;;  %v2416_v60 = vsel %vm8470_vm10, %v3818_v57, %v2412_v33  ;;  %3827 = vrcp.f32 %v8475_v28  ;;  %v3824_v32 = vpop.eup %3823  ;;  %v1634_v49 = vmul.f32 %v6550_v52, %v10116_v25  ;;  %v8502_v22 = vmul.f32 %v9921_v8, %v10117_v43  ;;  %v8504_v57 = vpop.permute.xlu2 %1510 }
 0x2ab   : > { %v2958_v18 = vadd.f32 %v2910_v37, %v1899_v14  ;;  %v2421_v56 = vsel %vm2418_vm14, %v2420_v29, %v2416_v60  ;;  %v1874_v3 = vadd.f32 %v8127_v16, %v8402_v12  ;;  %v8509_v55 = vadd.f32 1.0, %v3824_v32  ;;  %v8525_v16 = vld [vmem:[%s4289_s28 + $0xe0] sm:$0xff]  ;;  %v10119_v12 = vld [vmem:[#allocation61_spill] sm:$0xff] }
 0x2ac   : > { %v2834_v35 = vmul.f32 %v8043_v19, %v2421_v56  ;;  %v8513_v14 = vmul.f32 %v6456_v58, %v10118_v36  ;;  %v8516_v29 = vmul.f32 %v10061_v59, %v1733_v44  ;;  %v8522_v61 = vsel %vm673_vm12, %v8487_v41, %v8504_v57 }
 0x2ad   : > { %v3826_v20 = vpop.eup %3825  ;;  %3134 = vmatmul.f32.gmra.mxu3 %v2958_v18  ;;  %v1734_v19 = vsub.f32 %v8525_v16, %v10054_v7  ;;  %v8530_v33 = vmul.f32 %v1631_v9, %v10119_v12  ;;  %v1735_v44 = vsub.f32 %v8534_v63, %v6874_v53  ;;  %3829 = vrcp.f32 %v8509_v55  ;;  %v10120_v12 = vld [vmem:[#allocation52_spill] sm:$0xff] }
 0x2ae   : > { %v2885_v37 = vmul.f32 %v6938_v42, %v2834_v35  ;;  %v2469_v60 = vmul.f32 %v3826_v20, %v8458_v40  ;;  %vm2473_vm15 = vweird.f32 %v8458_v40  ;;  %v2477_v48 = vand.u32 2147483647, %v8458_v40 }
 0x2af   : > { %v2479_v21 = vand.u32 2147483648, %v8458_v40  ;;  %v2492_v9 = vand.u32 2147483647, %v8475_v28  ;;  %vm2474_vm13 = vweird.f32 %v3826_v20  ;;  %v3414_v25 = vmul.f32 -1.442695, %v8481_v39 }
 0x2b0   : > { %v3828_v32 = vpop.eup %3827  ;;  %v2933_v18 = vadd.f32 %v2885_v37, %v1874_v3  ;;  %v2470_v56 = vsub.f32 1.0, %v2469_v60  ;;  %v8546_v43 = vmul.f32 %v10059_v5, %v1734_v19  ;;  %v2494_v36 = vand.u32 2147483648, %v8475_v28  ;;  %vm8559_vm0 = vmor %vm2473_vm15, %vm2474_vm13 }
 0x2b1   : > { %v2484_v35 = vmul.f32 %v3828_v32, %v8475_v28  ;;  %v8551_v13 = vmul.f32 %v1634_v49, %v10120_v12  ;;  %v8554_v34 = vmul.f32 %v6876_v6, %v1735_v44  ;;  %3831 = vpow2.f32 %v3414_v25 }
 0x2b2   : > { %3045 = vmatmul.f32.gmra.mxu0 %v2933_v18  ;;  %v2471_v1 = vmul.f32 %v3826_v20, %v2470_v56  ;;  %v3415_v3 = vmul.f32 -1.442695, %v8525_v16  ;;  %v2480_v37 = vor.u32 1.1754944e-38, %v2479_v21  ;;  %vm2488_vm1 = vweird.f32 %v8475_v28 }
 0x2b3   : > { %v2485_v60 = vsub.f32 1.0, %v2484_v35  ;;  %vm2489_vm2 = vweird.f32 %v3828_v32  ;;  %v3830_v49 = vpop.eup %3829  ;;  %vm2478_vm3 = vcmp.eq.f32.partialorder %v2477_v48, 8.507059e+37  ;;  %vm8564_vm4 = vcmp.eq.f32.partialorder %v2492_v9, 8.507059e+37 }
 0x2b4   : > { %v2472_v18 = vadd.f32 %v3826_v20, %v2471_v1  ;;  %3833 = vpow2.f32 %v3415_v3  ;;  %v2495_v25 = vor.u32 1.1754944e-38, %v2494_v36  ;;  %v2454_v40 = vmul.f32 %v3830_v49, %v8509_v55  ;;  %vm8573_vm6 = vmor %vm2488_vm1, %vm2489_vm2 }
 0x2b5   : > { %v2486_v56 = vmul.f32 %v3828_v32, %v2485_v60  ;;  %3190 = vmatmul.f32.vlgmr.msra.gmra.mxu3 %v8088_v50  ;;  %vm2458_vm5 = vweird.f32 %v8509_v55  ;;  %v2462_v48 = vand.u32 2147483647, %v8509_v55  ;;  %v2464_v21 = vand.u32 2147483648, %v8509_v55  ;;  %v1543_v60 = vpop.permute.xlu1 %1542 }
 0x2b6   : > { %v2476_v28 = vsel %vm8559_vm0, %v3826_v20, %v2472_v18  ;;  %v3416_v9 = vmul.f32 -1.442695, %v8534_v63  ;;  %v2455_v36 = vsub.f32 1.0, %v2454_v40  ;;  %vm2459_vm7 = vweird.f32 %v3830_v49 }
 0x2b7   : > { %v2481_v35 = vsel %vm2478_vm3, %v2480_v37, %v2476_v28  ;;  %v2487_v50 = vadd.f32 %v3828_v32, %v2486_v56  ;;  %v3832_v12 = vpop.eup %3831  ;;  %v1878_v20 = vadd.f32 %v8435_v11, %v8492_v0  ;;  %v1879_v19 = vadd.f32 %v8477_v46, %v8495_v2  ;;  %vm8600_vm9 = vmor %vm2458_vm5, %vm2459_vm7  ;;  %v8605_v2 = vld [vmem:[%s4289_s28 + $0x148] sm:$0xff] }
 0x2b8   : > { %v2838_v3 = vmul.f32 %v8379_v17, %v2481_v35  ;;  %3835 = vpow2.f32 %v3416_v9  ;;  %v1736_v37 = vsub.f32 %v8588_v51, %v10056_v15  ;;  %v2456_v56 = vmul.f32 %v3830_v49, %v2455_v36  ;;  %v8609_v9 = vpop.permute.xlu0 %1480 }
 0x2b9   : > { %v2491_v18 = vsel %vm8573_vm6, %v3828_v32, %v2487_v50  ;;  %v8592_v40 = vadd.f32 1.0, %v3832_v12  ;;  %v2465_v0 = vor.u32 1.1754944e-38, %v2464_v21  ;;  %v3428_v32 = vmul.f32 -1.442695, %v8605_v2  ;;  %v8620_v50 = vpop.permute.xlu2 %1512 }
 0x2ba   : > { %v3834_v28 = vpop.eup %3833  ;;  %v2889_v11 = vmul.f32 %v6961_v54, %v2838_v3  ;;  %v2496_v17 = vsel %vm8564_vm4, %v2495_v25, %v2491_v18  ;;  %v2457_v35 = vadd.f32 %v3830_v49, %v2456_v56  ;;  %vm2463_vm8 = vcmp.eq.f32.partialorder %v2462_v48, 8.507059e+37 }
 0x2bb   : > { %v2839_v1 = vmul.f32 %v8397_v4, %v2496_v17  ;;  %3837 = vrcp.f32 %v8592_v40  ;;  %v1565_v55 = vsel %vm673_vm12, %v8504_v57, %v1543_v60  ;;  %v1597_v44 = vsel %vm673_vm12, %v1543_v60, %v8487_v41 }
 0x2bc   : > { %v2937_v25 = vadd.f32 %v2889_v11, %v1878_v20  ;;  %v8618_v21 = vadd.f32 1.0, %v3834_v28  ;;  %v1787_v36 = vmul.f32 %v10061_v59, %v1736_v37  ;;  %v2461_v48 = vsel %vm8600_vm9, %v3830_v49, %v2457_v35  ;;  %v10129_v20 = vld [vmem:[#allocation14_spill] sm:$0xff]  ;;  %v10130_v11 = vld [vmem:[#allocation76_spill] sm:$0xff] }
 0x2bd   : > { %v2890_v4 = vmul.f32 %v7170_v26, %v2839_v1  ;;  %3839 = vpow2.f32 %v3428_v32  ;;  %v1582_v41 = vsel %vm673_vm12, %v8609_v9, %v8620_v50  ;;  %v2466_v57 = vsel %vm2463_vm8, %v2465_v0, %v2461_v48 }
 0x2be   : > { %v3836_v12 = vpop.eup %3835  ;;  %3113 = vmatmul.f32.gmra.mxu1 %v2937_v25  ;;  %v1683_v3 = vmul.f32 %v8502_v22, %v10129_v20  ;;  %3841 = vrcp.f32 %v8618_v21  ;;  %v1832_v60 = vmul.f32 %v8516_v29, %v8522_v61  ;;  %v1877_v18 = vadd.f32 %v8406_v31, %v8530_v33  ;;  %v8652_v31 = vld [vmem:[%s4289_s28 + $0xf8] sm:$0xff]  ;;  %v8658_v33 = vld [vmem:[%s4289_s28 + $0x100] sm:$0xff] }
 0x2bf   : > { %v2938_v49 = vadd.f32 %v2890_v4, %v1879_v19  ;;  %v2837_v37 = vmul.f32 %v8326_v38, %v2466_v57  ;;  %v1833_v56 = vmul.f32 %v8546_v43, %v1565_v55  ;;  %v8640_v28 = vmul.f32 %v8554_v34, %v1597_v44 }
 0x2c0   : > { %v8644_v22 = vmul.f32 %v8513_v14, %v10130_v11  ;;  %v8646_v17 = vadd.f32 1.0, %v3836_v12  ;;  %v8648_v29 = vmul.f32 %v1787_v36, %v1582_v41  ;;  %v1737_v38 = vsub.f32 %v8652_v31, %v10054_v7 }
 0x2c1   : > { %v3838_v46 = vpop.eup %3837  ;;  %3178 = vmatmul.f32.gmra.mxu2 %v2938_v49  ;;  %v2888_v61 = vmul.f32 %v6938_v42, %v2837_v37  ;;  %v3417_v34 = vmul.f32 -1.442695, %v8588_v51  ;;  %v1738_v14 = vsub.f32 %v8658_v33, %v6874_v53  ;;  %v2509_v19 = vand.u32 2147483648, %v8592_v40 }
 0x2c2   : > { %v2499_v43 = vmul.f32 %v3838_v46, %v8592_v40  ;;  %3843 = vrcp.f32 %v8646_v17  ;;  %vm2503_vm11 = vweird.f32 %v8592_v40  ;;  %v2507_v1 = vand.u32 2147483647, %v8592_v40 }
 0x2c3   : > { %v3840_v0 = vpop.eup %3839  ;;  %v2936_v32 = vadd.f32 %v2888_v61, %v1877_v18  ;;  %v2522_v35 = vand.u32 2147483647, %v8618_v21  ;;  %vm2504_vm10 = vweird.f32 %v3838_v46  ;;  %3845 = vpow2.f32 %v3417_v34 }
 0x2c4   : > { %v3842_v55 = vpop.eup %3841  ;;  %v2500_v44 = vsub.f32 1.0, %v2499_v43  ;;  %v8668_v25 = vadd.f32 1.0, %v3840_v0  ;;  %v1880_v4 = vadd.f32 %v1832_v60, %v8551_v13  ;;  %v8671_v36 = vadd.f32 %v1833_v56, %v1683_v3  ;;  %vm8679_vm14 = vmor %vm2503_vm11, %vm2504_vm10 }
 0x2c5   : > { %3048 = vmatmul.f32.gmra.mxu0 %v2936_v32  ;;  %v2514_v48 = vmul.f32 %v3842_v55, %v8618_v21  ;;  %v2524_v12 = vand.u32 2147483648, %v8618_v21  ;;  %v2510_v57 = vor.u32 1.1754944e-38, %v2509_v19  ;;  %v2537_v20 = vand.u32 2147483647, %v8646_v17 }
 0x2c6   : > { %v2501_v41 = vmul.f32 %v3838_v46, %v2500_v44  ;;  %3847 = vrcp.f32 %v8668_v25  ;;  %vm2518_vm15 = vweird.f32 %v8618_v21  ;;  %vm2519_vm13 = vweird.f32 %v3842_v55 }
 0x2c7   : > { %v2515_v18 = vsub.f32 1.0, %v2514_v48  ;;  %v3418_v13 = vmul.f32 -1.442695, %v8652_v31  ;;  %vm2508_vm0 = vcmp.eq.f32.partialorder %v2507_v1, 8.507059e+37  ;;  %vm8685_vm1 = vcmp.eq.f32.partialorder %v2522_v35, 8.507059e+37  ;;  %vm8694_vm3 = vmor %vm2518_vm15, %vm2519_vm13 }
 0x2c8   : > { %v3844_v3 = vpop.eup %3843  ;;  %v2502_v60 = vadd.f32 %v3838_v46, %v2501_v41  ;;  %v2539_v56 = vand.u32 2147483648, %v8646_v17  ;;  %v2525_v11 = vor.u32 1.1754944e-38, %v2524_v12  ;;  %vm2533_vm2 = vweird.f32 %v8646_v17  ;;  %v1545_v41 = vpop.permute.xlu1 %1544 }
 0x2c9   : > { %v2516_v40 = vmul.f32 %v3842_v55, %v2515_v18  ;;  %v2529_v61 = vmul.f32 %v3844_v3, %v8646_v17  ;;  %v3846_v34 = vpop.eup %3845  ;;  %vm2534_vm4 = vweird.f32 %v3844_v3  ;;  %vm8698_vm5 = vcmp.eq.f32.partialorder %v2537_v20, 8.507059e+37 }
 0x2ca   : > { %v2506_v21 = vsel %vm8679_vm14, %v3838_v46, %v2502_v60  ;;  %3849 = vpow2.f32 %v3418_v13  ;;  %v8702_v35 = vadd.f32 1.0, %v3846_v34  ;;  %v2540_v12 = vor.u32 1.1754944e-38, %v2539_v56  ;;  %vm8717_vm7 = vmor %vm2533_vm2, %vm2534_vm4 }
 0x2cb   : > { %v2511_v0 = vsel %vm2508_vm0, %v2510_v57, %v2506_v21  ;;  %v2517_v32 = vadd.f32 %v3842_v55, %v2516_v40  ;;  %v2530_v1 = vsub.f32 1.0, %v2529_v61  ;;  %vm2713_vm6 = vweird.f32 %v8668_v25 }
 0x2cc   : > { %v3848_v44 = vpop.eup %3847  ;;  %v2840_v48 = vmul.f32 %v8481_v39, %v2511_v0  ;;  %v3419_v46 = vmul.f32 -1.442695, %v8658_v33  ;;  %v2717_v57 = vand.u32 2147483647, %v8668_v25  ;;  %v2719_v56 = vand.u32 2147483648, %v8668_v25 }
 0x2cd   : > { %v2521_v20 = vsel %vm8694_vm3, %v3842_v55, %v2517_v32  ;;  %v2531_v49 = vmul.f32 %v3844_v3, %v2530_v1  ;;  %v2709_v18 = vmul.f32 %v3848_v44, %v8668_v25  ;;  %3851 = vrcp.f32 %v8702_v35  ;;  %v3025_v32 = vpop.f32.mrf.mxu0  ;;  %v3090_v1 = vpop.f32.mrf.mxu1 }
 0x2ce   : > { %v2891_v13 = vmul.f32 %v6938_v42, %v2840_v48  ;;  %v2526_v60 = vsel %vm8685_vm1, %v2525_v11, %v2521_v20  ;;  %vm2714_vm9 = vweird.f32 %v3848_v44  ;;  %v1788_v37 = vmul.f32 %v10059_v5, %v1737_v38 }
 0x2cf   : > { %v2841_v55 = vmul.f32 %v8525_v16, %v2526_v60  ;;  %v2532_v40 = vadd.f32 %v3844_v3, %v2531_v49  ;;  %v2710_v61 = vsub.f32 1.0, %v2709_v18  ;;  %v1566_v17 = vsel %vm673_vm12, %v8620_v50, %v1545_v41  ;;  %vm8740_vm8 = vmor %vm2713_vm6, %vm2714_vm9 }
 0x2d0   : > { %v3850_v34 = vpop.eup %3849  ;;  %v2939_v11 = vadd.f32 %v2891_v13, %v1880_v4  ;;  %3853 = vpow2.f32 %v3419_v46  ;;  %v1882_v16 = vadd.f32 %v8640_v28, %v8644_v22  ;;  %v2720_v4 = vor.u32 1.1754944e-38, %v2719_v56 }
 0x2d1   : > { %v2892_v21 = vmul.f32 %v6961_v54, %v2841_v55  ;;  %v2536_v43 = vsel %vm8717_vm7, %v3844_v3, %v2532_v40  ;;  %v2711_v0 = vmul.f32 %v3848_v44, %v2710_v61  ;;  %v8744_v48 = vadd.f32 1.0, %v3850_v34  ;;  %v10143_v55 = vld [vmem:[#allocation81_spill] sm:$0xff] }
 0x2d2   : > { %3051 = vmatmul.f32.gmra.mxu0 %v2939_v11  ;;  %v2541_v38 = vsel %vm8698_vm5, %v2540_v12, %v2536_v43  ;;  %v3431_v28 = vmul.f32 -1.442695, %v8132_v10  ;;  %vm2718_vm11 = vcmp.eq.f32.partialorder %v2717_v57, 8.507059e+37  ;;  %v1894_v19 = vadd.f32 %v7997_v30, %v8411_v24  ;;  %v8759_v57 = vpop.f32.mrf.mxu3  ;;  %v3155_v24 = vpop.f32.mrf.mxu2 }
 0x2d3   : > { %v2940_v22 = vadd.f32 %v2892_v21, %v8671_v36  ;;  %v2842_v3 = vmul.f32 %v8534_v63, %v2541_v38  ;;  %v2712_v46 = vadd.f32 %v3848_v44, %v2711_v0  ;;  %v3852_v20 = vpop.eup %3851  ;;  %v3091_v25 = vadd.f32 %v3090_v1, %v3025_v32  ;;  %v10146_v32 = vld [vmem:[#allocation63_spill] sm:$0xff] }
 0x2d4   : > { %vm2548_vm10 = vweird.f32 %v8702_v35  ;;  %3855 = vrcp.f32 %v8744_v48  ;;  %v2544_v63 = vmul.f32 %v3852_v20, %v8702_v35  ;;  %v2552_v36 = vand.u32 2147483647, %v8702_v35 }
 0x2d5   : > { %3116 = vmatmul.f32.gmra.mxu1 %v2940_v22  ;;  %v2893_v12 = vmul.f32 %v7170_v26, %v2842_v3  ;;  %v2716_v10 = vsel %vm8740_vm8, %v3848_v44, %v2712_v46  ;;  %vm2549_vm14 = vweird.f32 %v3852_v20  ;;  %v2554_v30 = vand.u32 2147483648, %v8702_v35 }
 0x2d6   : > { %v3854_v49 = vpop.eup %3853  ;;  %v2721_v18 = vsel %vm2718_vm11, %v2720_v4, %v2716_v10  ;;  %3857 = vpow2.f32 %v3431_v28  ;;  %v2545_v39 = vsub.f32 1.0, %v2544_v63  ;;  %v1789_v44 = vmul.f32 %v6876_v6, %v1738_v14  ;;  %vm8780_vm15 = vmor %vm2548_vm10, %vm2549_vm14 }
 0x2d7   : > { %v2941_v13 = vadd.f32 %v2893_v12, %v1882_v16  ;;  %v2854_v60 = vmul.f32 %v8605_v2, %v2721_v18  ;;  %v8763_v56 = vadd.f32 1.0, %v3854_v49  ;;  %v1637_v40 = vmul.f32 %v6550_v52, %v10143_v55  ;;  %v10148_v12 = vld [vmem:[#allocation104_spill] sm:$0xff] }
 0x2d8   : > { %v3156_v61 = vadd.f32 %v3155_v24, %v3091_v25  ;;  %v3434_v34 = vmul.f32 -1.442695, %v8318_v62  ;;  %v1598_v11 = vsel %vm673_vm12, %v1545_v41, %v8609_v9  ;;  %v2546_v21 = vmul.f32 %v3852_v20, %v2545_v39  ;;  %v10149_v24 = vld [vmem:[#allocation36_spill] sm:$0xff] }
 0x2d9   : > { %3181 = vmatmul.f32.gmra.mxu2 %v2941_v13  ;;  %v2905_v2 = vmul.f32 %v7170_v26, %v2854_v60  ;;  %3859 = vrcp.f32 %v8763_v56  ;;  %v1836_v43 = vmul.f32 %v1788_v37, %v1566_v17  ;;  %v2555_v0 = vor.u32 1.1754944e-38, %v2554_v30  ;;  %v10147_v17 = vld [vmem:[#allocation35_spill] sm:$0xff]  ;;  %v3028_v13 = vpop.f32.mrf.mxu0  ;;  %v3093_v60 = vpop.f32.mrf.mxu1 }
 0x2da   : > { %v3856_v16 = vpop.eup %3855  ;;  %v1638_v1 = vmul.f32 %v9921_v8, %v10146_v32  ;;  %3203 = vst [vmem:[%s8788_s30] sm:$0xff] %v3156_v61  ;;  %3861 = vpow2.f32 %v3434_v34  ;;  %v2547_v41 = vadd.f32 %v3852_v20, %v2546_v21  ;;  %vm2553_vm13 = vcmp.eq.f32.partialorder %v2552_v36, 8.507059e+37  ;;  %v3158_v63 = vpop.f32.mrf.mxu2  ;;  %v8830_v32 = vld [vmem:[%s4289_s28 + $0x110] sm:$0xff] }
 0x2db   : > { %v2953_v9 = vadd.f32 %v2905_v2, %v1894_v19  ;;  %v2559_v37 = vmul.f32 %v3856_v16, %v8744_v48  ;;  %v1685_v38 = vmul.f32 %v1637_v40, %v10147_v17  ;;  %vm2563_vm0 = vweird.f32 %v8744_v48  ;;  %v8802_v36 = vpop.f32.mrf.mxu3 }
 0x2dc   : > { %v3858_v35 = vpop.eup %3857  ;;  %v2567_v50 = vand.u32 2147483647, %v8744_v48  ;;  %v2569_v4 = vand.u32 2147483648, %v8744_v48  ;;  %v2551_v28 = vsel %vm8780_vm15, %v3852_v20, %v2547_v41  ;;  %vm2564_vm1 = vweird.f32 %v3856_v16 }
 0x2dd   : > { %3193 = vmatmul.f32.gmra.mxu3 %v2953_v9  ;;  %v2560_v22 = vsub.f32 1.0, %v2559_v37  ;;  %v8798_v3 = vadd.f32 1.0, %v3858_v35  ;;  %v1837_v46 = vmul.f32 %v1789_v44, %v1598_v11  ;;  %v1883_v19 = vadd.f32 %v8648_v29, %v1685_v38  ;;  %vm8811_vm2 = vmor %vm2563_vm0, %vm2564_vm1  ;;  %v10154_v37 = vld [vmem:[#allocation31_spill] sm:$0xff] }
 0x2de   : > { %v2556_v25 = vsel %vm2553_vm13, %v2555_v0, %v2551_v28  ;;  %v1686_v10 = vmul.f32 %v1638_v1, %v10148_v12  ;;  %v1639_v20 = vmul.f32 %v6456_v58, %v10149_v24  ;;  %vm8815_vm3 = vcmp.eq.f32.partialorder %v2567_v50, 8.507059e+37 }
 0x2df   : > { %v3860_v49 = vpop.eup %3859  ;;  %v2843_v18 = vmul.f32 %v8588_v51, %v2556_v25  ;;  %v2561_v30 = vmul.f32 %v3856_v16, %v2560_v22  ;;  %3863 = vrcp.f32 %v8798_v3  ;;  %v2570_v51 = vor.u32 1.1754944e-38, %v2569_v4 }
 0x2e0   : > { %v3862_v39 = vpop.eup %3861  ;;  %v2574_v55 = vmul.f32 %v3860_v49, %v8763_v56  ;;  %v2584_v40 = vand.u32 2147483648, %v8763_v56  ;;  %v3094_v48 = vadd.f32 %v3093_v60, %v3028_v13  ;;  %vm2578_vm4 = vweird.f32 %v8763_v56 }
 0x2e1   : > { %v2894_v61 = vmul.f32 %v6938_v42, %v2843_v18  ;;  %v2562_v34 = vadd.f32 %v3856_v16, %v2561_v30  ;;  %v8822_v11 = vadd.f32 1.0, %v3862_v39  ;;  %vm2579_vm5 = vweird.f32 %v3860_v49  ;;  %v10159_v30 = vld [vmem:[#allocation49_spill] sm:$0xff] }
 0x2e2   : > { %v2575_v2 = vsub.f32 1.0, %v2574_v55  ;;  %v2582_v21 = vand.u32 2147483647, %v8763_v56  ;;  %v3421_v1 = vmul.f32 -1.442695, %v8830_v32  ;;  %v1884_v9 = vadd.f32 %v1836_v43, %v1686_v10  ;;  %vm8839_vm6 = vmor %vm2578_vm4, %vm2579_vm5  ;;  %v3161_v56 = vpop.f32.mrf.mxu2 }
 0x2e3   : > { %v2942_v14 = vadd.f32 %v2894_v61, %v1883_v19  ;;  %v2566_v0 = vsel %vm8811_vm2, %v3856_v16, %v2562_v34  ;;  %3865 = vrcp.f32 %v8822_v11  ;;  %v1687_v35 = vmul.f32 %v1639_v20, %v10154_v37  ;;  %v3096_v20 = vpop.f32.mrf.mxu1 }
 0x2e4   : > { %v2571_v41 = vsel %vm8815_vm3, %v2570_v51, %v2566_v0  ;;  %v2576_v17 = vmul.f32 %v3860_v49, %v2575_v2  ;;  %v2585_v4 = vor.u32 1.1754944e-38, %v2584_v40  ;;  %v2762_v43 = vand.u32 2147483647, %v8798_v3 }
 0x2e5   : > { %v3864_v38 = vpop.eup %3863  ;;  %3054 = vmatmul.f32.gmra.mxu0 %v2942_v14  ;;  %v2844_v50 = vmul.f32 %v8652_v31, %v2571_v41  ;;  %v3159_v28 = vadd.f32 %v3158_v63, %v3094_v48  ;;  %vm8844_vm7 = vcmp.eq.f32.partialorder %v2582_v21, 8.507059e+37  ;;  %v2764_v12 = vand.u32 2147483648, %v8798_v3  ;;  %v8850_v31 = vpop.f32.mrf.mxu3 }
 0x2e6   : > { %v2577_v22 = vadd.f32 %v3860_v49, %v2576_v17  ;;  %v2754_v25 = vmul.f32 %v3864_v38, %v8798_v3  ;;  %v1885_v18 = vadd.f32 %v1837_v46, %v1687_v35  ;;  %v1699_v24 = vmul.f32 %v8393_v27, %v10159_v30  ;;  %v3031_v63 = vpop.f32.mrf.mxu0  ;;  %v8886_v35 = vld [vmem:[%s4289_s28 + $0x108] sm:$0xff]  ;;  %v8920_v46 = vld [vmem:[%s4289_s28 + $0x118] sm:$0xff] }
 0x2e7   : > { %v2895_v10 = vmul.f32 %v6961_v54, %v2844_v50  ;;  %3204 = vst [vmem:[%s8788_s30 + $0x8] sm:$0xff] %v3159_v28  ;;  %3867 = vpow2.f32 %v3421_v1  ;;  %vm2758_vm9 = vweird.f32 %v8798_v3  ;;  %vm2759_vm8 = vweird.f32 %v3864_v38 }
 0x2e8   : > { %v2581_v13 = vsel %vm8839_vm6, %v3860_v49, %v2577_v22  ;;  %v2755_v60 = vsub.f32 1.0, %v2754_v25  ;;  %vm8861_vm11 = vcmp.eq.f32.partialorder %v2762_v43, 8.507059e+37  ;;  %v3097_v27 = vadd.f32 %v3096_v20, %v3031_v63  ;;  %vm8867_vm10 = vmor %vm2758_vm9, %vm2759_vm8 }
 0x2e9   : > { %v3866_v39 = vpop.eup %3865  ;;  %v2943_v29 = vadd.f32 %v2895_v10, %v1884_v9  ;;  %v2586_v44 = vsel %vm8844_vm7, %v2585_v4, %v2581_v13  ;;  %v2765_v40 = vor.u32 1.1754944e-38, %v2764_v12  ;;  %vm2803_vm14 = vweird.f32 %v8822_v11  ;;  %v10165_v9 = vld [vmem:[#allocation70_spill] sm:$0xff] }
 0x2ea   : > { %v2845_v51 = vmul.f32 %v8658_v33, %v2586_v44  ;;  %v2756_v55 = vmul.f32 %v3864_v38, %v2755_v60  ;;  %v2799_v49 = vmul.f32 %v3866_v39, %v8822_v11  ;;  %v2807_v61 = vand.u32 2147483647, %v8822_v11  ;;  %v3164_v28 = vpop.f32.mrf.mxu2 }
 0x2eb   : > { %3119 = vmatmul.f32.gmra.mxu1 %v2943_v29  ;;  %v2809_v34 = vand.u32 2147483648, %v8822_v11  ;;  %v3162_v48 = vadd.f32 %v3161_v56, %v3097_v27  ;;  %vm2804_vm15 = vweird.f32 %v3866_v39  ;;  %v10164_v0 = vsub.f32 %v8318_v62, %v6874_v53  ;;  %v3099_v12 = vpop.f32.mrf.mxu1  ;;  %v3989_v56 = vld [vmem:[%s4289_s28 + $0x160] sm:$0xff]  ;;  %v10170_v11 = vld [vmem:[#allocation53_spill] sm:$0xff] }
 0x2ec   : > { %v2896_v33 = vmul.f32 %v7170_v26, %v2845_v51  ;;  %v2757_v2 = vadd.f32 %v3864_v38, %v2756_v55  ;;  %v2800_v21 = vsub.f32 1.0, %v2799_v49  ;;  %v1603_v41 = vsel %vm673_vm12, %v8322_v45, %v10165_v9  ;;  %vm8900_vm13 = vmor %vm2803_vm14, %vm2804_vm15 }
 0x2ed   : > { %v3868_v14 = vpop.eup %3867  ;;  %v1804_v1 = vmul.f32 %v6876_v6, %v10164_v0  ;;  %v1897_v37 = vadd.f32 %v8229_v47, %v1699_v24  ;;  %3205 = vst [vmem:[%s8788_s30 + $0x10] sm:$0xff] %v3162_v48  ;;  %v3420_v17 = vmul.f32 -1.442695, %v8886_v35  ;;  %v8891_v43 = vpop.f32.mrf.mxu3  ;;  %vm8904_vm0 = vcmp.eq.f32.partialorder %v2807_v61, 8.507059e+37  ;;  %v10172_v0 = vld [vmem:[#allocation12_spill] sm:$0xff] }
 0x2ee   : > { %v2944_v50 = vadd.f32 %v2896_v33, %v1885_v18  ;;  %v2761_v16 = vsel %vm8867_vm10, %v3864_v38, %v2757_v2  ;;  %v2801_v4 = vmul.f32 %v3866_v39, %v2800_v21  ;;  %v8893_v22 = vadd.f32 1.0, %v3868_v14  ;;  %v3034_v25 = vpop.f32.mrf.mxu0 }
 0x2ef   : > { %v2766_v45 = vsel %vm8861_vm11, %v2765_v40, %v2761_v16  ;;  %v2810_v38 = vor.u32 1.1754944e-38, %v2809_v34  ;;  %3869 = vpow2.f32 %v3420_v17  ;;  %v3100_v30 = vadd.f32 %v3099_v12, %v3034_v25  ;;  %v8925_v40 = vpop.permute.xlu1 %1546 }
 0x2f0   : > { %3184 = vmatmul.f32.gmra.mxu2 %v2944_v50  ;;  %v2857_v10 = vmul.f32 %v3989_v56, %v2766_v45  ;;  %v2802_v18 = vadd.f32 %v3866_v39, %v2801_v4  ;;  %3871 = vrcp.f32 %v8893_v22  ;;  %v1654_v24 = vmul.f32 %v6456_v58, %v10170_v11 }
 0x2f1   : > { %v3165_v13 = vadd.f32 %v3164_v28, %v3100_v30  ;;  %v1740_v60 = vsub.f32 %v8830_v32, %v10054_v7  ;;  %v1852_v29 = vmul.f32 %v1804_v1, %v1603_v41  ;;  %v3422_v27 = vmul.f32 -1.442695, %v8920_v46  ;;  %v1515_v7 = vpop.permute.xlu2 %1514 }
 0x2f2   : > { %v2908_v63 = vmul.f32 %v7170_v26, %v2857_v10  ;;  %v2806_v20 = vsel %vm8900_vm13, %v3866_v39, %v2802_v18  ;;  %v10171_v39 = vld [vmem:[#allocation100_spill] sm:$0xff]  ;;  %v1641_v1 = vmul.f32 %v9921_v8, %v10172_v0  ;;  %v3167_v17 = vpop.f32.mrf.mxu2  ;;  %vm2608_vm1 = vweird.f32 %v8893_v22  ;;  %v1483_v10 = vpop.permute.xlu0 %1482 }
 0x2f3   : > { %v2811_v44 = vsel %vm8904_vm0, %v2810_v38, %v2806_v20  ;;  %3206 = vst [vmem:[%s8788_s30 + $0x18] sm:$0xff] %v3165_v13  ;;  %v1702_v3 = vmul.f32 %v1654_v24, %v10171_v39  ;;  %3873 = vpow2.f32 %v3422_v27  ;;  %v1791_v34 = vmul.f32 %v10059_v5, %v1740_v60  ;;  %v3102_v14 = vpop.f32.mrf.mxu1  ;;  %v10173_v38 = vld [vmem:[#allocation57_spill] sm:$0xff] }
 0x2f4   : > { %v2956_v51 = vadd.f32 %v2908_v63, %v1897_v37  ;;  %v2860_v55 = vmul.f32 %v8318_v62, %v2811_v44  ;;  %v1567_v62 = vsel %vm673_vm12, %v1515_v7, %v8925_v40  ;;  %v2614_v5 = vand.u32 2147483648, %v8893_v22 }
 0x2f5   : > { %v3870_v49 = vpop.eup %3869  ;;  %v8929_v48 = vpop.f32.mrf.mxu3  ;;  %v1900_v2 = vadd.f32 %v1852_v29, %v1702_v3  ;;  %v2612_v16 = vand.u32 2147483647, %v8893_v22  ;;  %v1839_v4 = vmul.f32 %v1791_v34, %v1567_v62  ;;  %v1739_v47 = vsub.f32 %v8886_v35, %v10056_v15 }
 0x2f6   : > { %v3872_v61 = vpop.eup %3871  ;;  %3196 = vmatmul.f32.gmra.mxu3 %v2956_v51  ;;  %v2078_v33 = vadd.f32 1.0, %v3870_v49  ;;  %v3037_v21 = vpop.f32.mrf.mxu0  ;;  %v2911_v41 = vmul.f32 %v7170_v26, %v2860_v55  ;;  %v1689_v25 = vmul.f32 %v1641_v1, %v10173_v38  ;;  %v2615_v56 = vor.u32 1.1754944e-38, %v2614_v5 }
 0x2f7   : > { %v2604_v9 = vmul.f32 %v3872_v61, %v8893_v22  ;;  %v3103_v37 = vadd.f32 %v3102_v14, %v3037_v21  ;;  %vm2609_vm2 = vweird.f32 %v3872_v61  ;;  %vm2613_vm4 = vcmp.eq.f32.partialorder %v2612_v16, 8.507059e+37 }
 0x2f8   : > { %3875 = vrcp.f32 %v2078_v33  ;;  %v2959_v19 = vadd.f32 %v2911_v41, %v1900_v2  ;;  %vm8945_vm3 = vmor %vm2608_vm1, %vm2609_vm2  ;;  %v1887_v11 = vadd.f32 %v1839_v4, %v1689_v25  ;;  %v1790_v24 = vmul.f32 %v10061_v59, %v1739_v47  ;;  %v10180_v4 = vld [vmem:[#allocation86_spill] sm:$0xff] }
 0x2f9   : > { %v2605_v50 = vsub.f32 1.0, %v2604_v9  ;;  %v3168_v28 = vadd.f32 %v3167_v17, %v3103_v37  ;;  %v3874_v45 = vpop.eup %3873  ;;  %v1583_v63 = vsel %vm673_vm12, %v1483_v10, %v1515_v7  ;;  %vm2593_vm5 = vweird.f32 %v2078_v33 }
 0x2fa   : > { %v2080_v18 = vadd.f32 1.0, %v3874_v45  ;;  %v2599_v44 = vand.u32 2147483648, %v2078_v33  ;;  %v2597_v39 = vand.u32 2147483647, %v2078_v33  ;;  %v3170_v3 = vpop.f32.mrf.mxu2  ;;  %v1741_v59 = vsub.f32 %v8920_v46, %v6874_v53 }
 0x2fb   : > { %v2606_v8 = vmul.f32 %v3872_v61, %v2605_v50  ;;  %3207 = vst [vmem:[%s8788_s30 + $0x20] sm:$0xff] %v3168_v28  ;;  %v3105_v60 = vpop.f32.mrf.mxu1  ;;  %v1838_v14 = vmul.f32 %v1790_v24, %v1583_v63  ;;  %v1599_v50 = vsel %vm673_vm12, %v8925_v40, %v1483_v10  ;;  %v1642_v28 = vmul.f32 %v6456_v58, %v10180_v4  ;;  %v10181_v40 = vld [vmem:[#allocation102_spill] sm:$0xff] }
 0x2fc   : > { %3877 = vrcp.f32 %v2080_v18  ;;  %vm2598_vm9 = vcmp.eq.f32.partialorder %v2597_v39, 8.507059e+37  ;;  %v1792_v41 = vmul.f32 %v6876_v6, %v1741_v59  ;;  %vm2623_vm8 = vweird.f32 %v2080_v18 }
 0x2fd   : > { %v2607_v30 = vadd.f32 %v3872_v61, %v2606_v8  ;;  %v8954_v27 = vpop.f32.mrf.mxu3  ;;  %v2627_v17 = vand.u32 2147483647, %v2080_v18  ;;  %v1690_v10 = vmul.f32 %v1642_v28, %v10181_v40 }
 0x2fe   : > { %v3876_v22 = vpop.eup %3875  ;;  %3199 = vmatmul.f32.gmra.mxu3 %v2959_v19  ;;  %v3040_v13 = vpop.f32.mrf.mxu0  ;;  %v1840_v25 = vmul.f32 %v1792_v41, %v1599_v50 }
 0x2ff   : > { %v2611_v15 = vsel %vm8945_vm3, %v3872_v61, %v2607_v30  ;;  %v2589_v20 = vmul.f32 %v3876_v22, %v2078_v33  ;;  %v3106_v51 = vadd.f32 %v3105_v60, %v3040_v13  ;;  %vm2594_vm6 = vweird.f32 %v3876_v22  ;;  %v10176_v61 = vld [vmem:[#allocation56_spill] sm:$0xff] }
 0x300   : > { %v2616_v29 = vsel %vm2613_vm4, %v2615_v56, %v2611_v15  ;;  %v1640_v7 = vmul.f32 %v6550_v52, %v10176_v61  ;;  %vm8963_vm7 = vmor %vm2593_vm5, %vm2594_vm6  ;;  %v10179_v52 = vld [vmem:[#allocation106_spill] sm:$0xff]  ;;  %vm2628_vm14 = vcmp.eq.f32.partialorder %v2627_v17, 8.507059e+37 }
 0x301   : > { %v2847_v55 = vmul.f32 %v8830_v32, %v2616_v29  ;;  %v2590_v49 = vsub.f32 1.0, %v2589_v20  ;;  %v3171_v34 = vadd.f32 %v3170_v3, %v3106_v51  ;;  %v2600_v32 = vor.u32 1.1754944e-38, %v2599_v44 }
 0x302   : > { %v3878_v21 = vpop.eup %3877  ;;  %v1688_v37 = vmul.f32 %v1640_v7, %v10179_v52 }
 0x303   : > { %v2898_v2 = vmul.f32 %v6961_v54, %v2847_v55  ;;  %v2591_v62 = vmul.f32 %v3876_v22, %v2590_v49  ;;  %3208 = vst [vmem:[%s8788_s30 + $0x28] sm:$0xff] %v3171_v34  ;;  %v2619_v53 = vmul.f32 %v3878_v21, %v2080_v18  ;;  %v2629_v54 = vand.u32 2147483648, %v2080_v18 }
 0x304   : > { %vm2624_vm11 = vweird.f32 %v3878_v21  ;;  %v1886_v45 = vadd.f32 %v1838_v14, %v1688_v37 }
 0x305   : > { %v2946_v1 = vadd.f32 %v2898_v2, %v1887_v11  ;;  %v2592_v9 = vadd.f32 %v3876_v22, %v2591_v62  ;;  %v2620_v5 = vsub.f32 1.0, %v2619_v53  ;;  %vm2625_vm10 = vmor %vm2623_vm8, %vm2624_vm11  ;;  %v2630_v38 = vor.u32 1.1754944e-38, %v2629_v54 }
 0x307   : > { %3122 = vmatmul.f32.gmra.mxu1 %v2946_v1  ;;  %v2596_v33 = vsel %vm8963_vm7, %v3876_v22, %v2592_v9  ;;  %v2621_v47 = vmul.f32 %v3878_v21, %v2620_v5  ;;  %v1888_v22 = vadd.f32 %v1840_v25, %v1690_v10 }
 0x308   : > { %v2601_v16 = vsel %vm2598_vm9, %v2600_v32, %v2596_v33 }
 0x309   : > { %v2846_v8 = vmul.f32 %v8886_v35, %v2601_v16  ;;  %v2622_v56 = vadd.f32 %v3878_v21, %v2621_v47 }
 0x30a   : > { %v3132_v6 = vpop.f32.mrf.mxu3 }
 0x30b   : > { %v3133_v19 = vadd.f32 %v3132_v6, %v8850_v31  ;;  %v2897_v12 = vmul.f32 %v6938_v42, %v2846_v8  ;;  %v2626_v58 = vsel %vm2625_vm10, %v3878_v21, %v2622_v56 }
 0x30c   : > { %v2631_v30 = vsel %vm2628_vm14, %v2630_v38, %v2626_v58 }
 0x30d   : > { %v2945_v23 = vadd.f32 %v2897_v12, %v1886_v45  ;;  %v2848_v35 = vmul.f32 %v8920_v46, %v2631_v30 }
 0x30e   : > { %v3173_v24 = vpop.f32.mrf.mxu2 }
 0x30f   : > { %3057 = vmatmul.f32.gmra.mxu0 %v2945_v23  ;;  %v2899_v31 = vmul.f32 %v7170_v26, %v2848_v35  ;;  %v3127_v26 = vadd.f32 %v8929_v48, %v8759_v57  ;;  %v3130_v57 = vadd.f32 %v8954_v27, %v8802_v36 }
 0x311   : > { %v2947_v18 = vadd.f32 %v2899_v31, %v1888_v22 }
 0x312   : > { %v3108_v11 = vpop.f32.mrf.mxu1 }
 0x313   : > { %3187 = vmatmul.f32.gmra.mxu2 %v2947_v18 }
 0x31a   : > { %v3043_v15 = vpop.f32.mrf.mxu0 }
 0x31b   : > { %v3109_v42 = vadd.f32 %v3108_v11, %v3043_v15 }
 0x31d   : > { %v3174_v63 = vadd.f32 %v3173_v24, %v3109_v42  ;;  %v3176_v44 = vpop.f32.mrf.mxu2 }
 0x31f   : > { %3209 = vst [vmem:[%s8788_s30 + $0x30] sm:$0xff] %v3174_v63 }
 0x327   : > { %v3111_v20 = vpop.f32.mrf.mxu1 }
 0x32f   : > { %v3046_v13 = vpop.f32.mrf.mxu0 }
 0x330   : > { %v3112_v60 = vadd.f32 %v3111_v20, %v3046_v13  ;;  %v3135_v29 = vpop.f32.mrf.mxu3 }
 0x331   : > { %v3136_v46 = vadd.f32 %v3135_v29, %v8891_v43 }
 0x332   : > { %v3177_v51 = vadd.f32 %v3176_v44, %v3112_v60 }
 0x334   : > { %3210 = vst [vmem:[%s8788_s30 + $0x38] sm:$0xff] %v3177_v51 }
 0x338   : > { %v3191_v55 = vpop.f32.mrf.mxu3 }
 0x339   : > { %v3192_v49 = vadd.f32 %v3191_v55, %v3127_v26 }
 0x33b   : > { %3215 = vst [vmem:[%s8788_s30 + $0x60] sm:$0xff] %v3192_v49  ;;  %v3114_v39 = vpop.f32.mrf.mxu1 }
 0x342   : > { %v3049_v3 = vpop.f32.mrf.mxu0 }
 0x343   : > { %v3115_v59 = vadd.f32 %v3114_v39, %v3049_v3 }
 0x344   : > { %v3179_v61 = vpop.f32.mrf.mxu2 }
 0x345   : > { %v3180_v7 = vadd.f32 %v3179_v61, %v3115_v59 }
 0x347   : > { %3211 = vst [vmem:[%s8788_s30 + $0x40] sm:$0xff] %v3180_v7 }
 0x34f   : > { %v3052_v34 = vpop.f32.mrf.mxu0 }
 0x352   : > { %v3117_v2 = vpop.f32.mrf.mxu1 }
 0x353   : > { %v3118_v43 = vadd.f32 %v3117_v2, %v3052_v34 }
 0x35c   : > { %v3182_v62 = vpop.f32.mrf.mxu2 }
 0x35d   : > { %v3183_v21 = vadd.f32 %v3182_v62, %v3118_v43 }
 0x35f   : > { %3212 = vst [vmem:[%s8788_s30 + $0x48] sm:$0xff] %v3183_v21 }
 0x360   : > { %v3194_v48 = vpop.f32.mrf.mxu3 }
 0x361   : > { %v3195_v14 = vadd.f32 %v3194_v48, %v3130_v57 }
 0x362   : > { %v3055_v0 = vpop.f32.mrf.mxu0 }
 0x363   : > { %3216 = vst [vmem:[%s8788_s30 + $0x68] sm:$0xff] %v3195_v14 }
 0x368   : > { %v3120_v32 = vpop.f32.mrf.mxu1 }
 0x369   : > { %v3121_v1 = vadd.f32 %v3120_v32, %v3055_v0 }
 0x373   : > { %v3185_v9 = vpop.f32.mrf.mxu2 }
 0x374   : > { %v3186_v53 = vadd.f32 %v3185_v9, %v3121_v1 }
 0x376   : > { %3213 = vst [vmem:[%s8788_s30 + $0x50] sm:$0xff] %v3186_v53 }
 0x379   : > { %v3197_v41 = vpop.f32.mrf.mxu3 }
 0x37a   : > { %v3198_v52 = vadd.f32 %v3197_v41, %v3133_v19 }
 0x37c   : > { %3217 = vst [vmem:[%s8788_s30 + $0x70] sm:$0xff] %v3198_v52 }
 0x381   : > { %v3200_v37 = vpop.f32.mrf.mxu3 }
 0x382   : > { %v3201_v36 = vadd.f32 %v3200_v37, %v3136_v46 }
 0x384   : > { %3218 = vst [vmem:[%s8788_s30 + $0x78] sm:$0xff] %v3201_v36  ;;  %v3123_v54 = vpop.f32.mrf.mxu1 }
 0x38c   : > { %v3058_v27 = vpop.f32.mrf.mxu0 }
 0x38d   : > { %v3124_v33 = vadd.f32 %v3123_v54, %v3058_v27 }
 0x396   : > { %v3188_v5 = vpop.f32.mrf.mxu2 }
 0x397   : > { %v3189_v17 = vadd.f32 %v3188_v5, %v3124_v33 }
 0x399   : > { %3214 = vst [vmem:[%s8788_s30 + $0x58] sm:$0xff] %v3189_v17 }
 0x39a   : > { %4108 = shalt.err (!%p4105_p10)
}
 0x39b   : > { %s4161_s29 = smov 128   ;;  %s4162_s28 = smov 8  }
 0x39c   : > { %3502 = dma.vmem_to_hbm [thread:$0]  (%p4255_p5), %s3233_s7, 2048, %s3235_s9, %s3220_s10, %s4161_s29, %s4161_s29, %s4162_s28  }
 0x39d PF: > { %s3249_s18 = sand.u32 1, %s4139_s12   ;;  %p10182_p12 = scmp.ge.s32.totalorder %s4151_s15, 2 }
 0x39e   : > { %s3250_s23 = scalar_lea.sflag [#allocation4], %s3249_s18 }
 0x39f   : > { %p3516_p13 = pnand %p10182_p12, %p4218_p6 }
 0x3a1   : > { %p3517_p0 = pneg %p3516_p13 }
 0x3a3   : > { %4134 = dma.done.wait (%p3517_p0), %s3250_s23, 2048  }
 0x3a4   : > { %4136 = vsyncadd (%p3517_p0), %s3250_s23, 4294965248  ;;  %p17_p3 = scmp.ge.s32.totalorder %s4242_s8, 4   ;;  %s10183_s12 = smov %s4143_s13 }
 0x3a5   : > { %s10184_s13 = smov %s4147_s14  ;;  %s10185_s14 = smov %s4251_s11 }
 0x3a6   : > { %s10186_s15 = smov %s4242_s8  ;;  %19 = sbr.rel (!%p17_p3) target bundleno = 6 (0x6), region = 85 }
 0x3ab   :  { %3256 = vsyncpa [#allocation3], 1 }
 0x3ac   :  { %3258 = vsyncpa [#allocation3 + $0x1], 1 }
 0x3ad   :  { %3259 = vsyncpa [#allocation6], 1 }
 0x3ae   :  { %3260 = vsyncpa [#allocation4], 1 }
 0x3af   :  { %3262 = vsyncpa [#allocation4 + $0x1], 1 }

// kernel: tpu_custom_call.1
= control target key start
LH: loop header
LB: loop body
LE: loop exit
PB: predicated region body
PF: predicated region fallthrough
CT: control target
= control target key end

     0   :  { %8 = vsyncpa [#allocation3], 0  ;;  %s9033_s0 = inlined_call_operand.hbm [shape: f32[256,384], index: 0, kind: input, shape index: {}]   ;;  %s9034_s1 = inlined_call_operand.hbm [shape: f32[16,384], index: 1, kind: input, shape index: {}]   ;;  %s9035_s2 = inlined_call_operand.hbm [shape: f32[384,128], index: 2, kind: input, shape index: {}]   ;;  %s9036_s3 = inlined_call_operand.hbm [shape: f32[256,128], index: 3, kind: output, shape index: {}]  }
   0x1   :  { %10 = vsyncpa [#allocation3 + $0x1], 0 }
   0x2   :  { %11 = vsyncpa [#allocation6], 0 }
   0x3   :  { %12 = vsyncpa [#allocation4], 0 }
   0x4   :  { %14 = vsyncpa [#allocation4 + $0x1], 0  ;;  %s4183_s12 = smov 0   ;;  %s4185_s13 = smov 0  }
   0x5   :  { %s4187_s14 = smov 0   ;;  %s4189_s15 = smov 0  }
   0x6 LB: > { %s4204_s16 = sadd.s32 4294967295, %s4151_s15   ;;  %s3327_s17 = sadd.s32 4294967294, %s4151_s15   ;;  %s4151_s15 = sphi %s4189_s15, %s10186_s15   ;;  %s4147_s14 = sphi %s4187_s14, %s10185_s14   ;;  %s4143_s13 = sphi %s4185_s13, %s10184_s13   ;;  %s4139_s12 = sphi %s4183_s12, %s10183_s12  }
   0x7   : > { %p40_p0 = scmp.ne.s32.totalorder %s4143_s13, %s4139_s12  ;;  %p41_p1 = scmp.eq.s32.totalorder %s4204_s16, 0 }
   0x8   : > { %p106_p2 = scmp.eq.s32.totalorder %s4204_s16, 1  ;;  %p112_p3 = scmp.eq.s32.totalorder %s3327_s17, 1 }
   0x9   : > { %p4213_p4 = por %p41_p1, %p40_p0  ;;  %p3328_p5 = scmp.ge.s32.totalorder %s4151_s15, 1 }
   0xa   : > { %p4218_p6 = por %p112_p3, %p40_p0  ;;  %p119_p7 = scmp.lt.s32.totalorder %s4151_s15, 3 }
   0xb   : > { %s130_s22 = sshll.u32 %s9034_s1, 4  ;;  %s4153_s24 = smov [#allocation5]   ;;  %s131_s22 = int_to_ptr.hbm [resolvable:$true] %s130_s22 }
   0xc   : > { %p4226_p8 = pnand %p3328_p5, %p119_p7  ;;  %s132_s25 = sshll.u32 %s4153_s24, 4  ;;  %s133_s25 = int_to_ptr.vmem [resolvable:$true] %s132_s25 }
   0xd   : > { %s144_s28 = sshll.u32 %s9035_s2, 4  ;;  %s9037_s29 = smov 384   ;;  %s145_s28 = int_to_ptr.hbm [resolvable:$true] %s144_s28 }
   0xe   : > { %p3504_p9 = pneg %p4226_p8  ;;  %s4155_s30 = smov 24  }
   0xf   : > { %s4156_s4 = smov [#allocation7]   ;;  %s4157_s6 = smov 128  }
  0x10   : > { %p3505_p10 = pnand %p3504_p9, %p41_p1  ;;  %s146_s5 = sshll.u32 %s4156_s4, 4  ;;  %s147_s5 = int_to_ptr.vmem [resolvable:$true] %s146_s5 }
  0x11   : > { %s4158_s7 = smov 8   ;;  %s4242_s8 = sadd.s32 1, %s4151_s15  }
  0x12   : > { %3507 = dma.hbm_to_vmem [thread:$0]  (!%p3505_p10), %s131_s22, 768, %s133_s25, [#allocation6], %s9037_s29, %s9037_s29, %s4155_s30  }
  0x13   : > { %3510 = dma.hbm_to_vmem [thread:$0]  (!%p3505_p10), %s145_s28, 6144, %s147_s5, [#allocation6], %s4157_s6, %s4157_s6, %s4158_s7  }
  0x14   : > { %s24_s9 = ssub.s32 %s4151_s15, %s4242_s8  ;;  %s27_s10 = sadd.s32 1, %s4147_s14 }
  0x15   : > { %p25_p12 = scmp.eq.s32.totalorder %s24_s9, 0  ;;  %p34_p13 = scmp.ne.s32.totalorder %s4147_s14, %s4143_s13 }
  0x16   : > { %p35_p0 = scmp.eq.s32.totalorder %s4151_s15, 0  ;;  %p3521_p7 = scmp.lt.s32.totalorder %s4151_s15, 2 }
  0x17   : > { %s4251_s11 = scalar_select %p25_p12, %s4147_s14, %s27_s10  }
  0x18   : > { %p36_p3 = por %p35_p0, %p34_p13  ;;  %p4255_p5 = por %p106_p2, %p34_p13 }
  0x19   : > { %s160_s20 = sand.u32 1, %s4147_s14   ;;  %s3490_s22 = smul.u32 384, %s4151_s15 }
  0x1a   : > { %s3489_s21 = smul.u32 384, %s160_s20  ;;  %p4262_p9 = pnand %p3521_p7, %p36_p3 }
  0x1b   : > { %s170_s27 = scalar_lea.hbm %s9033_s0, %s3490_s22  ;;  %s161_s6 = scalar_lea.sflag [#allocation3], %s160_s20 }
  0x1c   : > { %s164_s28 = scalar_lea.vmem [#allocation2], %s3489_s21  ;;  %s171_s5 = sshll.u32 %s170_s27, 4  ;;  %s172_s5 = int_to_ptr.hbm [resolvable:$true] %s171_s5 }
  0x1d   : > { %s173_s4 = sshll.u32 %s164_s28, 4  ;;  %s4051_s7 = sshra.s32 %s172_s5, 4  ;;  %s174_s4 = int_to_ptr.vmem [resolvable:$true] %s173_s4  ;;  %s4052_s7 = int_to_ptr.hbm [resolvable:$true] %s4051_s7 }
  0x1e   : > { %s4053_s9 = scalar_lea.hbm %s4052_s7, 384  ;;  %p4055_p10 = pneg %p4262_p9 }
  0x1f   : > { %p4054_p2 = scmp.ne.s32.totalorder %s4052_s7, %s4053_s9  ;;  %s4058_s25 = scalar_lea.hbm %s9033_s0, 768 }
  0x20   : > { %p4059_p0 = scmp.lt.s32.totalorder %s4052_s7, %s9033_s0  ;;  %p4060_p3 = scmp.lt.s32.totalorder %s4058_s25, %s4053_s9 }
  0x21   : > { %p4056_p12 = pnand %p4055_p10, %p4054_p2 }
  0x22   : > { %p4061_p7 = por %p4060_p3, %p4059_p0 }
  0x23   : > { %p4057_p13 = pneg %p4056_p12 }
  0x25   : > { %p4062_p11 = pnand %p4061_p7, %p4057_p13 }
  0x27   : > { %4065 = shalt.err (!%p4062_p11)
}
  0x28   : > { %s9388_s20 = smov 384   ;;  %185 = sbr.rel (%p4226_p8) target bundleno = 925 (0x39d), region = 32 }
  0x29   : > { %3514 = dma.hbm_to_vmem [thread:$0]  (!%p4262_p9), %s172_s5, 6144, %s174_s4, %s161_s6, %s9388_s20, %s9388_s20, %s4155_s30  }
  0x2d   : > { %s4285_s29 = sand.u32 1, %s4143_s13  }
  0x2e   : > { %s3491_s21 = smul.u32 384, %s4285_s29  ;;  %s188_s27 = scalar_lea.sflag [#allocation3], %s4285_s29 }
  0x30   : > { %s4289_s28 = scalar_lea.vmem [#allocation2], %s3491_s21 }
  0x31   : > { %4126 = dma.done.wait (%p4213_p4), %s188_s27, 6144  }
  0x32   : > { %4128 = vsyncadd (%p4213_p4), %s188_s27, 4294961152 }
  0x33   : > { %4130 = dma.done.wait (%p41_p1), [#allocation6], 6912  }
  0x34   : > { %4132 = vsyncadd (%p41_p1), [#allocation6], 4294960384  ;;  %v4300_v0 = vld [vmem:[%s4289_s28 + $0xc0] sm:$0xff]  ;;  %v4303_v1 = vld [vmem:[%s4289_s28 + $0xd8] sm:$0xff]  ;;  %v9041_v8 = vmov 0.0   ;;  %s4160_s18 = smov 96  }
  0x35   : > { %v4305_v2 = vld [vmem:[#allocation5] sm:$0xff]  ;;  %v4317_v6 = vld [vmem:[%s4289_s28 + $0x78] sm:$0xff]  ;;  %v257_v15 = vld [vmem:[%s4289_s28 + $0xf0] sm:$0xff]  ;;  %s3338_s23 = sshll.u32 %s4285_s29, 7  ;;  %s3440_s24 = sshll.u32 %s4204_s16, 7 }
  0x36   : > { %v4308_v3 = vperm.slane %v4305_v2, 0  ;;  %v4311_v4 = vperm.slane %v4305_v2, 1  ;;  %v4314_v5 = vld [vmem:[%s4289_s28 + $0x60] sm:$0xff]  ;;  %v4345_v11 = vld [vmem:[%s4289_s28 + $0x18] sm:$0xff]  ;;  %v260_v16 = vld [vmem:[%s4289_s28 + $0x108] sm:$0xff]  ;;  %s8788_s30 = scalar_lea.vmem [#allocation8], %s3338_s23  ;;  %s3231_s6 = scalar_lea.hbm %s9036_s3, %s3440_s24 }
  0x37   : > { %v4332_v7 = vld [vmem:[%s4289_s28] sm:$0xff]  ;;  %v245_v18 = vld [vmem:[%s4289_s28 + $0x90] sm:$0xff]  ;;  %v248_v19 = vld [vmem:[%s4289_s28 + $0xa8] sm:$0xff]  ;;  %s3232_s7 = sshll.u32 %s8788_s30, 4  ;;  %s3234_s9 = sshll.u32 %s3231_s6, 4  ;;  %s3233_s7 = int_to_ptr.vmem [resolvable:$true] %s3232_s7  ;;  %s3235_s9 = int_to_ptr.hbm [resolvable:$true] %s3234_s9 }
  0x38   : > { %9389 = vst [vmem:[#allocation12_spill] sm:$0xff] %v4308_v3  ;;  %vm308_vm0 = vcmp.ge.f32.partialorder %v4300_v0, %v4308_v3  ;;  %vm311_vm1 = vcmp.ge.f32.partialorder %v4303_v1, %v4308_v3  ;;  %vm359_vm2 = vcmp.lt.f32.partialorder %v4300_v0, %v4311_v4  ;;  %vm362_vm3 = vcmp.lt.f32.partialorder %v4303_v1, %v4311_v4  ;;  %v4382_v22 = vld [vmem:[%s4289_s28 + $0x30] sm:$0xff]  ;;  %v4385_v23 = vld [vmem:[%s4289_s28 + $0x48] sm:$0xff]  ;;  %v4424_v32 = vld [vmem:[%s4289_s28 + $0x120] sm:$0xff]  ;;  %s3220_s10 = scalar_lea.sflag [#allocation4], %s4285_s29  ;;  %s4095_s25 = sshra.s32 %s3235_s9, 4  ;;  %s4096_s25 = int_to_ptr.hbm [resolvable:$true] %s4095_s25 }
  0x39   : > { %vm407_vm4 = vmand %vm308_vm0, %vm359_vm2  ;;  %vm296_vm5 = vcmp.ge.f32.partialorder %v4314_v5, %v4308_v3  ;;  %vm299_vm6 = vcmp.ge.f32.partialorder %v4317_v6, %v4308_v3  ;;  %vm347_vm8 = vcmp.lt.f32.partialorder %v4314_v5, %v4311_v4  ;;  %vm350_vm9 = vcmp.lt.f32.partialorder %v4317_v6, %v4311_v4  ;;  %9392 = vst [vmem:[#allocation15_spill] sm:$0xff] %v4382_v22  ;;  %v4395_v26 = vld [vmem:[%s4289_s28 + $0x150] sm:$0xff]  ;;  %v4402_v28 = vld [vmem:[%s4289_s28 + $0x168] sm:$0xff]  ;;  %s4097_s26 = scalar_lea.hbm %s4096_s25, 128  ;;  %s4101_s20 = scalar_lea.hbm %s9036_s3, 256 }
  0x3a   : > { %vm410_vm7 = vmand %vm311_vm1, %vm362_vm3  ;;  %v4335_v9 = vsel %vm407_vm4, 1.0, %v9041_v8  ;;  %vm284_vm12 = vcmp.ge.f32.partialorder %v4332_v7, %v4308_v3  ;;  %vm287_vm13 = vcmp.ge.f32.partialorder %v4345_v11, %v4308_v3  ;;  %vm335_vm14 = vcmp.lt.f32.partialorder %v4332_v7, %v4311_v4  ;;  %9393 = vst [vmem:[#allocation16_spill] sm:$0xff] %v4385_v23  ;;  %v4412_v30 = vld [vmem:[#allocation5 + $0x8] sm:$0xff]  ;;  %v4427_v33 = vld [vmem:[%s4289_s28 + $0x138] sm:$0xff]  ;;  %p4098_p1 = scmp.ne.s32.totalorder %s4096_s25, %s4097_s26  ;;  %p4102_p11 = scmp.lt.s32.totalorder %s4096_s25, %s9036_s3 }
  0x3b   : > { %9390 = vst [vmem:[#allocation13_spill] sm:$0xff] %v4335_v9  ;;  %v4342_v10 = vsel %vm410_vm7, 1.0, %v9041_v8  ;;  %vm395_vm10 = vmand %vm296_vm5, %vm347_vm8  ;;  %vm338_vm15 = vcmp.lt.f32.partialorder %v4345_v11, %v4311_v4  ;;  %vm314_vm2 = vcmp.ge.f32.partialorder %v257_v15, %v4308_v3  ;;  %vm317_vm3 = vcmp.ge.f32.partialorder %v260_v16, %v4308_v3  ;;  %v4440_v35 = vld [vmem:[%s4289_s28 + $0x8] sm:$0xff]  ;;  %v4443_v36 = vld [vmem:[%s4289_s28 + $0x20] sm:$0xff]  ;;  %p4103_p9 = scmp.lt.s32.totalorder %s4101_s20, %s4097_s26 }
  0x3c   : > { %9391 = vst [vmem:[#allocation14_spill] sm:$0xff] %v4342_v10  ;;  %v3587_v12 = vpack.i.bf16 %v4342_v10, %v4335_v9  ;;  %vm398_vm11 = vmand %vm299_vm6, %vm350_vm9  ;;  %v4350_v13 = vsel %vm395_vm10, 1.0, %v9041_v8  ;;  %vm365_vm4 = vcmp.lt.f32.partialorder %v257_v15, %v4311_v4  ;;  %vm368_vm5 = vcmp.lt.f32.partialorder %v260_v16, %v4311_v4  ;;  %v4472_v42 = vld [vmem:[%s4289_s28 + $0x68] sm:$0xff]  ;;  %v243_v45 = vld [vmem:[%s4289_s28 + $0x80] sm:$0xff]  ;;  %p4099_p4 = pnand %p4098_p1, %p4255_p5 }
  0x3d   : > { %v4355_v14 = vsel %vm398_vm11, 1.0, %v9041_v8  ;;  %vm383_vm0 = vmand %vm284_vm12, %vm335_vm14  ;;  %vm302_vm8 = vcmp.ge.f32.partialorder %v245_v18, %v4308_v3  ;;  %vm305_vm9 = vcmp.ge.f32.partialorder %v248_v19, %v4308_v3  ;;  %9395 = vst [vmem:[#allocation18_spill] sm:$0xff] %v4395_v26  ;;  %vm353_vm10 = vcmp.lt.f32.partialorder %v245_v18, %v4311_v4  ;;  %v246_v48 = vld [vmem:[%s4289_s28 + $0x98] sm:$0xff]  ;;  %v249_v50 = vld [vmem:[%s4289_s28 + $0xb0] sm:$0xff]  ;;  %p4104_p2 = por %p4103_p9, %p4102_p11 }
  0x3e   : > { %3588 = vrot.lane.b32.xlu2 %v3587_v12, %s4160_s18  ;;  %v3577_v17 = vpack.i.bf16 %v4355_v14, %v4350_v13  ;;  %vm386_vm1 = vmand %vm287_vm13, %vm338_vm15  ;;  %v4372_v20 = vsel %vm383_vm0, 1.0, %v9041_v8  ;;  %9397 = vst [vmem:[#allocation20_spill] sm:$0xff] %v4402_v28  ;;  %vm356_vm11 = vcmp.lt.f32.partialorder %v248_v19, %v4311_v4  ;;  %vm290_vm13 = vcmp.ge.f32.partialorder %v4382_v22, %v4308_v3  ;;  %v4522_v52 = vld [vmem:[%s4289_s28 + $0x38] sm:$0xff]  ;;  %v4525_v53 = vld [vmem:[%s4289_s28 + $0x50] sm:$0xff]  ;;  %p4100_p8 = pneg %p4099_p4 }
  0x3f   : > { %v4378_v21 = vsel %vm386_vm1, 1.0, %v9041_v8  ;;  %vm413_vm6 = vmand %vm314_vm2, %vm365_vm4  ;;  %vm293_vm14 = vcmp.ge.f32.partialorder %v4385_v23, %v4308_v3  ;;  %vm341_vm0 = vcmp.lt.f32.partialorder %v4382_v22, %v4311_v4  ;;  %vm344_vm1 = vcmp.lt.f32.partialorder %v4385_v23, %v4311_v4  ;;  %9404 = vst [vmem:[#allocation27_spill] sm:$0xff] %v4472_v42  ;;  %v4543_v56 = vld [vmem:[#allocation5 + $0x10] sm:$0xff]  ;;  %v4589_v12 = vld [vmem:[%s4289_s28 + $0x28] sm:$0xff] }
  0x40   : > { %3578 = vrot.lane.b32.xlu1 %v3577_v17, %s4160_s18  ;;  %v3567_v24 = vpack.i.bf16 %v4378_v21, %v4372_v20  ;;  %vm416_vm7 = vmand %vm317_vm3, %vm368_vm5  ;;  %v4390_v25 = vsel %vm413_vm6, 1.0, %v9041_v8  ;;  %vm326_vm2 = vcmp.ge.f32.partialorder %v4395_v26, %v4308_v3  ;;  %vm329_vm4 = vcmp.ge.f32.partialorder %v4402_v28, %v4308_v3  ;;  %9409 = vst [vmem:[#allocation30_spill] sm:$0xff] %v4525_v53  ;;  %v4568_v60 = vld [vmem:[%s4289_s28 + $0x10] sm:$0xff]  ;;  %v4608_v18 = vld [vmem:[%s4289_s28 + $0x140] sm:$0xff]  ;;  %p4105_p10 = pnand %p4104_p2, %p4100_p8 }
  0x41   : > { %9394 = vst [vmem:[#allocation17_spill] sm:$0xff] %v4390_v25  ;;  %v4398_v27 = vsel %vm416_vm7, 1.0, %v9041_v8  ;;  %vm401_vm12 = vmand %vm302_vm8, %vm353_vm10  ;;  %vm377_vm5 = vcmp.lt.f32.partialorder %v4395_v26, %v4311_v4  ;;  %vm380_vm6 = vcmp.lt.f32.partialorder %v4402_v28, %v4311_v4  ;;  %v4454_v39 = vperm.slane %v4412_v30, 0  ;;  %v4571_v61 = vld [vmem:[%s4289_s28 + $0x130] sm:$0xff]  ;;  %v4683_v59 = vld [vmem:[%s4289_s28 + $0x58] sm:$0xff] }
  0x42   : > { %9396 = vst [vmem:[#allocation19_spill] sm:$0xff] %v4398_v27  ;;  %3568 = vrot.lane.b32.xlu0 %v3567_v24, %s4160_s18  ;;  %v3592_v29 = vpack.i.bf16 %v4398_v27, %v4390_v25  ;;  %vm404_vm15 = vmand %vm305_vm9, %vm356_vm11  ;;  %v4415_v31 = vsel %vm401_vm12, 1.0, %v9041_v8  ;;  %v4457_v40 = vperm.slane %v4412_v30, 1  ;;  %vm320_vm9 = vcmp.ge.f32.partialorder %v4424_v32, %v4308_v3  ;;  %v4689_v24 = vld [vmem:[%s4289_s28 + $0x170] sm:$0xff]  ;;  %v4769_v25 = vld [vmem:[%s4289_s28 + $0xa0] sm:$0xff] }
  0x43   : > { %9398 = vst [vmem:[#allocation21_spill] sm:$0xff] %v4415_v31  ;;  %v4431_v34 = vsel %vm404_vm15, 1.0, %v9041_v8  ;;  %vm389_vm3 = vmand %vm290_vm13, %vm341_vm0  ;;  %vm323_vm10 = vcmp.ge.f32.partialorder %v4427_v33, %v4308_v3  ;;  %vm371_vm11 = vcmp.lt.f32.partialorder %v4424_v32, %v4311_v4  ;;  %vm285_vm13 = vcmp.ge.f32.partialorder %v4440_v35, %v4454_v39 }
  0x44   : > { %9399 = vst [vmem:[#allocation22_spill] sm:$0xff] %v4431_v34  ;;  %v3582_v37 = vpack.i.bf16 %v4431_v34, %v4415_v31  ;;  %vm392_vm7 = vmand %vm293_vm14, %vm344_vm1  ;;  %v4451_v38 = vsel %vm389_vm3, 1.0, %v9041_v8  ;;  %vm288_vm14 = vcmp.ge.f32.partialorder %v4443_v36, %v4454_v39  ;;  %vm336_vm15 = vcmp.lt.f32.partialorder %v4440_v35, %v4457_v40  ;;  %v4703_v34 = vld [vmem:[%s4289_s28 + $0x160] sm:$0xff] }
  0x45   : > { %9400 = vst [vmem:[#allocation23_spill] sm:$0xff] %v4451_v38  ;;  %v4460_v41 = vsel %vm392_vm7, 1.0, %v9041_v8  ;;  %vm425_vm8 = vmand %vm326_vm2, %vm377_vm5  ;;  %vm339_vm0 = vcmp.lt.f32.partialorder %v4443_v36, %v4457_v40  ;;  %vm374_vm1 = vcmp.lt.f32.partialorder %v4427_v33, %v4311_v4  ;;  %vm348_vm7 = vcmp.lt.f32.partialorder %v4472_v42, %v4457_v40 }
  0x46   : > { %3593 = vrot.lane.b32.xlu2 %v3592_v29, %s4160_s18  ;;  %9401 = vst [vmem:[#allocation24_spill] sm:$0xff] %v4454_v39  ;;  %v3572_v43 = vpack.i.bf16 %v4460_v41, %v4451_v38  ;;  %vm428_vm12 = vmand %vm329_vm4, %vm380_vm6  ;;  %v4484_v44 = vsel %vm425_vm8, 1.0, %v9041_v8  ;;  %vm297_vm4 = vcmp.ge.f32.partialorder %v4472_v42, %v4454_v39  ;;  %vm300_vm6 = vcmp.ge.f32.partialorder %v243_v45, %v4454_v39  ;;  %v252_v29 = vld [vmem:[%s4289_s28 + $0xc8] sm:$0xff] }
  0x47   : > { %9402 = vst [vmem:[#allocation25_spill] sm:$0xff] %v4457_v40  ;;  %v4492_v46 = vsel %vm428_vm12, 1.0, %v9041_v8  ;;  %vm4503_vm2 = vmand %vm320_vm9, %vm371_vm11  ;;  %vm351_vm8 = vcmp.lt.f32.partialorder %v243_v45, %v4457_v40  ;;  %vm303_vm11 = vcmp.ge.f32.partialorder %v246_v48, %v4454_v39  ;;  %vm354_vm12 = vcmp.lt.f32.partialorder %v246_v48, %v4457_v40  ;;  %v4654_v45 = vld [vmem:[%s4289_s28 + $0x128] sm:$0xff] }
  0x48   : > { %9403 = vst [vmem:[#allocation26_spill] sm:$0xff] %v4460_v41  ;;  %3583 = vrot.lane.b32.xlu1 %v3582_v37, %s4160_s18  ;;  %v3602_v49 = vpack.i.bf16 %v4492_v46, %v4484_v44  ;;  %vm384_vm3 = vmand %vm285_vm13, %vm336_vm15  ;;  %v4539_v55 = vsel %vm4503_vm2, 1.0, %v9041_v8  ;;  %vm306_vm13 = vcmp.ge.f32.partialorder %v249_v50, %v4454_v39  ;;  %vm342_vm2 = vcmp.lt.f32.partialorder %v4522_v52, %v4457_v40 }
  0x49   : > { %9405 = vst [vmem:[#allocation28_spill] sm:$0xff] %v4484_v44  ;;  %vm387_vm5 = vmand %vm288_vm14, %vm339_vm0  ;;  %v4515_v51 = vsel %vm384_vm3, 1.0, %v9041_v8  ;;  %vm357_vm14 = vcmp.lt.f32.partialorder %v249_v50, %v4457_v40  ;;  %vm291_vm0 = vcmp.ge.f32.partialorder %v4522_v52, %v4454_v39  ;;  %v4583_v63 = vperm.slane %v4543_v56, 0 }
  0x4a   : > { %9406 = vst [vmem:[#allocation29_spill] sm:$0xff] %v4492_v46  ;;  %3573 = vrot.lane.b32.xlu0 %v3572_v43, %s4160_s18  ;;  %v4528_v54 = vsel %vm387_vm5, 1.0, %v9041_v8  ;;  %vm422_vm9 = vmand %vm323_vm10, %vm374_vm1  ;;  %vm294_vm1 = vcmp.ge.f32.partialorder %v4525_v53, %v4454_v39  ;;  %v4586_v4 = vperm.slane %v4543_v56, 1  ;;  %v4731_v43 = vld [vmem:[%s4289_s28 + $0x148] sm:$0xff]  ;;  %v5047_v44 = vsub.f32 %v4654_v45, %v4454_v39 }
  0x4b   : > { %v3607_v57 = vpack.i.bf16 %v4528_v54, %v4515_v51  ;;  %v4548_v58 = vsel %vm422_vm9, 1.0, %v9041_v8  ;;  %vm4553_vm10 = vmand %vm297_vm4, %vm348_vm7  ;;  %vm345_vm4 = vcmp.lt.f32.partialorder %v4525_v53, %v4457_v40  ;;  %9412 = vst [vmem:[#allocation31_spill] sm:$0xff] %v4583_v63  ;;  %vm286_vm7 = vcmp.ge.f32.partialorder %v4568_v60, %v4583_v63  ;;  %v255_v53 = vld [vmem:[%s4289_s28 + $0xe0] sm:$0xff] }
  0x4c   : > { %vm399_vm15 = vmand %vm300_vm6, %vm351_vm8  ;;  %v3597_v62 = vpack.i.bf16 %v4548_v58, %v4539_v55  ;;  %9413 = vst [vmem:[#allocation32_spill] sm:$0xff] %v4586_v4  ;;  %v4595_v15 = vsel %vm4553_vm10, 1.0, %v9041_v8  ;;  %vm322_vm8 = vcmp.ge.f32.partialorder %v4571_v61, %v4583_v63  ;;  %vm337_vm9 = vcmp.lt.f32.partialorder %v4568_v60, %v4586_v4 }
  0x4d   : > { %vm402_vm3 = vmand %vm303_vm11, %vm354_vm12  ;;  %9414 = vst [vmem:[#allocation33_spill] sm:$0xff] %v4595_v15  ;;  %v4598_v16 = vsel %vm399_vm15, 1.0, %v9041_v8  ;;  %vm373_vm12 = vcmp.lt.f32.partialorder %v4571_v61, %v4586_v4  ;;  %vm289_vm10 = vcmp.ge.f32.partialorder %v4589_v12, %v4583_v63  ;;  %vm340_vm15 = vcmp.lt.f32.partialorder %v4589_v12, %v4586_v4 }
  0x4e   : > { %3608 = vrot.lane.b32.xlu2 %v3607_v57, %s4160_s18  ;;  %9415 = vst [vmem:[#allocation34_spill] sm:$0xff] %v4598_v16  ;;  %vm405_vm5 = vmand %vm306_vm13, %vm357_vm14  ;;  %v4605_v17 = vsel %vm402_vm3, 1.0, %v9041_v8  ;;  %vm324_vm14 = vcmp.ge.f32.partialorder %v4608_v18, %v4454_v39  ;;  %v3617_v47 = vpack.i.bf16 %v4598_v16, %v4595_v15  ;;  %vm309_vm3 = vcmp.ge.f32.partialorder %v252_v29, %v4454_v39  ;;  %v4676_v57 = vld [vmem:[%s4289_s28 + $0x40] sm:$0xff]  ;;  %v4762_v15 = vld [vmem:[%s4289_s28 + $0x88] sm:$0xff] }
  0x4f   : > { %9416 = vst [vmem:[#allocation35_spill] sm:$0xff] %v4605_v17  ;;  %v4611_v19 = vsel %vm405_vm5, 1.0, %v9041_v8  ;;  %vm4619_vm6 = vmand %vm291_vm0, %vm342_vm2  ;;  %vm375_vm0 = vcmp.lt.f32.partialorder %v4608_v18, %v4457_v40  ;;  %v5115_v26 = vsub.f32 %v4568_v60, %v4583_v63 }
  0x50   : > { %3603 = vrot.lane.b32.xlu1 %v3602_v49, %s4160_s18  ;;  %9417 = vst [vmem:[#allocation36_spill] sm:$0xff] %v4611_v19  ;;  %vm393_vm11 = vmand %vm294_vm1, %vm345_vm4  ;;  %v3622_v37 = vpack.i.bf16 %v4611_v19, %v4605_v17  ;;  %v4661_v48 = vsel %vm4619_vm6, 1.0, %v9041_v8  ;;  %vm360_vm4 = vcmp.lt.f32.partialorder %v252_v29, %v4457_v40  ;;  %vm321_vm6 = vcmp.ge.f32.partialorder %v4654_v45, %v4454_v39  ;;  %v4745_v19 = vld [vmem:[%s4289_s28 + $0x158] sm:$0xff] }
  0x51   : > { %vm4643_vm13 = vmand %vm286_vm7, %vm337_vm9  ;;  %9422 = vst [vmem:[#allocation37_spill] sm:$0xff] %v4661_v48  ;;  %v4664_v49 = vsel %vm393_vm11, 1.0, %v9041_v8  ;;  %vm372_vm7 = vcmp.lt.f32.partialorder %v4654_v45, %v4457_v40  ;;  %vm292_vm9 = vcmp.ge.f32.partialorder %v4676_v57, %v4583_v63  ;;  %vm343_vm11 = vcmp.lt.f32.partialorder %v4676_v57, %v4586_v4 }
  0x52   : > { %3598 = vrot.lane.b32.xlu0 %v3597_v62, %s4160_s18  ;;  %9423 = vst [vmem:[#allocation38_spill] sm:$0xff] %v4664_v49  ;;  %vm4669_vm1 = vmand %vm322_vm8, %vm373_vm12  ;;  %v3612_v62 = vpack.i.bf16 %v4664_v49, %v4661_v48  ;;  %v9437_v17 = vmov 0.0   ;;  %v4775_v49 = vld [vmem:[%s4289_s28 + $0xb8] sm:$0xff] }
  0x53   : > { %vm388_vm2 = vmand %vm289_vm10, %vm340_vm15  ;;  %9426 = vst [vmem:[#allocation39_spill] sm:$0xff] %v4676_v57  ;;  %vm295_vm10 = vcmp.ge.f32.partialorder %v4683_v59, %v4583_v63  ;;  %vm330_vm15 = vcmp.ge.f32.partialorder %v4689_v24, %v4454_v39 }
  0x54   : > { %vm423_vm5 = vmand %vm324_vm14, %vm375_vm0  ;;  %9427 = vst [vmem:[#allocation40_spill] sm:$0xff] %v4683_v59  ;;  %v4693_v29 = vsel %vm388_vm2, 1.0, %v9041_v8  ;;  %vm346_vm14 = vcmp.lt.f32.partialorder %v4683_v59, %v4586_v4  ;;  %vm328_vm0 = vcmp.ge.f32.partialorder %v4703_v34, %v4583_v63 }
  0x55   : > { %9428 = vst [vmem:[#allocation41_spill] sm:$0xff] %v4689_v24  ;;  %v4696_v27 = vsel %vm423_vm5, 1.0, %v9041_v8  ;;  %vm4698_vm8 = vmand %vm309_vm3, %vm360_vm4  ;;  %vm325_vm5 = vcmp.ge.f32.partialorder %v4731_v43, %v4583_v63 }
  0x56   : > { %3623 = vrot.lane.b32.xlu2 %v3622_v37, %s4160_s18  ;;  %9429 = vst [vmem:[#allocation42_spill] sm:$0xff] %v4693_v29  ;;  %v4712_v37 = vsel %vm4643_vm13, 1.0, %v9041_v8  ;;  %vm420_vm12 = vmand %vm321_vm6, %vm372_vm7  ;;  %vm381_vm13 = vcmp.lt.f32.partialorder %v4689_v24, %v4457_v40  ;;  %v3637_v50 = vpack.i.bf16 %v4693_v29, %v4696_v27  ;;  %v4752_v31 = vsel %vm4698_vm8, 1.0, %v9437_v17 }
  0x57   : > { %9430 = vst [vmem:[#allocation43_spill] sm:$0xff] %v4696_v27  ;;  %vm4740_vm2 = vmand %vm292_vm9, %vm343_vm11  ;;  %v4755_v16 = vsel %vm420_vm12, 1.0, %v9437_v17  ;;  %vm376_vm6 = vcmp.lt.f32.partialorder %v4731_v43, %v4586_v4  ;;  %vm327_vm9 = vcmp.ge.f32.partialorder %v4745_v19, %v4454_v39  ;;  %vm378_vm8 = vcmp.lt.f32.partialorder %v4745_v19, %v4457_v40 }
  0x58   : > { %3618 = vrot.lane.b32.xlu1 %v3617_v47, %s4160_s18  ;;  %9433 = vst [vmem:[#allocation44_spill] sm:$0xff] %v4703_v34  ;;  %v4717_v47 = vsel %vm4669_vm1, 1.0, %v9041_v8  ;;  %vm379_vm1 = vcmp.lt.f32.partialorder %v4703_v34, %v4586_v4  ;;  %vm394_vm3 = vmand %vm295_vm10, %vm346_vm14  ;;  %v3627_v42 = vpack.i.bf16 %v4755_v16, %v4752_v31  ;;  %vm301_vm12 = vcmp.ge.f32.partialorder %v4762_v15, %v4583_v63  ;;  %v4813_v8 = vld [vmem:[%s4289_s28 + $0x70] sm:$0xff] }
  0x59   : > { %9436 = vst [vmem:[#allocation45_spill] sm:$0xff] %v4745_v19  ;;  %vm429_vm4 = vmand %vm330_vm15, %vm381_vm13  ;;  %v4779_v41 = vsel %vm394_vm3, 1.0, %v9437_v17  ;;  %vm352_vm10 = vcmp.lt.f32.partialorder %v4762_v15, %v4586_v4  ;;  %vm304_vm15 = vcmp.ge.f32.partialorder %v4769_v25, %v4583_v63  ;;  %vm355_vm13 = vcmp.lt.f32.partialorder %v4769_v25, %v4586_v4 }
  0x5a   : > { %3613 = vrot.lane.b32.xlu0 %v3612_v62, %s4160_s18  ;;  %v3632_v62 = vpack.i.bf16 %v4717_v47, %v4712_v37  ;;  %9438 = vst [vmem:[#allocation46_spill] sm:$0xff] %v4752_v31  ;;  %vm427_vm7 = vmand %vm328_vm0, %vm379_vm1  ;;  %v4782_v24 = vsel %vm429_vm4, 1.0, %v9437_v17  ;;  %vm307_vm0 = vcmp.ge.f32.partialorder %v4775_v49, %v4583_v63  ;;  %vm358_vm1 = vcmp.lt.f32.partialorder %v4775_v49, %v4586_v4 }
  0x5b   : > { %9439 = vst [vmem:[#allocation47_spill] sm:$0xff] %v4762_v15  ;;  %vm4784_vm11 = vmand %vm325_vm5, %vm376_vm6  ;;  %v3652_v31 = vpack.i.bf16 %v4779_v41, %v4782_v24  ;;  %vm363_vm3 = vcmp.lt.f32.partialorder %v255_v53, %v4457_v40  ;;  %v4825_v15 = vld [vmem:[%s4289_s28 + $0x178] sm:$0xff]  ;;  %v5151_v29 = vsub.f32 %v4427_v33, %v4308_v3 }
  0x5c   : > { %9440 = vst [vmem:[#allocation48_spill] sm:$0xff] %v4769_v25  ;;  %vm426_vm14 = vmand %vm327_vm9, %vm378_vm8  ;;  %vm349_vm9 = vcmp.lt.f32.partialorder %v4813_v8, %v4586_v4  ;;  %v4884_v25 = vld [vmem:[%s4289_s28 + $0xe8] sm:$0xff] }
  0x5d   : > { %9441 = vst [vmem:[#allocation49_spill] sm:$0xff] %v4775_v49  ;;  %vm4820_vm4 = vmand %vm301_vm12, %vm352_vm10  ;;  %vm331_vm12 = vcmp.ge.f32.partialorder %v4825_v15, %v4583_v63 }
  0x5e   : > { %3638 = vrot.lane.b32.xlu2 %v3637_v50, %s4160_s18  ;;  %9442 = vst [vmem:[#allocation50_spill] sm:$0xff] %v4779_v41  ;;  %v4796_v50 = vsel %vm4740_vm2, 1.0, %v9437_v17  ;;  %vm312_vm2 = vcmp.ge.f32.partialorder %v255_v53, %v4454_v39  ;;  %vm403_vm5 = vmand %vm304_vm15, %vm355_vm13  ;;  %v4849_v53 = vld [vmem:[%s4289_s28 + $0xf8] sm:$0xff] }
  0x5f   : > { %9443 = vst [vmem:[#allocation51_spill] sm:$0xff] %v4782_v24  ;;  %v4835_v24 = vsel %vm426_vm14, 1.0, %v9437_v17  ;;  %vm406_vm6 = vmand %vm307_vm0, %vm358_vm1  ;;  %vm315_vm15 = vcmp.ge.f32.partialorder %v4849_v53, %v4454_v39  ;;  %vm366_vm13 = vcmp.lt.f32.partialorder %v4849_v53, %v4457_v40 }
  0x60   : > { %3633 = vrot.lane.b32.xlu1 %v3632_v62, %s4160_s18  ;;  %9446 = vst [vmem:[#allocation52_spill] sm:$0xff] %v4796_v50  ;;  %v4799_v62 = vsel %vm427_vm7, 1.0, %v9437_v17  ;;  %vm298_vm7 = vcmp.ge.f32.partialorder %v4813_v8, %v4583_v63  ;;  %vm411_vm8 = vmand %vm312_vm2, %vm363_vm3  ;;  %v4856_v41 = vsel %vm406_vm6, 1.0, %v9437_v17  ;;  %vm313_vm6 = vcmp.ge.f32.partialorder %v4884_v25, %v4583_v63 }
  0x61   : > { %9447 = vst [vmem:[#allocation53_spill] sm:$0xff] %v4799_v62  ;;  %v3647_v49 = vpack.i.bf16 %v4799_v62, %v4796_v50  ;;  %vm397_vm10 = vmand %vm298_vm7, %vm349_vm9  ;;  %v4859_v50 = vld [vmem:[%s4289_s28 + $0x100] sm:$0xff]  ;;  %vm364_vm7 = vcmp.lt.f32.partialorder %v4884_v25, %v4586_v4 }
  0x62   : > { %9448 = vst [vmem:[#allocation54_spill] sm:$0xff] %v4813_v8  ;;  %3628 = vrot.lane.b32.xlu0 %v3627_v42, %s4160_s18  ;;  %v4832_v42 = vsel %vm4784_vm11, 1.0, %v9437_v17  ;;  %vm382_vm11 = vcmp.lt.f32.partialorder %v4825_v15, %v4586_v4  ;;  %v4853_v8 = vsel %vm403_vm5, 1.0, %v9437_v17  ;;  %vm316_vm0 = vcmp.ge.f32.partialorder %v4859_v50, %v4583_v63  ;;  %vm414_vm2 = vmand %vm315_vm15, %vm366_vm13 }
  0x63   : > { %9451 = vst [vmem:[#allocation55_spill] sm:$0xff] %v4825_v15  ;;  %v3642_v46 = vpack.i.bf16 %v4835_v24, %v4832_v42  ;;  %v4867_v15 = vsel %vm411_vm8, 1.0, %v9437_v17  ;;  %vm430_vm14 = vmand %vm331_vm12, %vm382_vm11  ;;  %vm367_vm1 = vcmp.lt.f32.partialorder %v4859_v50, %v4586_v4 }
  0x64   : > { %9452 = vst [vmem:[#allocation56_spill] sm:$0xff] %v4835_v24  ;;  %v3667_v24 = vpack.i.bf16 %v4856_v41, %v4853_v8  ;;  %v4892_v40 = vsel %vm430_vm14, 1.0, %v9437_v17  ;;  %vm415_vm5 = vmand %vm316_vm0, %vm367_vm1 }
  0x65   : > { %9453 = vst [vmem:[#allocation57_spill] sm:$0xff] %v4849_v53  ;;  %v4889_v53 = vsel %vm397_vm10, 1.0, %v9437_v17  ;;  %vm412_vm8 = vmand %vm313_vm6, %vm364_vm7 }
  0x66   : > { %3653 = vrot.lane.b32.xlu2 %v3652_v31, %s4160_s18  ;;  %9454 = vst [vmem:[#allocation58_spill] sm:$0xff] %v4853_v8  ;;  %v4864_v31 = vsel %vm4820_vm4, 1.0, %v9437_v17 }
  0x67   : > { %9455 = vst [vmem:[#allocation59_spill] sm:$0xff] %v4856_v41  ;;  %v3662_v23 = vpack.i.bf16 %v4864_v31, %v4867_v15  ;;  %v4919_v41 = vsel %vm412_vm8, 1.0, %v9437_v17 }
  0x68   : > { %3648 = vrot.lane.b32.xlu1 %v3647_v49, %s4160_s18  ;;  %9456 = vst [vmem:[#allocation60_spill] sm:$0xff] %v4859_v50  ;;  %v4874_v49 = vld [vmem:[%s4289_s28 + $0xd0] sm:$0xff]  ;;  %v4910_v50 = vsel %vm415_vm5, 1.0, %v9437_v17 }
  0x69   : > { %9457 = vst [vmem:[#allocation61_spill] sm:$0xff] %v4864_v31  ;;  %vm310_vm3 = vcmp.ge.f32.partialorder %v4874_v49, %v4583_v63  ;;  %vm361_vm4 = vcmp.lt.f32.partialorder %v4874_v49, %v4586_v4 }
  0x6a   : > { %9458 = vst [vmem:[#allocation62_spill] sm:$0xff] %v4867_v15  ;;  %3643 = vrot.lane.b32.xlu0 %v3642_v46, %s4160_s18  ;;  %v3657_v46 = vpack.i.bf16 %v4889_v53, %v4892_v40  ;;  %vm409_vm9 = vmand %vm310_vm3, %vm361_vm4  ;;  %v4907_v15 = vsel %vm414_vm2, 1.0, %v9437_v17 }
  0x6b   : > { %9459 = vst [vmem:[#allocation63_spill] sm:$0xff] %v4874_v49 }
  0x6c   : > { %9460 = vst [vmem:[#allocation64_spill] sm:$0xff] %v4884_v25  ;;  %v3677_v25 = vpack.i.bf16 %v4910_v50, %v4907_v15 }
  0x6d   : > { %9461 = vst [vmem:[#allocation65_spill] sm:$0xff] %v4889_v53 }
  0x6e   : > { %9462 = vst [vmem:[#allocation66_spill] sm:$0xff] %v4892_v40  ;;  %3668 = vrot.lane.b32.xlu2 %v3667_v24, %s4160_s18  ;;  %v4916_v24 = vsel %vm409_vm9, 1.0, %v9437_v17  ;;  %v4935_v17 = vperm.slane %v4305_v2, 3 }
  0x6f   : > { %9463 = vst [vmem:[#allocation67_spill] sm:$0xff] %v4907_v15  ;;  %v4930_v15 = vperm.slane %v4305_v2, 4 }
  0x70   : > { %3663 = vrot.lane.b32.xlu1 %v3662_v23, %s4160_s18  ;;  %9464 = vst [vmem:[#allocation68_spill] sm:$0xff] %v4910_v50  ;;  %v3672_v23 = vpack.i.bf16 %v4919_v41, %v4916_v24 }
  0x71   : > { %9465 = vst [vmem:[#allocation69_spill] sm:$0xff] %v4916_v24  ;;  %v4948_v24 = vperm.slane %v4305_v2, 5 }
  0x72   : > { %3658 = vrot.lane.b32.xlu0 %v3657_v46, %s4160_s18  ;;  %9466 = vst [vmem:[#allocation70_spill] sm:$0xff] %v4919_v41  ;;  %v671_v46 = vlaneseq  ;;  %v4939_v41 = vsub.f32 %v4332_v7, %v4308_v3 }
  0x73   : > { %9468 = vst [vmem:[#allocation72_spill] sm:$0xff] %v4930_v15 }
  0x74   : > { %9469 = vst [vmem:[#allocation73_spill] sm:$0xff] %v4935_v17  ;;  %v725_v31 = vmul.f32 %v4935_v17, %v4939_v41 }
  0x75   : > { %9470 = vst [vmem:[#allocation74_spill] sm:$0xff] %v4939_v41 }
  0x76   : > { %9472 = vst [vmem:[#allocation76_spill] sm:$0xff] %v4948_v24  ;;  %v773_v19 = vmul.f32 %v4372_v20, %v725_v31 }
  0x77   : > { %9492 = vst [vmem:[#allocation94_spill] sm:$0xff] %v5047_v44 }
  0x78   : > { %3678 = vrot.lane.b32.xlu1 %v3677_v25, %s4160_s18  ;;  %9504 = vst [vmem:[#allocation105_spill] sm:$0xff] %v5115_v26 }
  0x79   : > { %9507 = vst [vmem:[#allocation107_spill] sm:$0xff] %v5151_v29 }
  0x7a   : > { %3673 = vrot.lane.b32.xlu0 %v3672_v23, %s4160_s18  ;;  %v4943_v23 = vand.u32 127, %v671_v46 }
  0x7c   : > { %vm673_vm12 = vcmp.lt.s32.totalorder %v4943_v23, 96 }
  0x98   : > { %v4925_v49 = vpop.permute.xlu2 %3588 }
  0xa0   : > { %v4927_v8 = vpop.permute.xlu2 %3593 }
  0xa1   : > { %9467 = vst [vmem:[#allocation71_spill] sm:$0xff] %v4927_v8  ;;  %v824_v8 = vsub.f32 %v4332_v7, %v4930_v15 }
  0xa3   : > { %v875_v40 = vmul.f32 %v4948_v24, %v824_v8 }
  0xa8   : > { %v4932_v50 = vpop.permute.xlu2 %3608 }
  0xa9   : > { %v9107_v4 = vunpack.i.l.bf16 %v4932_v50 }
  0xb0   : > { %v4959_v59 = vpop.permute.xlu2 %3623 }
  0xb1   : > { %9473 = vst [vmem:[#allocation77_spill] sm:$0xff] %v4959_v59  ;;  %v9109_v7 = vunpack.i.h.bf16 %v4959_v59  ;;  %v9106_v41 = vunpack.i.l.bf16 %v4959_v59 }
  0xb2   : > { %v4941_v25 = vpop.permute.xlu1 %3578 }
  0xb3   : > { %9471 = vst [vmem:[#allocation75_spill] sm:$0xff] %v4941_v25  ;;  %v9489_v28 = vunpack.i.h.bf16 %v4941_v25 }
  0xb4   : > { %v4954_v53 = vpop.permute.xlu0 %3568 }
  0xb5   : > { %v9104_v46 = vunpack.i.l.bf16 %v4954_v53 }
  0xb7   : > { %v690_v2 = vsel %vm673_vm12, %v9104_v46, %v9107_v4  ;;  %v5006_v4 = vperm.slane %v4412_v30, 4 }
  0xb8   : > { %v923_v62 = vmul.f32 %v875_v40, %v690_v2 }
  0xb9   : > { %9482 = vst [vmem:[#allocation86_spill] sm:$0xff] %v5006_v4 }
  0xba   : > { %v4969_v38 = vpop.permute.xlu1 %3583  ;;  %v4973_v31 = vadd.f32 %v923_v62, %v773_v19 }
  0xbb   : > { %9474 = vst [vmem:[#allocation78_spill] sm:$0xff] %v4969_v38  ;;  %v9108_v8 = vunpack.i.h.bf16 %v4969_v38  ;;  %v9105_v20 = vunpack.i.l.bf16 %v4969_v38  ;;  %v5021_v38 = vperm.slane %v4412_v30, 3 }
  0xbc   : > { %9475 = vst [vmem:[#allocation79_spill] sm:$0xff] %v4973_v31  ;;  %v4991_v2 = vpop.permute.xlu0 %3573  ;;  %1019 = vrot.lane.b32.xlu2 %v4973_v31, %s4160_s18 }
  0xbd   : > { %v4981_v46 = vsel %vm673_vm12, %v9105_v20, %v9106_v41  ;;  %v4989_v40 = vsel %vm673_vm12, %v9108_v8, %v9109_v7  ;;  %9478 = vst [vmem:[#allocation82_spill] sm:$0xff] %v4991_v2  ;;  %v5001_v20 = vsub.f32 %v4303_v1, %v4308_v3  ;;  %v9122_v7 = vunpack.i.l.bf16 %v4941_v25 }
  0xbe   : > { %9476 = vst [vmem:[#allocation80_spill] sm:$0xff] %v4981_v46  ;;  %v5014_v46 = vsub.f32 %v4314_v5, %v4308_v3  ;;  %v5018_v1 = vsub.f32 %v4440_v35, %v4454_v39  ;;  %v5025_v8 = vsub.f32 %v4424_v32, %v4308_v3  ;;  %v825_v2 = vsub.f32 %v4440_v35, %v5006_v4 }
  0xbf   : > { %9477 = vst [vmem:[#allocation81_spill] sm:$0xff] %v4989_v40  ;;  %v860_v25 = vsub.f32 %v4424_v32, %v4930_v15  ;;  %v762_v32 = vmul.f32 %v5021_v38, %v5047_v44  ;;  %v5099_v44 = vsub.f32 %v4571_v61, %v4583_v63 }
  0xc0   : > { %9480 = vst [vmem:[#allocation84_spill] sm:$0xff] %v5001_v20  ;;  %v5070_v35 = vmul.f32 %v4935_v17, %v5014_v46 }
  0xc1   : > { %9483 = vst [vmem:[#allocation87_spill] sm:$0xff] %v5014_v46  ;;  %v5086_v46 = vperm.slane %v4543_v56, 4  ;;  %v911_v10 = vmul.f32 %v4948_v24, %v860_v25 }
  0xc2   : > { %v4995_v19 = vpop.permute.xlu1 %3603  ;;  %9484 = vst [vmem:[#allocation88_spill] sm:$0xff] %v5018_v1 }
  0xc3   : > { %9479 = vst [vmem:[#allocation83_spill] sm:$0xff] %v4995_v19  ;;  %v862_v34 = vsub.f32 %v4571_v61, %v5086_v46 }
  0xc4   : > { %v4997_v62 = vpop.permute.xlu0 %3598  ;;  %9485 = vst [vmem:[#allocation89_spill] sm:$0xff] %v5021_v38 }
  0xc5   : > { %9486 = vst [vmem:[#allocation90_spill] sm:$0xff] %v5025_v8 }
  0xc6   : > { %9498 = vst [vmem:[#allocation100_spill] sm:$0xff] %v5086_v46 }
  0xc7   : > { %9501 = vst [vmem:[#allocation103_spill] sm:$0xff] %v5099_v44 }
  0xca   : > { %v5003_v41 = vpop.permute.xlu1 %3618 }
  0xcb   : > { %9481 = vst [vmem:[#allocation85_spill] sm:$0xff] %v5003_v41  ;;  %v9123_v31 = vunpack.i.l.bf16 %v5003_v41  ;;  %v9488_v59 = vunpack.i.h.bf16 %v5003_v41  ;;  %v5080_v41 = vsub.f32 %v4345_v11, %v4308_v3 }
  0xcc   : > { %v5043_v57 = vpop.permute.xlu0 %3613 }
  0xcd   : > { %v5033_v40 = vsel %vm673_vm12, %v9122_v7, %v9123_v31  ;;  %v5041_v9 = vsel %vm673_vm12, %v9489_v28, %v9488_v59  ;;  %9491 = vst [vmem:[#allocation93_spill] sm:$0xff] %v5043_v57  ;;  %v5052_v7 = vperm.slane %v4412_v30, 5  ;;  %v5056_v31 = vsub.f32 %v4300_v0, %v4308_v3 }
  0xce   : > { %9487 = vst [vmem:[#allocation91_spill] sm:$0xff] %v5033_v40  ;;  %v5060_v28 = vmul.f32 %v4935_v17, %v5001_v20  ;;  %v5064_v59 = vsub.f32 %v4317_v6, %v4308_v3  ;;  %v726_v30 = vmul.f32 %v5021_v38, %v5018_v1  ;;  %v761_v0 = vmul.f32 %v4935_v17, %v5025_v8 }
  0xcf   : > { %9490 = vst [vmem:[#allocation92_spill] sm:$0xff] %v5041_v9  ;;  %v861_v20 = vsub.f32 %v4654_v45, %v5006_v4  ;;  %v876_v8 = vmul.f32 %v5052_v7, %v825_v2  ;;  %v5094_v45 = vperm.slane %v4543_v56, 5  ;;  %v810_v9 = vmul.f32 %v4755_v16, %v762_v32 }
  0xd0   : > { %9493 = vst [vmem:[#allocation95_spill] sm:$0xff] %v5052_v7  ;;  %v774_v48 = vmul.f32 %v4515_v51, %v726_v30  ;;  %v809_v2 = vmul.f32 %v4539_v55, %v761_v0  ;;  %v826_v51 = vsub.f32 %v4568_v60, %v5086_v46  ;;  %v3600_v55 = vunpack.i.l.bf16 %v4997_v62  ;;  %v5122_v30 = vpop.permute.xlu2 %3638 }
  0xd1   : > { %9494 = vst [vmem:[#allocation96_spill] sm:$0xff] %v5056_v31  ;;  %v5091_v31 = vperm.slane %v4543_v56, 3  ;;  %v912_v22 = vmul.f32 %v5052_v7, %v861_v20  ;;  %v9502_v56 = vunpack.i.l.bf16 %v4932_v50  ;;  %v913_v16 = vmul.f32 %v5094_v45, %v862_v34 }
  0xd2   : > { %9495 = vst [vmem:[#allocation97_spill] sm:$0xff] %v5060_v28  ;;  %v3634_v28 = vpop.permute.xlu1 %3633  ;;  %v5129_v32 = vsub.f32 %v4443_v36, %v4454_v39  ;;  %v828_v60 = vsub.f32 %v4443_v36, %v5006_v4 }
  0xd3   : > { %9496 = vst [vmem:[#allocation98_spill] sm:$0xff] %v5064_v59  ;;  %v3635_v27 = vunpack.i.l.bf16 %v3634_v28  ;;  %v3636_v1 = vunpack.i.h.bf16 %v3634_v28  ;;  %v763_v0 = vmul.f32 %v5091_v31, %v5099_v44 }
  0xd4   : > { %9497 = vst [vmem:[#allocation99_spill] sm:$0xff] %v5080_v41  ;;  %v5110_v25 = vpop.permute.xlu0 %3628 }
  0xd5   : > { %9499 = vst [vmem:[#allocation101_spill] sm:$0xff] %v5091_v31  ;;  %v674_v19 = vsel %vm673_vm12, %v9502_v56, %v3635_v27  ;;  %v3631_v61 = vunpack.i.h.bf16 %v5110_v25  ;;  %v9154_v20 = vunpack.i.l.bf16 %v5110_v25  ;;  %v718_v57 = vsel %vm673_vm12, %v3636_v1, %v3600_v55 }
  0xd6   : > { %9500 = vst [vmem:[#allocation102_spill] sm:$0xff] %v5094_v45  ;;  %v924_v28 = vmul.f32 %v876_v8, %v674_v19  ;;  %v9506_v8 = vunpack.i.l.bf16 %v4925_v49 }
  0xd7   : > { %9503 = vst [vmem:[#allocation104_spill] sm:$0xff] %v5110_v25  ;;  %v686_v56 = vsel %vm673_vm12, %v3631_v61, %v3636_v1  ;;  %v702_v34 = vsel %vm673_vm12, %v3600_v55, %v3631_v61  ;;  %v3641_v25 = vunpack.i.h.bf16 %v5122_v30  ;;  %v863_v61 = vsub.f32 %v4427_v33, %v4930_v15 }
  0xd8   : > { %9505 = vst [vmem:[#allocation106_spill] sm:$0xff] %v5129_v32  ;;  %v5141_v19 = vsel %vm673_vm12, %v9506_v8, %v9154_v20  ;;  %v5145_v44 = vadd.f32 %v924_v28, %v774_v48  ;;  %v959_v36 = vmul.f32 %v911_v10, %v702_v34  ;;  %v960_v40 = vmul.f32 %v912_v22, %v686_v56 }
  0xd9   : > { %v727_v8 = vmul.f32 %v5091_v31, %v5115_v26  ;;  %v877_v48 = vmul.f32 %v5094_v45, %v826_v51  ;;  %v729_v22 = vmul.f32 %v5021_v38, %v5129_v32  ;;  %v879_v55 = vmul.f32 %v5052_v7, %v828_v60 }
  0xda   : > { %1051 = vrot.lane.b32.xlu1 %v5145_v44, %s4160_s18  ;;  %v5161_v1 = vadd.f32 %v959_v36, %v809_v2  ;;  %v5163_v10 = vadd.f32 %v960_v40, %v810_v9  ;;  %v9508_v28 = vunpack.i.h.bf16 %v4932_v50  ;;  %v9509_v34 = vunpack.i.l.bf16 %v4954_v53 }
  0xdb   : > { %v811_v33 = vmul.f32 %v4717_v47, %v763_v0  ;;  %v961_v2 = vmul.f32 %v913_v16, %v718_v57  ;;  %v728_v9 = vmul.f32 %v4935_v17, %v5080_v41  ;;  %v3601_v60 = vunpack.i.h.bf16 %v4997_v62 }
  0xdc   : > { %v675_v56 = vsel %vm673_vm12, %v9508_v28, %v3641_v25  ;;  %v706_v51 = vsel %vm673_vm12, %v3635_v27, %v9509_v34  ;;  %v5181_v36 = vpop.permute.xlu0 %3643  ;;  %1043 = vrot.lane.b32.xlu0 %v5161_v1, %s4160_s18  ;;  %1075 = vrot.lane.b32.xlu2 %v5163_v10, %s4160_s18  ;;  %v827_v27 = vsub.f32 %v4345_v11, %v4930_v15  ;;  %v3571_v57 = vunpack.i.h.bf16 %v4954_v53 }
  0xdd   : > { %v5192_v47 = vsub.f32 %v4731_v43, %v4583_v63  ;;  %v865_v62 = vsub.f32 %v4731_v43, %v5086_v46  ;;  %v5198_v0 = vsub.f32 %v4589_v12, %v4583_v63  ;;  %v775_v16 = vmul.f32 %v4712_v37, %v727_v8 }
  0xde   : > { %v925_v28 = vmul.f32 %v877_v48, %v706_v51  ;;  %v777_v34 = vmul.f32 %v4528_v54, %v729_v22  ;;  %v927_v20 = vmul.f32 %v879_v55, %v675_v56  ;;  %v3645_v11 = vunpack.i.l.bf16 %v5181_v36 }
  0xdf   : > { %9510 = vst [vmem:[#allocation108_spill] sm:$0xff] %v5192_v47  ;;  %v5203_v53 = vadd.f32 %v961_v2, %v811_v33  ;;  %v764_v40 = vmul.f32 %v4935_v17, %v5151_v29  ;;  %v914_v32 = vmul.f32 %v4948_v24, %v863_v61  ;;  %v740_v43 = vmul.f32 %v4935_v17, %v5064_v59  ;;  %v5240_v2 = vpop.permute.xlu1 %3648 }
  0xe0   : > { %9511 = vst [vmem:[#allocation109_spill] sm:$0xff] %v5198_v0  ;;  %v9513_v41 = vunpack.i.l.bf16 %v5122_v30  ;;  %v878_v54 = vmul.f32 %v4948_v24, %v827_v27  ;;  %v829_v8 = vsub.f32 %v4589_v12, %v5086_v46  ;;  %v785_v48 = vmul.f32 %v4350_v13, %v5070_v35 }
  0xe1   : > { %9512 = vst [vmem:[#allocation110_spill] sm:$0xff] %v5203_v53  ;;  %v776_v22 = vmul.f32 %v4378_v21, %v728_v9  ;;  %v9514_v61 = vunpack.i.h.bf16 %v4932_v50  ;;  %v5228_v56 = vadd.f32 %v925_v28, %v775_v16  ;;  %v5230_v51 = vadd.f32 %v927_v20, %v777_v34 }
  0xe2   : > { %v703_v37 = vsel %vm673_vm12, %v3601_v60, %v9513_v41  ;;  %1107 = vrot.lane.b32.xlu1 %v5203_v53, %s4160_s18  ;;  %v766_v41 = vmul.f32 %v5091_v31, %v5192_v47  ;;  %v916_v12 = vmul.f32 %v5094_v45, %v865_v62  ;;  %v730_v13 = vmul.f32 %v5091_v31, %v5198_v0  ;;  %v9536_v47 = vld [vmem:[#allocation97_spill] sm:$0xff]  ;;  %v9537_v53 = vld [vmem:[#allocation14_spill] sm:$0xff] }
  0xe3   : > { %v691_v55 = vsel %vm673_vm12, %v3571_v57, %v9514_v61  ;;  %9515 = vst [vmem:[#allocation111_spill] sm:$0xff] %v5230_v51  ;;  %v719_v21 = vsel %vm673_vm12, %v3645_v11, %v3601_v60  ;;  %v812_v50 = vmul.f32 %v4548_v58, %v764_v40  ;;  %v962_v35 = vmul.f32 %v914_v32, %v703_v37  ;;  %v9520_v61 = vld [vmem:[#allocation91_spill] sm:$0xff] }
  0xe4   : > { %v836_v33 = vsub.f32 %v4314_v5, %v4930_v15  ;;  %1083 = vrot.lane.b32.xlu0 %v5228_v56, %s4160_s18  ;;  %1053 = vrot.lane.b32.xlu2 %v5230_v51, %s4160_s18  ;;  %v926_v20 = vmul.f32 %v878_v54, %v691_v55  ;;  %v880_v9 = vmul.f32 %v5094_v45, %v829_v8 }
  0xe5   : > { %v5249_v60 = vsub.f32 %v4522_v52, %v4454_v39  ;;  %v707_v58 = vsel %vm673_vm12, %v3641_v25, %v3571_v57  ;;  %v814_v5 = vmul.f32 %v4832_v42, %v766_v41  ;;  %v831_v32 = vsub.f32 %v4522_v52, %v5006_v4  ;;  %v9519_v52 = vld [vmem:[#allocation42_spill] sm:$0xff] }
  0xe6   : > { %v887_v40 = vmul.f32 %v4948_v24, %v836_v33  ;;  %v964_v27 = vmul.f32 %v916_v12, %v719_v21  ;;  %v5259_v62 = vsub.f32 %v4608_v18, %v4454_v39  ;;  %v864_v16 = vsub.f32 %v4608_v18, %v5006_v4  ;;  %v9521_v18 = vld [vmem:[#allocation93_spill] sm:$0xff] }
  0xe7   : > { %9516 = vst [vmem:[#allocation112_spill] sm:$0xff] %v5249_v60  ;;  %v839_v28 = vsub.f32 %v4317_v6, %v4930_v15  ;;  %v788_v25 = vmul.f32 %v4355_v14, %v740_v43  ;;  %v9159_v42 = vunpack.i.l.bf16 %v5240_v2  ;;  %v5267_v57 = vadd.f32 %v962_v35, %v812_v50  ;;  %v9522_v14 = vld [vmem:[#allocation18_spill] sm:$0xff] }
  0xe8   : > { %9517 = vst [vmem:[#allocation113_spill] sm:$0xff] %v5259_v62  ;;  %v778_v34 = vmul.f32 %v9519_v52, %v730_v13  ;;  %v5270_v37 = vadd.f32 %v926_v20, %v776_v22  ;;  %v928_v54 = vmul.f32 %v880_v9, %v707_v58  ;;  %v732_v8 = vmul.f32 %v5021_v38, %v5249_v60  ;;  %v9526_v58 = vld [vmem:[#allocation92_spill] sm:$0xff] }
  0xe9   : > { %9518 = vst [vmem:[#allocation114_spill] sm:$0xff] %v5267_v57  ;;  %v935_v55 = vmul.f32 %v887_v40, %v9520_v61  ;;  %v3615_v41 = vunpack.i.l.bf16 %v9521_v18  ;;  %v882_v6 = vmul.f32 %v5052_v7, %v831_v32  ;;  %v5281_v43 = vsub.f32 %v9522_v14, %v4308_v3  ;;  %v9527_v32 = vld [vmem:[#allocation83_spill] sm:$0xff]  ;;  %v9531_v61 = vld [vmem:[#allocation44_spill] sm:$0xff] }
  0xea   : > { %1045 = vrot.lane.b32.xlu1 %v5267_v57, %s4160_s18  ;;  %v890_v22 = vmul.f32 %v4948_v24, %v839_v28  ;;  %v5284_v12 = vadd.f32 %v964_v27, %v814_v5  ;;  %v765_v13 = vmul.f32 %v5021_v38, %v5259_v62  ;;  %v915_v21 = vmul.f32 %v5052_v7, %v864_v16  ;;  %v9528_v16 = vld [vmem:[#allocation15_spill] sm:$0xff] }
  0xeb   : > { %9523 = vst [vmem:[#allocation42_spill] sm:$0xff] %v5281_v43  ;;  %v866_v50 = vsub.f32 %v9522_v14, %v4930_v15  ;;  %v676_v35 = vsel %vm673_vm12, %v3615_v41, %v9159_v42  ;;  %v9525_v33 = vunpack.i.l.bf16 %v5122_v30  ;;  %v5299_v9 = vadd.f32 %v935_v55, %v785_v48  ;;  %v9530_v48 = vld [vmem:[#allocation37_spill] sm:$0xff] }
  0xec   : > { %9524 = vst [vmem:[#allocation91_spill] sm:$0xff] %v5284_v12  ;;  %v938_v5 = vmul.f32 %v890_v22, %v9526_v58  ;;  %v3605_v40 = vunpack.i.l.bf16 %v9527_v32  ;;  %1021 = vrot.lane.b32.xlu0 %v5270_v37, %s4160_s18  ;;  %1109 = vrot.lane.b32.xlu2 %v5284_v12, %s4160_s18  ;;  %v5310_v30 = vsub.f32 %v9528_v16, %v4308_v3  ;;  %v9533_v22 = vld [vmem:[#allocation43_spill] sm:$0xff] }
  0xed   : > { %v687_v20 = vsel %vm673_vm12, %v9525_v33, %v3645_v11  ;;  %v830_v11 = vsub.f32 %v9528_v16, %v4930_v15  ;;  %v780_v28 = vmul.f32 %v9530_v48, %v732_v8  ;;  %v767_v52 = vmul.f32 %v4935_v17, %v5281_v43  ;;  %v9535_v48 = vld [vmem:[#allocation96_spill] sm:$0xff] }
  0xee   : > { %9529 = vst [vmem:[#allocation93_spill] sm:$0xff] %v5310_v30  ;;  %v5319_v55 = vsub.f32 %v9531_v61, %v4583_v63  ;;  %v868_v14 = vsub.f32 %v9531_v61, %v5086_v46  ;;  %v813_v33 = vmul.f32 %v9533_v22, %v765_v13  ;;  %v963_v58 = vmul.f32 %v915_v21, %v687_v20  ;;  %v9539_v13 = vld [vmem:[#allocation82_spill] sm:$0xff]  ;;  %v9543_v22 = vld [vmem:[#allocation39_spill] sm:$0xff] }
  0xef   : > { %v930_v42 = vmul.f32 %v882_v6, %v676_v35  ;;  %v5324_v27 = vadd.f32 %v938_v5, %v788_v25  ;;  %v3651_v16 = vunpack.i.h.bf16 %v5240_v2  ;;  %v5327_v12 = vadd.f32 %v928_v54, %v778_v34  ;;  %v9540_v54 = vld [vmem:[#allocation28_spill] sm:$0xff] }
  0xf0   : > { %9532 = vst [vmem:[#allocation18_spill] sm:$0xff] %v5319_v55  ;;  %v917_v8 = vmul.f32 %v4948_v24, %v866_v50  ;;  %v749_v59 = vmul.f32 %v4935_v17, %v9535_v48  ;;  %v5334_v60 = vmul.f32 %v9537_v53, %v9536_v47  ;;  %v9538_v61 = vunpack.i.h.bf16 %v5181_v36  ;;  %v5349_v53 = vpop.permute.xlu2 %3653 }
  0xf1   : > { %9534 = vst [vmem:[#allocation92_spill] sm:$0xff] %v5324_v27  ;;  %v731_v25 = vmul.f32 %v4935_v17, %v5310_v30  ;;  %v3575_v34 = vunpack.i.l.bf16 %v9539_v13  ;;  %v815_v21 = vmul.f32 %v9540_v54, %v767_v52  ;;  %v881_v50 = vmul.f32 %v4948_v24, %v830_v11 }
  0xf2   : > { %v704_v6 = vsel %vm673_vm12, %v3605_v40, %v9538_v61  ;;  %1085 = vrot.lane.b32.xlu1 %v5327_v12, %s4160_s18  ;;  %v769_v47 = vmul.f32 %v5091_v31, %v5319_v55  ;;  %v5351_v35 = vadd.f32 %v963_v58, %v813_v33  ;;  %v5353_v20 = vadd.f32 %v930_v42, %v780_v28  ;;  %v9545_v33 = vld [vmem:[#allocation13_spill] sm:$0xff] }
  0xf3   : > { %v919_v5 = vmul.f32 %v5094_v45, %v868_v14  ;;  %v5358_v61 = vsub.f32 %v9543_v22, %v4583_v63  ;;  %v692_v52 = vsel %vm673_vm12, %v3575_v34, %v3615_v41  ;;  %v720_v11 = vsel %vm673_vm12, %v3651_v16, %v3605_v40  ;;  %v9546_v41 = vld [vmem:[#allocation20_spill] sm:$0xff] }
  0xf4   : > { %9541 = vst [vmem:[#allocation83_spill] sm:$0xff] %v5351_v35  ;;  %v965_v54 = vmul.f32 %v917_v8, %v704_v6  ;;  %v832_v48 = vsub.f32 %v9543_v22, %v5086_v46  ;;  %v5367_v58 = vmul.f32 %v9545_v33, %v749_v59  ;;  %1077 = vrot.lane.b32.xlu0 %v5351_v35, %s4160_s18  ;;  %v9548_v8 = vld [vmem:[#allocation23_spill] sm:$0xff]  ;;  %v9549_v6 = vld [vmem:[#allocation53_spill] sm:$0xff]  ;;  %v9550_v33 = vld [vmem:[#allocation40_spill] sm:$0xff] }
  0xf5   : > { %9542 = vst [vmem:[#allocation15_spill] sm:$0xff] %v5353_v20  ;;  %1055 = vrot.lane.b32.xlu2 %v5353_v20, %s4160_s18  ;;  %v5376_v28 = vsub.f32 %v9546_v41, %v4308_v3  ;;  %v869_v40 = vsub.f32 %v9546_v41, %v4930_v15  ;;  %v779_v59 = vmul.f32 %v9548_v8, %v731_v25  ;;  %v9552_v20 = vld [vmem:[#allocation45_spill] sm:$0xff]  ;;  %v9180_v41 = vunpack.i.h.bf16 %v9527_v32 }
  0xf6   : > { %9544 = vst [vmem:[#allocation37_spill] sm:$0xff] %v5358_v61  ;;  %v817_v22 = vmul.f32 %v9549_v6, %v769_v47  ;;  %v5385_v42 = vsub.f32 %v9550_v33, %v4583_v63  ;;  %v929_v55 = vmul.f32 %v881_v50, %v692_v52  ;;  %v967_v51 = vmul.f32 %v919_v5, %v720_v11 }
  0xf7   : > { %9547 = vst [vmem:[#allocation44_spill] sm:$0xff] %v5376_v28  ;;  %v5389_v43 = vsub.f32 %v9552_v20, %v4454_v39  ;;  %v867_v30 = vsub.f32 %v9552_v20, %v5006_v4  ;;  %v5394_v14 = vadd.f32 %v965_v54, %v815_v21  ;;  %v733_v25 = vmul.f32 %v5091_v31, %v5358_v61 }
  0xf8   : > { %9551 = vst [vmem:[#allocation43_spill] sm:$0xff] %v5385_v42  ;;  %v883_v47 = vmul.f32 %v5094_v45, %v832_v48  ;;  %v9555_v8 = vunpack.i.l.bf16 %v5240_v2  ;;  %v770_v5 = vmul.f32 %v4935_v17, %v5376_v28  ;;  %v920_v52 = vmul.f32 %v4948_v24, %v869_v40  ;;  %v9556_v48 = vld [vmem:[#allocation16_spill] sm:$0xff] }
  0xf9   : > { %9553 = vst [vmem:[#allocation97_spill] sm:$0xff] %v5389_v43  ;;  %v835_v20 = vsub.f32 %v9550_v33, %v5086_v46  ;;  %v3576_v21 = vunpack.i.h.bf16 %v9539_v13  ;;  %v5413_v11 = vsub.f32 %v9556_v48, %v4308_v3  ;;  %v833_v2 = vsub.f32 %v9556_v48, %v4930_v15 }
  0xfa   : > { %9554 = vst [vmem:[#allocation14_spill] sm:$0xff] %v5394_v14  ;;  %v708_v50 = vsel %vm673_vm12, %v9555_v8, %v3575_v34  ;;  %1047 = vrot.lane.b32.xlu1 %v5394_v14, %s4160_s18  ;;  %v736_v34 = vmul.f32 %v5091_v31, %v5385_v42  ;;  %v5419_v54 = vadd.f32 %v929_v55, %v779_v59  ;;  %v9560_v33 = vunpack.i.l.bf16 %v5349_v53  ;;  %v9562_v59 = vld [vmem:[#allocation52_spill] sm:$0xff] }
  0xfb   : > { %9557 = vst [vmem:[#allocation82_spill] sm:$0xff] %v5413_v11  ;;  %v5421_v40 = vadd.f32 %v967_v51, %v817_v22  ;;  %v768_v13 = vmul.f32 %v5021_v38, %v5389_v43  ;;  %v918_v6 = vmul.f32 %v5052_v7, %v867_v30  ;;  %v9561_v48 = vunpack.i.h.bf16 %v5181_v36  ;;  %v5439_v30 = vpop.permute.xlu1 %3663  ;;  %v9563_v36 = vld [vmem:[#allocation30_spill] sm:$0xff]  ;;  %v9567_v14 = vld [vmem:[#allocation56_spill] sm:$0xff] }
  0xfc   : > { %9558 = vst [vmem:[#allocation28_spill] sm:$0xff] %v5419_v54  ;;  %v705_v8 = vsel %vm673_vm12, %v9180_v41, %v9560_v33  ;;  %v781_v51 = vmul.f32 %v9562_v59, %v733_v25  ;;  %v931_v22 = vmul.f32 %v883_v47, %v708_v50  ;;  %v3656_v42 = vunpack.i.h.bf16 %v5349_v53  ;;  %1023 = vrot.lane.b32.xlu0 %v5419_v54, %s4160_s18  ;;  %v9565_v47 = vld [vmem:[#allocation29_spill] sm:$0xff] }
  0xfd   : > { %9559 = vst [vmem:[#allocation39_spill] sm:$0xff] %v5421_v40  ;;  %v688_v55 = vsel %vm673_vm12, %v9561_v48, %v3651_v16  ;;  %v3616_v28 = vunpack.i.h.bf16 %v9521_v18  ;;  %1111 = vrot.lane.b32.xlu2 %v5421_v40, %s4160_s18  ;;  %v5447_v33 = vsub.f32 %v9563_v36, %v4454_v39  ;;  %v3879_v16 = vld [vmem:[%s4289_s28 + $0xc0] sm:$0xff]  ;;  %v818_v50 = vmul.f32 %v9565_v47, %v770_v5 }
  0xfe   : > { %v848_v25 = vsub.f32 %v3879_v16, %v4930_v15  ;;  %v834_v18 = vsub.f32 %v9563_v36, %v5006_v4  ;;  %v9566_v48 = vld [vmem:[#allocation50_spill] sm:$0xff]  ;;  %v886_v41 = vmul.f32 %v5094_v45, %v835_v20  ;;  %v816_v43 = vmul.f32 %v9567_v14, %v768_v13  ;;  %v3659_v13 = vpop.permute.xlu0 %3658 }
  0xff   : > { %9564 = vst [vmem:[#allocation13_spill] sm:$0xff] %v5447_v33  ;;  %v784_v59 = vmul.f32 %v9566_v48, %v736_v34  ;;  %v966_v61 = vmul.f32 %v918_v6, %v688_v55  ;;  %v968_v40 = vmul.f32 %v920_v52, %v705_v8  ;;  %v9190_v35 = vunpack.i.l.bf16 %v5439_v30  ;;  %v9568_v8 = vld [vmem:[#allocation41_spill] sm:$0xff] }
 0x100   : > { %v899_v54 = vmul.f32 %v4948_v24, %v848_v25  ;;  %v5459_v57 = vadd.f32 %v931_v22, %v781_v51  ;;  %v734_v5 = vmul.f32 %v4935_v17, %v5413_v11  ;;  %v884_v36 = vmul.f32 %v4948_v24, %v833_v2  ;;  %v3880_v51 = vld [vmem:[%s4289_s28 + $0xd8] sm:$0xff] }
 0x101   : > { %v709_v34 = vsel %vm673_vm12, %v3656_v42, %v3576_v21  ;;  %v693_v14 = vsel %vm673_vm12, %v3576_v21, %v3616_v28  ;;  %v735_v52 = vmul.f32 %v5021_v38, %v5447_v33  ;;  %v885_v6 = vmul.f32 %v5052_v7, %v834_v18  ;;  %v9572_v18 = vld [vmem:[#allocation26_spill] sm:$0xff] }
 0x102   : > { %v947_v20 = vmul.f32 %v899_v54, %v5141_v19  ;;  %1087 = vrot.lane.b32.xlu1 %v5459_v57, %s4160_s18  ;;  %v5476_v2 = vsub.f32 %v9568_v8, %v4454_v39  ;;  %v870_v55 = vsub.f32 %v9568_v8, %v5006_v4  ;;  %v851_v21 = vsub.f32 %v3880_v51, %v4930_v15 }
 0x103   : > { %v677_v22 = vsel %vm673_vm12, %v3616_v28, %v3656_v42  ;;  %v5484_v19 = vadd.f32 %v966_v61, %v816_v43  ;;  %v5486_v54 = vadd.f32 %v968_v40, %v818_v50  ;;  %v9571_v25 = vunpack.i.h.bf16 %v4925_v49  ;;  %v9573_v43 = vld [vmem:[#allocation38_spill] sm:$0xff]  ;;  %v9574_v28 = vld [vmem:[#allocation55_spill] sm:$0xff] }
 0x104   : > { %9569 = vst [vmem:[#allocation20_spill] sm:$0xff] %v5476_v2  ;;  %v5489_v16 = vadd.f32 %v947_v20, %v5367_v58  ;;  %v782_v48 = vmul.f32 %v9572_v18, %v734_v5  ;;  %v932_v8 = vmul.f32 %v884_v36, %v693_v14  ;;  %v902_v51 = vmul.f32 %v4948_v24, %v851_v21 }
 0x105   : > { %v699_v47 = vsel %vm673_vm12, %v9571_v25, %v9190_v35  ;;  %v3660_v42 = vunpack.i.l.bf16 %v3659_v13  ;;  %1079 = vrot.lane.b32.xlu0 %v5484_v19, %s4160_s18  ;;  %1049 = vrot.lane.b32.xlu2 %v5486_v54, %s4160_s18  ;;  %v783_v61 = vmul.f32 %v9573_v43, %v735_v52  ;;  %v934_v58 = vmul.f32 %v886_v41, %v709_v34  ;;  %v9577_v41 = vld [vmem:[#allocation27_spill] sm:$0xff] }
 0x106   : > { %9570 = vst [vmem:[#allocation23_spill] sm:$0xff] %v5489_v16  ;;  %v5506_v40 = vsub.f32 %v9574_v28, %v4583_v63  ;;  %v933_v50 = vmul.f32 %v885_v6, %v677_v22  ;;  %v771_v5 = vmul.f32 %v5021_v38, %v5476_v2  ;;  %v921_v36 = vmul.f32 %v5052_v7, %v870_v55  ;;  %v9579_v43 = vld [vmem:[#allocation51_spill] sm:$0xff] }
 0x107   : > { %v871_v14 = vsub.f32 %v9574_v28, %v5086_v46  ;;  %v9576_v20 = vunpack.i.l.bf16 %v5349_v53  ;;  %v5519_v34 = vsub.f32 %v9577_v41, %v4454_v39  ;;  %v837_v52 = vsub.f32 %v9577_v41, %v5006_v4 }
 0x108   : > { %9575 = vst [vmem:[#allocation53_spill] sm:$0xff] %v5506_v40  ;;  %v950_v6 = vmul.f32 %v902_v51, %v699_v47  ;;  %v3661_v22 = vunpack.i.h.bf16 %v3659_v13  ;;  %v5523_v25 = vadd.f32 %v932_v8, %v782_v48  ;;  %v5530_v53 = vadd.f32 %v933_v50, %v783_v61  ;;  %v9580_v48 = vld [vmem:[#allocation85_spill] sm:$0xff]  ;;  %v9584_v50 = vld [vmem:[#allocation54_spill] sm:$0xff] }
 0x109   : > { %v689_v21 = vsel %vm673_vm12, %v9576_v20, %v3660_v42  ;;  %9578 = vst [vmem:[#allocation40_spill] sm:$0xff] %v5519_v34  ;;  %v5532_v18 = vadd.f32 %v934_v58, %v784_v59  ;;  %v819_v28 = vmul.f32 %v9579_v43, %v771_v5  ;;  %v772_v41 = vmul.f32 %v5091_v31, %v5506_v40  ;;  %v5653_v40 = vld [vmem:[%s4289_s28 + $0x98] sm:$0xff] }
 0x10a   : > { %v5526_v55 = vadd.f32 %v950_v6, %v5334_v60  ;;  %1025 = vrot.lane.b32.xlu1 %v5523_v25, %s4160_s18  ;;  %v969_v20 = vmul.f32 %v921_v36, %v689_v21  ;;  %v922_v13 = vmul.f32 %v5094_v45, %v871_v14  ;;  %v738_v47 = vmul.f32 %v5021_v38, %v5519_v34  ;;  %v9587_v21 = vld [vmem:[#allocation33_spill] sm:$0xff] }
 0x10b   : > { %v888_v60 = vmul.f32 %v5052_v7, %v837_v52  ;;  %v9581_v8 = vunpack.i.l.bf16 %v9580_v48  ;;  %v9582_v59 = vunpack.i.h.bf16 %v9527_v32  ;;  %v5557_v5 = vsub.f32 %v9584_v50, %v4583_v63  ;;  %v9586_v32 = vld [vmem:[#allocation66_spill] sm:$0xff]  ;;  %9611 = vst [vmem:[#allocation85_spill] sm:$0xff] %v5653_v40 }
 0x10c   : > { %v5553_v58 = vadd.f32 %v969_v20, %v819_v28  ;;  %v838_v36 = vsub.f32 %v9584_v50, %v5086_v46  ;;  %v820_v14 = vmul.f32 %v9586_v32, %v772_v41  ;;  %v786_v52 = vmul.f32 %v9587_v21, %v738_v47  ;;  %v9588_v20 = vld [vmem:[#allocation75_spill] sm:$0xff] }
 0x10d   : > { %v678_v51 = vsel %vm673_vm12, %v9581_v8, %v3661_v22  ;;  %v721_v61 = vsel %vm673_vm12, %v3660_v42, %v9582_v59  ;;  %1057 = vrot.lane.b32.xlu0 %v5530_v53, %s4160_s18  ;;  %1089 = vrot.lane.b32.xlu2 %v5532_v18, %s4160_s18  ;;  %9585 = vst [vmem:[#allocation16_spill] sm:$0xff] %v5557_v5  ;;  %v9589_v8 = vunpack.i.l.bf16 %v9588_v20  ;;  %v9592_v47 = vld [vmem:[#allocation47_spill] sm:$0xff]  ;;  %v3666_v50 = vunpack.i.h.bf16 %v5439_v30 }
 0x10e   : > { %9583 = vst [vmem:[#allocation45_spill] sm:$0xff] %v5553_v58  ;;  %v970_v42 = vmul.f32 %v922_v13, %v721_v61  ;;  %v936_v6 = vmul.f32 %v888_v60, %v678_v51  ;;  %v739_v43 = vmul.f32 %v5091_v31, %v5557_v5  ;;  %v889_v28 = vmul.f32 %v5094_v45, %v838_v36  ;;  %v5583_v61 = vld [vmem:[%s4289_s28 + $0x110] sm:$0xff]  ;;  %v9595_v36 = vld [vmem:[#allocation65_spill] sm:$0xff] }
 0x10f   : > { %v710_v59 = vsel %vm673_vm12, %v3661_v22, %v9589_v8  ;;  %v5578_v60 = vsub.f32 %v9592_v47, %v4583_v63  ;;  %v841_v51 = vsub.f32 %v9592_v47, %v5086_v46  ;;  %9594 = vst [vmem:[#allocation50_spill] sm:$0xff] %v5583_v61  ;;  %v262_v22 = vld [vmem:[%s4289_s28 + $0x118] sm:$0xff]  ;;  %vm318_vm11 = vcmp.ge.f32.partialorder %v5583_v61, %v4454_v39  ;;  %v9599_v8 = vld [vmem:[#allocation32_spill] sm:$0xff] }
 0x110   : > { %v5572_v41 = vadd.f32 %v970_v42, %v820_v14  ;;  %v5574_v13 = vadd.f32 %v936_v6, %v786_v52  ;;  %v787_v32 = vmul.f32 %v9595_v36, %v739_v43  ;;  %v937_v14 = vmul.f32 %v889_v28, %v710_v59  ;;  %v5593_v42 = vld [vmem:[%s4289_s28 + $0x80] sm:$0xff]  ;;  %v9598_v6 = vld [vmem:[#allocation25_spill] sm:$0xff]  ;;  %v3669_v36 = vpop.permute.xlu2 %3668 }
 0x111   : > { %9593 = vst [vmem:[#allocation29_spill] sm:$0xff] %v5578_v60  ;;  %v5597_v21 = vsub.f32 %v5593_v42, %v4454_v39  ;;  %v840_v52 = vsub.f32 %v5593_v42, %v5006_v4  ;;  %vm369_vm10 = vcmp.lt.f32.partialorder %v5583_v61, %v9598_v6  ;;  %v742_v43 = vmul.f32 %v5091_v31, %v5578_v60  ;;  %v9619_v60 = vld [vmem:[#allocation21_spill] sm:$0xff] }
 0x112   : > { %1081 = vrot.lane.b32.xlu1 %v5553_v58, %s4160_s18  ;;  %9590 = vst [vmem:[#allocation52_spill] sm:$0xff] %v5572_v41  ;;  %v892_v28 = vmul.f32 %v5094_v45, %v841_v51  ;;  %vm319_vm14 = vcmp.ge.f32.partialorder %v262_v22, %v4583_v63  ;;  %vm370_vm15 = vcmp.lt.f32.partialorder %v262_v22, %v9599_v8  ;;  %v9600_v59 = vunpack.i.h.bf16 %v9588_v20  ;;  %vm417_vm13 = vmand %vm318_vm11, %vm369_vm10  ;;  %v9602_v8 = vld [vmem:[#allocation61_spill] sm:$0xff] }
 0x113   : > { %9591 = vst [vmem:[#allocation30_spill] sm:$0xff] %v5574_v13  ;;  %v9601_v6 = vunpack.i.h.bf16 %v9580_v48  ;;  %v5620_v51 = vadd.f32 %v937_v14, %v787_v32  ;;  %v741_v22 = vmul.f32 %v5021_v38, %v5597_v21  ;;  %v891_v20 = vmul.f32 %v5052_v7, %v840_v52  ;;  %vm418_vm0 = vmand %vm319_vm14, %vm370_vm15 }
 0x114   : > { %9596 = vst [vmem:[#allocation56_spill] sm:$0xff] %v5593_v42  ;;  %v711_v47 = vsel %vm673_vm12, %v3666_v50, %v9600_v59  ;;  %v790_v59 = vmul.f32 %v9602_v8, %v742_v43  ;;  %v5627_v42 = vld [vmem:[%s4289_s28 + $0x90] sm:$0xff]  ;;  %v3670_v32 = vunpack.i.l.bf16 %v3669_v36  ;;  %v9605_v14 = vmov 0.0   ;;  %v9610_v8 = vld [vmem:[#allocation34_spill] sm:$0xff] }
 0x115   : > { %1113 = vrot.lane.b32.xlu0 %v5572_v41, %s4160_s18  ;;  %1059 = vrot.lane.b32.xlu2 %v5574_v13, %s4160_s18  ;;  %9597 = vst [vmem:[#allocation41_spill] sm:$0xff] %v5597_v21  ;;  %v679_v35 = vsel %vm673_vm12, %v9601_v6, %v3666_v50  ;;  %v940_v61 = vmul.f32 %v892_v28, %v711_v47  ;;  %v5640_v52 = vsel %vm417_vm13, 1.0, %v9605_v14  ;;  %v5643_v43 = vsel %vm418_vm0, 1.0, %v9605_v14  ;;  %v9608_v28 = vld [vmem:[#allocation48_spill] sm:$0xff] }
 0x116   : > { %9603 = vst [vmem:[#allocation26_spill] sm:$0xff] %v5627_v42  ;;  %v5631_v48 = vsub.f32 %v5627_v42, %v4308_v3  ;;  %v842_v50 = vsub.f32 %v5627_v42, %v4930_v15  ;;  %v5647_v47 = vsub.f32 %v9608_v28, %v4583_v63  ;;  %v844_v6 = vsub.f32 %v9608_v28, %v5086_v46 }
 0x117   : > { %9606 = vst [vmem:[#allocation55_spill] sm:$0xff] %v5640_v52  ;;  %v789_v42 = vmul.f32 %v9610_v8, %v741_v22  ;;  %v939_v41 = vmul.f32 %v891_v20, %v679_v35  ;;  %v5657_v58 = vsub.f32 %v5653_v40, %v4454_v39  ;;  %v843_v14 = vsub.f32 %v5653_v40, %v5006_v4  ;;  %v9614_v22 = vld [vmem:[#allocation77_spill] sm:$0xff]  ;;  %v9616_v40 = vld [vmem:[#allocation78_spill] sm:$0xff] }
 0x118   : > { %9604 = vst [vmem:[#allocation38_spill] sm:$0xff] %v5631_v48  ;;  %v5661_v2 = vadd.f32 %v940_v61, %v790_v59  ;;  %v743_v21 = vmul.f32 %v4935_v17, %v5631_v48  ;;  %v893_v28 = vmul.f32 %v4948_v24, %v842_v50  ;;  %v3682_v35 = vpack.i.bf16 %v5643_v43, %v5640_v52 }
 0x119   : > { %9607 = vst [vmem:[#allocation27_spill] sm:$0xff] %v5643_v43  ;;  %v9615_v20 = vunpack.i.l.bf16 %v9614_v22  ;;  %v745_v61 = vmul.f32 %v5091_v31, %v5647_v47  ;;  %v895_v59 = vmul.f32 %v5094_v45, %v844_v6  ;;  %v9617_v48 = vunpack.i.l.bf16 %v9616_v40 }
 0x11a   : > { %1027 = vrot.lane.b32.xlu1 %v5299_v9, %s4160_s18  ;;  %9609 = vst [vmem:[#allocation51_spill] sm:$0xff] %v5647_v47  ;;  %v5681_v43 = vadd.f32 %v939_v41, %v789_v42  ;;  %v744_v52 = vmul.f32 %v5021_v38, %v5657_v58  ;;  %v5689_v47 = vld [vmem:[%s4289_s28 + $0xb0] sm:$0xff]  ;;  %v3671_v41 = vunpack.i.h.bf16 %v3669_v36  ;;  %v9623_v42 = vld [vmem:[#allocation58_spill] sm:$0xff] }
 0x11b   : > { %9612 = vst [vmem:[#allocation54_spill] sm:$0xff] %v5657_v58  ;;  %v680_v8 = vsel %vm673_vm12, %v9615_v20, %v3670_v32  ;;  %v712_v50 = vsel %vm673_vm12, %v3670_v32, %v9617_v48  ;;  %v894_v20 = vmul.f32 %v5052_v7, %v843_v14  ;;  %v5693_v6 = vsub.f32 %v5689_v47, %v4454_v39  ;;  %v9627_v58 = vld [vmem:[#allocation49_spill] sm:$0xff] }
 0x11c   : > { %9613 = vst [vmem:[#allocation66_spill] sm:$0xff] %v5661_v2  ;;  %v846_v48 = vsub.f32 %v5689_v47, %v5006_v4  ;;  %v793_v32 = vmul.f32 %v9623_v42, %v745_v61  ;;  %v9630_v42 = vunpack.i.h.bf16 %v9614_v22 }
 0x11d   : > { %1091 = vrot.lane.b32.xlu0 %v5620_v51, %s4160_s18  ;;  %1029 = vrot.lane.b32.xlu2 %v5324_v27, %s4160_s18  ;;  %9618 = vst [vmem:[#allocation33_spill] sm:$0xff] %v5681_v43  ;;  %v9620_v27 = vld [vmem:[#allocation80_spill] sm:$0xff]  ;;  %v942_v36 = vmul.f32 %v894_v20, %v680_v8  ;;  %v9631_v8 = vunpack.i.h.bf16 %v9616_v40 }
 0x11e   : > { %v941_v13 = vmul.f32 %v893_v28, %v9620_v27  ;;  %9621 = vst [vmem:[#allocation75_spill] sm:$0xff] %v5689_v47  ;;  %v9626_v28 = vld [vmem:[#allocation35_spill] sm:$0xff] }
 0x11f   : > { %9622 = vst [vmem:[#allocation47_spill] sm:$0xff] %v5693_v6  ;;  %v792_v47 = vmul.f32 %v9626_v28, %v744_v52  ;;  %v681_v52 = vsel %vm673_vm12, %v9630_v42, %v3671_v41  ;;  %v713_v20 = vsel %vm673_vm12, %v3671_v41, %v9631_v8  ;;  %v3674_v28 = vpop.permute.xlu0 %3673  ;;  %v9633_v41 = vld [vmem:[#allocation36_spill] sm:$0xff] }
 0x121   : > { %v5737_v22 = vadd.f32 %v942_v36, %v792_v47  ;;  %v9636_v47 = vld [vmem:[#allocation22_spill] sm:$0xff]  ;;  %v9637_v36 = vld [vmem:[#allocation81_spill] sm:$0xff] }
 0x122   : > { %1093 = vrot.lane.b32.xlu1 %v5661_v2, %s4160_s18  ;;  %v791_v2 = vmul.f32 %v9619_v60, %v743_v21  ;;  %v943_v60 = vmul.f32 %v895_v59, %v712_v50  ;;  %v5702_v21 = vld [vmem:[%s4289_s28 + $0xa8] sm:$0xff]  ;;  %v747_v59 = vmul.f32 %v5021_v38, %v5693_v6  ;;  %v897_v50 = vmul.f32 %v5052_v7, %v846_v48 }
 0x123   : > { %9624 = vst [vmem:[#allocation65_spill] sm:$0xff] %v5702_v21  ;;  %v5706_v27 = vsub.f32 %v5702_v21, %v4308_v3  ;;  %v845_v14 = vsub.f32 %v5702_v21, %v4930_v15  ;;  %v9634_v21 = vld [vmem:[#allocation63_spill] sm:$0xff] }
 0x124   : > { %v5717_v61 = vadd.f32 %v941_v13, %v791_v2  ;;  %v5735_v13 = vadd.f32 %v943_v60, %v793_v32  ;;  %v795_v42 = vmul.f32 %v9633_v41, %v747_v59  ;;  %v945_v8 = vmul.f32 %v897_v50, %v681_v52  ;;  %v5755_v59 = vpop.permute.xlu2 %1019  ;;  %v9638_v50 = vld [vmem:[#allocation59_spill] sm:$0xff] }
 0x125   : > { %1061 = vrot.lane.b32.xlu0 %v5681_v43, %s4160_s18  ;;  %3683 = vrot.lane.b32.xlu2 %v3682_v35, %s4160_s18  ;;  %9625 = vst [vmem:[#allocation25_spill] sm:$0xff] %v5706_v27  ;;  %v5713_v43 = vsub.f32 %v9627_v58, %v4583_v63  ;;  %v847_v35 = vsub.f32 %v9627_v58, %v5086_v46  ;;  %v3675_v32 = vunpack.i.l.bf16 %v3674_v28 }
 0x126   : > { %9629 = vst [vmem:[#allocation61_spill] sm:$0xff] %v5717_v61  ;;  %v746_v2 = vmul.f32 %v4935_v17, %v5706_v27  ;;  %v896_v58 = vmul.f32 %v4948_v24, %v845_v14  ;;  %v5745_v6 = vsub.f32 %v9634_v21, %v4583_v63  ;;  %v850_v14 = vsub.f32 %v9634_v21, %v5086_v46 }
 0x127   : > { %9628 = vst [vmem:[#allocation32_spill] sm:$0xff] %v5713_v43  ;;  %v748_v40 = vmul.f32 %v5091_v31, %v5713_v43  ;;  %v898_v48 = vmul.f32 %v5094_v45, %v847_v35  ;;  %v5767_v43 = vadd.f32 %v945_v8, %v795_v42 }
 0x128   : > { %9632 = vst [vmem:[#allocation48_spill] sm:$0xff] %v5735_v13  ;;  %v794_v60 = vmul.f32 %v9636_v47, %v746_v2  ;;  %v944_v35 = vmul.f32 %v896_v58, %v9637_v36  ;;  %v751_v2 = vmul.f32 %v5091_v31, %v5745_v6  ;;  %v901_v58 = vmul.f32 %v5094_v45, %v850_v14  ;;  %v9643_v36 = vld [vmem:[#allocation104_spill] sm:$0xff] }
 0x129   : > { %9635 = vst [vmem:[#allocation34_spill] sm:$0xff] %v5745_v6  ;;  %v796_v52 = vmul.f32 %v9638_v50, %v748_v40  ;;  %v946_v41 = vmul.f32 %v898_v48, %v713_v20  ;;  %v9642_v47 = vunpack.i.l.bf16 %v4925_v49  ;;  %v9644_v14 = vunpack.i.l.bf16 %v9643_v36 }
 0x12a   : > { %1031 = vrot.lane.b32.xlu1 %v5717_v61, %s4160_s18  ;;  %v5759_v61 = vld [vmem:[%s4289_s28 + $0xc8] sm:$0xff]  ;;  %9641 = vst [vmem:[#allocation21_spill] sm:$0xff] %v5767_v43  ;;  %v5778_v40 = vadd.f32 %v944_v35, %v794_v60  ;;  %v3676_v60 = vunpack.i.h.bf16 %v3674_v28  ;;  %v9646_v35 = vld [vmem:[#allocation64_spill] sm:$0xff]  ;;  %v3679_v28 = vpop.permute.xlu1 %3678 }
 0x12b   : > { %9639 = vst [vmem:[#allocation77_spill] sm:$0xff] %v5759_v61  ;;  %v5763_v21 = vsub.f32 %v5759_v61, %v4454_v39  ;;  %v714_v20 = vsel %vm673_vm12, %v3675_v32, %v9642_v47  ;;  %v5780_v48 = vadd.f32 %v946_v41, %v796_v52  ;;  %v682_v50 = vsel %vm673_vm12, %v9644_v14, %v3675_v32  ;;  %v9648_v32 = vld [vmem:[#allocation46_spill] sm:$0xff] }
 0x12c   : > { %v949_v6 = vmul.f32 %v901_v58, %v714_v20  ;;  %v5796_v52 = vsub.f32 %v9646_v35, %v4583_v63 }
 0x12d   : > { %1095 = vrot.lane.b32.xlu0 %v5735_v13, %s4160_s18  ;;  %1063 = vrot.lane.b32.xlu2 %v5737_v22, %s4160_s18  ;;  %9640 = vst [vmem:[#allocation78_spill] sm:$0xff] %v5763_v21  ;;  %v849_v13 = vsub.f32 %v5759_v61, %v5006_v4  ;;  %v750_v42 = vmul.f32 %v5021_v38, %v5763_v21  ;;  %v9645_v61 = vld [vmem:[#allocation69_spill] sm:$0xff] }
 0x12e   : > { %v799_v47 = vmul.f32 %v9645_v61, %v751_v2  ;;  %9647 = vst [vmem:[#allocation80_spill] sm:$0xff] %v5796_v52  ;;  %v3887_v2 = vld [vmem:[%s4289_s28 + $0xe0] sm:$0xff] }
 0x12f   : > { %v900_v8 = vmul.f32 %v5052_v7, %v849_v13  ;;  %v853_v13 = vsub.f32 %v9646_v35, %v5086_v46  ;;  %v798_v36 = vmul.f32 %v9648_v32, %v750_v42  ;;  %v5805_v58 = vsub.f32 %v3887_v2, %v4454_v39 }
 0x130   : > { %v852_v20 = vsub.f32 %v3887_v2, %v5006_v4  ;;  %v5808_v14 = vadd.f32 %v949_v6, %v799_v47  ;;  %v754_v35 = vmul.f32 %v5091_v31, %v5796_v52  ;;  %v9651_v42 = vunpack.i.h.bf16 %v4925_v49 }
 0x131   : > { %v948_v61 = vmul.f32 %v900_v8, %v682_v50  ;;  %9649 = vst [vmem:[#allocation58_spill] sm:$0xff] %v5805_v58  ;;  %v904_v21 = vmul.f32 %v5094_v45, %v853_v13  ;;  %v753_v6 = vmul.f32 %v5021_v38, %v5805_v58  ;;  %v9653_v32 = vunpack.i.l.bf16 %v5439_v30  ;;  %v9654_v13 = vld [vmem:[#allocation60_spill] sm:$0xff] }
 0x132   : > { %1065 = vrot.lane.b32.xlu1 %v5767_v43, %s4160_s18  ;;  %9650 = vst [vmem:[#allocation35_spill] sm:$0xff] %v5808_v14  ;;  %v715_v8 = vsel %vm673_vm12, %v3676_v60, %v9651_v42  ;;  %v903_v47 = vmul.f32 %v5052_v7, %v852_v20  ;;  %v856_v49 = vsub.f32 %v9654_v13, %v5086_v46  ;;  %v9658_v20 = vld [vmem:[#allocation71_spill] sm:$0xff]  ;;  %v9660_v46 = vld [vmem:[#allocation62_spill] sm:$0xff]  ;;  %v5850_v43 = vld [vmem:[%s4289_s28 + $0xf0] sm:$0xff] }
 0x133   : > { %v5819_v50 = vadd.f32 %v948_v61, %v798_v36  ;;  %v683_v2 = vsel %vm673_vm12, %v9653_v32, %v3676_v60  ;;  %v3681_v36 = vunpack.i.h.bf16 %v3679_v28  ;;  %v9656_v61 = vld [vmem:[#allocation57_spill] sm:$0xff]  ;;  %v3595_v42 = vunpack.i.l.bf16 %v9658_v20  ;;  %v9659_v32 = vld [vmem:[#allocation70_spill] sm:$0xff]  ;;  %9661 = vst [vmem:[#allocation22_spill] sm:$0xff] %v5850_v43 }
 0x134   : > { %v5840_v30 = vsub.f32 %v9656_v61, %v4454_v39  ;;  %v855_v60 = vsub.f32 %v9656_v61, %v5006_v4  ;;  %v952_v58 = vmul.f32 %v904_v21, %v715_v8  ;;  %v801_v52 = vmul.f32 %v9660_v46, %v753_v6  ;;  %v9683_v4 = vld [vmem:[#allocation79_spill] sm:$0xff] }
 0x135   : > { %1033 = vrot.lane.b32.xlu0 %v5778_v40, %s4160_s18  ;;  %1097 = vrot.lane.b32.xlu2 %v5780_v48, %s4160_s18  ;;  %9652 = vst [vmem:[#allocation49_spill] sm:$0xff] %v5819_v50  ;;  %v854_v39 = vsub.f32 %v5850_v43, %v4930_v15  ;;  %v3680_v61 = vunpack.i.l.bf16 %v3679_v28  ;;  %v907_v21 = vmul.f32 %v5094_v45, %v856_v49  ;;  %v3889_v28 = vld [vmem:[#allocation5] sm:$0xff] }
 0x136   : > { %v5800_v41 = vpop.permute.xlu2 %1075  ;;  %9657 = vst [vmem:[#allocation63_spill] sm:$0xff] %v5840_v30  ;;  %v756_v46 = vmul.f32 %v5021_v38, %v5840_v30  ;;  %v906_v8 = vmul.f32 %v5052_v7, %v855_v60  ;;  %v5879_v60 = vld [vmem:[#allocation5 + $0x18] sm:$0xff]  ;;  %v9667_v30 = vld [vmem:[#allocation68_spill] sm:$0xff] }
 0x137   : > { %v684_v6 = vsel %vm673_vm12, %v3680_v61, %v3681_v36  ;;  %9666 = vst [vmem:[#allocation64_spill] sm:$0xff] %v5879_v60 }
 0x13a   : > { %1099 = vrot.lane.b32.xlu1 %v5808_v14, %s4160_s18  ;;  %v5830_v14 = vsub.f32 %v9654_v13, %v4583_v63  ;;  %v802_v63 = vmul.f32 %v9659_v32, %v754_v35  ;;  %v716_v35 = vsel %vm673_vm12, %v3681_v36, %v3595_v42  ;;  %v700_v36 = vsel %vm673_vm12, %v3595_v42, %v3680_v61  ;;  %v9670_v61 = vld [vmem:[#allocation17_spill] sm:$0xff] }
 0x13c   : > { %9655 = vst [vmem:[#allocation36_spill] sm:$0xff] %v5830_v14  ;;  %v757_v20 = vmul.f32 %v5091_v31, %v5830_v14  ;;  %v955_v31 = vmul.f32 %v907_v21, %v716_v35  ;;  %v5897_v21 = vperm.slane %v3889_v28, 6 }
 0x13d   : > { %1067 = vrot.lane.b32.xlu0 %v5819_v50, %s4160_s18  ;;  %1035 = vrot.lane.b32.xlu2 %v5489_v16, %s4160_s18  ;;  %v951_v50 = vmul.f32 %v903_v47, %v683_v2  ;;  %v5854_v16 = vsub.f32 %v5850_v43, %v4308_v3  ;;  %v5870_v47 = vperm.slane %v3889_v28, 7  ;;  %v5872_v2 = vadd.f32 %v952_v58, %v802_v63  ;;  %v9668_v63 = vld [vmem:[#allocation67_spill] sm:$0xff]  ;;  %v5917_v28 = vld [vmem:[#allocation5 + $0x20] sm:$0xff] }
 0x13e   : > { %v5846_v13 = vpop.permute.xlu2 %1053  ;;  %v905_v43 = vmul.f32 %v4948_v24, %v854_v39  ;;  %v805_v45 = vmul.f32 %v9667_v30, %v757_v20  ;;  %v954_v58 = vmul.f32 %v906_v8, %v684_v6  ;;  %v5890_v39 = vperm.slane %v5879_v60, 0  ;;  %9671 = vst [vmem:[#allocation60_spill] sm:$0xff] %v5897_v21  ;;  %v5904_v24 = vld [vmem:[%s4289_s28 + $0x120] sm:$0xff]  ;;  %v3892_v6 = vld [vmem:[#allocation5 + $0x8] sm:$0xff] }
 0x13f   : > { %9662 = vst [vmem:[#allocation81_spill] sm:$0xff] %v5854_v16  ;;  %v5874_v49 = vadd.f32 %v951_v50, %v801_v52  ;;  %v755_v32 = vmul.f32 %v4935_v17, %v5854_v16  ;;  %v804_v52 = vmul.f32 %v9668_v63, %v756_v46  ;;  %v3890_v50 = vld [vmem:[%s4289_s28] sm:$0xff]  ;;  %v1301_v46 = vsub.f32 %v5904_v24, %v5870_v47 }
 0x140   : > { %9663 = vst [vmem:[#allocation59_spill] sm:$0xff] %v5870_v47  ;;  %v1265_v7 = vsub.f32 %v3890_v50, %v5870_v47  ;;  %v953_v20 = vmul.f32 %v905_v43, %v700_v36  ;;  %v5899_v35 = vadd.f32 %v955_v31, %v805_v45  ;;  %v9677_v31 = vld [vmem:[#allocation74_spill] sm:$0xff]  ;;  %v3893_v50 = vld [vmem:[#allocation5 + $0x10] sm:$0xff] }
 0x141   : > { %9664 = vst [vmem:[#allocation104_spill] sm:$0xff] %v5872_v2  ;;  %v803_v30 = vmul.f32 %v9670_v61, %v755_v32  ;;  %v5901_v38 = vadd.f32 %v954_v58, %v804_v52  ;;  %v5911_v32 = vperm.slane %v3892_v6, 7  ;;  %v1166_v45 = vmul.f32 %v5897_v21, %v9677_v31  ;;  %v9678_v63 = vld [vmem:[#allocation90_spill] sm:$0xff] }
 0x142   : > { %1037 = vrot.lane.b32.xlu1 %v5526_v55, %s4160_s18  ;;  %9665 = vst [vmem:[#allocation69_spill] sm:$0xff] %v5874_v49  ;;  %v1316_v8 = vmul.f32 %v5890_v39, %v1265_v7  ;;  %v1202_v52 = vmul.f32 %v5897_v21, %v9678_v63  ;;  %v1352_v58 = vmul.f32 %v5890_v39, %v1301_v46  ;;  %v5929_v61 = vperm.slane %v3893_v50, 7 }
 0x143   : > { %9669 = vst [vmem:[#allocation46_spill] sm:$0xff] %v5890_v39  ;;  %v5913_v43 = vadd.f32 %v953_v20, %v803_v30  ;;  %v5931_v20 = vld [vmem:[#allocation5 + $0x28] sm:$0xff]  ;;  %v5938_v63 = vperm.slane %v3892_v6, 6  ;;  %v1214_v46 = vmul.f32 %v1166_v45, %v9683_v4  ;;  %v9686_v45 = vld [vmem:[#allocation94_spill] sm:$0xff]  ;;  %v5959_v14 = vperm.slane %v3893_v50, 6 }
 0x144   : > { %9672 = vst [vmem:[#allocation57_spill] sm:$0xff] %v5899_v35  ;;  %v5952_v6 = vperm.slane %v5931_v20, 0 }
 0x145   : > { %1101 = vrot.lane.b32.xlu0 %v5872_v2, %s4160_s18  ;;  %1069 = vrot.lane.b32.xlu2 %v5874_v49, %s4160_s18  ;;  %9673 = vst [vmem:[#allocation70_spill] sm:$0xff] %v5901_v38  ;;  %v3895_v49 = vld [vmem:[%s4289_s28 + $0x8] sm:$0xff]  ;;  %v1203_v2 = vmul.f32 %v5938_v63, %v9686_v45  ;;  %v1176_v16 = vmul.f32 %v5938_v63, %v5447_v33 }
 0x146   : > { %v5894_v42 = vpop.permute.xlu2 %1109  ;;  %9674 = vst [vmem:[#allocation62_spill] sm:$0xff] %v5904_v24  ;;  %v3894_v24 = vld [vmem:[%s4289_s28 + $0x128] sm:$0xff]  ;;  %v1266_v15 = vsub.f32 %v3895_v49, %v5911_v32 }
 0x147   : > { %9675 = vst [vmem:[#allocation68_spill] sm:$0xff] %v5911_v32  ;;  %v1302_v31 = vsub.f32 %v3894_v24, %v5911_v32 }
 0x148   : > { %9676 = vst [vmem:[#allocation67_spill] sm:$0xff] %v5913_v43 }
 0x149   : > { %9679 = vst [vmem:[#allocation17_spill] sm:$0xff] %v5929_v61 }
 0x14a   : > { %1103 = vrot.lane.b32.xlu1 %v5899_v35, %s4160_s18  ;;  %9680 = vst [vmem:[#allocation115_spill] sm:$0xff] %v5931_v20  ;;  %v3896_v35 = vld [vmem:[%s4289_s28 + $0x10] sm:$0xff] }
 0x14b   : > { %9682 = vst [vmem:[#allocation117_spill] sm:$0xff] %v5938_v63 }
 0x14c   : > { %v1052_v36 = vpop.permute.xlu1 %1051  ;;  %9685 = vst [vmem:[#allocation118_spill] sm:$0xff] %v5952_v6 }
 0x14d   : > { %1071 = vrot.lane.b32.xlu0 %v5901_v38, %s4160_s18  ;;  %1039 = vrot.lane.b32.xlu2 %v5913_v43, %s4160_s18  ;;  %v1131_v7 = vsel %vm673_vm12, %v5755_v59, %v1052_v36  ;;  %v5936_v38 = vperm.slane %v5917_v28, 0  ;;  %v1267_v43 = vsub.f32 %v3896_v35, %v5929_v61  ;;  %9687 = vst [vmem:[#allocation119_spill] sm:$0xff] %v5959_v14 }
 0x14e   : > { %v1364_v30 = vmul.f32 %v1316_v8, %v1131_v7  ;;  %v1044_v60 = vpop.permute.xlu0 %1043  ;;  %v1250_v7 = vmul.f32 %v1202_v52, %v5161_v1 }
 0x14f   : > { %9681 = vst [vmem:[#allocation116_spill] sm:$0xff] %v5936_v38  ;;  %v5940_v17 = vpop.permute.xlu2 %1055  ;;  %v1143_v8 = vsel %vm673_vm12, %v1044_v60, %v5800_v41  ;;  %v1353_v4 = vmul.f32 %v5936_v38, %v1302_v31  ;;  %v1317_v49 = vmul.f32 %v5936_v38, %v1266_v15  ;;  %v1318_v31 = vmul.f32 %v5952_v6, %v1267_v43 }
 0x150   : > { %v1400_v24 = vmul.f32 %v1352_v58, %v1143_v8  ;;  %v5949_v3 = vadd.f32 %v1364_v30, %v1214_v46  ;;  %v9689_v58 = vld [vmem:[#allocation88_spill] sm:$0xff]  ;;  %v1168_v46 = vmul.f32 %v5959_v14, %v5115_v26  ;;  %v1251_v8 = vmul.f32 %v1203_v2, %v5163_v10  ;;  %v3897_v10 = vld [vmem:[%s4289_s28 + $0x18] sm:$0xff] }
 0x151   : > { %v1167_v30 = vmul.f32 %v5938_v63, %v9689_v58  ;;  %v1268_v2 = vsub.f32 %v3897_v10, %v5870_v47 }
 0x152   : > { %9684 = vst [vmem:[#allocation79_spill] sm:$0xff] %v5949_v3  ;;  %v5961_v1 = vadd.f32 %v1400_v24, %v1250_v7 }
 0x154   : > { %9688 = vst [vmem:[#allocation120_spill] sm:$0xff] %v5961_v1  ;;  %v1108_v52 = vpop.permute.xlu1 %1107  ;;  %1484 = vrot.lane.b32.xlu1 %v5961_v1, %s4160_s18  ;;  %v9707_v1 = vld [vmem:[#allocation37_spill] sm:$0xff] }
 0x155   : > { %1460 = vrot.lane.b32.xlu0 %v5949_v3, %s4160_s18  ;;  %v1127_v35 = vsel %vm673_vm12, %v5800_v41, %v1108_v52  ;;  %v5977_v15 = vsel %vm673_vm12, %v1108_v52, %v1044_v60  ;;  %v1215_v41 = vmul.f32 %v1167_v30, %v5145_v44 }
 0x156   : > { %v1401_v50 = vmul.f32 %v1353_v4, %v1127_v35  ;;  %v1084_v7 = vpop.permute.xlu0 %1083  ;;  %v1216_v4 = vmul.f32 %v1168_v46, %v5228_v56  ;;  %v6010_v56 = vld [vmem:[%s4289_s28 + $0x28] sm:$0xff] }
 0x157   : > { %v5981_v24 = vpop.permute.xlu2 %1111  ;;  %v1115_v26 = vsel %vm673_vm12, %v1052_v36, %v1084_v7  ;;  %v1147_v3 = vsel %vm673_vm12, %v1084_v7, %v5755_v59  ;;  %9694 = vst [vmem:[#allocation124_spill] sm:$0xff] %v6010_v56  ;;  %v3899_v7 = vld [vmem:[%s4289_s28 + $0x138] sm:$0xff] }
 0x158   : > { %v5989_v60 = vadd.f32 %v1401_v50, %v1251_v8  ;;  %v1365_v52 = vmul.f32 %v1317_v49, %v1115_v26  ;;  %v1366_v43 = vmul.f32 %v1318_v31, %v1147_v3  ;;  %v1319_v3 = vmul.f32 %v5890_v39, %v1268_v2  ;;  %v9693_v26 = vld [vmem:[#allocation99_spill] sm:$0xff] }
 0x159   : > { %v1169_v44 = vmul.f32 %v5897_v21, %v9693_v26  ;;  %v1270_v49 = vsub.f32 %v6010_v56, %v5929_v61  ;;  %v1171_v2 = vmul.f32 %v5959_v14, %v5198_v0  ;;  %v1205_v56 = vmul.f32 %v5897_v21, %v5151_v29  ;;  %v9696_v29 = vld [vmem:[#allocation114_spill] sm:$0xff] }
 0x15a   : > { %9690 = vst [vmem:[#allocation121_spill] sm:$0xff] %v5989_v60  ;;  %1516 = vrot.lane.b32.xlu2 %v5989_v60, %s4160_s18  ;;  %v5996_v36 = vadd.f32 %v1365_v52, %v1215_v41  ;;  %v5998_v59 = vadd.f32 %v1366_v43, %v1216_v4  ;;  %v1304_v41 = vsub.f32 %v3899_v7, %v5870_v47  ;;  %v3900_v52 = vld [vmem:[%s4289_s28 + $0x140] sm:$0xff]  ;;  %v9718_v60 = vld [vmem:[#allocation43_spill] sm:$0xff] }
 0x15b   : > { %v1217_v8 = vmul.f32 %v1169_v44, %v5270_v37  ;;  %v1305_v43 = vsub.f32 %v3900_v52, %v5911_v32  ;;  %v1321_v4 = vmul.f32 %v5952_v6, %v1270_v49  ;;  %v1206_v37 = vmul.f32 %v5938_v63, %v5259_v62  ;;  %v3901_v62 = vld [vmem:[%s4289_s28 + $0x20] sm:$0xff] }
 0x15c   : > { %9691 = vst [vmem:[#allocation122_spill] sm:$0xff] %v5996_v36  ;;  %v6000_v35 = vpop.permute.xlu1 %1045  ;;  %1492 = vrot.lane.b32.xlu1 %v5996_v36, %s4160_s18  ;;  %v1355_v49 = vmul.f32 %v5890_v39, %v1304_v41  ;;  %v1219_v52 = vmul.f32 %v1171_v2, %v5327_v12  ;;  %v1253_v0 = vmul.f32 %v1205_v56, %v9696_v29  ;;  %v3902_v29 = vld [vmem:[%s4289_s28 + $0x30] sm:$0xff] }
 0x15d   : > { %9692 = vst [vmem:[#allocation123_spill] sm:$0xff] %v5998_v59  ;;  %1524 = vrot.lane.b32.xlu0 %v5998_v59, %s4160_s18  ;;  %v1269_v26 = vsub.f32 %v3901_v62, %v5911_v32  ;;  %v1271_v12 = vsub.f32 %v3902_v29, %v5870_v47  ;;  %v1177_v45 = vmul.f32 %v5959_v14, %v9718_v60  ;;  %v6439_v60 = vld [vmem:[#allocation7 + $0xf0] sm:$0xff] }
 0x15e   : > { %v1022_v30 = vpop.permute.xlu0 %1021 }
 0x15f   : > { %v6014_v46 = vpop.permute.xlu2 %1049  ;;  %v1132_v31 = vsel %vm673_vm12, %v1022_v30, %v5846_v13  ;;  %v1320_v2 = vmul.f32 %v5936_v38, %v1269_v26  ;;  %v3903_v26 = vld [vmem:[%s4289_s28 + $0x130] sm:$0xff] }
 0x160   : > { %v1367_v50 = vmul.f32 %v1319_v3, %v1132_v31  ;;  %v1356_v31 = vmul.f32 %v5936_v38, %v1305_v43  ;;  %v9697_v43 = vld [vmem:[#allocation83_spill] sm:$0xff] }
 0x162   : > { %v6025_v10 = vadd.f32 %v1367_v50, %v1217_v8 }
 0x164   : > { %9695 = vst [vmem:[#allocation125_spill] sm:$0xff] %v6025_v10  ;;  %v1086_v3 = vpop.permute.xlu1 %1085  ;;  %1462 = vrot.lane.b32.xlu2 %v6025_v10, %s4160_s18 }
 0x165   : > { %v1148_v44 = vsel %vm673_vm12, %v1086_v3, %v1022_v30 }
 0x166   : > { %v1369_v50 = vmul.f32 %v1321_v4, %v1148_v44  ;;  %v1078_v8 = vpop.permute.xlu0 %1077  ;;  %v1254_v4 = vmul.f32 %v1206_v37, %v9697_v43  ;;  %v1116_v37 = vsel %vm673_vm12, %v5846_v13, %v1086_v3  ;;  %v9702_v13 = vld [vmem:[#allocation106_spill] sm:$0xff] }
 0x167   : > { %v6039_v7 = vpop.permute.xlu2 %1089  ;;  %v1128_v30 = vsel %vm673_vm12, %v1078_v8, %v5894_v42  ;;  %v1144_v41 = vsel %vm673_vm12, %v6000_v35, %v1078_v8  ;;  %v1170_v3 = vmul.f32 %v5938_v63, %v9702_v13  ;;  %v9705_v13 = vld [vmem:[#allocation111_spill] sm:$0xff] }
 0x168   : > { %v1403_v44 = vmul.f32 %v1355_v49, %v1144_v41  ;;  %v1404_v10 = vmul.f32 %v1356_v31, %v1128_v30  ;;  %v6052_v59 = vadd.f32 %v1369_v50, %v1219_v52  ;;  %v9701_v49 = vld [vmem:[#allocation93_spill] sm:$0xff]  ;;  %v1303_v31 = vsub.f32 %v3903_v26, %v5929_v61  ;;  %v3904_v50 = vld [vmem:[%s4289_s28 + $0x40] sm:$0xff] }
 0x169   : > { %v1273_v8 = vsub.f32 %v3904_v50, %v5929_v61  ;;  %v1368_v41 = vmul.f32 %v1320_v2, %v1116_v37  ;;  %v1218_v2 = vmul.f32 %v1170_v3, %v9705_v13 }
 0x16a   : > { %9698 = vst [vmem:[#allocation114_spill] sm:$0xff] %v6052_v59  ;;  %v6056_v62 = vadd.f32 %v1404_v10, %v1254_v4  ;;  %v6058_v56 = vadd.f32 %v1403_v44, %v1253_v0  ;;  %v1322_v10 = vmul.f32 %v5890_v39, %v1271_v12  ;;  %v1172_v0 = vmul.f32 %v5897_v21, %v9701_v49  ;;  %v9703_v4 = vld [vmem:[#allocation42_spill] sm:$0xff]  ;;  %v9704_v12 = vld [vmem:[#allocation28_spill] sm:$0xff] }
 0x16b   : > { %v1208_v44 = vmul.f32 %v5897_v21, %v9703_v4  ;;  %v1354_v49 = vmul.f32 %v5952_v6, %v1303_v31  ;;  %v1324_v37 = vmul.f32 %v5952_v6, %v1273_v8  ;;  %v3908_v4 = vld [vmem:[%s4289_s28 + $0x38] sm:$0xff] }
 0x16c   : > { %9699 = vst [vmem:[#allocation83_spill] sm:$0xff] %v6056_v62  ;;  %v6061_v36 = vpop.permute.xlu1 %1047  ;;  %1526 = vrot.lane.b32.xlu2 %v6052_v59, %s4160_s18  ;;  %1518 = vrot.lane.b32.xlu1 %v6056_v62, %s4160_s18  ;;  %v1220_v26 = vmul.f32 %v1172_v0, %v9704_v12  ;;  %v3905_v62 = vld [vmem:[%s4289_s28 + $0x150] sm:$0xff]  ;;  %v3906_v59 = vld [vmem:[%s4289_s28 + $0x158] sm:$0xff] }
 0x16d   : > { %9700 = vst [vmem:[#allocation126_spill] sm:$0xff] %v6058_v56  ;;  %1486 = vrot.lane.b32.xlu0 %v6058_v56, %s4160_s18  ;;  %v1307_v56 = vsub.f32 %v3905_v62, %v5870_v47  ;;  %v1308_v50 = vsub.f32 %v3906_v59, %v5911_v32  ;;  %v9709_v62 = vld [vmem:[#allocation97_spill] sm:$0xff]  ;;  %v9710_v59 = vld [vmem:[#allocation103_spill] sm:$0xff] }
 0x16e   : > { %v1024_v52 = vpop.permute.xlu0 %1023  ;;  %v1209_v12 = vmul.f32 %v5938_v63, %v9709_v62  ;;  %v1204_v31 = vmul.f32 %v5959_v14, %v9710_v59  ;;  %v9712_v62 = vld [vmem:[#allocation112_spill] sm:$0xff] }
 0x16f   : > { %v6081_v30 = vpop.permute.xlu2 %1059  ;;  %v1133_v43 = vsel %vm673_vm12, %v1024_v52, %v5940_v17  ;;  %v1358_v3 = vmul.f32 %v5890_v39, %v1307_v56  ;;  %v1359_v8 = vmul.f32 %v5936_v38, %v1308_v50  ;;  %v1272_v50 = vsub.f32 %v3908_v4, %v5911_v32 }
 0x170   : > { %v1370_v29 = vmul.f32 %v1322_v10, %v1133_v43  ;;  %v1174_v10 = vmul.f32 %v5959_v14, %v9707_v1  ;;  %v6100_v43 = vadd.f32 %v1368_v41, %v1218_v2  ;;  %v9711_v41 = vld [vmem:[#allocation14_spill] sm:$0xff]  ;;  %v1173_v1 = vmul.f32 %v5938_v63, %v9712_v62 }
 0x172   : > { %v6096_v58 = vadd.f32 %v1370_v29, %v1220_v26  ;;  %9708 = vst [vmem:[#allocation111_spill] sm:$0xff] %v6100_v43  ;;  %v1256_v29 = vmul.f32 %v1208_v44, %v9711_v41  ;;  %v1402_v26 = vmul.f32 %v1354_v49, %v5977_v15  ;;  %v1222_v15 = vmul.f32 %v1174_v10, %v5459_v57  ;;  %v9714_v49 = vld [vmem:[#allocation44_spill] sm:$0xff]  ;;  %v3909_v57 = vld [vmem:[%s4289_s28 + $0x48] sm:$0xff] }
 0x173   : > { %v1274_v10 = vsub.f32 %v3909_v57, %v5870_v47  ;;  %v6186_v57 = vmul.f32 %v1176_v16, %v5530_v53  ;;  %v9725_v53 = vld [vmem:[#allocation30_spill] sm:$0xff] }
 0x174   : > { %9706 = vst [vmem:[#allocation28_spill] sm:$0xff] %v6096_v58  ;;  %v1088_v0 = vpop.permute.xlu1 %1087  ;;  %1464 = vrot.lane.b32.xlu1 %v6096_v58, %s4160_s18  ;;  %v1175_v58 = vmul.f32 %v5897_v21, %v5413_v11 }
 0x175   : > { %v1149_v13 = vsel %vm673_vm12, %v1088_v0, %v1024_v52  ;;  %1494 = vrot.lane.b32.xlu0 %v6100_v43, %s4160_s18  ;;  %v3907_v52 = vld [vmem:[%s4289_s28 + $0x148] sm:$0xff]  ;;  %v9715_v43 = vld [vmem:[#allocation110_spill] sm:$0xff] }
 0x176   : > { %v1372_v2 = vmul.f32 %v1324_v37, %v1149_v13  ;;  %v1306_v56 = vsub.f32 %v3907_v52, %v5929_v61  ;;  %v1211_v37 = vmul.f32 %v5897_v21, %v9714_v49  ;;  %v1257_v52 = vmul.f32 %v1209_v12, %v5484_v19  ;;  %v9717_v49 = vld [vmem:[#allocation15_spill] sm:$0xff] }
 0x177   : > { %v1080_v44 = vpop.permute.xlu0 %1079  ;;  %v6124_v41 = vpop.permute.xlu2 %1029  ;;  %v1252_v4 = vmul.f32 %v1204_v31, %v9715_v43  ;;  %v1117_v31 = vsel %vm673_vm12, %v5940_v17, %v1088_v0  ;;  %v9723_v17 = vld [vmem:[#allocation108_spill] sm:$0xff] }
 0x178   : > { %9713 = vst [vmem:[#allocation14_spill] sm:$0xff] %v6124_v41  ;;  %v1129_v13 = vsel %vm673_vm12, %v1080_v44, %v5981_v24  ;;  %v1145_v11 = vsel %vm673_vm12, %v6061_v36, %v1080_v44  ;;  %v6137_v20 = vadd.f32 %v1372_v2, %v1222_v15  ;;  %v1221_v41 = vmul.f32 %v1173_v1, %v9717_v49 }
 0x179   : > { %v1406_v62 = vmul.f32 %v1358_v3, %v1145_v11  ;;  %v1407_v59 = vmul.f32 %v1359_v8, %v1129_v13  ;;  %v6146_v44 = vadd.f32 %v1402_v26, %v1252_v4  ;;  %v1357_v19 = vmul.f32 %v5952_v6, %v1306_v56  ;;  %v9722_v8 = vld [vmem:[#allocation87_spill] sm:$0xff] }
 0x17a   : > { %9716 = vst [vmem:[#allocation110_spill] sm:$0xff] %v6137_v20  ;;  %v1323_v11 = vmul.f32 %v5936_v38, %v1272_v50  ;;  %v1160_v1 = vsel %vm673_vm12, %v5894_v42, %v6000_v35  ;;  %v1178_v26 = vmul.f32 %v5897_v21, %v9722_v8  ;;  %v1180_v2 = vmul.f32 %v5959_v14, %v5557_v5  ;;  %v9724_v50 = vld [vmem:[#allocation98_spill] sm:$0xff] }
 0x17b   : > { %9719 = vst [vmem:[#allocation15_spill] sm:$0xff] %v6146_v44  ;;  %v6150_v43 = vadd.f32 %v1406_v62, %v1256_v29  ;;  %v6152_v12 = vadd.f32 %v1407_v59, %v1257_v52  ;;  %v1325_v42 = vmul.f32 %v5890_v39, %v1274_v10  ;;  %v1179_v35 = vmul.f32 %v5938_v63, %v5519_v34  ;;  %v3910_v59 = vld [vmem:[%s4289_s28 + $0x168] sm:$0xff]  ;;  %v3911_v10 = vld [vmem:[%s4289_s28 + $0x58] sm:$0xff]  ;;  %v9740_v34 = vld [vmem:[#allocation54_spill] sm:$0xff] }
 0x17c   : > { %v1026_v3 = vpop.permute.xlu1 %1025  ;;  %1528 = vrot.lane.b32.xlu1 %v6137_v20, %s4160_s18  ;;  %v1207_v0 = vmul.f32 %v5959_v14, %v9723_v17  ;;  %v1223_v62 = vmul.f32 %v1175_v58, %v5523_v25  ;;  %v1310_v29 = vsub.f32 %v3910_v59, %v5870_v47  ;;  %v1259_v56 = vmul.f32 %v1211_v37, %v5486_v54 }
 0x17d   : > { %9720 = vst [vmem:[#allocation127_spill] sm:$0xff] %v6150_v43  ;;  %1488 = vrot.lane.b32.xlu2 %v6150_v43, %s4160_s18  ;;  %1520 = vrot.lane.b32.xlu0 %v6152_v12, %s4160_s18  ;;  %v1181_v15 = vmul.f32 %v5897_v21, %v9724_v50  ;;  %v1405_v49 = vmul.f32 %v1357_v19, %v1160_v1  ;;  %v9726_v1 = vld [vmem:[#allocation91_spill] sm:$0xff]  ;;  %v9735_v50 = vld [vmem:[#allocation38_spill] sm:$0xff] }
 0x17e   : > { %9721 = vst [vmem:[#allocation128_spill] sm:$0xff] %v6152_v12  ;;  %v1371_v13 = vmul.f32 %v1323_v11, %v1117_v31  ;;  %v6183_v4 = vmul.f32 %v1177_v45, %v5532_v18  ;;  %v1276_v25 = vsub.f32 %v3911_v10, %v5929_v61  ;;  %v6193_v54 = vmul.f32 %v1178_v26, %v5299_v9  ;;  %v3912_v18 = vld [vmem:[%s4289_s28 + $0x170] sm:$0xff]  ;;  %v9728_v26 = vld [vmem:[#allocation29_spill] sm:$0xff] }
 0x17f   : > { %v1058_v52 = vpop.permute.xlu0 %1057  ;;  %v6196_v37 = vmul.f32 %v1180_v2, %v5620_v51  ;;  %v6198_v11 = vpop.permute.xlu2 %3683  ;;  %v1311_v16 = vsub.f32 %v3912_v18, %v5911_v32  ;;  %v6203_v45 = vmul.f32 %v1179_v35, %v9725_v53  ;;  %v1255_v31 = vmul.f32 %v1207_v0, %v9726_v1  ;;  %v9727_v10 = vld [vmem:[#allocation92_spill] sm:$0xff]  ;;  %v9729_v2 = vld [vmem:[#allocation41_spill] sm:$0xff] }
 0x180   : > { %v1134_v58 = vsel %vm673_vm12, %v1026_v3, %v1058_v52  ;;  %v1361_v59 = vmul.f32 %v5890_v39, %v1310_v29  ;;  %v6208_v9 = vmul.f32 %v1181_v15, %v9727_v10  ;;  %v1183_v51 = vmul.f32 %v5959_v14, %v9728_v26  ;;  %v9732_v18 = vld [vmem:[#allocation20_spill] sm:$0xff]  ;;  %v9734_v10 = vld [vmem:[#allocation51_spill] sm:$0xff] }
 0x181   : > { %v1373_v19 = vmul.f32 %v1325_v42, %v1134_v58  ;;  %v1182_v42 = vmul.f32 %v5938_v63, %v9729_v2  ;;  %v6214_v58 = vadd.f32 %v1371_v13, %v1221_v41  ;;  %v1212_v35 = vmul.f32 %v5938_v63, %v9732_v18  ;;  %v3913_v15 = vld [vmem:[%s4289_s28 + $0x50] sm:$0xff]  ;;  %v9737_v18 = vld [vmem:[#allocation66_spill] sm:$0xff] }
 0x182   : > { %v6220_v0 = vadd.f32 %v1405_v49, %v1255_v31  ;;  %v1327_v29 = vmul.f32 %v5952_v6, %v1276_v25  ;;  %v1275_v53 = vsub.f32 %v3913_v15, %v5911_v32  ;;  %v1186_v12 = vmul.f32 %v5959_v14, %v9734_v10  ;;  %v9736_v25 = vld [vmem:[#allocation18_spill] sm:$0xff] }
 0x183   : > { %9730 = vst [vmem:[#allocation30_spill] sm:$0xff] %v6214_v58  ;;  %v6216_v17 = vadd.f32 %v1373_v19, %v1223_v62  ;;  %v1184_v41 = vmul.f32 %v5897_v21, %v9735_v50  ;;  %v1150_v62 = vsel %vm673_vm12, %v6039_v7, %v1026_v3  ;;  %v1362_v13 = vmul.f32 %v5936_v38, %v1311_v16  ;;  %v3914_v15 = vld [vmem:[%s4289_s28 + $0x60] sm:$0xff]  ;;  %v9738_v16 = vld [vmem:[#allocation45_spill] sm:$0xff] }
 0x184   : > { %9733 = vst [vmem:[#allocation92_spill] sm:$0xff] %v6220_v0  ;;  %v1082_v1 = vpop.permute.xlu1 %1081  ;;  %v1210_v19 = vmul.f32 %v5959_v14, %v9736_v25  ;;  %v1277_v3 = vsub.f32 %v3914_v15, %v5870_v47  ;;  %v6245_v50 = vmul.f32 %v1183_v51, %v9737_v18  ;;  %v1187_v10 = vmul.f32 %v5897_v21, %v5706_v27  ;;  %v9739_v25 = vld [vmem:[#allocation33_spill] sm:$0xff] }
 0x185   : > { %9731 = vst [vmem:[#allocation91_spill] sm:$0xff] %v6216_v17  ;;  %1496 = vrot.lane.b32.xlu2 %v6214_v58, %s4160_s18  ;;  %v1146_v49 = vsel %vm673_vm12, %v6014_v46, %v1082_v1  ;;  %1466 = vrot.lane.b32.xlu0 %v6216_v17, %s4160_s18  ;;  %v1260_v26 = vmul.f32 %v1212_v35, %v9738_v16  ;;  %v3915_v17 = vld [vmem:[%s4289_s28 + $0x160] sm:$0xff]  ;;  %v3916_v16 = vld [vmem:[%s4289_s28 + $0x70] sm:$0xff] }
 0x186   : > { %v1409_v31 = vmul.f32 %v1361_v59, %v1146_v49  ;;  %v6253_v8 = vmul.f32 %v1182_v42, %v9739_v25  ;;  %v1185_v59 = vmul.f32 %v5938_v63, %v9740_v34  ;;  %v9741_v49 = vld [vmem:[#allocation32_spill] sm:$0xff]  ;;  %v1375_v5 = vmul.f32 %v1327_v29, %v1150_v62 }
 0x187   : > { %v6249_v2 = vpop.permute.xlu0 %1113  ;;  %v1189_v15 = vmul.f32 %v5959_v14, %v9741_v49  ;;  %v1326_v51 = vmul.f32 %v5936_v38, %v1275_v53  ;;  %v1309_v35 = vsub.f32 %v3915_v17, %v5929_v61  ;;  %v1118_v42 = vsel %vm673_vm12, %v1058_v52, %v6039_v7  ;;  %v9743_v53 = vld [vmem:[#allocation48_spill] sm:$0xff]  ;;  %v9745_v17 = vld [vmem:[#allocation47_spill] sm:$0xff]  ;;  %v6283_v34 = vpop.permute.xlu2 %1063 }
 0x188   : > { %v1130_v18 = vsel %vm673_vm12, %v1082_v1, %v6249_v2  ;;  %v6263_v27 = vadd.f32 %v1409_v31, %v1259_v56  ;;  %v1279_v49 = vsub.f32 %v3916_v16, %v5929_v61  ;;  %v1328_v29 = vmul.f32 %v5890_v39, %v1277_v3  ;;  %v9744_v56 = vld [vmem:[#allocation61_spill] sm:$0xff]  ;;  %v9747_v52 = vld [vmem:[#allocation39_spill] sm:$0xff] }
 0x189   : > { %v1410_v25 = vmul.f32 %v1362_v13, %v1130_v18  ;;  %v6276_v1 = vmul.f32 %v1186_v12, %v9743_v53  ;;  %v6279_v62 = vmul.f32 %v1184_v41, %v9744_v56  ;;  %v1188_v31 = vmul.f32 %v5938_v63, %v9745_v17  ;;  %v9748_v18 = vld [vmem:[#allocation53_spill] sm:$0xff] }
 0x18a   : > { %9742 = vst [vmem:[#allocation66_spill] sm:$0xff] %v6263_v27  ;;  %1490 = vrot.lane.b32.xlu1 %v6263_v27, %s4160_s18  ;;  %v1258_v13 = vmul.f32 %v1210_v19, %v9747_v52  ;;  %v1213_v16 = vmul.f32 %v5959_v14, %v9748_v18  ;;  %v9749_v27 = vld [vmem:[#allocation96_spill] sm:$0xff]  ;;  %v1374_v12 = vmul.f32 %v1326_v51, %v1118_v42  ;;  %v3920_v17 = vld [vmem:[%s4289_s28 + $0x178] sm:$0xff] }
 0x18b   : > { %v6285_v7 = vadd.f32 %v1410_v25, %v1260_v26  ;;  %v1190_v3 = vmul.f32 %v5897_v21, %v9749_v27  ;;  %v6293_v41 = vadd.f32 %v1375_v5, %v6183_v4  ;;  %v6296_v56 = vmul.f32 %v1187_v10, %v5778_v40  ;;  %v9751_v4 = vld [vmem:[#allocation21_spill] sm:$0xff]  ;;  %v9754_v52 = vld [vmem:[#allocation52_spill] sm:$0xff] }
 0x18c   : > { %v1028_v53 = vpop.permute.xlu1 %1027  ;;  %v6299_v26 = vmul.f32 %v1185_v59, %v5737_v22  ;;  %v1360_v19 = vmul.f32 %v5952_v6, %v1309_v35  ;;  %v1330_v42 = vmul.f32 %v5952_v6, %v1279_v49  ;;  %v6309_v5 = vmul.f32 %v1189_v15, %v5780_v48  ;;  %v9752_v59 = vld [vmem:[#allocation84_spill] sm:$0xff]  ;;  %v3917_v48 = vld [vmem:[%s4289_s28 + $0x68] sm:$0xff] }
 0x18d   : > { %9746 = vst [vmem:[#allocation45_spill] sm:$0xff] %v6285_v7  ;;  %1522 = vrot.lane.b32.xlu2 %v6285_v7, %s4160_s18  ;;  %v1135_v51 = vsel %vm673_vm12, %v1028_v53, %v6081_v30  ;;  %v1161_v22 = vsel %vm673_vm12, %v5981_v24, %v6061_v36  ;;  %1530 = vrot.lane.b32.xlu0 %v6293_v41, %s4160_s18  ;;  %v6323_v49 = vperm.slane %v5917_v28, 1  ;;  %v9755_v36 = vld [vmem:[#allocation23_spill] sm:$0xff] }
 0x18e   : > { %9750 = vst [vmem:[#allocation33_spill] sm:$0xff] %v6293_v41  ;;  %v1376_v40 = vmul.f32 %v1328_v29, %v1135_v51  ;;  %v6318_v10 = vmul.f32 %v1188_v31, %v9751_v4  ;;  %v1193_v35 = vmul.f32 %v5897_v21, %v9752_v59  ;;  %v1278_v15 = vsub.f32 %v3917_v48, %v5911_v32  ;;  %v9758_v51 = vld [vmem:[#allocation78_spill] sm:$0xff] }
 0x18f   : > { %9753 = vst [vmem:[#allocation48_spill] sm:$0xff] %v6323_v49  ;;  %v1092_v25 = vpop.permute.xlu0 %1091  ;;  %v6328_v24 = vmul.f32 %v1213_v16, %v9754_v52  ;;  %v6331_v18 = vmul.f32 %v1190_v3, %v9755_v36  ;;  %v6336_v31 = vadd.f32 %v1374_v12, %v6186_v57  ;;  %v1191_v28 = vmul.f32 %v5938_v63, %v9758_v51  ;;  %v9759_v4 = vld [vmem:[#allocation34_spill] sm:$0xff]  ;;  %v3918_v52 = vld [vmem:[%s4289_s28 + $0x78] sm:$0xff]  ;;  %v2975_v36 = vld [vmem:[#allocation7 + $0x78] sm:$0xff] }
 0x190   : > { %v1151_v29 = vsel %vm673_vm12, %v1092_v25, %v1028_v53  ;;  %v1192_v59 = vmul.f32 %v5959_v14, %v9759_v4  ;;  %v1408_v48 = vmul.f32 %v1360_v19, %v1161_v22  ;;  %v6343_v16 = vadd.f32 %v1376_v40, %v6193_v54  ;;  %v2974_v53 = vld [vmem:[#allocation7 + $0x70] sm:$0xff]  ;;  %3441 = vmatpush.msra.mxu3 %v2975_v36  ;;  %v9762_v12 = vld [vmem:[#allocation80_spill] sm:$0xff]  ;;  %v2973_v4 = vld [vmem:[#allocation7 + $0x68] sm:$0xff] }
 0x191   : > { %9756 = vst [vmem:[#allocation61_spill] sm:$0xff] %v6331_v18  ;;  %v1378_v27 = vmul.f32 %v1330_v42, %v1151_v29  ;;  %v1280_v3 = vsub.f32 %v3918_v52, %v5870_v47  ;;  %v6350_v57 = vmul.f32 %v1193_v35, %v5526_v55  ;;  %v1195_v19 = vmul.f32 %v5959_v14, %v9762_v12  ;;  %v9763_v42 = vld [vmem:[#allocation81_spill] sm:$0xff]  ;;  %v9764_v22 = vld [vmem:[#allocation94_spill] sm:$0xff]  ;;  %v9766_v51 = vld [vmem:[#allocation36_spill] sm:$0xff] }
 0x192   : > { %9757 = vst [vmem:[#allocation39_spill] sm:$0xff] %v6336_v31  ;;  %1498 = vrot.lane.b32.xlu1 %v6336_v31, %s4160_s18  ;;  %v1196_v54 = vmul.f32 %v5897_v21, %v9763_v42  ;;  %v1644_v40 = vmul.f32 %v6323_v49, %v9764_v22  ;;  %v1329_v29 = vmul.f32 %v5936_v38, %v1278_v15  ;;  %v3919_v12 = vld [vmem:[%s4289_s28 + $0x88] sm:$0xff]  ;;  %v9767_v15 = vld [vmem:[#allocation49_spill] sm:$0xff]  ;;  %v9789_v41 = vld [vmem:[#allocation50_spill] sm:$0xff] }
 0x193   : > { %9760 = vst [vmem:[#allocation21_spill] sm:$0xff] %v6343_v16  ;;  %v6360_v52 = vadd.f32 %v1378_v27, %v6196_v37  ;;  %3008 = vmatpush.msra.mxu0 %v2975_v36  ;;  %v1198_v55 = vmul.f32 %v5959_v14, %v9766_v51  ;;  %v1119_v35 = vsel %vm673_vm12, %v6081_v30, %v1092_v25  ;;  %v9769_v27 = vld [vmem:[#allocation35_spill] sm:$0xff]  ;;  %v6377_v36 = vpop.permute.xlu2 %1097  ;;  %v9771_v25 = vld [vmem:[#allocation58_spill] sm:$0xff] }
 0x194   : > { %9761 = vst [vmem:[#allocation52_spill] sm:$0xff] %v6350_v57  ;;  %v1282_v42 = vsub.f32 %v3919_v12, %v5929_v61  ;;  %v6369_v7 = vpop.permute.xlu1 %1093  ;;  %3442 = vmatpush.msra.mxu3 %v2974_v53  ;;  %v6372_v22 = vmul.f32 %v1191_v28, %v9767_v15  ;;  %v6375_v37 = vmul.f32 %v1192_v59, %v9769_v27  ;;  %v2972_v59 = vld [vmem:[#allocation7 + $0x60] sm:$0xff] }
 0x195   : > { %9765 = vst [vmem:[#allocation23_spill] sm:$0xff] %v6360_v52  ;;  %1468 = vrot.lane.b32.xlu2 %v6343_v16, %s4160_s18  ;;  %v1331_v51 = vmul.f32 %v5890_v39, %v1280_v3  ;;  %v6382_v30 = vadd.f32 %v1408_v48, %v1258_v13  ;;  %3009 = vmatpush.msra.mxu0 %v2974_v53  ;;  %v9772_v15 = vld [vmem:[#allocation104_spill] sm:$0xff]  ;;  %v9774_v16 = vld [vmem:[#allocation67_spill] sm:$0xff]  ;;  %v9776_v13 = vld [vmem:[#allocation121_spill] sm:$0xff] }
 0x196   : > { %9768 = vst [vmem:[#allocation94_spill] sm:$0xff] %v6372_v22  ;;  %v1194_v12 = vmul.f32 %v5938_v63, %v9771_v25  ;;  %v1312_v28 = vsub.f32 %v3920_v17, %v5929_v61  ;;  %1532 = vrot.lane.b32.xlu0 %v6360_v52, %s4160_s18  ;;  %3443 = vmatpush.msra.mxu3 %v2973_v4  ;;  %v9778_v25 = vld [vmem:[#allocation56_spill] sm:$0xff]  ;;  %v9779_v17 = vld [vmem:[#allocation57_spill] sm:$0xff] }
 0x197   : > { %9770 = vst [vmem:[#allocation49_spill] sm:$0xff] %v6382_v30  ;;  %v6391_v27 = vmul.f32 %v1195_v19, %v9772_v15  ;;  %v6394_v3 = vmul.f32 %v1196_v54, %v9774_v16  ;;  %v6397_v48 = vmul.f32 %v1644_v40, %v9776_v13  ;;  %v1377_v53 = vmul.f32 %v1329_v29, %v1119_v35  ;;  %v6401_v14 = vpop.permute.xlu0 %1061  ;;  %v9781_v19 = vld [vmem:[#allocation14_spill] sm:$0xff]  ;;  %v3921_v54 = vld [vmem:[%s4289_s28 + $0x108] sm:$0xff]  ;;  %v9782_v40 = vld [vmem:[#allocation12_spill] sm:$0xff] }
 0x198   : > { %v1281_v21 = vsub.f32 %v9778_v25, %v5911_v32  ;;  %3010 = vmatpush.msra.mxu0 %v2973_v4  ;;  %v6404_v52 = vmul.f32 %v1198_v55, %v9779_v17  ;;  %v1333_v31 = vmul.f32 %v5952_v6, %v1282_v42  ;;  %v1136_v16 = vsel %vm673_vm12, %v9781_v19, %v6401_v14  ;;  %v9784_v29 = vld [vmem:[#allocation72_spill] sm:$0xff]  ;;  %v2971_v55 = vld [vmem:[#allocation7 + $0x58] sm:$0xff] }
 0x199   : > { %9773 = vst [vmem:[#allocation35_spill] sm:$0xff] %v6391_v27  ;;  %v6413_v15 = vsub.f32 %v3921_v54, %v9782_v40  ;;  %v857_v35 = vsub.f32 %v3921_v54, %v9784_v29  ;;  %3444 = vmatpush.msra.mxu3 %v2972_v59  ;;  %v3685_v25 = vunpack.i.l.bf16 %v6198_v11  ;;  %v1152_v4 = vsel %vm673_vm12, %v6369_v7, %v9781_v19  ;;  %v6421_v13 = vld [vmem:[#allocation7 + $0xf8] sm:$0xff]  ;;  %v9788_v29 = vld [vmem:[#allocation24_spill] sm:$0xff]  ;;  %v9791_v19 = vld [vmem:[#allocation86_spill] sm:$0xff] }
 0x19a   : > { %9775 = vst [vmem:[#allocation104_spill] sm:$0xff] %v6394_v3  ;;  %v1379_v42 = vmul.f32 %v1331_v51, %v1136_v16  ;;  %v6423_v17 = vld [vmem:[#allocation7 + $0x178] sm:$0xff]  ;;  %3011 = vmatpush.msra.mxu0 %v2972_v59  ;;  %v1363_v54 = vmul.f32 %v5952_v6, %v1312_v28  ;;  %1548 = vrot.lane.b32.xlu1 %v6146_v44, %s4160_s18  ;;  %v6437_v16 = vld [vmem:[#allocation7 + $0x50] sm:$0xff]  ;;  %v3686_v44 = vunpack.i.h.bf16 %v6198_v11 }
 0x19b   : > { %9777 = vst [vmem:[#allocation67_spill] sm:$0xff] %v6397_v48  ;;  %v9786_v48 = vld [vmem:[#allocation69_spill] sm:$0xff]  ;;  %v6433_v33 = vsub.f32 %v9789_v41, %v9788_v29  ;;  %v858_v51 = vsub.f32 %v9789_v41, %v9791_v19  ;;  %3445 = vmatpush.msra.mxu3 %v2971_v55  ;;  %v9792_v59 = vld [vmem:[#allocation71_spill] sm:$0xff]  ;;  %v6446_v28 = vadd.f32 %v1377_v53, %v6203_v45  ;;  %v6453_v41 = vld [vmem:[#allocation7 + $0x170] sm:$0xff]  ;;  %v6496_v3 = vpop.permute.xlu2 %1035 }
 0x19c   : > { %9780 = vst [vmem:[#allocation121_spill] sm:$0xff] %v6404_v52  ;;  %v6426_v40 = vmul.f32 %v1194_v12, %v9786_v48  ;;  %v3596_v12 = vunpack.i.h.bf16 %v9792_v59  ;;  %v6443_v48 = vmul.f32 %v5936_v38, %v1281_v21  ;;  %v6449_v20 = vadd.f32 %v1379_v42, %v6208_v9  ;;  %3073 = vmatpush.msra.mxu1 %v6421_v13  ;;  %v9796_v19 = vld [vmem:[#allocation115_spill] sm:$0xff]  ;;  %v6458_v59 = vpop.permute.xlu1 %1031  ;;  %v9797_v21 = vld [vmem:[#allocation73_spill] sm:$0xff]  ;;  %v9798_v45 = vld [vmem:[#allocation76_spill] sm:$0xff] }
 0x19d   : > { %9783 = vst [vmem:[#allocation56_spill] sm:$0xff] %v6413_v15  ;;  %3138 = vmatpush.msra.mxu2 %v6423_v17  ;;  %v1381_v29 = vmul.f32 %v1333_v31, %v1152_v4  ;;  %v6456_v58 = vperm.slane %v9796_v19, 1  ;;  %v758_v43 = vmul.f32 %v9797_v21, %v6413_v15  ;;  %v908_v53 = vmul.f32 %v9798_v45, %v857_v35  ;;  %v6464_v9 = vld [vmem:[#allocation7 + $0x48] sm:$0xff]  ;;  %v9799_v4 = vld [vmem:[#allocation26_spill] sm:$0xff]  ;;  %v9803_v15 = vld [vmem:[#allocation95_spill] sm:$0xff] }
 0x19e   : > { %9785 = vst [vmem:[#allocation57_spill] sm:$0xff] %v6423_v17  ;;  %3446 = vmatpush.msra.mxu3 %v6437_v16  ;;  %v6466_v42 = vld [vmem:[#allocation7 + $0xe8] sm:$0xff]  ;;  %3012 = vmatpush.msra.mxu0 %v2971_v55  ;;  %v701_v31 = vsel %vm673_vm12, %v3596_v12, %v3685_v25  ;;  %v1283_v19 = vsub.f32 %v9799_v4, %v5870_v47  ;;  %v6492_v17 = vld [vmem:[#allocation7 + $0xe0] sm:$0xff] }
 0x19f   : > { %9787 = vst [vmem:[#allocation14_spill] sm:$0xff] %v6426_v40  ;;  %1500 = vrot.lane.b32.xlu2 %v6446_v28, %s4160_s18  ;;  %v9800_v35 = vld [vmem:[#allocation85_spill] sm:$0xff]  ;;  %3074 = vmatpush.msra.mxu1 %v6439_v60  ;;  %v1162_v11 = vsel %vm673_vm12, %v6249_v2, %v6014_v46  ;;  %v909_v4 = vmul.f32 %v9803_v15, %v858_v51  ;;  %v6498_v46 = vpop.permute.xlu0 %1095  ;;  %v6507_v51 = vld [vmem:[#allocation7 + $0x160] sm:$0xff]  ;;  %v9811_v40 = vld [vmem:[#allocation19_spill] sm:$0xff] }
 0x1a0   : > { %9790 = vst [vmem:[#allocation12_spill] sm:$0xff] %v6433_v33  ;;  %v1284_v21 = vsub.f32 %v9800_v35, %v5911_v32  ;;  %v6478_v45 = vld [vmem:[#allocation7 + $0x168] sm:$0xff]  ;;  %1470 = vrot.lane.b32.xlu0 %v6449_v20, %s4160_s18  ;;  %3139 = vmatpush.msra.mxu2 %v6453_v41  ;;  %v6490_v35 = vld [vmem:[#allocation7 + $0x40] sm:$0xff]  ;;  %v685_v52 = vsel %vm673_vm12, %v3685_v25, %v3686_v44 }
 0x1a1   : > { %9793 = vst [vmem:[#allocation72_spill] sm:$0xff] %v6446_v28  ;;  %v9802_v55 = vld [vmem:[#allocation89_spill] sm:$0xff]  ;;  %3447 = vmatpush.msra.mxu3 %v6464_v9  ;;  %3075 = vmatpush.msra.mxu1 %v6466_v42  ;;  %v806_v57 = vmul.f32 %v9811_v40, %v758_v43  ;;  %v956_v22 = vmul.f32 %v908_v53, %v701_v31  ;;  %v9814_v40 = vld [vmem:[#allocation55_spill] sm:$0xff]  ;;  %v6537_v31 = vld [vmem:[#allocation7 + $0x30] sm:$0xff] }
 0x1a2   : > { %9794 = vst [vmem:[#allocation69_spill] sm:$0xff] %v6449_v20  ;;  %v759_v28 = vmul.f32 %v9802_v55, %v6433_v33  ;;  %v3922_v2 = vld [vmem:[%s4289_s28 + $0x118] sm:$0xff]  ;;  %v9804_v20 = vld [vmem:[#allocation31_spill] sm:$0xff]  ;;  %v9806_v55 = vld [vmem:[#allocation100_spill] sm:$0xff]  ;;  %3140 = vmatpush.msra.mxu2 %v6478_v45  ;;  %v717_v43 = vsel %vm673_vm12, %v3686_v44, %v3596_v12  ;;  %v957_v53 = vmul.f32 %v909_v4, %v685_v52 }
 0x1a3   : > { %9795 = vst [vmem:[#allocation24_spill] sm:$0xff] %v6453_v41  ;;  %v6502_v27 = vsub.f32 %v3922_v2, %v9804_v20  ;;  %v859_v15 = vsub.f32 %v3922_v2, %v9806_v55  ;;  %v9808_v33 = vld [vmem:[#allocation103_spill] sm:$0xff]  ;;  %v6514_v41 = vadd.f32 %v1381_v29, %v6245_v50  ;;  %v1411_v20 = vmul.f32 %v1363_v54, %v1162_v11  ;;  %v3923_v55 = vld [vmem:[%s4289_s28 + $0xa0] sm:$0xff]  ;;  %v9815_v11 = vld [vmem:[#allocation101_spill] sm:$0xff] }
 0x1a4   : > { %9801 = vst [vmem:[#allocation50_spill] sm:$0xff] %v6478_v45  ;;  %v6511_v25 = vmul.f32 %v6456_v58, %v9808_v33  ;;  %v6519_v2 = vmul.f32 %v5890_v39, %v1283_v19  ;;  %v1285_v18 = vsub.f32 %v3923_v55, %v5929_v61  ;;  %3448 = vmatpush.msra.mxu3 %v6490_v35  ;;  %v6525_v33 = vld [vmem:[#allocation7 + $0x38] sm:$0xff]  ;;  %v6547_v44 = vld [vmem:[#allocation7 + $0xd0] sm:$0xff]  ;;  %v9818_v12 = vld [vmem:[#allocation64_spill] sm:$0xff] }
 0x1a5   : > { %9805 = vst [vmem:[#allocation86_spill] sm:$0xff] %v6502_v27  ;;  %3076 = vmatpush.msra.mxu1 %v6492_v17  ;;  %v6527_v50 = vld [vmem:[#allocation7 + $0xd8] sm:$0xff]  ;;  %1534 = vrot.lane.b32.xlu1 %v6514_v41, %s4160_s18  ;;  %v807_v54 = vmul.f32 %v9814_v40, %v759_v28  ;;  %v6540_v19 = vmul.f32 %v5936_v38, %v1284_v21  ;;  %v6550_v52 = vperm.slane %v9818_v12, 1  ;;  %v6556_v40 = vpop.permute.xlu1 %1065 }
 0x1a6   : > { %9807 = vst [vmem:[#allocation71_spill] sm:$0xff] %v6507_v51  ;;  %v6529_v29 = vld [vmem:[#allocation7 + $0x158] sm:$0xff]  ;;  %3141 = vmatpush.msra.mxu2 %v6507_v51  ;;  %v760_v55 = vmul.f32 %v9815_v11, %v6502_v27  ;;  %3449 = vmatpush.msra.mxu3 %v6525_v33  ;;  %v6552_v28 = vadd.f32 %v956_v22, %v806_v57  ;;  %v9823_v22 = vld [vmem:[#allocation65_spill] sm:$0xff] }
 0x1a7   : > { %9809 = vst [vmem:[#allocation115_spill] sm:$0xff] %v6511_v25  ;;  %v9816_v25 = vld [vmem:[#allocation102_spill] sm:$0xff]  ;;  %3077 = vmatpush.msra.mxu1 %v6527_v50  ;;  %v9820_v4 = vld [vmem:[#allocation75_spill] sm:$0xff]  ;;  %3013 = vmatpush.msra.mxu0 %v6437_v16  ;;  %v1120_v57 = vsel %vm673_vm12, %v6401_v14, %v6369_v7  ;;  %v1286_v12 = vsub.f32 %v9823_v22, %v5870_v47  ;;  %v6575_v16 = vld [vmem:[#allocation7 + $0xc8] sm:$0xff] }
 0x1a8   : > { %9810 = vst [vmem:[#allocation73_spill] sm:$0xff] %v6514_v41  ;;  %v910_v45 = vmul.f32 %v9816_v25, %v859_v15  ;;  %v1287_v21 = vsub.f32 %v9820_v4, %v5911_v32  ;;  %3142 = vmatpush.msra.mxu2 %v6529_v29  ;;  %v6560_v15 = vld [vmem:[#allocation7 + $0x150] sm:$0xff]  ;;  %v9822_v25 = vld [vmem:[#allocation63_spill] sm:$0xff]  ;;  %1550 = vrot.lane.b32.xlu2 %v6220_v0, %s4160_s18  ;;  %v6573_v4 = vld [vmem:[#allocation7 + $0x28] sm:$0xff] }
 0x1a9   : > { %9812 = vst [vmem:[#allocation76_spill] sm:$0xff] %v6527_v50  ;;  %v1197_v11 = vmul.f32 %v5938_v63, %v9822_v25  ;;  %3450 = vmatpush.msra.mxu3 %v6537_v31  ;;  %v6578_v41 = vadd.f32 %v1411_v20, %v6328_v24  ;;  %v1336_v25 = vmul.f32 %v5952_v6, %v1285_v18  ;;  %v3924_v14 = vld [vmem:[%s4289_s28 + $0xb8] sm:$0xff]  ;;  %v6590_v63 = vpop.permute.xlu0 %1033  ;;  %v9828_v27 = vld [vmem:[#allocation27_spill] sm:$0xff]  ;;  %v6595_v18 = vld [vmem:[#allocation7 + $0x20] sm:$0xff] }
 0x1aa   : > { %9813 = vst [vmem:[#allocation26_spill] sm:$0xff] %v6529_v29  ;;  %1041 = vrot.lane.b32.xlu0 %v6552_v28, %s4160_s18  ;;  %v1288_v7 = vsub.f32 %v3924_v14, %v5929_v61  ;;  %v6585_v0 = vadd.f32 %v957_v53, %v807_v54  ;;  %3078 = vmatpush.msra.mxu1 %v6547_v44  ;;  %v6588_v22 = vld [vmem:[#allocation7 + $0x148] sm:$0xff]  ;;  %v9829_v20 = vld [vmem:[#allocation90_spill] sm:$0xff] }
 0x1ab   : > { %9817 = vst [vmem:[#allocation85_spill] sm:$0xff] %v6547_v44  ;;  %v808_v29 = vmul.f32 %v9828_v27, %v760_v55  ;;  %v958_v24 = vmul.f32 %v910_v45, %v717_v43  ;;  %3143 = vmatpush.msra.mxu2 %v6560_v15  ;;  %3014 = vmatpush.msra.mxu0 %v6464_v9  ;;  %v6605_v27 = vld [vmem:[#allocation7 + $0xc0] sm:$0xff]  ;;  %v9832_v9 = vld [vmem:[#allocation70_spill] sm:$0xff]  ;;  %v6616_v55 = vpop.permute.xlu2 %1069  ;;  %v3931_v44 = vld [vmem:[%s4289_s28 + $0xf8] sm:$0xff] }
 0x1ac   : > { %9819 = vst [vmem:[#allocation89_spill] sm:$0xff] %v6552_v28  ;;  %v1643_v54 = vmul.f32 %v6550_v52, %v9829_v20  ;;  %v1380_v53 = vmul.f32 %v6443_v48, %v1120_v57  ;;  %v6601_v14 = vmul.f32 %v5936_v38, %v1287_v21  ;;  %3451 = vmatpush.msra.mxu3 %v6573_v4  ;;  %v6607_v45 = vld [vmem:[#allocation7 + $0x140] sm:$0xff]  ;;  %v6625_v28 = vld [vmem:[#allocation7 + $0x18] sm:$0xff] }
 0x1ad   : > { %9821 = vst [vmem:[#allocation95_spill] sm:$0xff] %v6560_v15  ;;  %3079 = vmatpush.msra.mxu1 %v6575_v16  ;;  %v6610_v43 = vmul.f32 %v1197_v11, %v9832_v9  ;;  %v1137_v48 = vsel %vm673_vm12, %v6458_v59, %v6283_v34  ;;  %v6619_v21 = vmul.f32 %v5890_v39, %v1286_v12  ;;  %v3925_v57 = vld [vmem:[%s4289_s28 + $0xd0] sm:$0xff]  ;;  %v3926_v11 = vld [vmem:[%s4289_s28 + $0xc0] sm:$0xff]  ;;  %v9834_v15 = vld [vmem:[#allocation77_spill] sm:$0xff] }
 0x1ae   : > { %9824 = vst [vmem:[#allocation31_spill] sm:$0xff] %v6575_v16  ;;  %v1291_v20 = vsub.f32 %v3925_v57, %v5929_v61  ;;  %3144 = vmatpush.msra.mxu2 %v6588_v22  ;;  %3015 = vmatpush.msra.mxu0 %v6490_v35  ;;  %v1289_v9 = vsub.f32 %v3926_v11, %v5870_v47  ;;  %v6634_v12 = vld [vmem:[#allocation7 + $0xb8] sm:$0xff]  ;;  %v9836_v57 = vld [vmem:[#allocation74_spill] sm:$0xff] }
 0x1af   : > { %9825 = vst [vmem:[#allocation100_spill] sm:$0xff] %v6578_v41  ;;  %1073 = vrot.lane.b32.xlu1 %v6585_v0, %s4160_s18  ;;  %v1290_v51 = vsub.f32 %v9834_v15, %v5911_v32  ;;  %3452 = vmatpush.msra.mxu3 %v6595_v18  ;;  %v6639_v35 = vmul.f32 %v5952_v6, %v1288_v7  ;;  %v6645_v11 = vld [vmem:[#allocation7 + $0x138] sm:$0xff] }
 0x1b0   : > { %9826 = vst [vmem:[#allocation103_spill] sm:$0xff] %v6585_v0  ;;  %3080 = vmatpush.msra.mxu1 %v6605_v27  ;;  %3145 = vmatpush.msra.mxu2 %v6607_v45  ;;  %v9839_v0 = vld [vmem:[#allocation120_spill] sm:$0xff]  ;;  %v1382_v16 = vmul.f32 %v6519_v2, %v1137_v48  ;;  %v6656_v7 = vadd.f32 %v1380_v53, %v6253_v8  ;;  %v6670_v8 = vld [vmem:[#allocation7 + $0xb0] sm:$0xff] }
 0x1b1   : > { %9827 = vst [vmem:[#allocation19_spill] sm:$0xff] %v6588_v22  ;;  %v1607_v22 = vmul.f32 %v6550_v52, %v9836_v57  ;;  %v6648_v15 = vmul.f32 %v1643_v54, %v9839_v0  ;;  %v1153_v57 = vsel %vm673_vm12, %v6498_v46, %v6458_v59  ;;  %3016 = vmatpush.msra.mxu0 %v6525_v33  ;;  %v6672_v59 = vld [vmem:[#allocation7 + $0x130] sm:$0xff]  ;;  %v9844_v2 = vld [vmem:[#allocation88_spill] sm:$0xff]  ;;  %v9845_v54 = vld [vmem:[#allocation105_spill] sm:$0xff] }
 0x1b2   : > { %9830 = vst [vmem:[#allocation55_spill] sm:$0xff] %v6605_v27  ;;  %3453 = vmatpush.msra.mxu3 %v6625_v28  ;;  %v6667_v0 = vmul.f32 %v5952_v6, %v1291_v20  ;;  %3081 = vmatpush.msra.mxu1 %v6634_v12  ;;  %v1608_v33 = vmul.f32 %v6323_v49, %v9844_v2  ;;  %v6692_v49 = vpop.permute.xlu0 %1067 }
 0x1b3   : > { %9831 = vst [vmem:[#allocation101_spill] sm:$0xff] %v6607_v45  ;;  %v1609_v53 = vmul.f32 %v6456_v58, %v9845_v54  ;;  %1502 = vrot.lane.b32.xlu0 %v6656_v7, %s4160_s18  ;;  %v6681_v48 = vmul.f32 %v5890_v39, %v1289_v9  ;;  %v6684_v20 = vmul.f32 %v5936_v38, %v1290_v51  ;;  %v9846_v45 = vld [vmem:[#allocation79_spill] sm:$0xff]  ;;  %v3927_v54 = vld [vmem:[%s4289_s28 + $0xd8] sm:$0xff] }
 0x1b4   : > { %9833 = vst [vmem:[#allocation102_spill] sm:$0xff] %v6610_v43  ;;  %v6641_v43 = vadd.f32 %v958_v24, %v808_v29  ;;  %v6658_v29 = vpop.permute.xlu1 %1099  ;;  %v6662_v24 = vld [vmem:[#allocation7 + $0x10] sm:$0xff]  ;;  %3146 = vmatpush.msra.mxu2 %v6645_v11  ;;  %v1384_v2 = vmul.f32 %v1336_v25, %v1153_v57  ;;  %3017 = vmatpush.msra.mxu0 %v6537_v31  ;;  %v6700_v51 = vld [vmem:[#allocation7 + $0xa8] sm:$0xff] }
 0x1b5   : > { %9835 = vst [vmem:[#allocation64_spill] sm:$0xff] %v6634_v12  ;;  %v3928_v12 = vld [vmem:[%s4289_s28 + $0xe0] sm:$0xff]  ;;  %3454 = vmatpush.msra.mxu3 %v6662_v24  ;;  %v6707_v25 = vadd.f32 %v1382_v16, %v6279_v62  ;;  %3082 = vmatpush.msra.mxu1 %v6670_v8  ;;  %v6713_v31 = vld [vmem:[#allocation7 + $0x128] sm:$0xff]  ;;  %v6723_v62 = vld [vmem:[#allocation7 + $0xa0] sm:$0xff]  ;;  %v1296_v50 = vsub.f32 %v3931_v44, %v5911_v32 }
 0x1b6   : > { %9837 = vst [vmem:[#allocation75_spill] sm:$0xff] %v6641_v43  ;;  %1105 = vrot.lane.b32.xlu2 %v6641_v43, %s4160_s18  ;;  %v6687_v43 = vld [vmem:[#allocation7 + $0x8] sm:$0xff]  ;;  %v1293_v9 = vsub.f32 %v3928_v12, %v5911_v32  ;;  %3147 = vmatpush.msra.mxu2 %v6672_v59  ;;  %v1122_v12 = vsel %vm673_vm12, %v6556_v40, %v6377_v36  ;;  %v6863_v32 = vld [vmem:[%s4289_s28 + $0x8] sm:$0xff] }
 0x1b7   : > { %9838 = vst [vmem:[#allocation65_spill] sm:$0xff] %v6645_v11  ;;  %3018 = vmatpush.msra.mxu0 %v6573_v4  ;;  %3455 = vmatpush.msra.mxu3 %v6687_v43  ;;  %v1386_v44 = vmul.f32 %v6601_v14, %v1122_v12  ;;  %v6798_v12 = vld [vmem:[#allocation7 + $0x90] sm:$0xff] }
 0x1b8   : > { %9840 = vst [vmem:[#allocation27_spill] sm:$0xff] %v6648_v15  ;;  %v6690_v15 = vmul.f32 %v1607_v22, %v9846_v45  ;;  %v1121_v22 = vsel %vm673_vm12, %v6283_v34, %v6498_v46  ;;  %v3929_v45 = vld [vmem:[%s4289_s28 + $0xe8] sm:$0xff]  ;;  %v6721_v34 = vld [vmem:[#allocation7] sm:$0xff]  ;;  %v9850_v46 = vld [vmem:[#allocation62_spill] sm:$0xff]  ;;  %1472 = vrot.lane.b32.xlu1 %v6707_v25, %s4160_s18  ;;  %3083 = vmatpush.msra.mxu1 %v6700_v51 }
 0x1b9   : > { %9841 = vst [vmem:[#allocation90_spill] sm:$0xff] %v6656_v7  ;;  %v1292_v7 = vsub.f32 %v3927_v54, %v5870_v47  ;;  %v1294_v57 = vsub.f32 %v3929_v45, %v5929_v61  ;;  %v3423_v16 = vmul.f32 -1.442695, %v9850_v46  ;;  %v9851_v54 = vld [vmem:[#allocation122_spill] sm:$0xff]  ;;  %v6741_v46 = vld [vmem:[#allocation7 + $0x120] sm:$0xff]  ;;  %3148 = vmatpush.msra.mxu2 %v6713_v31  ;;  %3019 = vmatpush.msra.mxu0 %v6595_v18  ;;  %v6767_v18 = vld [vmem:[#allocation7 + $0x98] sm:$0xff] }
 0x1ba   : > { %9842 = vst [vmem:[#allocation70_spill] sm:$0xff] %v6670_v8  ;;  %v6727_v45 = vmul.f32 %v1608_v33, %v9851_v54  ;;  %v9853_v8 = vld [vmem:[#allocation22_spill] sm:$0xff]  ;;  %v1383_v33 = vmul.f32 %v6540_v19, %v1121_v22  ;;  %v1138_v19 = vsel %vm673_vm12, %v6590_v63, %v6556_v40  ;;  %3456 = vmatpush.msra.mxu3 %v6721_v34 }
 0x1bb   : > { %9843 = vst [vmem:[#allocation77_spill] sm:$0xff] %v6672_v59  ;;  %v9852_v59 = vld [vmem:[#allocation123_spill] sm:$0xff]  ;;  %v1295_v27 = vsub.f32 %v9853_v8, %v5870_v47  ;;  %v6750_v54 = vmul.f32 %v5890_v39, %v1292_v7  ;;  %3687 = vpow2.f32 %v3423_v16  ;;  %3084 = vmatpush.msra.mxu1 %v6723_v62  ;;  %v6774_v40 = vmul.f32 %v5936_v38, %v1293_v9  ;;  %v6800_v16 = vld [vmem:[#allocation7 + $0x110] sm:$0xff] }
 0x1bc   : > { %9847 = vst [vmem:[#allocation74_spill] sm:$0xff] %v6690_v15  ;;  %v6730_v11 = vmul.f32 %v1609_v53, %v9852_v59  ;;  %v3930_v15 = vld [vmem:[%s4289_s28 + $0x100] sm:$0xff]  ;;  %v6744_v59 = vpop.permute.xlu2 %1039  ;;  %v6747_v53 = vadd.f32 %v1384_v2, %v6276_v1  ;;  %v1154_v1 = vsel %vm673_vm12, %v6377_v36, %v6590_v63  ;;  %v6769_v7 = vld [vmem:[#allocation7 + $0x118] sm:$0xff]  ;;  %v6777_v14 = vmul.f32 %v5952_v6, %v1294_v57  ;;  %v3932_v63 = vld [vmem:[#allocation5 + $0x18] sm:$0xff] }
 0x1bd   : > { %9848 = vst [vmem:[#allocation120_spill] sm:$0xff] %v6707_v25  ;;  %v1297_v4 = vsub.f32 %v3930_v15, %v5929_v61  ;;  %v6763_v15 = vpop.permute.xlu1 %1037  ;;  %v6779_v36 = vperm.slane %v3932_v63, 2  ;;  %3149 = vmatpush.msra.mxu2 %v6741_v46  ;;  %v9858_v8 = vld [vmem:[#allocation99_spill] sm:$0xff]  ;;  %1552 = vrot.lane.b32.xlu0 %v6382_v30, %s4160_s18  ;;  %v6792_v9 = vmul.f32 %v5890_v39, %v1295_v27  ;;  %v6804_v30 = vpop.permute.xlu0 %1101  ;;  %v6809_v27 = vld [vmem:[%s4289_s28] sm:$0xff] }
 0x1be   : > { %9849 = vst [vmem:[#allocation88_spill] sm:$0xff] %v6713_v31  ;;  %1536 = vrot.lane.b32.xlu2 %v6747_v53, %s4160_s18  ;;  %v6784_v2 = vmul.f32 %v6550_v52, %v9858_v8  ;;  %v6795_v57 = vmul.f32 %v5936_v38, %v1296_v50  ;;  %3020 = vmatpush.msra.mxu0 %v6625_v28  ;;  %v3387_v50 = vmul.f32 -1.442695, %v6809_v27  ;;  %v9860_v28 = vld [vmem:[#allocation109_spill] sm:$0xff]  ;;  %v9865_v38 = vld [vmem:[#allocation107_spill] sm:$0xff] }
 0x1bf   : > { %9854 = vst [vmem:[#allocation105_spill] sm:$0xff] %v6741_v46  ;;  %v6789_v22 = vmul.f32 %v5952_v6, %v1297_v4  ;;  %v1385_v8 = vmul.f32 %v6619_v21, %v1138_v19  ;;  %v1387_v25 = vmul.f32 %v6639_v35, %v1154_v1  ;;  %3085 = vmatpush.msra.mxu1 %v6767_v18  ;;  %v6822_v35 = vperm.slane %v3932_v63, 3  ;;  %v6825_v19 = vld [vmem:[#allocation7 + $0x88] sm:$0xff] }
 0x1c0   : > { %9855 = vst [vmem:[#allocation79_spill] sm:$0xff] %v6747_v53  ;;  %3150 = vmatpush.msra.mxu2 %v6769_v7  ;;  %v6814_v4 = vmul.f32 %v6456_v58, %v9860_v28  ;;  %v6817_v53 = vadd.f32 %v1383_v33, %v6299_v26  ;;  %v6820_v21 = vadd.f32 %v1386_v44, %v6318_v10  ;;  %v6827_v1 = vld [vmem:[#allocation7 + $0x108] sm:$0xff]  ;;  %v6843_v33 = vld [vmem:[%s4289_s28 + $0x120] sm:$0xff]  ;;  %3689 = vpow2.f32 %v3387_v50  ;;  %v6860_v28 = vld [vmem:[#allocation7 + $0x80] sm:$0xff] }
 0x1c1   : > { %9856 = vst [vmem:[#allocation62_spill] sm:$0xff] %v6769_v7  ;;  %3021 = vmatpush.msra.mxu0 %v6662_v24  ;;  %v6831_v39 = vmul.f32 %v6550_v52, %v9865_v38  ;;  %3457 = vmatpush.msrb.mxu3 %v6421_v13  ;;  %v3688_v26 = vpop.eup %3687  ;;  %v1155_v10 = vsel %vm673_vm12, %v6658_v29, %v6496_v3  ;;  %v3388_v50 = vmul.f32 -1.442695, %v6863_v32 }
 0x1c2   : > { %9857 = vst [vmem:[#allocation122_spill] sm:$0xff] %v6779_v36  ;;  %v1123_v24 = vsel %vm673_vm12, %v6692_v49, %v6658_v29  ;;  %v1742_v38 = vsub.f32 %v6843_v33, %v6779_v36  ;;  %3086 = vmatpush.msra.mxu1 %v6798_v12  ;;  %3151 = vmatpush.msra.mxu2 %v6800_v16  ;;  %v6855_v44 = vadd.f32 1.0, %v3688_v26  ;;  %v3935_v29 = vld [vmem:[#allocation5 + $0x20] sm:$0xff]  ;;  %v3937_v26 = vld [vmem:[#allocation5 + $0x28] sm:$0xff] }
 0x1c3   : > { %9859 = vst [vmem:[#allocation123_spill] sm:$0xff] %v6800_v16  ;;  %v1139_v13 = vsel %vm673_vm12, %v6496_v3, %v6692_v49  ;;  %1504 = vrot.lane.b32.xlu1 %v6817_v53, %s4160_s18  ;;  %v6857_v63 = vperm.slane %v3935_v29, 2  ;;  %3022 = vmatpush.msra.mxu0 %v6687_v43  ;;  %v6869_v49 = vadd.f32 %v1385_v8, %v6296_v56  ;;  %v6876_v6 = vperm.slane %v3937_v26, 3  ;;  %v6880_v43 = vld [vmem:[#allocation7 + $0x100] sm:$0xff] }
 0x1c4   : > { %9861 = vst [vmem:[#allocation22_spill] sm:$0xff] %v6817_v53  ;;  %v6866_v47 = vpop.permute.xlu2 %1516  ;;  %v6872_v3 = vadd.f32 %v1387_v25, %v6309_v5  ;;  %v6874_v53 = vperm.slane %v3937_v26, 2  ;;  %3087 = vmatpush.msra.mxu1 %v6825_v19  ;;  %3152 = vmatpush.msra.mxu2 %v6827_v1  ;;  %v1390_v61 = vmul.f32 %v6667_v0, %v1155_v10  ;;  %3691 = vrcp.f32 %v6855_v44 }
 0x1c5   : > { %9862 = vst [vmem:[#allocation99_spill] sm:$0xff] %v6820_v21  ;;  %v1140_v56 = vsel %vm673_vm12, %v6763_v15, %v6616_v55  ;;  %v1124_v5 = vsel %vm673_vm12, %v6616_v55, %v6804_v30  ;;  %3023 = vmatpush.msra.mxu0 %v6721_v34  ;;  %3458 = vmatpush.msrb.mxu3 %v6439_v60  ;;  %v1104_v8 = vpop.permute.xlu1 %1103  ;;  %3693 = vpow2.f32 %v3388_v50  ;;  %v6906_v55 = vld [vmem:[%s4289_s28 + $0x10] sm:$0xff]  ;;  %vm2638_vm1 = vweird.f32 %v6855_v44 }
 0x1c6   : > { %9863 = vst [vmem:[#allocation109_spill] sm:$0xff] %v6822_v35  ;;  %v1388_v25 = vmul.f32 %v6681_v48, %v1139_v13  ;;  %v1389_v0 = vmul.f32 %v6684_v20, %v1123_v24  ;;  %1474 = vrot.lane.b32.xlu2 %v6869_v49, %s4160_s18  ;;  %v1706_v10 = vsub.f32 %v6809_v27, %v6779_v36  ;;  %v6910_v20 = vperm.slane %v3935_v29, 3  ;;  %v3690_v24 = vpop.eup %3689  ;;  %v9872_v29 = vld [vmem:[#allocation124_spill] sm:$0xff] }
 0x1c7   : > { %9864 = vst [vmem:[#allocation129_spill] sm:$0xff] %v6827_v1  ;;  %3088 = vmatpush.msra.mxu1 %v6860_v28  ;;  %1538 = vrot.lane.b32.xlu0 %v6872_v3, %s4160_s18  ;;  %v1707_v60 = vsub.f32 %v6863_v32, %v6857_v63  ;;  %v1708_v48 = vsub.f32 %v6906_v55, %v6874_v53  ;;  %v3389_v34 = vmul.f32 -1.442695, %v6906_v55  ;;  %v6927_v16 = vadd.f32 1.0, %v3690_v24 }
 0x1c8   : > { %9866 = vst [vmem:[#allocation107_spill] sm:$0xff] %v6857_v63  ;;  %3153 = vmatpush.msra.mxu2 %v6880_v43  ;;  %v1391_v13 = vmul.f32 %v6750_v54, %v1140_v56  ;;  %v1156_v50 = vsel %vm673_vm12, %v6804_v30, %v6763_v15  ;;  %v1392_v26 = vmul.f32 %v6774_v40, %v1124_v5  ;;  %v9874_v54 = vld [vmem:[#allocation61_spill] sm:$0xff]  ;;  %v9876_v30 = vld [vmem:[#allocation94_spill] sm:$0xff] }
 0x1c9   : > { %9867 = vst [vmem:[#allocation130_spill] sm:$0xff] %v6866_v47  ;;  %3459 = vmatpush.msrb.mxu3 %v6466_v42  ;;  %v6925_v1 = vadd.f32 %v1390_v61, %v6375_v37  ;;  %3695 = vpow2.f32 %v3389_v34  ;;  %v6930_v56 = vadd.f32 %v1388_v25, %v9874_v54  ;;  %v6933_v15 = vadd.f32 %v1389_v0, %v9876_v30 }
 0x1ca   : > { %9868 = vst [vmem:[#allocation131_spill] sm:$0xff] %v6869_v49  ;;  %v1072_v49 = vpop.permute.xlu0 %1071  ;;  %v6936_v40 = vmul.f32 %v6822_v35, %v1706_v10  ;;  %v6941_v5 = vpop.eup %3691  ;;  %v1393_v61 = vmul.f32 %v6777_v14, %v1156_v50  ;;  %v6947_v37 = vmul.f32 %v6910_v20, %v1707_v60  ;;  %v6950_v25 = vmul.f32 %v6876_v6, %v1708_v48  ;;  %v9878_v10 = vld [vmem:[#allocation52_spill] sm:$0xff]  ;;  %v9880_v14 = vld [vmem:[#allocation14_spill] sm:$0xff]  ;;  %v3940_v50 = vld [vmem:[#allocation5 + $0x8] sm:$0xff] }
 0x1cb   : > { %9869 = vst [vmem:[#allocation132_spill] sm:$0xff] %v6872_v3  ;;  %v1793_v3 = vmul.f32 %v6822_v35, %v1742_v38  ;;  %v3939_v38 = vld [vmem:[#allocation5] sm:$0xff]  ;;  %3460 = vmatpush.msrb.mxu3 %v6492_v17  ;;  %1554 = vrot.lane.b32.xlu1 %v6578_v41, %s4160_s18  ;;  %3697 = vrcp.f32 %v6927_v16  ;;  %v3694_v0 = vpop.eup %3693  ;;  %v6954_v34 = vadd.f32 %v1391_v13, %v9878_v10  ;;  %v6961_v54 = vperm.slane %v3940_v50, 2  ;;  %v9882_v60 = vld [vmem:[#allocation76_spill] sm:$0xff] }
 0x1cc   : > { %9870 = vst [vmem:[#allocation133_spill] sm:$0xff] %v6880_v43  ;;  %v6938_v42 = vperm.slane %v3939_v38, 2  ;;  %v2634_v17 = vmul.f32 %v6941_v5, %v6855_v44  ;;  %v6959_v24 = vadd.f32 %v1392_v26, %v9880_v14  ;;  %v1141_v48 = vsel %vm673_vm12, %v6744_v59, %v1072_v49  ;;  %v6971_v10 = vpop.permute.xlu2 %1462  ;;  %v6978_v14 = vld [vmem:[%s4289_s28 + $0x28] sm:$0xff] }
 0x1cd   : > { %9871 = vst [vmem:[#allocation134_spill] sm:$0xff] %v6910_v20  ;;  %3461 = vmatpush.msrb.mxu3 %v9882_v60  ;;  %v2642_v30 = vand.u32 2147483647, %v6855_v44  ;;  %v2644_v13 = vand.u32 2147483648, %v6855_v44  ;;  %v6969_v38 = vadd.f32 1.0, %v3694_v0  ;;  %vm2639_vm2 = vweird.f32 %v6941_v5  ;;  %v9883_v60 = vld [vmem:[#allocation85_spill] sm:$0xff]  ;;  %v6994_v46 = vpop.permute.xlu1 %1484 }
 0x1ce   : > { %9873 = vst [vmem:[#allocation124_spill] sm:$0xff] %v6925_v1  ;;  %1506 = vrot.lane.b32.xlu2 %v6820_v21, %s4160_s18  ;;  %v2635_v26 = vsub.f32 1.0, %v2634_v17  ;;  %v3392_v50 = vmul.f32 -1.442695, %v6978_v14  ;;  %v1157_v0 = vsel %vm673_vm12, %v1104_v8, %v6744_v59  ;;  %v1125_v41 = vsel %vm673_vm12, %v1072_v49, %v1104_v8  ;;  %v9884_v17 = vld [vmem:[#allocation35_spill] sm:$0xff]  ;;  %vm7012_vm3 = vmor %vm2638_vm1, %vm2639_vm2 }
 0x1cf   : > { %9875 = vst [vmem:[#allocation61_spill] sm:$0xff] %v6930_v56  ;;  %3462 = vmatpush.msrb.mxu3 %v9883_v60  ;;  %v3696_v43 = vpop.eup %3695  ;;  %1476 = vrot.lane.b32.xlu0 %v6930_v56, %s4160_s18  ;;  %v6990_v21 = vadd.f32 %v1393_v61, %v9884_v17  ;;  %3699 = vrcp.f32 %v6969_v38  ;;  %v1394_v7 = vmul.f32 %v6792_v9, %v1141_v48  ;;  %v9887_v59 = vld [vmem:[#allocation31_spill] sm:$0xff]  ;;  %vm7016_vm4 = vcmp.eq.f32.partialorder %v2642_v30, 8.507059e+37 }
 0x1d0   : > { %9877 = vst [vmem:[#allocation94_spill] sm:$0xff] %v6933_v15  ;;  %v2636_v60 = vmul.f32 %v6941_v5, %v2635_v26  ;;  %v6997_v31 = vadd.f32 1.0, %v3696_v43  ;;  %3701 = vpow2.f32 %v3392_v50  ;;  %v1584_v8 = vsel %vm673_vm12, %v6994_v46, %v6866_v47  ;;  %v9892_v44 = vld [vmem:[#allocation55_spill] sm:$0xff]  ;;  %v9899_v43 = vld [vmem:[#allocation70_spill] sm:$0xff] }
 0x1d1   : > { %9879 = vst [vmem:[#allocation52_spill] sm:$0xff] %v6954_v34  ;;  %3463 = vmatpush.msrb.mxu3 %v9887_v59  ;;  %v7000_v49 = vpop.eup %3697  ;;  %v2645_v48 = vor.u32 1.1754944e-38, %v2644_v13  ;;  %v2102_v26 = vand.u32 2147483647, %v6927_v16  ;;  %v1841_v50 = vmul.f32 %v1793_v3, %v1584_v8  ;;  %v2104_v56 = vand.u32 2147483648, %v6927_v16  ;;  %v9893_v13 = vld [vmem:[#allocation104_spill] sm:$0xff] }
 0x1d2   : > { %9881 = vst [vmem:[#allocation14_spill] sm:$0xff] %v6959_v24  ;;  %v7006_v61 = vpop.permute.xlu0 %1460  ;;  %v2637_v17 = vadd.f32 %v6941_v5, %v2636_v60  ;;  %v2094_v59 = vmul.f32 %v7000_v49, %v6927_v16  ;;  %v1396_v47 = vmul.f32 %v6789_v22, %v1157_v0  ;;  %v7028_v30 = vmul.f32 %v6795_v57, %v1125_v41  ;;  %v9895_v0 = vld [vmem:[#allocation64_spill] sm:$0xff]  ;;  %v9896_v57 = vld [vmem:[#allocation27_spill] sm:$0xff] }
 0x1d3   : > { %9885 = vst [vmem:[#allocation76_spill] sm:$0xff] %v6990_v21  ;;  %3464 = vmatpush.msrb.mxu3 %v9892_v44  ;;  %1540 = vrot.lane.b32.xlu1 %v6925_v1, %s4160_s18  ;;  %vm2098_vm5 = vweird.f32 %v6927_v16  ;;  %3703 = vrcp.f32 %v6997_v31  ;;  %v7038_v60 = vadd.f32 %v1394_v7, %v9893_v13  ;;  %v2117_v22 = vand.u32 2147483647, %v6969_v38 }
 0x1d4   : > { %9886 = vst [vmem:[#allocation85_spill] sm:$0xff] %v6994_v46  ;;  %v2641_v3 = vsel %vm7012_vm3, %v6941_v5, %v2637_v17  ;;  %v2095_v8 = vsub.f32 1.0, %v2094_v59  ;;  %v1889_v44 = vadd.f32 %v1841_v50, %v9896_v57  ;;  %vm2099_vm6 = vweird.f32 %v7000_v49  ;;  %v7105_v46 = vld [vmem:[%s4289_s28 + $0x138] sm:$0xff] }
 0x1d5   : > { %9894 = vst [vmem:[#allocation35_spill] sm:$0xff] %v7038_v60  ;;  %3465 = vmatpush.msrb.mxu3 %v9895_v0  ;;  %v7042_v41 = vpop.eup %3699  ;;  %v2646_v1 = vsel %vm7016_vm4, %v2645_v48, %v2641_v3  ;;  %vm7048_vm7 = vcmp.eq.f32.partialorder %v2102_v26, 8.507059e+37  ;;  %v2105_v59 = vor.u32 1.1754944e-38, %v2104_v56  ;;  %vm2113_vm9 = vweird.f32 %v6969_v38  ;;  %v9900_v26 = vld [vmem:[#allocation121_spill] sm:$0xff]  ;;  %vm7076_vm8 = vmor %vm2098_vm5, %vm2099_vm6 }
 0x1d6   : > { %v3702_v7 = vpop.eup %3701  ;;  %1508 = vrot.lane.b32.xlu2 %v6933_v15, %s4160_s18  ;;  %v2849_v5 = vmul.f32 %v6843_v33, %v2646_v1  ;;  %v2096_v17 = vmul.f32 %v7000_v49, %v2095_v8  ;;  %v2109_v50 = vmul.f32 %v7042_v41, %v6969_v38  ;;  %v2119_v48 = vand.u32 2147483648, %v6969_v38  ;;  %v7068_v1 = vpop.permute.xlu2 %1526 }
 0x1d7   : > { %3466 = vmatpush.msrb.mxu3 %v9899_v43  ;;  %1478 = vrot.lane.b32.xlu0 %v6954_v34, %s4160_s18  ;;  %v7064_v3 = vadd.f32 %v1396_v47, %v9900_v26  ;;  %v7066_v13 = vadd.f32 1.0, %v3702_v7  ;;  %v1493_v33 = vpop.permute.xlu1 %1492  ;;  %vm7080_vm11 = vcmp.eq.f32.partialorder %v2117_v22, 8.507059e+37  ;;  %vm2114_vm10 = vweird.f32 %v7042_v41 }
 0x1d8   : > { %v2900_v56 = vmul.f32 %v6938_v42, %v2849_v5  ;;  %v2097_v8 = vadd.f32 %v7000_v49, %v2096_v17  ;;  %v2110_v57 = vsub.f32 1.0, %v2109_v50  ;;  %v1572_v5 = vsel %vm673_vm12, %v7006_v61, %v1493_v33  ;;  %vm7117_vm14 = vmor %vm2113_vm9, %vm2114_vm10 }
 0x1d9   : > { %9901 = vst [vmem:[#allocation31_spill] sm:$0xff] %v7064_v3  ;;  %3467 = vmatpush.msrb.mxu3 %v6700_v51  ;;  %v7085_v7 = vpop.eup %3703  ;;  %v2132_v16 = vand.u32 2147483647, %v6997_v31  ;;  %3705 = vrcp.f32 %v7066_v13  ;;  %v1805_v22 = vmul.f32 %v6936_v40, %v1572_v5  ;;  %v2134_v43 = vand.u32 2147483648, %v6997_v31 }
 0x1da   : > { %v1525_v17 = vpop.permute.xlu0 %1524  ;;  %v2948_v50 = vadd.f32 %v2900_v56, %v1889_v44  ;;  %v2101_v26 = vsel %vm7076_vm8, %v7000_v49, %v2097_v8  ;;  %v2111_v34 = vmul.f32 %v7042_v41, %v2110_v57  ;;  %v2120_v15 = vor.u32 1.1754944e-38, %v2119_v48  ;;  %v9908_v56 = vld [vmem:[#allocation74_spill] sm:$0xff]  ;;  %v9921_v8 = vld [vmem:[#allocation48_spill] sm:$0xff] }
 0x1db   : > { %v1556_v51 = vsel %vm673_vm12, %v1493_v33, %v1525_v17  ;;  %3468 = vmatpush.msrb.mxu3 %v6723_v62  ;;  %1542 = vrot.lane.b32.xlu1 %v6990_v21, %s4160_s18  ;;  %v3426_v40 = vmul.f32 -1.442695, %v7105_v46  ;;  %v1588_v44 = vsel %vm673_vm12, %v1525_v17, %v7006_v61  ;;  %v2106_v62 = vsel %vm7048_vm7, %v2105_v59, %v2101_v26  ;;  %v9967_v21 = vld [vmem:[#allocation91_spill] sm:$0xff] }
 0x1dc   : > { %3060 = vmatmul.f32.vlgmr.msra.gmra.mxu3 %v2948_v50  ;;  %v2124_v48 = vmul.f32 %v7085_v7, %v6997_v31  ;;  %vm2128_vm15 = vweird.f32 %v6997_v31  ;;  %v1806_v33 = vmul.f32 %v6947_v37, %v1556_v51  ;;  %v1853_v61 = vadd.f32 %v1805_v22, %v9908_v56 }
 0x1dd   : > { %v2813_v9 = vmul.f32 %v6809_v27, %v2106_v62  ;;  %v2112_v59 = vadd.f32 %v7042_v41, %v2111_v34  ;;  %3469 = vmatpush.msrb.mxu3 %v6767_v18  ;;  %vm2129_vm13 = vweird.f32 %v7085_v7  ;;  %vm7132_vm0 = vcmp.eq.f32.partialorder %v2132_v16, 8.507059e+37  ;;  %v9915_v62 = vld [vmem:[#allocation102_spill] sm:$0xff] }
 0x1de   : > { %1510 = vrot.lane.b32.xlu2 %v6959_v24, %s4160_s18  ;;  %v2125_v38 = vsub.f32 1.0, %v2124_v48  ;;  %v2135_v0 = vor.u32 1.1754944e-38, %v2134_v43  ;;  %vm2173_vm1 = vweird.f32 %v7066_v13  ;;  %3707 = vpow2.f32 %v3426_v40  ;;  %v7145_v57 = vpop.permute.xlu2 %1488  ;;  %vm7157_vm2 = vmor %vm2128_vm15, %vm2129_vm13  ;;  %v3943_v43 = vld [vmem:[#allocation5 + $0x10] sm:$0xff] }
 0x1df   : > { %v3706_v37 = vpop.eup %3705  ;;  %1480 = vrot.lane.b32.xlu0 %v7038_v60, %s4160_s18  ;;  %v2864_v27 = vmul.f32 %v6938_v42, %v2813_v9  ;;  %v2116_v18 = vsel %vm7117_vm14, %v7042_v41, %v2112_v59  ;;  %3470 = vmatpush.msrb.mxu3 %v6798_v12  ;;  %v1807_v34 = vmul.f32 %v6950_v25, %v1588_v44  ;;  %v7170_v26 = vperm.slane %v3943_v43, 2  ;;  %v9928_v43 = vld [vmem:[#allocation50_spill] sm:$0xff] }
 0x1e0   : > { %9911 = vst [vmem:[#allocation55_spill] sm:$0xff] %v7145_v57  ;;  %v2121_v5 = vsel %vm7080_vm11, %v2120_v15, %v2116_v18  ;;  %v2126_v17 = vmul.f32 %v7085_v7, %v2125_v38  ;;  %v2169_v16 = vmul.f32 %v3706_v37, %v7066_v13  ;;  %v1854_v41 = vadd.f32 %v1806_v33, %v6727_v45  ;;  %v9920_v38 = vld [vmem:[#allocation106_spill] sm:$0xff]  ;;  %v9922_v18 = vld [vmem:[#allocation113_spill] sm:$0xff] }
 0x1e1   : > { %v2912_v22 = vadd.f32 %v2864_v27, %v1853_v61  ;;  %v2814_v50 = vmul.f32 %v6863_v32, %v2121_v5  ;;  %v2179_v15 = vand.u32 2147483648, %v7066_v13  ;;  %3471 = vmatpush.msrb.mxu3 %v6825_v19  ;;  %vm2174_vm3 = vweird.f32 %v3706_v37  ;;  %v7175_v19 = vld [vmem:[%s4289_s28 + $0x20] sm:$0xff]  ;;  %v7209_v27 = vld [vmem:[%s4289_s28 + $0x18] sm:$0xff]  ;;  %v9923_v5 = vld [vmem:[#allocation24_spill] sm:$0xff] }
 0x1e2   : > { %v2127_v25 = vadd.f32 %v7085_v7, %v2126_v17  ;;  %v2170_v47 = vsub.f32 1.0, %v2169_v16  ;;  %v2177_v45 = vand.u32 2147483647, %v7066_v13  ;;  %v9914_v32 = vsub.f32 %v9872_v29, %v6874_v53  ;;  %vm7192_vm4 = vmor %vm2173_vm1, %vm2174_vm3 }
 0x1e3   : > { %3024 = vmatmul.f32.vlgmr.msra.gmra.mxu0 %v2912_v22  ;;  %v2865_v31 = vmul.f32 %v6961_v54, %v2814_v50  ;;  %1544 = vrot.lane.b32.xlu1 %v7064_v3, %s4160_s18  ;;  %v3391_v40 = vmul.f32 -1.442695, %v7175_v19  ;;  %v1855_v44 = vadd.f32 %v1807_v34, %v6730_v11  ;;  %v7184_v49 = vadd.f32 %v7028_v30, %v9915_v62  ;;  %v9919_v30 = vld [vmem:[#allocation57_spill] sm:$0xff]  ;;  %v7231_v62 = vpop.permute.xlu0 %1486  ;;  %v9931_v11 = vld [vmem:[#allocation114_spill] sm:$0xff] }
 0x1e4   : > { %v1762_v51 = vmul.f32 %v6876_v6, %v9914_v32  ;;  %v2131_v29 = vsel %vm7157_vm2, %v7085_v7, %v2127_v25  ;;  %v2171_v48 = vmul.f32 %v3706_v37, %v2170_v47  ;;  %3472 = vmatpush.msrb.mxu3 %v6860_v28  ;;  %v3708_v33 = vpop.eup %3707  ;;  %v2180_v7 = vor.u32 1.1754944e-38, %v2179_v15  ;;  %v9925_v15 = vld [vmem:[#allocation42_spill] sm:$0xff]  ;;  %v9926_v47 = vld [vmem:[#allocation112_spill] sm:$0xff]  ;;  %v9927_v32 = vld [vmem:[#allocation37_spill] sm:$0xff] }
 0x1e5   : > { %9916 = vst [vmem:[#allocation104_spill] sm:$0xff] %v7184_v49  ;;  %v2913_v56 = vadd.f32 %v2865_v31, %v1854_v41  ;;  %v2136_v61 = vsel %vm7132_vm0, %v2135_v0, %v2131_v29  ;;  %3709 = vpow2.f32 %v3391_v40  ;;  %vm2178_vm5 = vcmp.eq.f32.partialorder %v2177_v45, 8.507059e+37  ;;  %v9924_v41 = vld [vmem:[#allocation93_spill] sm:$0xff] }
 0x1e6   : > { %3473 = vmatpush.msra.mxu3 %v9919_v30  ;;  %v2815_v9 = vmul.f32 %v6906_v55, %v2136_v61  ;;  %1512 = vrot.lane.b32.xlu2 %v7184_v49, %s4160_s18  ;;  %v2172_v28 = vadd.f32 %v3706_v37, %v2171_v48  ;;  %v7200_v59 = vadd.f32 1.0, %v3708_v33  ;;  %v1589_v13 = vsel %vm673_vm12, %v7068_v1, %v6971_v10  ;;  %v7216_v16 = vpop.permute.xlu2 %1496  ;;  %v9929_v33 = vld [vmem:[#allocation15_spill] sm:$0xff]  ;;  %v9951_v3 = vld [vmem:[#allocation65_spill] sm:$0xff] }
 0x1e7   : > { %3089 = vmatmul.f32.vlgmr.msra.gmra.mxu1 %v2913_v56  ;;  %v1611_v0 = vmul.f32 %v9921_v8, %v9920_v38  ;;  %v3390_v55 = vmul.f32 -1.442695, %v7209_v27  ;;  %v1647_v34 = vmul.f32 %v9921_v8, %v9922_v18  ;;  %v1613_v50 = vmul.f32 %v6550_v52, %v9924_v41  ;;  %v9930_v56 = vld [vmem:[#allocation115_spill] sm:$0xff]  ;;  %v9938_v41 = vld [vmem:[#allocation28_spill] sm:$0xff] }
 0x1e8   : > { %3474 = vmatpush.msra.mxu3 %v9923_v5  ;;  %v2866_v17 = vmul.f32 %v7170_v26, %v2815_v9  ;;  %v2176_v22 = vsel %vm7192_vm4, %v3706_v37, %v2172_v28  ;;  %3711 = vrcp.f32 %v7200_v59  ;;  %v1649_v25 = vmul.f32 %v6550_v52, %v9925_v15  ;;  %v9932_v9 = vld [vmem:[#allocation125_spill] sm:$0xff]  ;;  %v9936_v5 = vld [vmem:[#allocation127_spill] sm:$0xff] }
 0x1e9   : > { %v2181_v12 = vsel %vm2178_vm5, %v2180_v7, %v2176_v22  ;;  %v1614_v45 = vmul.f32 %v9921_v8, %v9926_v47  ;;  %v1615_v31 = vmul.f32 %v6456_v58, %v9927_v32  ;;  %v1810_v40 = vmul.f32 %v1762_v51, %v1589_v13  ;;  %v9935_v13 = vld [vmem:[#allocation111_spill] sm:$0xff]  ;;  %v7272_v32 = vpop.permute.xlu1 %1518 }
 0x1ea   : > { %3475 = vmatpush.msra.mxu3 %v9928_v43  ;;  %v2914_v37 = vadd.f32 %v2866_v17, %v1855_v44  ;;  %v2818_v29 = vmul.f32 %v6978_v14, %v2181_v12  ;;  %3713 = vpow2.f32 %v3390_v55  ;;  %v7235_v61 = vmul.f32 %v9930_v56, %v9929_v33  ;;  %v9933_v44 = vld [vmem:[#allocation71_spill] sm:$0xff]  ;;  %v9934_v14 = vld [vmem:[#allocation126_spill] sm:$0xff] }
 0x1eb   : > { %v3710_v48 = vpop.eup %3709  ;;  %v1660_v7 = vmul.f32 %v6814_v4, %v9931_v11  ;;  %v1745_v30 = vsub.f32 %v7105_v46, %v6779_v36  ;;  %v7243_v51 = vmul.f32 %v6784_v2, %v9932_v9  ;;  %v7248_v28 = vmul.f32 %v6831_v39, %v9934_v14  ;;  %v7256_v4 = vld [vmem:[%s4289_s28 + $0x150] sm:$0xff]  ;;  %v9937_v2 = vld [vmem:[#allocation30_spill] sm:$0xff]  ;;  %v9939_v39 = vld [vmem:[#allocation83_spill] sm:$0xff] }
 0x1ec   : > { %3476 = vmatpush.msra.mxu3 %v9933_v44  ;;  %3154 = vmatmul.f32.vlgmr.msra.gmra.mxu2 %v2914_v37  ;;  %v7251_v38 = vmul.f32 %v1611_v0, %v9935_v13  ;;  %v7253_v55 = vadd.f32 1.0, %v3710_v48  ;;  %v3429_v18 = vmul.f32 -1.442695, %v7256_v4  ;;  %v7260_v17 = vmul.f32 %v1649_v25, %v9936_v5  ;;  %v9940_v0 = vld [vmem:[#allocation26_spill] sm:$0xff]  ;;  %v9942_v33 = vld [vmem:[#allocation95_spill] sm:$0xff] }
 0x1ed   : > { %v7263_v22 = vmul.f32 %v1614_v45, %v9937_v2  ;;  %v7266_v12 = vmul.f32 %v1613_v50, %v9938_v41  ;;  %v7269_v15 = vmul.f32 %v1647_v34, %v9939_v39  ;;  %v1858_v43 = vadd.f32 %v1810_v40, %v1660_v7  ;;  %v9941_v25 = vld [vmem:[#allocation110_spill] sm:$0xff]  ;;  %v9944_v14 = vld [vmem:[#allocation19_spill] sm:$0xff]  ;;  %v9946_v41 = vld [vmem:[#allocation13_spill] sm:$0xff] }
 0x1ee   : > { %3477 = vmatpush.msra.mxu3 %v9940_v0  ;;  %v3712_v47 = vpop.eup %3711  ;;  %v2869_v37 = vmul.f32 %v7170_v26, %v2818_v29  ;;  %3715 = vrcp.f32 %v7253_v55  ;;  %v7277_v45 = vmul.f32 %v1615_v31, %v9941_v25  ;;  %v1796_v50 = vmul.f32 %v6822_v35, %v1745_v30  ;;  %v7284_v11 = vpop.permute.xlu2 %1522  ;;  %v7291_v29 = vld [vmem:[%s4289_s28 + $0x38] sm:$0xff]  ;;  %v9945_v5 = vld [vmem:[#allocation43_spill] sm:$0xff] }
 0x1ef   : > { %v2679_v48 = vmul.f32 %v3712_v47, %v7200_v59  ;;  %v1709_v34 = vsub.f32 %v7209_v27, %v6779_v36  ;;  %3717 = vpow2.f32 %v3429_v18  ;;  %9943 = vst [vmem:[#allocation64_spill] sm:$0xff] %v7284_v11  ;;  %vm2683_vm6 = vweird.f32 %v7200_v59 }
 0x1f0   : > { %3478 = vmatpush.msra.mxu3 %v9942_v33  ;;  %v3714_v56 = vpop.eup %3713  ;;  %v2689_v40 = vand.u32 2147483648, %v7200_v59  ;;  %v1710_v31 = vsub.f32 %v7175_v19, %v6857_v63  ;;  %v3394_v7 = vmul.f32 -1.442695, %v7291_v29  ;;  %vm2684_vm7 = vweird.f32 %v3712_v47 }
 0x1f1   : > { %v2680_v30 = vsub.f32 1.0, %v2679_v48  ;;  %v2687_v9 = vand.u32 2147483647, %v7200_v59  ;;  %v7295_v44 = vadd.f32 1.0, %v3714_v56  ;;  %v2917_v13 = vadd.f32 %v2869_v37, %v1858_v43  ;;  %v9947_v48 = vld [vmem:[#allocation82_spill] sm:$0xff]  ;;  %v9948_v37 = vld [vmem:[#allocation101_spill] sm:$0xff]  ;;  %vm7320_vm9 = vmor %vm2683_vm6, %vm2684_vm7 }
 0x1f2   : > { %3479 = vmatpush.msra.mxu3 %v9944_v14  ;;  %v1585_v18 = vsel %vm673_vm12, %v7231_v62, %v7272_v32  ;;  %v7304_v2 = vmul.f32 %v6456_v58, %v9945_v5  ;;  %v7308_v39 = vmul.f32 %v9921_v8, %v9946_v41  ;;  %v1760_v25 = vmul.f32 %v6822_v35, %v1709_v34  ;;  %v1495_v14 = vpop.permute.xlu0 %1494 }
 0x1f3   : > { %v2681_v0 = vmul.f32 %v3712_v47, %v2680_v30  ;;  %3719 = vrcp.f32 %v7295_v44  ;;  %v7314_v43 = vmul.f32 %v6550_v52, %v9947_v48  ;;  %v2690_v30 = vor.u32 1.1754944e-38, %v2689_v40 }
 0x1f4   : > { %3480 = vmatpush.msra.mxu3 %v9948_v37  ;;  %v3716_v33 = vpop.eup %3715  ;;  %3157 = vmatmul.f32.gmra.mxu2 %v2917_v13  ;;  %v1761_v34 = vmul.f32 %v6910_v20, %v1710_v31  ;;  %v1748_v5 = vsub.f32 %v7256_v4, %v6779_v36  ;;  %3721 = vpow2.f32 %v3394_v7  ;;  %v1844_v48 = vmul.f32 %v1796_v50, %v1585_v18 }
 0x1f5   : > { %v3718_v41 = vpop.eup %3717  ;;  %v2682_v37 = vadd.f32 %v3712_v47, %v2681_v0  ;;  %vm2688_vm8 = vcmp.eq.f32.partialorder %v2687_v9, 8.507059e+37  ;;  %v2154_v13 = vmul.f32 %v3716_v33, %v7253_v55  ;;  %vm2158_vm11 = vweird.f32 %v7253_v55  ;;  %v9952_v9 = vld [vmem:[#allocation77_spill] sm:$0xff]  ;;  %v7374_v0 = vld [vmem:[%s4289_s28 + $0x40] sm:$0xff] }
 0x1f6   : > { %3481 = vmatpush.msra.mxu3 %v9951_v3  ;;  %v2162_v59 = vand.u32 2147483647, %v7253_v55  ;;  %v2164_v40 = vand.u32 2147483648, %v7253_v55  ;;  %v7332_v31 = vadd.f32 1.0, %v3718_v41  ;;  %v1557_v50 = vsel %vm673_vm12, %v1495_v14, %v7068_v1  ;;  %v7340_v3 = vpop.permute.xlu1 %1464  ;;  %v7344_v60 = vpop.permute.xlu2 %1468 }
 0x1f7   : > { %v2686_v49 = vsel %vm7320_vm9, %v3712_v47, %v2682_v37  ;;  %v2155_v7 = vsub.f32 1.0, %v2154_v13  ;;  %vm2159_vm10 = vweird.f32 %v3716_v33  ;;  %v7347_v41 = vmul.f32 %v6822_v35, %v1748_v5 }
 0x1f8   : > { %3482 = vmatpush.msra.mxu3 %v9952_v9  ;;  %v2691_v18 = vsel %vm2688_vm8, %v2690_v30, %v2686_v49  ;;  %3723 = vrcp.f32 %v7332_v31  ;;  %v1892_v1 = vadd.f32 %v1844_v48, %v7248_v28  ;;  %v1573_v37 = vsel %vm673_vm12, %v6971_v10, %v1495_v14  ;;  %v9953_v30 = vld [vmem:[#allocation88_spill] sm:$0xff]  ;;  %vm7359_vm14 = vmor %vm2158_vm11, %vm2159_vm10 }
 0x1f9   : > { %v3720_v47 = vpop.eup %3719  ;;  %v2852_v56 = vmul.f32 %v7105_v46, %v2691_v18  ;;  %v2156_v49 = vmul.f32 %v3716_v33, %v2155_v7  ;;  %v1809_v9 = vmul.f32 %v1761_v34, %v1557_v50  ;;  %v2165_v28 = vor.u32 1.1754944e-38, %v2164_v40  ;;  %v9956_v34 = vld [vmem:[#allocation105_spill] sm:$0xff] }
 0x1fa   : > { %3483 = vmatpush.msra.mxu3 %v9953_v30  ;;  %v3722_v13 = vpop.eup %3721  ;;  %v2139_v46 = vmul.f32 %v3720_v47, %v7295_v44  ;;  %v2147_v48 = vand.u32 2147483647, %v7295_v44  ;;  %vm2163_vm15 = vcmp.eq.f32.partialorder %v2162_v59, 8.507059e+37  ;;  %v2149_v7 = vand.u32 2147483648, %v7295_v44  ;;  %v9957_v59 = vld [vmem:[#allocation62_spill] sm:$0xff] }
 0x1fb   : > { %v2903_v10 = vmul.f32 %v6938_v42, %v2852_v56  ;;  %v2157_v14 = vadd.f32 %v3716_v33, %v2156_v49  ;;  %v1808_v50 = vmul.f32 %v1760_v25, %v1573_v37  ;;  %vm2143_vm13 = vweird.f32 %v7295_v44 }
 0x1fc   : > { %3484 = vmatpush.msra.mxu3 %v9956_v34  ;;  %v2140_v55 = vsub.f32 1.0, %v2139_v46  ;;  %vm2144_vm0 = vweird.f32 %v3720_v47  ;;  %v7371_v30 = vadd.f32 1.0, %v3722_v13  ;;  %v3395_v56 = vmul.f32 -1.442695, %v7374_v0 }
 0x1fd   : > { %v2951_v18 = vadd.f32 %v2903_v10, %v1892_v1  ;;  %v2161_v40 = vsel %vm7359_vm14, %v3716_v33, %v2157_v14  ;;  %v1857_v34 = vadd.f32 %v1809_v9, %v7251_v38  ;;  %vm7379_vm1 = vcmp.eq.f32.partialorder %v2147_v48, 8.507059e+37  ;;  %v7384_v1 = vpop.permute.xlu0 %1520  ;;  %vm7389_vm2 = vmor %vm2143_vm13, %vm2144_vm0  ;;  %v9963_v10 = vld [vmem:[#allocation123_spill] sm:$0xff] }
 0x1fe   : > { %3485 = vmatpush.msra.mxu3 %v9957_v59  ;;  %v3724_v49 = vpop.eup %3723  ;;  %v2166_v25 = vsel %vm2163_vm15, %v2165_v28, %v2161_v40  ;;  %v2141_v37 = vmul.f32 %v3720_v47, %v2140_v55  ;;  %9960 = vst [vmem:[#allocation27_spill] sm:$0xff] %v7384_v1  ;;  %v2150_v5 = vor.u32 1.1754944e-38, %v2149_v7  ;;  %3725 = vrcp.f32 %v7371_v30  ;;  %v7395_v28 = vpop.permute.xlu2 %1500  ;;  %v9964_v40 = vld [vmem:[#allocation33_spill] sm:$0xff] }
 0x1ff   : > { %3063 = vmatmul.f32.gmra.mxu3 %v2951_v18  ;;  %v2817_v33 = vmul.f32 %v7175_v19, %v2166_v25  ;;  %v2724_v38 = vmul.f32 %v3724_v49, %v7332_v31  ;;  %vm2728_vm3 = vweird.f32 %v7332_v31  ;;  %v2732_v19 = vand.u32 2147483647, %v7332_v31  ;;  %v7402_v7 = vpop.permute.xlu1 %1528  ;;  %v9965_v25 = vld [vmem:[#allocation39_spill] sm:$0xff] }
 0x200   : > { %v2142_v9 = vadd.f32 %v3720_v47, %v2141_v37  ;;  %v2734_v48 = vand.u32 2147483648, %v7332_v31  ;;  %3486 = vmatpush.msra.mxu3 %v9963_v10  ;;  %vm2729_vm4 = vweird.f32 %v3724_v49  ;;  %3727 = vpow2.f32 %v3395_v56 }
 0x201   : > { %v2868_v44 = vmul.f32 %v6961_v54, %v2817_v33  ;;  %v2725_v14 = vsub.f32 1.0, %v2724_v38  ;;  %v1586_v55 = vsel %vm673_vm12, %v7145_v57, %v7384_v1  ;;  %v7412_v59 = vmul.f32 %v7304_v2, %v9964_v40  ;;  %v9966_v33 = vld [vmem:[#allocation129_spill] sm:$0xff]  ;;  %vm7429_vm5 = vmor %vm2728_vm3, %vm2729_vm4  ;;  %v9991_v57 = vld [vmem:[#allocation103_spill] sm:$0xff] }
 0x202   : > { %v2146_v18 = vsel %vm7389_vm2, %v3720_v47, %v2142_v9  ;;  %v7416_v37 = vmul.f32 %v7308_v39, %v9965_v25  ;;  %3487 = vmatpush.msra.mxu3 %v9966_v33  ;;  %v7423_v24 = vmul.f32 %v7314_v43, %v9967_v21  ;;  %v1856_v47 = vadd.f32 %v1808_v50, %v7243_v51 }
 0x203   : > { %v2916_v56 = vadd.f32 %v2868_v44, %v1857_v34  ;;  %v2151_v38 = vsel %vm7379_vm1, %v2150_v5, %v2146_v18  ;;  %v2726_v10 = vmul.f32 %v3724_v49, %v2725_v14  ;;  %v2735_v13 = vor.u32 1.1754944e-38, %v2734_v48  ;;  %v7434_v34 = vld [vmem:[%s4289_s28 + $0x30] sm:$0xff]  ;;  %v9970_v5 = vld [vmem:[#allocation133_spill] sm:$0xff] }
 0x204   : > { %v2816_v2 = vmul.f32 %v7209_v27, %v2151_v38  ;;  %v3393_v46 = vmul.f32 -1.442695, %v7434_v34  ;;  %3488 = vmatpush.msra.mxu3 %v9970_v5  ;;  %v3726_v9 = vpop.eup %3725  ;;  %v9971_v21 = vsub.f32 %v7291_v29, %v6857_v63  ;;  %v1847_v27 = vmul.f32 %v7347_v41, %v1586_v55  ;;  %v9972_v38 = vld [vmem:[#allocation86_spill] sm:$0xff]  ;;  %v9976_v5 = vld [vmem:[#allocation56_spill] sm:$0xff] }
 0x205   : > { %3092 = vmatmul.f32.gmra.mxu1 %v2916_v56  ;;  %v2727_v43 = vadd.f32 %v3724_v49, %v2726_v10  ;;  %vm2733_vm6 = vcmp.eq.f32.partialorder %v2732_v19, 8.507059e+37  ;;  %v2199_v50 = vmul.f32 %v3726_v9, %v7371_v30  ;;  %vm2203_vm7 = vweird.f32 %v7371_v30  ;;  %v9973_v10 = vld [vmem:[#allocation119_spill] sm:$0xff] }
 0x206   : > { %v1764_v51 = vmul.f32 %v6910_v20, %v9971_v21  ;;  %v2867_v31 = vmul.f32 %v6938_v42, %v2816_v2  ;;  %3729 = vpow2.f32 %v3393_v46  ;;  %v3728_v48 = vpop.eup %3727  ;;  %vm2204_vm9 = vweird.f32 %v3726_v9  ;;  %v9977_v21 = vld [vmem:[#allocation60_spill] sm:$0xff] }
 0x207   : > { %v2731_v44 = vsel %vm7429_vm5, %v3724_v49, %v2727_v43  ;;  %v2207_v14 = vand.u32 2147483647, %v7371_v30  ;;  %v2209_v18 = vand.u32 2147483648, %v7371_v30  ;;  %v2200_v55 = vsub.f32 1.0, %v2199_v50  ;;  %v7458_v49 = vpop.permute.xlu2 %1550  ;;  %v7463_v39 = vpop.permute.xlu1 %1490  ;;  %vm7477_vm8 = vmor %vm2203_vm7, %vm2204_vm9  ;;  %v9980_v30 = vld [vmem:[#allocation16_spill] sm:$0xff] }
 0x208   : > { %v2915_v40 = vadd.f32 %v2867_v31, %v1856_v47  ;;  %v2736_v41 = vsel %vm2733_vm6, %v2735_v13, %v2731_v44  ;;  %v7450_v19 = vadd.f32 1.0, %v3728_v48  ;;  %v1558_v25 = vsel %vm673_vm12, %v7216_v16, %v7402_v7  ;;  %9974 = vst [vmem:[#allocation70_spill] sm:$0xff] %v7463_v39  ;;  %v9975_v13 = vld [vmem:[#allocation44_spill] sm:$0xff]  ;;  %v7508_v31 = vld [vmem:[%s4289_s28 + $0x60] sm:$0xff] }
 0x209   : > { %v1895_v33 = vadd.f32 %v1847_v27, %v7260_v17  ;;  %v2855_v56 = vmul.f32 %v7256_v4, %v2736_v41  ;;  %v1201_v2 = vmul.f32 %v9973_v10, %v9972_v38  ;;  %v2201_v47 = vmul.f32 %v3726_v9, %v2200_v55 }
 0x20a   : > { %3027 = vmatmul.f32.gmra.mxu0 %v2915_v40  ;;  %3731 = vrcp.f32 %v7450_v19  ;;  %v1652_v46 = vmul.f32 %v6550_v52, %v9975_v13  ;;  %v1199_v43 = vmul.f32 %v9977_v21, %v9976_v5  ;;  %v1712_v4 = vsub.f32 %v7434_v34, %v6779_v36  ;;  %v9981_v13 = vld [vmem:[#allocation40_spill] sm:$0xff] }
 0x20b   : > { %v1714_v17 = vsub.f32 %v7374_v0, %v6874_v53  ;;  %v2906_v27 = vmul.f32 %v6938_v42, %v2855_v56  ;;  %v2210_v50 = vor.u32 1.1754944e-38, %v2209_v18  ;;  %v1812_v44 = vmul.f32 %v1764_v51, %v1558_v25 }
 0x20c   : > { %v3730_v48 = vpop.eup %3729  ;;  %v2202_v40 = vadd.f32 %v3726_v9, %v2201_v47  ;;  %vm2208_vm11 = vcmp.eq.f32.partialorder %v2207_v14, 8.507059e+37  ;;  %v7485_v41 = vsel %vm673_vm12, %v7458_v49, %v7231_v62  ;;  %v1621_v10 = vmul.f32 %v6456_v58, %v9980_v30  ;;  %v9982_v14 = vld [vmem:[#allocation66_spill] sm:$0xff]  ;;  %v9983_v47 = vld [vmem:[#allocation75_spill] sm:$0xff]  ;;  %v9984_v62 = vld [vmem:[#allocation89_spill] sm:$0xff] }
 0x20d   : > { %v2954_v55 = vadd.f32 %v2906_v27, %v1895_v33  ;;  %v7487_v56 = vadd.f32 1.0, %v3730_v48  ;;  %v1620_v18 = vmul.f32 %v9921_v8, %v9981_v13  ;;  %v7496_v25 = vmul.f32 %v1652_v46, %v9982_v14  ;;  %v9989_v14 = vld [vmem:[#allocation117_spill] sm:$0xff] }
 0x20e   : > { %v2206_v51 = vsel %vm7477_vm8, %v3726_v9, %v2202_v40  ;;  %v7499_v21 = vmul.f32 %v1201_v2, %v9983_v47  ;;  %v7502_v38 = vmul.f32 %v1199_v43, %v9984_v62  ;;  %v1763_v33 = vmul.f32 %v6822_v35, %v1712_v4  ;;  %v9985_v43 = vld [vmem:[#allocation87_spill] sm:$0xff] }
 0x20f   : > { %v1765_v27 = vmul.f32 %v6876_v6, %v1714_v17  ;;  %3066 = vmatmul.f32.gmra.mxu3 %v2954_v55  ;;  %v2211_v48 = vsel %vm2208_vm11, %v2210_v50, %v2206_v51  ;;  %3733 = vrcp.f32 %v7487_v56  ;;  %v1718_v9 = vsub.f32 %v7508_v31, %v6779_v36  ;;  %v9986_v17 = vld [vmem:[#allocation23_spill] sm:$0xff]  ;;  %v9987_v55 = vld [vmem:[#allocation72_spill] sm:$0xff] }
 0x210   : > { %v3732_v30 = vpop.eup %3731  ;;  %v1860_v2 = vadd.f32 %v1812_v44, %v7263_v22  ;;  %v2820_v46 = vmul.f32 %v7291_v29, %v2211_v48  ;;  %v1619_v40 = vmul.f32 %v6550_v52, %v9985_v43  ;;  %v7518_v50 = vmul.f32 %v1621_v10, %v9986_v17  ;;  %v9988_v51 = vld [vmem:[#allocation12_spill] sm:$0xff]  ;;  %v7537_v48 = vpop.permute.xlu0 %1466 }
 0x211   : > { %v2214_v4 = vmul.f32 %v3732_v30, %v7450_v19  ;;  %v7521_v13 = vmul.f32 %v1620_v18, %v9987_v55  ;;  %v1200_v47 = vmul.f32 %v9989_v14, %v9988_v51  ;;  %v1574_v22 = vsel %vm673_vm12, %v7340_v3, %v7216_v16  ;;  %v7540_v17 = vpop.permute.xlu1 %1498  ;;  %v7543_v55 = vld [vmem:[%s4289_s28 + $0x168] sm:$0xff] }
 0x212   : > { %v1590_v29 = vsel %vm673_vm12, %v7402_v7, %v7340_v3  ;;  %v2871_v44 = vmul.f32 %v6961_v54, %v2820_v46  ;;  %v2224_v10 = vand.u32 2147483648, %v7450_v19  ;;  %vm2218_vm10 = vweird.f32 %v7450_v19  ;;  %v9990_v7 = vld [vmem:[#allocation21_spill] sm:$0xff] }
 0x213   : > { %v2215_v62 = vsub.f32 1.0, %v2214_v4  ;;  %vm2219_vm14 = vweird.f32 %v3732_v30  ;;  %v2222_v18 = vand.u32 2147483647, %v7450_v19  ;;  %v1769_v43 = vmul.f32 %v6822_v35, %v1718_v9 }
 0x214   : > { %v2919_v16 = vadd.f32 %v2871_v44, %v1860_v2  ;;  %v3432_v3 = vmul.f32 -1.442695, %v7543_v55  ;;  %v7547_v46 = vmul.f32 %v1619_v40, %v9990_v7  ;;  %v1811_v14 = vmul.f32 %v1763_v33, %v1574_v22  ;;  %vm7559_vm15 = vmor %vm2218_vm10, %vm2219_vm14 }
 0x215   : > { %v3734_v4 = vpop.eup %3733  ;;  %v1813_v5 = vmul.f32 %v1765_v27, %v1590_v29  ;;  %v2216_v51 = vmul.f32 %v3732_v30, %v2215_v62  ;;  %v7550_v1 = vmul.f32 %v1200_v47, %v9991_v57  ;;  %v1576_v9 = vsel %vm673_vm12, %v7344_v60, %v7395_v28  ;;  %v7566_v47 = vld [vmem:[%s4289_s28 + $0x58] sm:$0xff] }
 0x216   : > { %3095 = vmatmul.f32.gmra.mxu1 %v2919_v16  ;;  %v2225_v40 = vor.u32 1.1754944e-38, %v2224_v10  ;;  %v2184_v33 = vmul.f32 %v3734_v4, %v7487_v56  ;;  %3735 = vpow2.f32 %v3432_v3  ;;  %vm2223_vm13 = vcmp.eq.f32.partialorder %v2222_v18, 8.507059e+37  ;;  %v7579_v3 = vld [vmem:[%s4289_s28 + $0x140] sm:$0xff] }
 0x217   : > { %v2217_v27 = vadd.f32 %v3732_v30, %v2216_v51  ;;  %v2194_v57 = vand.u32 2147483648, %v7487_v56  ;;  %v3398_v22 = vmul.f32 -1.442695, %v7566_v47  ;;  %vm2188_vm0 = vweird.f32 %v7487_v56 }
 0x218   : > { %v2185_v29 = vsub.f32 1.0, %v2184_v33  ;;  %vm2189_vm1 = vweird.f32 %v3734_v4  ;;  %v2192_v19 = vand.u32 2147483647, %v7487_v56  ;;  %v1861_v44 = vadd.f32 %v1813_v5, %v7277_v45  ;;  %v7596_v33 = vld [vmem:[%s4289_s28 + $0x48] sm:$0xff] }
 0x219   : > { %v2221_v10 = vsel %vm7559_vm15, %v3732_v30, %v2217_v27  ;;  %v1751_v51 = vsub.f32 %v7543_v55, %v6779_v36  ;;  %3737 = vpow2.f32 %v3398_v22  ;;  %v7576_v62 = vmul.f32 %v1769_v43, %v1576_v9  ;;  %vm7585_vm2 = vmor %vm2188_vm0, %vm2189_vm1 }
 0x21a   : > { %v2226_v18 = vsel %vm2223_vm13, %v2225_v40, %v2221_v10  ;;  %v2186_v16 = vmul.f32 %v3734_v4, %v2185_v29  ;;  %v1746_v56 = vsub.f32 %v7579_v3, %v6857_v63  ;;  %v1859_v5 = vadd.f32 %v1811_v14, %v7266_v12  ;;  %v1531_v29 = vpop.permute.xlu0 %1530  ;;  %v9999_v40 = vld [vmem:[#allocation85_spill] sm:$0xff] }
 0x21b   : > { %v2821_v45 = vmul.f32 %v7374_v0, %v2226_v18  ;;  %v2195_v7 = vor.u32 1.1754944e-38, %v2194_v57  ;;  %v1717_v43 = vsub.f32 %v7566_v47, %v6874_v53  ;;  %vm7591_vm3 = vcmp.eq.f32.partialorder %v2192_v19, 8.507059e+37  ;;  %v7601_v0 = vld [vmem:[%s4289_s28 + $0x130] sm:$0xff] }
 0x21c   : > { %v3736_v9 = vpop.eup %3735  ;;  %v2187_v2 = vadd.f32 %v3734_v4, %v2186_v16  ;;  %v1715_v12 = vsub.f32 %v7596_v33, %v6779_v36  ;;  %9998 = vst [vmem:[#allocation121_spill] sm:$0xff] %v7601_v0  ;;  %v1744_v14 = vsub.f32 %v7601_v0, %v6874_v53  ;;  %v1802_v57 = vmul.f32 %v6822_v35, %v1751_v51  ;;  %v1549_v36 = vpop.permute.xlu1 %1548 }
 0x21d   : > { %v2872_v27 = vmul.f32 %v7170_v26, %v2821_v45  ;;  %v1587_v22 = vsel %vm673_vm12, %v7463_v39, %v7284_v11  ;;  %v7611_v19 = vadd.f32 1.0, %v3736_v9  ;;  %v1797_v18 = vmul.f32 %v6910_v20, %v1746_v56  ;;  %v7621_v45 = vld [vmem:[%s4289_s28 + $0x50] sm:$0xff] }
 0x21e   : > { %v2191_v10 = vsel %vm7585_vm2, %v3734_v4, %v2187_v2  ;;  %v1569_v16 = vsel %vm673_vm12, %v7272_v32, %v7458_v49  ;;  %v1716_v51 = vsub.f32 %v7621_v45, %v6857_v63  ;;  %v1795_v4 = vmul.f32 %v6876_v6, %v1744_v14 }
 0x21f   : > { %v3738_v39 = vpop.eup %3737  ;;  %v2920_v9 = vadd.f32 %v2872_v27, %v1861_v44  ;;  %v2196_v30 = vsel %vm7591_vm3, %v2195_v7, %v2191_v10  ;;  %3739 = vrcp.f32 %v7611_v19  ;;  %v1768_v32 = vmul.f32 %v6876_v6, %v1717_v43 }
 0x220   : > { %v2819_v56 = vmul.f32 %v7434_v34, %v2196_v30  ;;  %v1766_v49 = vmul.f32 %v6822_v35, %v1715_v12  ;;  %v7632_v2 = vadd.f32 1.0, %v3738_v39  ;;  %v1591_v44 = vsel %vm673_vm12, %v1531_v29, %v7537_v48  ;;  %v7647_v12 = vld [vmem:[%s4289_s28 + $0x148] sm:$0xff] }
 0x221   : > { %3160 = vmatmul.f32.gmra.mxu2 %v2920_v9  ;;  %v1575_v7 = vsel %vm673_vm12, %v7537_v48, %v7540_v17  ;;  %v1600_v34 = vsel %vm673_vm12, %v1549_v36, %v9999_v40  ;;  %v3397_v43 = vmul.f32 -1.442695, %v7621_v45  ;;  %v1767_v27 = vmul.f32 %v6910_v20, %v1716_v51  ;;  %v7664_v35 = vld [vmem:[%s4289_s28 + $0x128] sm:$0xff] }
 0x222   : > { %v2870_v39 = vmul.f32 %v6938_v42, %v2819_v56  ;;  %3741 = vrcp.f32 %v7632_v2  ;;  %v7653_v10 = vmul.f32 %v1802_v57, %v1587_v22  ;;  %v7655_v48 = vmul.f32 %v1797_v18, %v1569_v16 }
 0x223   : > { %v1559_v9 = vsel %vm673_vm12, %v7540_v17, %v1531_v29  ;;  %v1843_v30 = vmul.f32 %v1795_v4, %v1600_v34  ;;  %v1816_v40 = vmul.f32 %v1768_v32, %v1591_v44  ;;  %v7660_v11 = vmul.f32 %v1766_v49, %v1575_v7  ;;  %v7674_v29 = vld [vmem:[%s4289_s28 + $0x68] sm:$0xff]  ;;  %v7679_v4 = vld [vmem:[%s4289_s28 + $0x70] sm:$0xff]  ;;  %v1533_v44 = vpop.permute.xlu0 %1532  ;;  %v10001_v7 = vld [vmem:[#allocation130_spill] sm:$0xff] }
 0x224   : > { %v2918_v56 = vadd.f32 %v2870_v39, %v1859_v5  ;;  %3743 = vpow2.f32 %v3397_v43  ;;  %v2779_v51 = vand.u32 2147483648, %v7611_v19  ;;  %v1743_v57 = vsub.f32 %v7664_v35, %v6857_v63 }
 0x225   : > { %v3740_v14 = vpop.eup %3739  ;;  %v3425_v22 = vmul.f32 -1.442695, %v7601_v0  ;;  %v7670_v18 = vadd.f32 %v1843_v30, %v7235_v61  ;;  %v1815_v17 = vmul.f32 %v1767_v27, %v1559_v9  ;;  %v1719_v16 = vsub.f32 %v7674_v29, %v6857_v63 }
 0x226   : > { %3030 = vmatmul.f32.gmra.mxu0 %v2918_v56  ;;  %v2769_v5 = vmul.f32 %v3740_v14, %v7611_v19  ;;  %v3401_v32 = vmul.f32 -1.442695, %v7679_v4  ;;  %vm2773_vm4 = vweird.f32 %v7611_v19  ;;  %v2777_v49 = vand.u32 2147483647, %v7611_v19 }
 0x227   : > { %10000 = vst [vmem:[#allocation74_spill] sm:$0xff] %v7670_v18  ;;  %v1720_v61 = vsub.f32 %v7679_v4, %v6874_v53  ;;  %v1568_v34 = vsel %vm673_vm12, %v10001_v7, %v1549_v36  ;;  %vm2774_vm5 = vweird.f32 %v3740_v14  ;;  %v3396_v27 = vmul.f32 -1.442695, %v7596_v33 }
 0x228   : > { %v3742_v43 = vpop.eup %3741  ;;  %v2770_v39 = vsub.f32 1.0, %v2769_v5  ;;  %3745 = vpow2.f32 %v3401_v32  ;;  %v2780_v9 = vor.u32 1.1754944e-38, %v2779_v51  ;;  %v1794_v56 = vmul.f32 %v6910_v20, %v1743_v57  ;;  %vm7696_vm7 = vmor %vm2773_vm4, %vm2774_vm5 }
 0x229   : > { %v2259_v30 = vmul.f32 %v3742_v43, %v7632_v2  ;;  %3747 = vpow2.f32 %v3425_v22  ;;  %vm2263_vm6 = vweird.f32 %v7632_v2  ;;  %v2269_v0 = vand.u32 2147483648, %v7632_v2 }
 0x22a   : > { %v3744_v18 = vpop.eup %3743  ;;  %v2771_v63 = vmul.f32 %v3740_v14, %v2770_v39  ;;  %3749 = vpow2.f32 %v3396_v27  ;;  %vm2264_vm9 = vweird.f32 %v3742_v43  ;;  %v2267_v51 = vand.u32 2147483647, %v7632_v2 }
 0x22b   : > { %v2260_v5 = vsub.f32 1.0, %v2259_v30  ;;  %v7701_v32 = vadd.f32 1.0, %v3744_v18  ;;  %vm2778_vm8 = vcmp.eq.f32.partialorder %v2777_v49, 8.507059e+37  ;;  %v1770_v22 = vmul.f32 %v6910_v20, %v1719_v16  ;;  %vm7716_vm11 = vmor %vm2263_vm6, %vm2264_vm9 }
 0x22c   : > { %v2772_v57 = vadd.f32 %v3740_v14, %v2771_v63  ;;  %v1560_v7 = vsel %vm673_vm12, %v7395_v28, %v1533_v44  ;;  %v1771_v19 = vmul.f32 %v6876_v6, %v1720_v61  ;;  %v1592_v27 = vsel %vm673_vm12, %v1533_v44, %v7344_v60 }
 0x22d   : > { %v2261_v39 = vmul.f32 %v3742_v43, %v2260_v5  ;;  %3751 = vrcp.f32 %v7701_v32  ;;  %v2270_v28 = vor.u32 1.1754944e-38, %v2269_v0  ;;  %v1842_v16 = vmul.f32 %v1794_v56, %v1568_v34  ;;  %v7735_v56 = vpop.permute.xlu0 %1470 }
 0x22e   : > { %v3746_v30 = vpop.eup %3745  ;;  %v2776_v63 = vsel %vm7696_vm7, %v3740_v14, %v2772_v57  ;;  %v3399_v49 = vmul.f32 -1.442695, %v7508_v31  ;;  %vm2268_vm10 = vcmp.eq.f32.partialorder %v2267_v51, 8.507059e+37  ;;  %v1898_v14 = vadd.f32 %v7653_v10, %v7496_v25 }
 0x22f   : > { %v3748_v61 = vpop.eup %3747  ;;  %v2781_v5 = vsel %vm2778_vm8, %v2780_v9, %v2776_v63  ;;  %v2262_v20 = vadd.f32 %v3742_v43, %v2261_v39  ;;  %v7721_v60 = vadd.f32 1.0, %v3746_v30  ;;  %v1864_v36 = vadd.f32 %v1816_v40, %v7412_v59  ;;  %v10006_v40 = vld [vmem:[#allocation67_spill] sm:$0xff] }
 0x230   : > { %v3750_v44 = vpop.eup %3749  ;;  %v2858_v2 = vmul.f32 %v7543_v55, %v2781_v5  ;;  %v7727_v57 = vmul.f32 %v1770_v22, %v1560_v7  ;;  %v1819_v34 = vmul.f32 %v1771_v19, %v1592_v27  ;;  %v7732_v9 = vadd.f32 %v1815_v17, %v7416_v37 }
 0x231   : > { %v2266_v0 = vsel %vm7716_vm11, %v3742_v43, %v2262_v20  ;;  %3753 = vrcp.f32 %v7721_v60  ;;  %v7738_v10 = vadd.f32 1.0, %v3748_v61  ;;  %v7742_v22 = vadd.f32 %v1842_v16, %v10006_v40 }
 0x232   : > { %v2909_v51 = vmul.f32 %v6938_v42, %v2858_v2  ;;  %v2271_v25 = vsel %vm2268_vm10, %v2270_v28, %v2266_v0  ;;  %3755 = vpow2.f32 %v3399_v49  ;;  %v7744_v20 = vadd.f32 1.0, %v3750_v44 }
 0x233   : > { %v3752_v59 = vpop.eup %3751  ;;  %v2824_v55 = vmul.f32 %v7566_v47, %v2271_v25  ;;  %v3400_v37 = vmul.f32 -1.442695, %v7674_v29  ;;  %v2252_v7 = vand.u32 2147483647, %v7701_v32  ;;  %v2254_v39 = vand.u32 2147483648, %v7701_v32  ;;  %v10013_v25 = vld [vmem:[#allocation17_spill] sm:$0xff] }
 0x234   : > { %v2957_v17 = vadd.f32 %v2909_v51, %v1898_v14  ;;  %v2244_v43 = vmul.f32 %v3752_v59, %v7701_v32  ;;  %v2312_v27 = vand.u32 2147483647, %v7721_v60  ;;  %v2314_v47 = vand.u32 2147483648, %v7721_v60  ;;  %v3961_v51 = vld [vmem:[%s4289_s28 + $0x118] sm:$0xff] }
 0x235   : > { %v2875_v19 = vmul.f32 %v7170_v26, %v2824_v55  ;;  %3757 = vrcp.f32 %v7744_v20  ;;  %vm2248_vm14 = vweird.f32 %v7701_v32  ;;  %vm2249_vm15 = vweird.f32 %v3752_v59  ;;  %v7782_v40 = vpop.permute.xlu0 %1041 }
 0x236   : > { %3069 = vmatmul.f32.gmra.mxu3 %v2957_v17  ;;  %3759 = vrcp.f32 %v7738_v10  ;;  %v2245_v30 = vsub.f32 1.0, %v2244_v43  ;;  %v7757_v28 = vadd.f32 %v1819_v34, %v7518_v50  ;;  %v7761_v16 = vadd.f32 %v7660_v11, %v7423_v24  ;;  %vm7768_vm0 = vmor %vm2248_vm14, %vm2249_vm15  ;;  %v7788_v43 = vpop.permute.xlu2 %1105 }
 0x237   : > { %v3754_v63 = vpop.eup %3753  ;;  %v2923_v18 = vadd.f32 %v2875_v19, %v1864_v36  ;;  %3761 = vpow2.f32 %v3400_v37  ;;  %vm7763_vm13 = vcmp.eq.f32.partialorder %v2252_v7, 8.507059e+37  ;;  %v2255_v44 = vor.u32 1.1754944e-38, %v2254_v39 }
 0x238   : > { %v3756_v49 = vpop.eup %3755  ;;  %v2246_v61 = vmul.f32 %v3752_v59, %v2245_v30  ;;  %v2304_v32 = vmul.f32 %v3754_v63, %v7721_v60  ;;  %vm2308_vm1 = vweird.f32 %v7721_v60  ;;  %vm7773_vm2 = vcmp.eq.f32.partialorder %v2312_v27, 8.507059e+37 }
 0x239   : > { %3163 = vmatmul.f32.gmra.mxu2 %v2923_v18  ;;  %v2315_v11 = vor.u32 1.1754944e-38, %v2314_v47  ;;  %v3424_v50 = vmul.f32 -1.442695, %v7664_v35  ;;  %vm2309_vm3 = vweird.f32 %v3754_v63  ;;  %vm2233_vm4 = vweird.f32 %v7744_v20 }
 0x23a   : > { %v2247_v2 = vadd.f32 %v3752_v59, %v2246_v61  ;;  %v2305_v36 = vsub.f32 1.0, %v2304_v32  ;;  %v2237_v34 = vand.u32 2147483647, %v7744_v20  ;;  %v1300_v55 = vsub.f32 %v3961_v51, %v10013_v25  ;;  %vm7799_vm5 = vmor %vm2308_vm1, %vm2309_vm3 }
 0x23b   : > { %v3758_v0 = vpop.eup %3757  ;;  %3763 = vpow2.f32 %v3424_v50  ;;  %v7784_v37 = vadd.f32 1.0, %v3756_v49  ;;  %v2239_v27 = vand.u32 2147483648, %v7744_v20  ;;  %v10016_v49 = vld [vmem:[#allocation118_spill] sm:$0xff]  ;;  %vm2668_vm1 = vweird.f32 %v7738_v10 }
 0x23c   : > { %v7786_v17 = vpop.eup %3759  ;;  %v2251_v7 = vsel %vm7768_vm0, %v3752_v59, %v2247_v2  ;;  %v2306_v39 = vmul.f32 %v3754_v63, %v2305_v36  ;;  %v2229_v19 = vmul.f32 %v3758_v0, %v7744_v20  ;;  %vm2234_vm6 = vweird.f32 %v3758_v0 }
 0x23d   : > { %v3762_v47 = vpop.eup %3761  ;;  %v2256_v30 = vsel %vm7763_vm13, %v2255_v44, %v2251_v7  ;;  %v1351_v61 = vmul.f32 %v10016_v49, %v1300_v55  ;;  %v1158_v59 = vsel %vm673_vm12, %v7788_v43, %v7782_v40  ;;  %v7809_v44 = vpop.permute.xlu1 %1534  ;;  %v7815_v60 = vmul.f32 %v7786_v17, %v7738_v10  ;;  %vm7830_vm7 = vmor %vm2233_vm4, %vm2234_vm6 }
 0x23e   : > { %v2823_v32 = vmul.f32 %v7621_v45, %v2256_v30  ;;  %v2307_v14 = vadd.f32 %v3754_v63, %v2306_v39  ;;  %v2230_v5 = vsub.f32 1.0, %v2229_v19  ;;  %v7811_v50 = vadd.f32 1.0, %v3762_v47  ;;  %v10026_v39 = vld [vmem:[#allocation59_spill] sm:$0xff] }
 0x23f   : > { %v1399_v2 = vmul.f32 %v1351_v61, %v1158_v59  ;;  %3765 = vrcp.f32 %v7784_v37  ;;  %v7819_v36 = vmul.f32 -1.442695, %v7579_v3  ;;  %vm7834_vm9 = vcmp.eq.f32.partialorder %v2237_v34, 8.507059e+37 }
 0x240   : > { %v2874_v51 = vmul.f32 %v6961_v54, %v2823_v32  ;;  %v2311_v45 = vsel %vm7799_vm5, %v3754_v63, %v2307_v14  ;;  %v2231_v25 = vmul.f32 %v3758_v0, %v2230_v5  ;;  %3767 = vrcp.f32 %v7811_v50 }
 0x241   : > { %v3764_v55 = vpop.eup %3763  ;;  %v2316_v7 = vsel %vm7773_vm2, %v2315_v11, %v2311_v45  ;;  %v2240_v47 = vor.u32 1.1754944e-38, %v2239_v27  ;;  %v2282_v63 = vand.u32 2147483647, %v7784_v37  ;;  %v2297_v20 = vand.u32 2147483647, %v7811_v50 }
 0x242   : > { %v2922_v30 = vadd.f32 %v2874_v51, %v7732_v9  ;;  %v2827_v18 = vmul.f32 %v7679_v4, %v2316_v7  ;;  %v2232_v24 = vadd.f32 %v3758_v0, %v2231_v25  ;;  %v7841_v11 = vadd.f32 1.0, %v3764_v55  ;;  %v3962_v7 = vld [vmem:[%s4289_s28 + $0x108] sm:$0xff] }
 0x243   : > { %v2299_v49 = vand.u32 2147483648, %v7811_v50  ;;  %v2284_v61 = vand.u32 2147483648, %v7784_v37  ;;  %v7847_v34 = vadd.f32 %v1399_v2, %v7499_v21  ;;  %v7854_v4 = vadd.f32 %v7727_v57, %v7521_v13 }
 0x244   : > { %3098 = vmatmul.f32.gmra.mxu1 %v2922_v30  ;;  %v2878_v27 = vmul.f32 %v7170_v26, %v2827_v18  ;;  %v2236_v9 = vsel %vm7830_vm7, %v3758_v0, %v2232_v24  ;;  %3769 = vrcp.f32 %v7841_v11  ;;  %v2665_v32 = vsub.f32 1.0, %v7815_v60 }
 0x245   : > { %10021 = vst [vmem:[#allocation102_spill] sm:$0xff] %v7847_v34  ;;  %v3766_v59 = vpop.eup %3765  ;;  %v2241_v14 = vsel %vm7834_vm9, %v2240_v47, %v2236_v9  ;;  %vm2278_vm8 = vweird.f32 %v7784_v37  ;;  %vm7861_vm11 = vcmp.eq.f32.partialorder %v2282_v63, 8.507059e+37  ;;  %1546 = vrot.lane.b32.xlu1 %v7847_v34, %s4160_s18  ;;  %vm2293_vm10 = vweird.f32 %v7811_v50  ;;  %v3963_v47 = vld [vmem:[%s4289_s28 + $0x110] sm:$0xff] }
 0x246   : > { %v3768_v0 = vpop.eup %3767  ;;  %v2926_v13 = vadd.f32 %v2878_v27, %v7757_v28  ;;  %v2822_v57 = vmul.f32 %v7596_v33, %v2241_v14  ;;  %v2274_v5 = vmul.f32 %v3766_v59, %v7784_v37  ;;  %vm7872_vm14 = vcmp.eq.f32.partialorder %v2297_v20, 8.507059e+37  ;;  %v1074_v33 = vpop.permute.xlu1 %1073  ;;  %v10027_v63 = vld [vmem:[#allocation68_spill] sm:$0xff] }
 0x247   : > { %v2289_v60 = vmul.f32 %v3768_v0, %v7811_v50  ;;  %v2300_v51 = vor.u32 1.1754944e-38, %v2299_v49  ;;  %v2285_v45 = vor.u32 1.1754944e-38, %v2284_v61  ;;  %vm2653_vm15 = vweird.f32 %v7841_v11 }
 0x248   : > { %3166 = vmatmul.f32.gmra.mxu2 %v2926_v13  ;;  %v2873_v25 = vmul.f32 %v6938_v42, %v2822_v57  ;;  %v2275_v28 = vsub.f32 1.0, %v2274_v5  ;;  %vm2279_vm13 = vweird.f32 %v3766_v59  ;;  %vm2294_vm0 = vweird.f32 %v3768_v0  ;;  %v10030_v13 = vld [vmem:[#allocation46_spill] sm:$0xff] }
 0x249   : > { %v2290_v55 = vsub.f32 1.0, %v2289_v60  ;;  %v1298_v19 = vsub.f32 %v3962_v7, %v10026_v39  ;;  %v1299_v30 = vsub.f32 %v3963_v47, %v10027_v63  ;;  %v2657_v20 = vand.u32 2147483647, %v7841_v11  ;;  %vm7890_vm2 = vmor %vm2278_vm8, %vm2279_vm13  ;;  %v10033_v60 = vld [vmem:[#allocation116_spill] sm:$0xff]  ;;  %v7919_v47 = vld [vmem:[%s4289_s28 + $0x88] sm:$0xff] }
 0x24a   : > { %v3770_v18 = vpop.eup %3769  ;;  %v2921_v24 = vadd.f32 %v2873_v25, %v7761_v16  ;;  %v2659_v49 = vand.u32 2147483648, %v7841_v11  ;;  %v2276_v61 = vmul.f32 %v3766_v59, %v2275_v28  ;;  %v1126_v57 = vsel %vm673_vm12, %v1074_v33, %v7788_v43  ;;  %vm7901_vm3 = vmor %vm2293_vm10, %vm2294_vm0 }
 0x24b   : > { %v2291_v27 = vmul.f32 %v3768_v0, %v2290_v55  ;;  %v2649_v9 = vmul.f32 %v3770_v18, %v7841_v11  ;;  %v1349_v16 = vmul.f32 %v10030_v13, %v1298_v19  ;;  %v1350_v25 = vmul.f32 %v10033_v60, %v1299_v30 }
 0x24c   : > { %3033 = vmatmul.f32.gmra.mxu0 %v2921_v24  ;;  %v2277_v37 = vadd.f32 %v3766_v59, %v2276_v61  ;;  %v7908_v28 = vadd.f32 %v7655_v48, %v7269_v15  ;;  %3771 = vpow2.f32 %v7819_v36  ;;  %vm2654_vm4 = vweird.f32 %v3770_v18 }
 0x24d   : > { %v2292_v55 = vadd.f32 %v3768_v0, %v2291_v27  ;;  %v2650_v7 = vsub.f32 1.0, %v2649_v9  ;;  %v1142_v43 = vsel %vm673_vm12, %v7782_v40, %v1074_v33  ;;  %v1865_v50 = vadd.f32 %v7576_v62, %v7547_v46  ;;  %vm7930_vm5 = vmor %vm2653_vm15, %vm2654_vm4  ;;  %v10046_v46 = vld [vmem:[#allocation90_spill] sm:$0xff] }
 0x24e   : > { %v2281_v39 = vsel %vm7890_vm2, %v3766_v59, %v2277_v37  ;;  %v1398_v19 = vmul.f32 %v1350_v25, %v1126_v57  ;;  %v3404_v15 = vmul.f32 -1.442695, %v7919_v47  ;;  %v2660_v63 = vor.u32 1.1754944e-38, %v2659_v49  ;;  %v7947_v49 = vld [vmem:[%s4289_s28 + $0x80] sm:$0xff]  ;;  %v7967_v57 = vpop.permute.xlu2 %1536  ;;  %v10042_v25 = vld [vmem:[#allocation41_spill] sm:$0xff] }
 0x24f   : > { %v2296_v48 = vsel %vm7901_vm3, %v3768_v0, %v2292_v55  ;;  %v2651_v36 = vmul.f32 %v3770_v18, %v2650_v7  ;;  %v2286_v30 = vsel %vm7861_vm11, %v2285_v45, %v2281_v39  ;;  %v1397_v59 = vmul.f32 %v1349_v16, %v1142_v43  ;;  %v10043_v7 = vld [vmem:[#allocation98_spill] sm:$0xff] }
 0x250   : > { %v2301_v40 = vsel %vm7872_vm14, %v2300_v51, %v2296_v48  ;;  %v2825_v62 = vmul.f32 %v7508_v31, %v2286_v30  ;;  %3773 = vpow2.f32 %v3404_v15  ;;  %v2666_v0 = vmul.f32 %v7786_v17, %v2665_v32  ;;  %v10044_v15 = vld [vmem:[#allocation73_spill] sm:$0xff] }
 0x251   : > { %v2826_v33 = vmul.f32 %v7674_v29, %v2301_v40  ;;  %v2652_v21 = vadd.f32 %v3770_v18, %v2651_v36  ;;  %vm2658_vm6 = vcmp.eq.f32.partialorder %v2657_v20, 8.507059e+37  ;;  %vm2669_vm7 = vweird.f32 %v7786_v17  ;;  %v10045_v36 = vld [vmem:[#allocation97_spill] sm:$0xff] }
 0x252   : > { %v3772_v45 = vpop.eup %3771  ;;  %v2672_v11 = vand.u32 2147483647, %v7738_v10  ;;  %v2876_v2 = vmul.f32 %v6938_v42, %v2825_v62  ;;  %v7941_v51 = vadd.f32 %v1398_v19, %v7550_v1  ;;  %v3403_v29 = vmul.f32 -1.442695, %v7947_v49  ;;  %vm7963_vm9 = vmor %vm2668_vm1, %vm2669_vm7 }
 0x253   : > { %v2877_v31 = vmul.f32 %v6961_v54, %v2826_v33  ;;  %v2656_v24 = vsel %vm7930_vm5, %v3770_v18, %v2652_v21  ;;  %v2085_v32 = vadd.f32 1.0, %v3772_v45  ;;  %v2674_v20 = vand.u32 2147483648, %v7738_v10  ;;  %v10047_v33 = vld [vmem:[#allocation69_spill] sm:$0xff] }
 0x254   : > { %10036 = vst [vmem:[#allocation57_spill] sm:$0xff] %v7941_v51  ;;  %v2661_v61 = vsel %vm2658_vm6, %v2660_v63, %v2656_v24  ;;  %v2924_v27 = vadd.f32 %v2876_v2, %v1865_v50  ;;  %1514 = vrot.lane.b32.xlu2 %v7941_v51, %s4160_s18  ;;  %v7954_v1 = vadd.f32 %v1397_v59, %v7502_v38  ;;  %vm2673_vm8 = vcmp.eq.f32.partialorder %v2672_v11, 8.507059e+37  ;;  %v8006_v45 = vld [vmem:[%s4289_s28 + $0x78] sm:$0xff]  ;;  %v8588_v51 = vld [vmem:[%s4289_s28 + $0xf0] sm:$0xff] }
 0x255   : > { %v2667_v9 = vadd.f32 %v7786_v17, %v2666_v0  ;;  %v2925_v14 = vadd.f32 %v2877_v31, %v7854_v4  ;;  %v2850_v18 = vmul.f32 %v7664_v35, %v2661_v61  ;;  %3775 = vrcp.f32 %v2085_v32  ;;  %v10040_v35 = vld [vmem:[#allocation29_spill] sm:$0xff]  ;;  %v10049_v61 = vld [vmem:[#allocation128_spill] sm:$0xff] }
 0x256   : > { %10037 = vst [vmem:[#allocation106_spill] sm:$0xff] %v7954_v1  ;;  %v3774_v13 = vpop.eup %3773  ;;  %3036 = vmatmul.f32.gmra.mxu0 %v2924_v27  ;;  %1482 = vrot.lane.b32.xlu0 %v7954_v1, %s4160_s18  ;;  %v1624_v4 = vmul.f32 %v6456_v58, %v10040_v35  ;;  %3777 = vpow2.f32 %v3403_v29  ;;  %v10041_v10 = vsub.f32 %v7647_v12, %v6874_v53  ;;  %v2675_v60 = vor.u32 1.1754944e-38, %v2674_v20  ;;  %v10048_v24 = vld [vmem:[#allocation121_spill] sm:$0xff] }
 0x257   : > { %3101 = vmatmul.f32.gmra.mxu1 %v2925_v14  ;;  %v2901_v38 = vmul.f32 %v6961_v54, %v2850_v18  ;;  %v7974_v5 = vadd.f32 1.0, %v3774_v13  ;;  %v1623_v55 = vmul.f32 %v9921_v8, %v10042_v25  ;;  %v1622_v43 = vmul.f32 %v6550_v52, %v10043_v7  ;;  %v8020_v14 = vpop.permute.xlu2 %1474  ;;  %v10054_v7 = vld [vmem:[#allocation107_spill] sm:$0xff] }
 0x258   : > { %v1798_v37 = vmul.f32 %v6876_v6, %v10041_v10  ;;  %v2671_v50 = vsel %vm7963_vm9, %v7786_v17, %v2667_v9  ;;  %v1723_v19 = vsub.f32 %v7919_v47, %v6874_v53  ;;  %v7992_v48 = vmul.f32 %v1624_v4, %v10044_v15  ;;  %v10056_v15 = vld [vmem:[#allocation122_spill] sm:$0xff] }
 0x259   : > { %v2949_v39 = vadd.f32 %v2901_v38, %v7742_v22  ;;  %3779 = vrcp.f32 %v7974_v5  ;;  %v1650_v63 = vmul.f32 %v9921_v8, %v10045_v36  ;;  %v2676_v17 = vsel %vm2673_vm8, %v2675_v60, %v2671_v50  ;;  %v1503_v60 = vpop.permute.xlu0 %1502  ;;  %v10055_v50 = vld [vmem:[#allocation51_spill] sm:$0xff] }
 0x25a   : > { %v7997_v30 = vmul.f32 %v1798_v37, %v7485_v41  ;;  %v8000_v22 = vmul.f32 %v1623_v55, %v10046_v46  ;;  %v2702_v59 = vand.u32 2147483647, %v2085_v32  ;;  %v2704_v0 = vand.u32 2147483648, %v2085_v32 }
 0x25b   : > { %v3776_v12 = vpop.eup %3775  ;;  %3125 = vmatmul.f32.vlgmr.msrb.gmra.mxu3 %v2949_v39  ;;  %v8003_v21 = vmul.f32 %v1622_v43, %v10047_v33  ;;  %v3402_v11 = vmul.f32 -1.442695, %v8006_v45  ;;  %vm2698_vm11 = vweird.f32 %v2085_v32  ;;  %v2851_v29 = vmul.f32 %v10048_v24, %v2676_v17 }
 0x25c   : > { %v2694_v40 = vmul.f32 %v3776_v12, %v2085_v32  ;;  %v3778_v62 = vpop.eup %3777  ;;  %vm2699_vm10 = vweird.f32 %v3776_v12  ;;  %v1774_v20 = vmul.f32 %v6876_v6, %v1723_v19  ;;  %v8014_v27 = vmul.f32 %v1650_v63, %v10049_v61  ;;  %v8043_v19 = vld [vmem:[%s4289_s28 + $0xa8] sm:$0xff] }
 0x25d   : > { %v8009_v41 = vadd.f32 1.0, %v3778_v62  ;;  %3781 = vpow2.f32 %v3402_v11  ;;  %v1593_v9 = vsel %vm673_vm12, %v7809_v44, %v7735_v56  ;;  %vm8024_vm14 = vmor %vm2698_vm11, %vm2699_vm10  ;;  %vm8028_vm15 = vcmp.eq.f32.partialorder %v2702_v59, 8.507059e+37  ;;  %v10061_v59 = vld [vmem:[#allocation109_spill] sm:$0xff] }
 0x25e   : > { %v2695_v2 = vsub.f32 1.0, %v2694_v40  ;;  %v2705_v38 = vor.u32 1.1754944e-38, %v2704_v0  ;;  %vm2353_vm13 = vweird.f32 %v7974_v5  ;;  %v2359_v35 = vand.u32 2147483648, %v7974_v5 }
 0x25f   : > { %v3780_v31 = vpop.eup %3779  ;;  %3783 = vrcp.f32 %v8009_v41  ;;  %v2357_v37 = vand.u32 2147483647, %v7974_v5  ;;  %v2902_v25 = vmul.f32 %v7170_v26, %v2851_v29  ;;  %v1822_v55 = vmul.f32 %v1774_v20, %v1593_v9 }
 0x260   : > { %v2696_v32 = vmul.f32 %v3776_v12, %v2695_v2  ;;  %v2349_v18 = vmul.f32 %v3780_v31, %v7974_v5  ;;  %vm2354_vm0 = vweird.f32 %v3780_v31  ;;  %v1722_v43 = vsub.f32 %v7947_v49, %v10054_v7  ;;  %v10059_v5 = vld [vmem:[#allocation134_spill] sm:$0xff] }
 0x261   : > { %v8040_v39 = vmul.f32 %v6456_v58, %v10055_v50  ;;  %v1727_v36 = vsub.f32 %v8043_v19, %v10056_v15  ;;  %v1721_v40 = vsub.f32 %v8006_v45, %v10056_v15  ;;  %vm8055_vm1 = vmor %vm2353_vm13, %vm2354_vm0  ;;  %v2360_v0 = vor.u32 1.1754944e-38, %v2359_v35 }
 0x262   : > { %v2697_v4 = vadd.f32 %v3776_v12, %v2696_v32  ;;  %v2350_v10 = vsub.f32 1.0, %v2349_v18  ;;  %v1561_v33 = vsel %vm673_vm12, %v1503_v60, %v7809_v44  ;;  %vm2358_vm2 = vcmp.eq.f32.partialorder %v2357_v37, 8.507059e+37  ;;  %v8084_v37 = vld [vmem:[%s4289_s28 + $0xa0] sm:$0xff] }
 0x263   : > { %v3782_v46 = vpop.eup %3781  ;;  %v1773_v61 = vmul.f32 %v10059_v5, %v1722_v43  ;;  %vm2338_vm3 = vweird.f32 %v8009_v41  ;;  %v2344_v18 = vand.u32 2147483648, %v8009_v41  ;;  %v2342_v16 = vand.u32 2147483647, %v8009_v41  ;;  %v10060_v43 = vld [vmem:[#allocation74_spill] sm:$0xff] }
 0x264   : > { %v2701_v63 = vsel %vm8024_vm14, %v3776_v12, %v2697_v4  ;;  %v2351_v17 = vmul.f32 %v3780_v31, %v2350_v10  ;;  %v8063_v12 = vld [vmem:[%s4289_s28 + $0x158] sm:$0xff]  ;;  %v8067_v20 = vadd.f32 1.0, %v3782_v46  ;;  %v1870_v4 = vadd.f32 %v1822_v55, %v7992_v48  ;;  %v8092_v46 = vpop.permute.xlu1 %1472 }
 0x265   : > { %v2706_v62 = vsel %vm8028_vm15, %v2705_v38, %v2701_v63  ;;  %v3430_v11 = vmul.f32 -1.442695, %v8063_v12  ;;  %v3784_v2 = vpop.eup %3783  ;;  %v8078_v38 = vpop.permute.xlu2 %1506  ;;  %v8088_v50 = vadd.f32 %v2902_v25, %v10060_v43  ;;  %v1821_v63 = vmul.f32 %v1773_v61, %v1561_v33 }
 0x266   : > { %v2853_v24 = vmul.f32 %v7579_v3, %v2706_v62  ;;  %v2352_v29 = vadd.f32 %v3780_v31, %v2351_v17  ;;  %v2334_v9 = vmul.f32 %v3784_v2, %v8009_v41  ;;  %vm2339_vm4 = vweird.f32 %v3784_v2 }
 0x267   : > { %3785 = vpow2.f32 %v3430_v11  ;;  %v1726_v17 = vsub.f32 %v8084_v37, %v6874_v53  ;;  %vm8099_vm5 = vmor %vm2338_vm3, %vm2339_vm4  ;;  %v2345_v25 = vor.u32 1.1754944e-38, %v2344_v18  ;;  %vm2343_vm6 = vcmp.eq.f32.partialorder %v2342_v16, 8.507059e+37 }
 0x268   : > { %v2904_v44 = vmul.f32 %v6961_v54, %v2853_v24  ;;  %v2356_v32 = vsel %vm8055_vm1, %v3780_v31, %v2352_v29  ;;  %3787 = vrcp.f32 %v8067_v20  ;;  %v2335_v13 = vsub.f32 1.0, %v2334_v9 }
 0x269   : > { %v2361_v3 = vsel %vm2358_vm2, %v2360_v0, %v2356_v32  ;;  %v3407_v31 = vmul.f32 -1.442695, %v8084_v37  ;;  %v1579_v0 = vsel %vm673_vm12, %v8020_v14, %v8078_v38  ;;  %v1577_v41 = vsel %vm673_vm12, %v7735_v56, %v1503_v60 }
 0x26a   : > { %v2952_v35 = vadd.f32 %v2904_v44, %v7908_v28  ;;  %v2830_v10 = vmul.f32 %v7919_v47, %v2361_v3  ;;  %v2336_v62 = vmul.f32 %v3784_v2, %v2335_v13  ;;  %v1778_v28 = vmul.f32 %v10061_v59, %v1727_v36  ;;  %v1553_v3 = vpop.permute.xlu0 %1552 }
 0x26b   : > { %3789 = vpow2.f32 %v3407_v31  ;;  %v1772_v36 = vmul.f32 %v10061_v59, %v1721_v40  ;;  %v1594_v29 = vsel %vm673_vm12, %v7967_v57, %v8092_v46  ;;  %v1777_v9 = vmul.f32 %v6876_v6, %v1726_v17 }
 0x26c   : > { %3128 = vmatmul.f32.gmra.mxu3 %v2952_v35  ;;  %v2881_v48 = vmul.f32 %v7170_v26, %v2830_v10  ;;  %v2337_v33 = vadd.f32 %v3784_v2, %v2336_v62  ;;  %v1869_v44 = vadd.f32 %v1821_v63, %v8000_v22  ;;  %vm2323_vm7 = vweird.f32 %v8067_v20  ;;  %v8132_v10 = vld [vmem:[%s4289_s28 + $0x160] sm:$0xff]  ;;  %v10064_v63 = vld [vmem:[#allocation79_spill] sm:$0xff] }
 0x26d   : > { %v3786_v55 = vpop.eup %3785  ;;  %v2329_v56 = vand.u32 2147483648, %v8067_v20  ;;  %v2327_v22 = vand.u32 2147483647, %v8067_v20  ;;  %v8127_v16 = vmul.f32 %v1778_v28, %v1579_v0  ;;  %v1820_v35 = vmul.f32 %v1772_v36, %v1577_v41  ;;  %v8155_v0 = vld [vmem:[%s4289_s28 + $0x98] sm:$0xff] }
 0x26e   : > { %v3788_v11 = vpop.eup %3787  ;;  %v2929_v24 = vadd.f32 %v2881_v48, %v1870_v4  ;;  %v8115_v61 = vadd.f32 1.0, %v3786_v55  ;;  %v2341_v40 = vsel %vm8099_vm5, %v3784_v2, %v2337_v33  ;;  %v1749_v4 = vsub.f32 %v8063_v12, %v10054_v7  ;;  %v10065_v48 = vld [vmem:[#allocation27_spill] sm:$0xff] }
 0x26f   : > { %v2319_v32 = vmul.f32 %v3788_v11, %v8067_v20  ;;  %v2346_v18 = vsel %vm2343_vm6, %v2345_v25, %v2341_v40  ;;  %vm2324_vm9 = vweird.f32 %v3788_v11  ;;  %v1750_v31 = vsub.f32 %v8132_v10, %v6874_v53 }
 0x270   : > { %3169 = vmatmul.f32.gmra.mxu2 %v2929_v24  ;;  %3791 = vrcp.f32 %v8115_v61  ;;  %v2829_v60 = vmul.f32 %v7947_v49, %v2346_v18  ;;  %v8139_v17 = vmul.f32 %v8040_v39, %v10064_v63  ;;  %v8143_v28 = vmul.f32 %v1777_v9, %v1594_v29  ;;  %vm8150_vm8 = vmor %vm2323_vm7, %vm2324_vm9  ;;  %v10068_v29 = vld [vmem:[#allocation55_spill] sm:$0xff] }
 0x271   : > { %v2320_v13 = vsub.f32 1.0, %v2319_v32  ;;  %v3790_v2 = vpop.eup %3789  ;;  %v1570_v47 = vsel %vm673_vm12, %v10065_v48, %v1553_v3  ;;  %v2330_v55 = vor.u32 1.1754944e-38, %v2329_v56  ;;  %v3406_v39 = vmul.f32 -1.442695, %v8155_v0  ;;  %v8168_v32 = vld [vmem:[%s4289_s28 + $0x90] sm:$0xff] }
 0x272   : > { %v2880_v49 = vmul.f32 %v6961_v54, %v2829_v60  ;;  %v8141_v62 = vadd.f32 1.0, %v3790_v2  ;;  %vm2328_vm11 = vcmp.eq.f32.partialorder %v2327_v22, 8.507059e+37  ;;  %v1800_v41 = vmul.f32 %v10059_v5, %v1749_v4 }
 0x273   : > { %v2321_v43 = vmul.f32 %v3788_v11, %v2320_v13  ;;  %v1801_v20 = vmul.f32 %v6876_v6, %v1750_v31  ;;  %v1602_v9 = vsel %vm673_vm12, %v1553_v3, %v10068_v29  ;;  %v1868_v40 = vadd.f32 %v1820_v35, %v8003_v21  ;;  %v10069_v31 = vld [vmem:[#allocation54_spill] sm:$0xff] }
 0x274   : > { %v2928_v36 = vadd.f32 %v2880_v49, %v1869_v44  ;;  %3793 = vrcp.f32 %v8141_v62  ;;  %v1724_v18 = vsub.f32 %v8168_v32, %v10056_v15  ;;  %vm2743_vm10 = vweird.f32 %v8115_v61 }
 0x275   : > { %v2322_v33 = vadd.f32 %v3788_v11, %v2321_v43  ;;  %3795 = vpow2.f32 %v3406_v39  ;;  %v2747_v13 = vand.u32 2147483647, %v8115_v61  ;;  %v2749_v3 = vand.u32 2147483648, %v8115_v61  ;;  %v10070_v43 = vld [vmem:[#allocation32_spill] sm:$0xff]  ;;  %v1505_v39 = vpop.permute.xlu1 %1504 }
 0x276   : > { %v3792_v24 = vpop.eup %3791  ;;  %3104 = vmatmul.f32.gmra.mxu1 %v2928_v36  ;;  %v1848_v35 = vmul.f32 %v1800_v41, %v1570_v47  ;;  %v1725_v4 = vsub.f32 %v8155_v0, %v10054_v7  ;;  %v1626_v49 = vmul.f32 %v9921_v8, %v10069_v31  ;;  %v1630_v63 = vmul.f32 %v6456_v58, %v10070_v43 }
 0x277   : > { %v2326_v44 = vsel %vm8150_vm8, %v3788_v11, %v2322_v33  ;;  %v2739_v56 = vmul.f32 %v3792_v24, %v8115_v61  ;;  %vm2744_vm14 = vweird.f32 %v3792_v24  ;;  %v8178_v11 = vld [vmem:[%s4289_s28 + $0xb8] sm:$0xff]  ;;  %vm8195_vm13 = vcmp.eq.f32.partialorder %v2747_v13, 8.507059e+37 }
 0x278   : > { %v2331_v60 = vsel %vm2328_vm11, %v2330_v55, %v2326_v44  ;;  %v3410_v2 = vmul.f32 -1.442695, %v8178_v11  ;;  %vm8191_vm15 = vmor %vm2743_vm10, %vm2744_vm14  ;;  %v2750_v33 = vor.u32 1.1754944e-38, %v2749_v3  ;;  %vm2398_vm0 = vweird.f32 %v8141_v62 }
 0x279   : > { %v2828_v21 = vmul.f32 %v8006_v45, %v2331_v60  ;;  %v2740_v22 = vsub.f32 1.0, %v2739_v56  ;;  %v1775_v45 = vmul.f32 %v10061_v59, %v1724_v18  ;;  %v2404_v56 = vand.u32 2147483648, %v8141_v62 }
 0x27a   : > { %v3794_v48 = vpop.eup %3793  ;;  %3797 = vpow2.f32 %v3410_v2  ;;  %v3405_v61 = vmul.f32 -1.442695, %v8168_v32  ;;  %v1776_v3 = vmul.f32 %v10059_v5, %v1725_v4  ;;  %v1578_v2 = vsel %vm673_vm12, %v8092_v46, %v1505_v39  ;;  %v10077_v46 = vld [vmem:[#allocation38_spill] sm:$0xff] }
 0x27b   : > { %v2879_v25 = vmul.f32 %v6938_v42, %v2828_v21  ;;  %v2741_v55 = vmul.f32 %v3792_v24, %v2740_v22  ;;  %v2394_v41 = vmul.f32 %v3794_v48, %v8141_v62  ;;  %v3796_v29 = vpop.eup %3795  ;;  %vm2399_vm1 = vweird.f32 %v3794_v48 }
 0x27c   : > { %v2402_v21 = vand.u32 2147483647, %v8141_v62  ;;  %v8204_v13 = vadd.f32 1.0, %v3796_v29  ;;  %v1562_v22 = vsel %vm673_vm12, %v1505_v39, %v7967_v57  ;;  %3799 = vpow2.f32 %v3405_v61  ;;  %vm8223_vm2 = vmor %vm2398_vm0, %vm2399_vm1  ;;  %v1539_v29 = vpop.permute.xlu0 %1538 }
 0x27d   : > { %v2927_v44 = vadd.f32 %v2879_v25, %v1868_v40  ;;  %v2742_v18 = vadd.f32 %v3792_v24, %v2741_v55  ;;  %v2395_v60 = vsub.f32 1.0, %v2394_v41  ;;  %v1896_v4 = vadd.f32 %v1848_v35, %v8014_v27 }
 0x27e   : > { %3801 = vrcp.f32 %v8204_v13  ;;  %v1625_v39 = vmul.f32 %v6550_v52, %v10077_v46  ;;  %v8229_v47 = vmul.f32 %v1801_v20, %v1602_v9  ;;  %vm2403_vm3 = vcmp.eq.f32.partialorder %v2402_v21, 8.507059e+37  ;;  %v10079_v9 = vld [vmem:[#allocation132_spill] sm:$0xff] }
 0x27f   : > { %3039 = vmatmul.f32.gmra.mxu0 %v2927_v44  ;;  %v2746_v40 = vsel %vm8191_vm15, %v3792_v24, %v2742_v18  ;;  %v2396_v43 = vmul.f32 %v3794_v48, %v2395_v60  ;;  %v2405_v24 = vor.u32 1.1754944e-38, %v2404_v56  ;;  %v8233_v27 = vmul.f32 %v1775_v45, %v1578_v2  ;;  %v10078_v44 = vld [vmem:[#allocation22_spill] sm:$0xff]  ;;  %v10080_v21 = vld [vmem:[#allocation120_spill] sm:$0xff] }
 0x280   : > { %v2751_v31 = vsel %vm8195_vm13, %v2750_v33, %v2746_v40  ;;  %v3798_v25 = vpop.eup %3797  ;;  %v1729_v62 = vsub.f32 %v8178_v11, %v6874_v53  ;;  %v1674_v20 = vmul.f32 %v1626_v49, %v10078_v44  ;;  %v8242_v18 = vmul.f32 %v1630_v63, %v10079_v9  ;;  %v10081_v49 = vld [vmem:[#allocation47_spill] sm:$0xff]  ;;  %v10082_v2 = vld [vmem:[#allocation20_spill] sm:$0xff] }
 0x281   : > { %v2856_v55 = vmul.f32 %v8063_v12, %v2751_v31  ;;  %v2397_v36 = vadd.f32 %v3794_v48, %v2396_v43  ;;  %v8231_v33 = vadd.f32 1.0, %v3798_v25  ;;  %v1824_v12 = vmul.f32 %v1776_v3, %v1562_v22  ;;  %v8262_v43 = vld [vmem:[%s4289_s28 + $0xb0] sm:$0xff] }
 0x282   : > { %v3800_v45 = vpop.eup %3799  ;;  %v1873_v61 = vadd.f32 %v8143_v28, %v8139_v17  ;;  %v8248_v3 = vmul.f32 %v1625_v39, %v10080_v21  ;;  %v8255_v63 = vmul.f32 %v9921_v8, %v10081_v49  ;;  %v8259_v31 = vmul.f32 %v9921_v8, %v10082_v2  ;;  %v8283_v44 = vld [vmem:[%s4289_s28 + $0x170] sm:$0xff] }
 0x283   : > { %v2907_v35 = vmul.f32 %v6961_v54, %v2856_v55  ;;  %v2401_v41 = vsel %vm8223_vm2, %v3794_v48, %v2397_v36  ;;  %3803 = vrcp.f32 %v8231_v33  ;;  %v8251_v40 = vadd.f32 1.0, %v3800_v45 }
 0x284   : > { %v2406_v60 = vsel %vm2403_vm3, %v2405_v24, %v2401_v41  ;;  %v3802_v22 = vpop.eup %3801  ;;  %v1728_v17 = vsub.f32 %v8262_v43, %v10054_v7  ;;  %v1780_v28 = vmul.f32 %v6876_v6, %v1729_v62  ;;  %v2387_v55 = vand.u32 2147483647, %v8204_v13 }
 0x285   : > { %v2955_v56 = vadd.f32 %v2907_v35, %v1896_v4  ;;  %v2833_v48 = vmul.f32 %v8084_v37, %v2406_v60  ;;  %v1595_v37 = vsel %vm673_vm12, %v1539_v29, %v8020_v14  ;;  %v2379_v25 = vmul.f32 %v3802_v22, %v8204_v13 }
 0x286   : > { %v2389_v57 = vand.u32 2147483648, %v8204_v13  ;;  %3805 = vrcp.f32 %v8251_v40  ;;  %vm2383_vm4 = vweird.f32 %v8204_v13  ;;  %vm2384_vm5 = vweird.f32 %v3802_v22 }
 0x287   : > { %3131 = vmatmul.f32.gmra.mxu3 %v2955_v56  ;;  %v2884_v4 = vmul.f32 %v7170_v26, %v2833_v48  ;;  %v2380_v24 = vsub.f32 1.0, %v2379_v25  ;;  %v3409_v46 = vmul.f32 -1.442695, %v8262_v43  ;;  %v1563_v14 = vsel %vm673_vm12, %v8078_v38, %v1539_v29  ;;  %vm8288_vm6 = vmor %vm2383_vm4, %vm2384_vm5  ;;  %v8326_v38 = vld [vmem:[%s4289_s28 + $0xc0] sm:$0xff] }
 0x288   : > { %v2447_v35 = vand.u32 2147483647, %v8231_v33  ;;  %v2449_v62 = vand.u32 2147483648, %v8231_v33  ;;  %v1828_v41 = vmul.f32 %v1780_v28, %v1595_v37  ;;  %v1752_v9 = vsub.f32 %v8283_v44, %v10054_v7 }
 0x289   : > { %v3804_v39 = vpop.eup %3803  ;;  %v2932_v36 = vadd.f32 %v2884_v4, %v1873_v61  ;;  %v2381_v13 = vmul.f32 %v3802_v22, %v2380_v24  ;;  %vm8292_vm7 = vcmp.eq.f32.partialorder %v2387_v55, 8.507059e+37  ;;  %v2390_v29 = vor.u32 1.1754944e-38, %v2389_v57 }
 0x28a   : > { %v2439_v45 = vmul.f32 %v3804_v39, %v8231_v33  ;;  %3807 = vpow2.f32 %v3409_v46  ;;  %v3433_v61 = vmul.f32 -1.442695, %v8283_v44  ;;  %vm2443_vm9 = vweird.f32 %v8231_v33 }
 0x28b   : > { %3172 = vmatmul.f32.gmra.mxu2 %v2932_v36  ;;  %v2382_v60 = vadd.f32 %v3802_v22, %v2381_v13  ;;  %vm2444_vm8 = vweird.f32 %v3804_v39  ;;  %v1872_v49 = vadd.f32 %v1824_v12, %v1674_v20  ;;  %vm8298_vm11 = vcmp.eq.f32.partialorder %v2447_v35, 8.507059e+37  ;;  %v10095_v12 = vld [vmem:[#allocation64_spill] sm:$0xff] }
 0x28c   : > { %v2440_v21 = vsub.f32 1.0, %v2439_v45  ;;  %v3806_v48 = vpop.eup %3805  ;;  %v2450_v28 = vor.u32 1.1754944e-38, %v2449_v62  ;;  %3809 = vpow2.f32 %v3433_v61  ;;  %vm2368_vm10 = vweird.f32 %v8251_v40  ;;  %vm8308_vm14 = vmor %vm2443_vm9, %vm2444_vm8  ;;  %v8318_v62 = vld [vmem:[%s4289_s28 + $0x178] sm:$0xff]  ;;  %v8322_v45 = vpop.permute.xlu1 %1554 }
 0x28d   : > { %v2386_v37 = vsel %vm8288_vm6, %v3802_v22, %v2382_v60  ;;  %v2364_v4 = vmul.f32 %v3806_v48, %v8251_v40  ;;  %vm2369_vm15 = vweird.f32 %v3806_v48  ;;  %v2372_v20 = vand.u32 2147483647, %v8251_v40 }
 0x28e   : > { %v2441_v25 = vmul.f32 %v3804_v39, %v2440_v21  ;;  %v2391_v33 = vsel %vm8292_vm7, %v2390_v29, %v2386_v37  ;;  %v2374_v55 = vand.u32 2147483648, %v8251_v40  ;;  %v3408_v46 = vmul.f32 -1.442695, %v8043_v19  ;;  %vm8340_vm13 = vmor %vm2368_vm10, %vm2369_vm15 }
 0x28f   : > { %v2832_v22 = vmul.f32 %v8155_v0, %v2391_v33  ;;  %v2365_v24 = vsub.f32 1.0, %v2364_v4  ;;  %v1779_v35 = vmul.f32 %v10059_v5, %v1728_v17  ;;  %v1876_v56 = vadd.f32 %v1828_v41, %v8242_v18  ;;  %v8349_v33 = vpop.permute.xlu0 %1476  ;;  %v10098_v18 = vld [vmem:[#allocation99_spill] sm:$0xff] }
 0x290   : > { %v2442_v57 = vadd.f32 %v3804_v39, %v2441_v25  ;;  %v3808_v36 = vpop.eup %3807  ;;  %v1730_v0 = vsub.f32 %v8326_v38, %v10056_v15  ;;  %vm8344_vm0 = vcmp.eq.f32.partialorder %v2372_v20, 8.507059e+37  ;;  %v2375_v25 = vor.u32 1.1754944e-38, %v2374_v55 }
 0x291   : > { %v2883_v29 = vmul.f32 %v6961_v54, %v2832_v22  ;;  %v2366_v17 = vmul.f32 %v3806_v48, %v2365_v24  ;;  %v8333_v60 = vadd.f32 1.0, %v3808_v36  ;;  %3811 = vpow2.f32 %v3408_v46  ;;  %v10097_v24 = vld [vmem:[#allocation108_spill] sm:$0xff] }
 0x292   : > { %v2446_v61 = vsel %vm8308_vm14, %v3804_v39, %v2442_v57  ;;  %v3810_v21 = vpop.eup %3809  ;;  %v1803_v40 = vmul.f32 %v10059_v5, %v1752_v9  ;;  %v1571_v20 = vsel %vm673_vm12, %v10095_v12, %v8322_v45  ;;  %v10096_v57 = vld [vmem:[#allocation25_spill] sm:$0xff]  ;;  %v1648_v9 = vmul.f32 %v6456_v58, %v10097_v24 }
 0x293   : > { %v2451_v37 = vsel %vm8298_vm11, %v2450_v28, %v2446_v61  ;;  %v2931_v39 = vadd.f32 %v2883_v29, %v1872_v49  ;;  %v2367_v2 = vadd.f32 %v3806_v48, %v2366_v17  ;;  %3813 = vrcp.f32 %v8333_v60  ;;  %v1509_v49 = vpop.permute.xlu2 %1508  ;;  %v8379_v17 = vld [vmem:[%s4289_s28 + $0xc8] sm:$0xff] }
 0x294   : > { %v2836_v4 = vmul.f32 %v8178_v11, %v2451_v37  ;;  %v8352_v28 = vmul.f32 %v1779_v35, %v1563_v14  ;;  %v8359_v55 = vadd.f32 1.0, %v3810_v21  ;;  %v1628_v14 = vmul.f32 %v6550_v52, %v10096_v57  ;;  %v10102_v57 = vld [vmem:[#allocation92_spill] sm:$0xff] }
 0x295   : > { %3107 = vmatmul.f32.gmra.mxu1 %v2931_v39  ;;  %v2371_v22 = vsel %vm8340_vm13, %v3806_v48, %v2367_v2  ;;  %v1781_v46 = vmul.f32 %v10061_v59, %v1730_v0  ;;  %v1580_v36 = vsel %vm673_vm12, %v8349_v33, %v1509_v49  ;;  %v1871_v48 = vadd.f32 %v8233_v27, %v8248_v3 }
 0x296   : > { %v2887_v11 = vmul.f32 %v7170_v26, %v2836_v4  ;;  %v2376_v35 = vsel %vm8344_vm0, %v2375_v25, %v2371_v22  ;;  %3815 = vrcp.f32 %v8359_v55  ;;  %v1731_v0 = vsub.f32 %v8379_v17, %v10054_v7  ;;  %v10099_v25 = vld [vmem:[#allocation45_spill] sm:$0xff]  ;;  %v8397_v4 = vld [vmem:[%s4289_s28 + $0xd0] sm:$0xff] }
 0x297   : > { %v2831_v61 = vmul.f32 %v8168_v32, %v2376_v35  ;;  %v3812_v21 = vpop.eup %3811  ;;  %v8383_v37 = vmul.f32 %v1803_v40, %v1571_v20  ;;  %v1677_v41 = vmul.f32 %v8255_v63, %v10098_v18  ;;  %v8389_v39 = vmul.f32 %v8259_v31, %v10099_v25  ;;  %v10101_v40 = vld [vmem:[#allocation131_spill] sm:$0xff]  ;;  %v1541_v20 = vpop.permute.xlu1 %1540 }
 0x298   : > { %v2935_v29 = vadd.f32 %v2887_v11, %v1876_v56  ;;  %v10100_v56 = vld [vmem:[#allocation18_spill] sm:$0xff]  ;;  %v1732_v2 = vsub.f32 %v8397_v4, %v6874_v53  ;;  %v8402_v12 = vmul.f32 %v1628_v14, %v10101_v40  ;;  %v8404_v63 = vadd.f32 1.0, %v3812_v21 }
 0x299   : > { %v8393_v27 = vmul.f32 %v6456_v58, %v10100_v56  ;;  %v3814_v32 = vpop.eup %3813  ;;  %v2882_v3 = vmul.f32 %v6938_v42, %v2831_v61  ;;  %v8406_v31 = vmul.f32 %v1781_v46, %v1580_v36  ;;  %v2434_v22 = vand.u32 2147483648, %v8333_v60 }
 0x29a   : > { %3175 = vmatmul.f32.gmra.mxu2 %v2935_v29  ;;  %v2424_v11 = vmul.f32 %v3814_v32, %v8333_v60  ;;  %v8411_v24 = vmul.f32 %v1648_v9, %v10102_v57  ;;  %v1782_v29 = vmul.f32 %v10059_v5, %v1731_v0  ;;  %vm2428_vm1 = vweird.f32 %v8333_v60 }
 0x29b   : > { %v2930_v35 = vadd.f32 %v2882_v3, %v1871_v48  ;;  %3817 = vrcp.f32 %v8404_v63  ;;  %vm2429_vm2 = vweird.f32 %v3814_v32  ;;  %v2432_v46 = vand.u32 2147483647, %v8333_v60 }
 0x29c   : > { %v3816_v14 = vpop.eup %3815  ;;  %v2425_v61 = vsub.f32 1.0, %v2424_v11  ;;  %v3412_v36 = vmul.f32 -1.442695, %v8379_v17  ;;  %v1783_v21 = vmul.f32 %v6876_v6, %v1732_v2  ;;  %v1564_v9 = vsel %vm673_vm12, %v1509_v49, %v1541_v20  ;;  %vm8426_vm3 = vmor %vm2428_vm1, %vm2429_vm2 }
 0x29d   : > { %3042 = vmatmul.f32.gmra.mxu0 %v2930_v35  ;;  %v2784_v48 = vmul.f32 %v3816_v14, %v8359_v55  ;;  %v2792_v0 = vand.u32 2147483647, %v8359_v55  ;;  %v2435_v25 = vor.u32 1.1754944e-38, %v2434_v22  ;;  %v2794_v56 = vand.u32 2147483648, %v8359_v55 }
 0x29e   : > { %v2426_v18 = vmul.f32 %v3814_v32, %v2425_v61  ;;  %3819 = vpow2.f32 %v3412_v36  ;;  %vm2788_vm4 = vweird.f32 %v8359_v55  ;;  %vm2789_vm5 = vweird.f32 %v3816_v14 }
 0x29f   : > { %v2785_v40 = vsub.f32 1.0, %v2784_v48  ;;  %v3413_v49 = vmul.f32 -1.442695, %v8397_v4  ;;  %v1596_v2 = vsel %vm673_vm12, %v1541_v20, %v8349_v33  ;;  %v8435_v11 = vmul.f32 %v1782_v29, %v1564_v9  ;;  %vm8444_vm9 = vmor %vm2788_vm4, %vm2789_vm5 }
 0x2a0   : > { %v2427_v22 = vadd.f32 %v3814_v32, %v2426_v18  ;;  %vm2433_vm6 = vcmp.eq.f32.partialorder %v2432_v46, 8.507059e+37  ;;  %v1875_v60 = vadd.f32 %v8352_v28, %v1677_v41  ;;  %vm8438_vm7 = vcmp.eq.f32.partialorder %v2792_v0, 8.507059e+37 }
 0x2a1   : > { %v3818_v57 = vpop.eup %3817  ;;  %v2786_v35 = vmul.f32 %v3816_v14, %v2785_v40  ;;  %3821 = vpow2.f32 %v3413_v49  ;;  %v2795_v33 = vor.u32 1.1754944e-38, %v2794_v56  ;;  %vm2413_vm8 = vweird.f32 %v8404_v63  ;;  %v10109_v56 = vld [vmem:[#allocation78_spill] sm:$0xff] }
 0x2a2   : > { %v2431_v55 = vsel %vm8426_vm3, %v3814_v32, %v2427_v22  ;;  %v2409_v20 = vmul.f32 %v3818_v57, %v8404_v63  ;;  %v2419_v41 = vand.u32 2147483648, %v8404_v63  ;;  %v3411_v46 = vmul.f32 -1.442695, %v8326_v38  ;;  %v10110_v22 = vld [vmem:[#allocation34_spill] sm:$0xff] }
 0x2a3   : > { %v2436_v29 = vsel %vm2433_vm6, %v2435_v25, %v2431_v55  ;;  %v2787_v28 = vadd.f32 %v3816_v14, %v2786_v35  ;;  %vm2414_vm11 = vweird.f32 %v3818_v57  ;;  %v2417_v32 = vand.u32 2147483647, %v8404_v63  ;;  %v10113_v63 = vld [vmem:[#allocation96_spill] sm:$0xff] }
 0x2a4   : > { %v3820_v9 = vpop.eup %3819  ;;  %v2835_v48 = vmul.f32 %v8262_v43, %v2436_v29  ;;  %v2410_v0 = vsub.f32 1.0, %v2409_v20  ;;  %v1632_v3 = vmul.f32 %v9921_v8, %v10109_v56  ;;  %3823 = vpow2.f32 %v3411_v46  ;;  %vm8470_vm10 = vmor %vm2413_vm8, %vm2414_vm11 }
 0x2a5   : > { %v2791_v18 = vsel %vm8444_vm9, %v3816_v14, %v2787_v28  ;;  %v8458_v40 = vadd.f32 1.0, %v3820_v9  ;;  %v1633_v35 = vmul.f32 %v6456_v58, %v10110_v22  ;;  %v1899_v14 = vadd.f32 %v8383_v37, %v8389_v39  ;;  %v8481_v39 = vld [vmem:[%s4289_s28 + $0xd8] sm:$0xff] }
 0x2a6   : > { %v2886_v25 = vmul.f32 %v6961_v54, %v2835_v48  ;;  %v2796_v49 = vsel %vm8438_vm7, %v2795_v33, %v2791_v18  ;;  %v2411_v43 = vmul.f32 %v3818_v57, %v2410_v0  ;;  %v2420_v29 = vor.u32 1.1754944e-38, %v2419_v41  ;;  %v8487_v41 = vpop.permute.xlu0 %1478  ;;  %v10114_v48 = vld [vmem:[#allocation94_spill] sm:$0xff] }
 0x2a7   : > { %v3822_v55 = vpop.eup %3821  ;;  %v2859_v36 = vmul.f32 %v8283_v44, %v2796_v49  ;;  %3825 = vrcp.f32 %v8458_v40  ;;  %vm2418_vm14 = vcmp.eq.f32.partialorder %v2417_v32, 8.507059e+37  ;;  %v8477_v46 = vmul.f32 %v1783_v21, %v1596_v2  ;;  %v10115_v21 = vld [vmem:[#allocation124_spill] sm:$0xff] }
 0x2a8   : > { %v2934_v61 = vadd.f32 %v2886_v25, %v1875_v60  ;;  %v2412_v33 = vadd.f32 %v3818_v57, %v2411_v43  ;;  %v8475_v28 = vadd.f32 1.0, %v3822_v55  ;;  %v1733_v44 = vsub.f32 %v8481_v39, %v10056_v15  ;;  %v10116_v25 = vld [vmem:[#allocation84_spill] sm:$0xff]  ;;  %v10117_v43 = vld [vmem:[#allocation58_spill] sm:$0xff] }
 0x2a9   : > { %v2910_v37 = vmul.f32 %v6961_v54, %v2859_v36  ;;  %v1631_v9 = vmul.f32 %v6550_v52, %v10113_v63  ;;  %v8492_v0 = vmul.f32 %v1632_v3, %v10114_v48  ;;  %v8495_v2 = vmul.f32 %v1633_v35, %v10115_v21  ;;  %v10118_v36 = vld [vmem:[#allocation80_spill] sm:$0xff]  ;;  %v8534_v63 = vld [vmem:[%s4289_s28 + $0xe8] sm:$0xff] }
 0x2aa   : > { %3110 = vmatmul.f32.gmra.mxu1 %v2934_v61  ;;  %v2416_v60 = vsel %vm8470_vm10, %v3818_v57, %v2412_v33  ;;  %3827 = vrcp.f32 %v8475_v28  ;;  %v3824_v32 = vpop.eup %3823  ;;  %v1634_v49 = vmul.f32 %v6550_v52, %v10116_v25  ;;  %v8502_v22 = vmul.f32 %v9921_v8, %v10117_v43  ;;  %v8504_v57 = vpop.permute.xlu2 %1510 }
 0x2ab   : > { %v2958_v18 = vadd.f32 %v2910_v37, %v1899_v14  ;;  %v2421_v56 = vsel %vm2418_vm14, %v2420_v29, %v2416_v60  ;;  %v1874_v3 = vadd.f32 %v8127_v16, %v8402_v12  ;;  %v8509_v55 = vadd.f32 1.0, %v3824_v32  ;;  %v8525_v16 = vld [vmem:[%s4289_s28 + $0xe0] sm:$0xff]  ;;  %v10119_v12 = vld [vmem:[#allocation61_spill] sm:$0xff] }
 0x2ac   : > { %v2834_v35 = vmul.f32 %v8043_v19, %v2421_v56  ;;  %v8513_v14 = vmul.f32 %v6456_v58, %v10118_v36  ;;  %v8516_v29 = vmul.f32 %v10061_v59, %v1733_v44  ;;  %v8522_v61 = vsel %vm673_vm12, %v8487_v41, %v8504_v57 }
 0x2ad   : > { %v3826_v20 = vpop.eup %3825  ;;  %3134 = vmatmul.f32.gmra.mxu3 %v2958_v18  ;;  %v1734_v19 = vsub.f32 %v8525_v16, %v10054_v7  ;;  %v8530_v33 = vmul.f32 %v1631_v9, %v10119_v12  ;;  %v1735_v44 = vsub.f32 %v8534_v63, %v6874_v53  ;;  %3829 = vrcp.f32 %v8509_v55  ;;  %v10120_v12 = vld [vmem:[#allocation52_spill] sm:$0xff] }
 0x2ae   : > { %v2885_v37 = vmul.f32 %v6938_v42, %v2834_v35  ;;  %v2469_v60 = vmul.f32 %v3826_v20, %v8458_v40  ;;  %vm2473_vm15 = vweird.f32 %v8458_v40  ;;  %v2477_v48 = vand.u32 2147483647, %v8458_v40 }
 0x2af   : > { %v2479_v21 = vand.u32 2147483648, %v8458_v40  ;;  %v2492_v9 = vand.u32 2147483647, %v8475_v28  ;;  %vm2474_vm13 = vweird.f32 %v3826_v20  ;;  %v3414_v25 = vmul.f32 -1.442695, %v8481_v39 }
 0x2b0   : > { %v3828_v32 = vpop.eup %3827  ;;  %v2933_v18 = vadd.f32 %v2885_v37, %v1874_v3  ;;  %v2470_v56 = vsub.f32 1.0, %v2469_v60  ;;  %v8546_v43 = vmul.f32 %v10059_v5, %v1734_v19  ;;  %v2494_v36 = vand.u32 2147483648, %v8475_v28  ;;  %vm8559_vm0 = vmor %vm2473_vm15, %vm2474_vm13 }
 0x2b1   : > { %v2484_v35 = vmul.f32 %v3828_v32, %v8475_v28  ;;  %v8551_v13 = vmul.f32 %v1634_v49, %v10120_v12  ;;  %v8554_v34 = vmul.f32 %v6876_v6, %v1735_v44  ;;  %3831 = vpow2.f32 %v3414_v25 }
 0x2b2   : > { %3045 = vmatmul.f32.gmra.mxu0 %v2933_v18  ;;  %v2471_v1 = vmul.f32 %v3826_v20, %v2470_v56  ;;  %v3415_v3 = vmul.f32 -1.442695, %v8525_v16  ;;  %v2480_v37 = vor.u32 1.1754944e-38, %v2479_v21  ;;  %vm2488_vm1 = vweird.f32 %v8475_v28 }
 0x2b3   : > { %v2485_v60 = vsub.f32 1.0, %v2484_v35  ;;  %vm2489_vm2 = vweird.f32 %v3828_v32  ;;  %v3830_v49 = vpop.eup %3829  ;;  %vm2478_vm3 = vcmp.eq.f32.partialorder %v2477_v48, 8.507059e+37  ;;  %vm8564_vm4 = vcmp.eq.f32.partialorder %v2492_v9, 8.507059e+37 }
 0x2b4   : > { %v2472_v18 = vadd.f32 %v3826_v20, %v2471_v1  ;;  %3833 = vpow2.f32 %v3415_v3  ;;  %v2495_v25 = vor.u32 1.1754944e-38, %v2494_v36  ;;  %v2454_v40 = vmul.f32 %v3830_v49, %v8509_v55  ;;  %vm8573_vm6 = vmor %vm2488_vm1, %vm2489_vm2 }
 0x2b5   : > { %v2486_v56 = vmul.f32 %v3828_v32, %v2485_v60  ;;  %3190 = vmatmul.f32.vlgmr.msra.gmra.mxu3 %v8088_v50  ;;  %vm2458_vm5 = vweird.f32 %v8509_v55  ;;  %v2462_v48 = vand.u32 2147483647, %v8509_v55  ;;  %v2464_v21 = vand.u32 2147483648, %v8509_v55  ;;  %v1543_v60 = vpop.permute.xlu1 %1542 }
 0x2b6   : > { %v2476_v28 = vsel %vm8559_vm0, %v3826_v20, %v2472_v18  ;;  %v3416_v9 = vmul.f32 -1.442695, %v8534_v63  ;;  %v2455_v36 = vsub.f32 1.0, %v2454_v40  ;;  %vm2459_vm7 = vweird.f32 %v3830_v49 }
 0x2b7   : > { %v2481_v35 = vsel %vm2478_vm3, %v2480_v37, %v2476_v28  ;;  %v2487_v50 = vadd.f32 %v3828_v32, %v2486_v56  ;;  %v3832_v12 = vpop.eup %3831  ;;  %v1878_v20 = vadd.f32 %v8435_v11, %v8492_v0  ;;  %v1879_v19 = vadd.f32 %v8477_v46, %v8495_v2  ;;  %vm8600_vm9 = vmor %vm2458_vm5, %vm2459_vm7  ;;  %v8605_v2 = vld [vmem:[%s4289_s28 + $0x148] sm:$0xff] }
 0x2b8   : > { %v2838_v3 = vmul.f32 %v8379_v17, %v2481_v35  ;;  %3835 = vpow2.f32 %v3416_v9  ;;  %v1736_v37 = vsub.f32 %v8588_v51, %v10056_v15  ;;  %v2456_v56 = vmul.f32 %v3830_v49, %v2455_v36  ;;  %v8609_v9 = vpop.permute.xlu0 %1480 }
 0x2b9   : > { %v2491_v18 = vsel %vm8573_vm6, %v3828_v32, %v2487_v50  ;;  %v8592_v40 = vadd.f32 1.0, %v3832_v12  ;;  %v2465_v0 = vor.u32 1.1754944e-38, %v2464_v21  ;;  %v3428_v32 = vmul.f32 -1.442695, %v8605_v2  ;;  %v8620_v50 = vpop.permute.xlu2 %1512 }
 0x2ba   : > { %v3834_v28 = vpop.eup %3833  ;;  %v2889_v11 = vmul.f32 %v6961_v54, %v2838_v3  ;;  %v2496_v17 = vsel %vm8564_vm4, %v2495_v25, %v2491_v18  ;;  %v2457_v35 = vadd.f32 %v3830_v49, %v2456_v56  ;;  %vm2463_vm8 = vcmp.eq.f32.partialorder %v2462_v48, 8.507059e+37 }
 0x2bb   : > { %v2839_v1 = vmul.f32 %v8397_v4, %v2496_v17  ;;  %3837 = vrcp.f32 %v8592_v40  ;;  %v1565_v55 = vsel %vm673_vm12, %v8504_v57, %v1543_v60  ;;  %v1597_v44 = vsel %vm673_vm12, %v1543_v60, %v8487_v41 }
 0x2bc   : > { %v2937_v25 = vadd.f32 %v2889_v11, %v1878_v20  ;;  %v8618_v21 = vadd.f32 1.0, %v3834_v28  ;;  %v1787_v36 = vmul.f32 %v10061_v59, %v1736_v37  ;;  %v2461_v48 = vsel %vm8600_vm9, %v3830_v49, %v2457_v35  ;;  %v10129_v20 = vld [vmem:[#allocation14_spill] sm:$0xff]  ;;  %v10130_v11 = vld [vmem:[#allocation76_spill] sm:$0xff] }
 0x2bd   : > { %v2890_v4 = vmul.f32 %v7170_v26, %v2839_v1  ;;  %3839 = vpow2.f32 %v3428_v32  ;;  %v1582_v41 = vsel %vm673_vm12, %v8609_v9, %v8620_v50  ;;  %v2466_v57 = vsel %vm2463_vm8, %v2465_v0, %v2461_v48 }
 0x2be   : > { %v3836_v12 = vpop.eup %3835  ;;  %3113 = vmatmul.f32.gmra.mxu1 %v2937_v25  ;;  %v1683_v3 = vmul.f32 %v8502_v22, %v10129_v20  ;;  %3841 = vrcp.f32 %v8618_v21  ;;  %v1832_v60 = vmul.f32 %v8516_v29, %v8522_v61  ;;  %v1877_v18 = vadd.f32 %v8406_v31, %v8530_v33  ;;  %v8652_v31 = vld [vmem:[%s4289_s28 + $0xf8] sm:$0xff]  ;;  %v8658_v33 = vld [vmem:[%s4289_s28 + $0x100] sm:$0xff] }
 0x2bf   : > { %v2938_v49 = vadd.f32 %v2890_v4, %v1879_v19  ;;  %v2837_v37 = vmul.f32 %v8326_v38, %v2466_v57  ;;  %v1833_v56 = vmul.f32 %v8546_v43, %v1565_v55  ;;  %v8640_v28 = vmul.f32 %v8554_v34, %v1597_v44 }
 0x2c0   : > { %v8644_v22 = vmul.f32 %v8513_v14, %v10130_v11  ;;  %v8646_v17 = vadd.f32 1.0, %v3836_v12  ;;  %v8648_v29 = vmul.f32 %v1787_v36, %v1582_v41  ;;  %v1737_v38 = vsub.f32 %v8652_v31, %v10054_v7 }
 0x2c1   : > { %v3838_v46 = vpop.eup %3837  ;;  %3178 = vmatmul.f32.gmra.mxu2 %v2938_v49  ;;  %v2888_v61 = vmul.f32 %v6938_v42, %v2837_v37  ;;  %v3417_v34 = vmul.f32 -1.442695, %v8588_v51  ;;  %v1738_v14 = vsub.f32 %v8658_v33, %v6874_v53  ;;  %v2509_v19 = vand.u32 2147483648, %v8592_v40 }
 0x2c2   : > { %v2499_v43 = vmul.f32 %v3838_v46, %v8592_v40  ;;  %3843 = vrcp.f32 %v8646_v17  ;;  %vm2503_vm11 = vweird.f32 %v8592_v40  ;;  %v2507_v1 = vand.u32 2147483647, %v8592_v40 }
 0x2c3   : > { %v3840_v0 = vpop.eup %3839  ;;  %v2936_v32 = vadd.f32 %v2888_v61, %v1877_v18  ;;  %v2522_v35 = vand.u32 2147483647, %v8618_v21  ;;  %vm2504_vm10 = vweird.f32 %v3838_v46  ;;  %3845 = vpow2.f32 %v3417_v34 }
 0x2c4   : > { %v3842_v55 = vpop.eup %3841  ;;  %v2500_v44 = vsub.f32 1.0, %v2499_v43  ;;  %v8668_v25 = vadd.f32 1.0, %v3840_v0  ;;  %v1880_v4 = vadd.f32 %v1832_v60, %v8551_v13  ;;  %v8671_v36 = vadd.f32 %v1833_v56, %v1683_v3  ;;  %vm8679_vm14 = vmor %vm2503_vm11, %vm2504_vm10 }
 0x2c5   : > { %3048 = vmatmul.f32.gmra.mxu0 %v2936_v32  ;;  %v2514_v48 = vmul.f32 %v3842_v55, %v8618_v21  ;;  %v2524_v12 = vand.u32 2147483648, %v8618_v21  ;;  %v2510_v57 = vor.u32 1.1754944e-38, %v2509_v19  ;;  %v2537_v20 = vand.u32 2147483647, %v8646_v17 }
 0x2c6   : > { %v2501_v41 = vmul.f32 %v3838_v46, %v2500_v44  ;;  %3847 = vrcp.f32 %v8668_v25  ;;  %vm2518_vm15 = vweird.f32 %v8618_v21  ;;  %vm2519_vm13 = vweird.f32 %v3842_v55 }
 0x2c7   : > { %v2515_v18 = vsub.f32 1.0, %v2514_v48  ;;  %v3418_v13 = vmul.f32 -1.442695, %v8652_v31  ;;  %vm2508_vm0 = vcmp.eq.f32.partialorder %v2507_v1, 8.507059e+37  ;;  %vm8685_vm1 = vcmp.eq.f32.partialorder %v2522_v35, 8.507059e+37  ;;  %vm8694_vm3 = vmor %vm2518_vm15, %vm2519_vm13 }
 0x2c8   : > { %v3844_v3 = vpop.eup %3843  ;;  %v2502_v60 = vadd.f32 %v3838_v46, %v2501_v41  ;;  %v2539_v56 = vand.u32 2147483648, %v8646_v17  ;;  %v2525_v11 = vor.u32 1.1754944e-38, %v2524_v12  ;;  %vm2533_vm2 = vweird.f32 %v8646_v17  ;;  %v1545_v41 = vpop.permute.xlu1 %1544 }
 0x2c9   : > { %v2516_v40 = vmul.f32 %v3842_v55, %v2515_v18  ;;  %v2529_v61 = vmul.f32 %v3844_v3, %v8646_v17  ;;  %v3846_v34 = vpop.eup %3845  ;;  %vm2534_vm4 = vweird.f32 %v3844_v3  ;;  %vm8698_vm5 = vcmp.eq.f32.partialorder %v2537_v20, 8.507059e+37 }
 0x2ca   : > { %v2506_v21 = vsel %vm8679_vm14, %v3838_v46, %v2502_v60  ;;  %3849 = vpow2.f32 %v3418_v13  ;;  %v8702_v35 = vadd.f32 1.0, %v3846_v34  ;;  %v2540_v12 = vor.u32 1.1754944e-38, %v2539_v56  ;;  %vm8717_vm7 = vmor %vm2533_vm2, %vm2534_vm4 }
 0x2cb   : > { %v2511_v0 = vsel %vm2508_vm0, %v2510_v57, %v2506_v21  ;;  %v2517_v32 = vadd.f32 %v3842_v55, %v2516_v40  ;;  %v2530_v1 = vsub.f32 1.0, %v2529_v61  ;;  %vm2713_vm6 = vweird.f32 %v8668_v25 }
 0x2cc   : > { %v3848_v44 = vpop.eup %3847  ;;  %v2840_v48 = vmul.f32 %v8481_v39, %v2511_v0  ;;  %v3419_v46 = vmul.f32 -1.442695, %v8658_v33  ;;  %v2717_v57 = vand.u32 2147483647, %v8668_v25  ;;  %v2719_v56 = vand.u32 2147483648, %v8668_v25 }
 0x2cd   : > { %v2521_v20 = vsel %vm8694_vm3, %v3842_v55, %v2517_v32  ;;  %v2531_v49 = vmul.f32 %v3844_v3, %v2530_v1  ;;  %v2709_v18 = vmul.f32 %v3848_v44, %v8668_v25  ;;  %3851 = vrcp.f32 %v8702_v35  ;;  %v3025_v32 = vpop.f32.mrf.mxu0  ;;  %v3090_v1 = vpop.f32.mrf.mxu1 }
 0x2ce   : > { %v2891_v13 = vmul.f32 %v6938_v42, %v2840_v48  ;;  %v2526_v60 = vsel %vm8685_vm1, %v2525_v11, %v2521_v20  ;;  %vm2714_vm9 = vweird.f32 %v3848_v44  ;;  %v1788_v37 = vmul.f32 %v10059_v5, %v1737_v38 }
 0x2cf   : > { %v2841_v55 = vmul.f32 %v8525_v16, %v2526_v60  ;;  %v2532_v40 = vadd.f32 %v3844_v3, %v2531_v49  ;;  %v2710_v61 = vsub.f32 1.0, %v2709_v18  ;;  %v1566_v17 = vsel %vm673_vm12, %v8620_v50, %v1545_v41  ;;  %vm8740_vm8 = vmor %vm2713_vm6, %vm2714_vm9 }
 0x2d0   : > { %v3850_v34 = vpop.eup %3849  ;;  %v2939_v11 = vadd.f32 %v2891_v13, %v1880_v4  ;;  %3853 = vpow2.f32 %v3419_v46  ;;  %v1882_v16 = vadd.f32 %v8640_v28, %v8644_v22  ;;  %v2720_v4 = vor.u32 1.1754944e-38, %v2719_v56 }
 0x2d1   : > { %v2892_v21 = vmul.f32 %v6961_v54, %v2841_v55  ;;  %v2536_v43 = vsel %vm8717_vm7, %v3844_v3, %v2532_v40  ;;  %v2711_v0 = vmul.f32 %v3848_v44, %v2710_v61  ;;  %v8744_v48 = vadd.f32 1.0, %v3850_v34  ;;  %v10143_v55 = vld [vmem:[#allocation81_spill] sm:$0xff] }
 0x2d2   : > { %3051 = vmatmul.f32.gmra.mxu0 %v2939_v11  ;;  %v2541_v38 = vsel %vm8698_vm5, %v2540_v12, %v2536_v43  ;;  %v3431_v28 = vmul.f32 -1.442695, %v8132_v10  ;;  %vm2718_vm11 = vcmp.eq.f32.partialorder %v2717_v57, 8.507059e+37  ;;  %v1894_v19 = vadd.f32 %v7997_v30, %v8411_v24  ;;  %v8759_v57 = vpop.f32.mrf.mxu3  ;;  %v3155_v24 = vpop.f32.mrf.mxu2 }
 0x2d3   : > { %v2940_v22 = vadd.f32 %v2892_v21, %v8671_v36  ;;  %v2842_v3 = vmul.f32 %v8534_v63, %v2541_v38  ;;  %v2712_v46 = vadd.f32 %v3848_v44, %v2711_v0  ;;  %v3852_v20 = vpop.eup %3851  ;;  %v3091_v25 = vadd.f32 %v3090_v1, %v3025_v32  ;;  %v10146_v32 = vld [vmem:[#allocation63_spill] sm:$0xff] }
 0x2d4   : > { %vm2548_vm10 = vweird.f32 %v8702_v35  ;;  %3855 = vrcp.f32 %v8744_v48  ;;  %v2544_v63 = vmul.f32 %v3852_v20, %v8702_v35  ;;  %v2552_v36 = vand.u32 2147483647, %v8702_v35 }
 0x2d5   : > { %3116 = vmatmul.f32.gmra.mxu1 %v2940_v22  ;;  %v2893_v12 = vmul.f32 %v7170_v26, %v2842_v3  ;;  %v2716_v10 = vsel %vm8740_vm8, %v3848_v44, %v2712_v46  ;;  %vm2549_vm14 = vweird.f32 %v3852_v20  ;;  %v2554_v30 = vand.u32 2147483648, %v8702_v35 }
 0x2d6   : > { %v3854_v49 = vpop.eup %3853  ;;  %v2721_v18 = vsel %vm2718_vm11, %v2720_v4, %v2716_v10  ;;  %3857 = vpow2.f32 %v3431_v28  ;;  %v2545_v39 = vsub.f32 1.0, %v2544_v63  ;;  %v1789_v44 = vmul.f32 %v6876_v6, %v1738_v14  ;;  %vm8780_vm15 = vmor %vm2548_vm10, %vm2549_vm14 }
 0x2d7   : > { %v2941_v13 = vadd.f32 %v2893_v12, %v1882_v16  ;;  %v2854_v60 = vmul.f32 %v8605_v2, %v2721_v18  ;;  %v8763_v56 = vadd.f32 1.0, %v3854_v49  ;;  %v1637_v40 = vmul.f32 %v6550_v52, %v10143_v55  ;;  %v10148_v12 = vld [vmem:[#allocation104_spill] sm:$0xff] }
 0x2d8   : > { %v3156_v61 = vadd.f32 %v3155_v24, %v3091_v25  ;;  %v3434_v34 = vmul.f32 -1.442695, %v8318_v62  ;;  %v1598_v11 = vsel %vm673_vm12, %v1545_v41, %v8609_v9  ;;  %v2546_v21 = vmul.f32 %v3852_v20, %v2545_v39  ;;  %v10149_v24 = vld [vmem:[#allocation36_spill] sm:$0xff] }
 0x2d9   : > { %3181 = vmatmul.f32.gmra.mxu2 %v2941_v13  ;;  %v2905_v2 = vmul.f32 %v7170_v26, %v2854_v60  ;;  %3859 = vrcp.f32 %v8763_v56  ;;  %v1836_v43 = vmul.f32 %v1788_v37, %v1566_v17  ;;  %v2555_v0 = vor.u32 1.1754944e-38, %v2554_v30  ;;  %v10147_v17 = vld [vmem:[#allocation35_spill] sm:$0xff]  ;;  %v3028_v13 = vpop.f32.mrf.mxu0  ;;  %v3093_v60 = vpop.f32.mrf.mxu1 }
 0x2da   : > { %v3856_v16 = vpop.eup %3855  ;;  %v1638_v1 = vmul.f32 %v9921_v8, %v10146_v32  ;;  %3203 = vst [vmem:[%s8788_s30] sm:$0xff] %v3156_v61  ;;  %3861 = vpow2.f32 %v3434_v34  ;;  %v2547_v41 = vadd.f32 %v3852_v20, %v2546_v21  ;;  %vm2553_vm13 = vcmp.eq.f32.partialorder %v2552_v36, 8.507059e+37  ;;  %v3158_v63 = vpop.f32.mrf.mxu2  ;;  %v8830_v32 = vld [vmem:[%s4289_s28 + $0x110] sm:$0xff] }
 0x2db   : > { %v2953_v9 = vadd.f32 %v2905_v2, %v1894_v19  ;;  %v2559_v37 = vmul.f32 %v3856_v16, %v8744_v48  ;;  %v1685_v38 = vmul.f32 %v1637_v40, %v10147_v17  ;;  %vm2563_vm0 = vweird.f32 %v8744_v48  ;;  %v8802_v36 = vpop.f32.mrf.mxu3 }
 0x2dc   : > { %v3858_v35 = vpop.eup %3857  ;;  %v2567_v50 = vand.u32 2147483647, %v8744_v48  ;;  %v2569_v4 = vand.u32 2147483648, %v8744_v48  ;;  %v2551_v28 = vsel %vm8780_vm15, %v3852_v20, %v2547_v41  ;;  %vm2564_vm1 = vweird.f32 %v3856_v16 }
 0x2dd   : > { %3193 = vmatmul.f32.gmra.mxu3 %v2953_v9  ;;  %v2560_v22 = vsub.f32 1.0, %v2559_v37  ;;  %v8798_v3 = vadd.f32 1.0, %v3858_v35  ;;  %v1837_v46 = vmul.f32 %v1789_v44, %v1598_v11  ;;  %v1883_v19 = vadd.f32 %v8648_v29, %v1685_v38  ;;  %vm8811_vm2 = vmor %vm2563_vm0, %vm2564_vm1  ;;  %v10154_v37 = vld [vmem:[#allocation31_spill] sm:$0xff] }
 0x2de   : > { %v2556_v25 = vsel %vm2553_vm13, %v2555_v0, %v2551_v28  ;;  %v1686_v10 = vmul.f32 %v1638_v1, %v10148_v12  ;;  %v1639_v20 = vmul.f32 %v6456_v58, %v10149_v24  ;;  %vm8815_vm3 = vcmp.eq.f32.partialorder %v2567_v50, 8.507059e+37 }
 0x2df   : > { %v3860_v49 = vpop.eup %3859  ;;  %v2843_v18 = vmul.f32 %v8588_v51, %v2556_v25  ;;  %v2561_v30 = vmul.f32 %v3856_v16, %v2560_v22  ;;  %3863 = vrcp.f32 %v8798_v3  ;;  %v2570_v51 = vor.u32 1.1754944e-38, %v2569_v4 }
 0x2e0   : > { %v3862_v39 = vpop.eup %3861  ;;  %v2574_v55 = vmul.f32 %v3860_v49, %v8763_v56  ;;  %v2584_v40 = vand.u32 2147483648, %v8763_v56  ;;  %v3094_v48 = vadd.f32 %v3093_v60, %v3028_v13  ;;  %vm2578_vm4 = vweird.f32 %v8763_v56 }
 0x2e1   : > { %v2894_v61 = vmul.f32 %v6938_v42, %v2843_v18  ;;  %v2562_v34 = vadd.f32 %v3856_v16, %v2561_v30  ;;  %v8822_v11 = vadd.f32 1.0, %v3862_v39  ;;  %vm2579_vm5 = vweird.f32 %v3860_v49  ;;  %v10159_v30 = vld [vmem:[#allocation49_spill] sm:$0xff] }
 0x2e2   : > { %v2575_v2 = vsub.f32 1.0, %v2574_v55  ;;  %v2582_v21 = vand.u32 2147483647, %v8763_v56  ;;  %v3421_v1 = vmul.f32 -1.442695, %v8830_v32  ;;  %v1884_v9 = vadd.f32 %v1836_v43, %v1686_v10  ;;  %vm8839_vm6 = vmor %vm2578_vm4, %vm2579_vm5  ;;  %v3161_v56 = vpop.f32.mrf.mxu2 }
 0x2e3   : > { %v2942_v14 = vadd.f32 %v2894_v61, %v1883_v19  ;;  %v2566_v0 = vsel %vm8811_vm2, %v3856_v16, %v2562_v34  ;;  %3865 = vrcp.f32 %v8822_v11  ;;  %v1687_v35 = vmul.f32 %v1639_v20, %v10154_v37  ;;  %v3096_v20 = vpop.f32.mrf.mxu1 }
 0x2e4   : > { %v2571_v41 = vsel %vm8815_vm3, %v2570_v51, %v2566_v0  ;;  %v2576_v17 = vmul.f32 %v3860_v49, %v2575_v2  ;;  %v2585_v4 = vor.u32 1.1754944e-38, %v2584_v40  ;;  %v2762_v43 = vand.u32 2147483647, %v8798_v3 }
 0x2e5   : > { %v3864_v38 = vpop.eup %3863  ;;  %3054 = vmatmul.f32.gmra.mxu0 %v2942_v14  ;;  %v2844_v50 = vmul.f32 %v8652_v31, %v2571_v41  ;;  %v3159_v28 = vadd.f32 %v3158_v63, %v3094_v48  ;;  %vm8844_vm7 = vcmp.eq.f32.partialorder %v2582_v21, 8.507059e+37  ;;  %v2764_v12 = vand.u32 2147483648, %v8798_v3  ;;  %v8850_v31 = vpop.f32.mrf.mxu3 }
 0x2e6   : > { %v2577_v22 = vadd.f32 %v3860_v49, %v2576_v17  ;;  %v2754_v25 = vmul.f32 %v3864_v38, %v8798_v3  ;;  %v1885_v18 = vadd.f32 %v1837_v46, %v1687_v35  ;;  %v1699_v24 = vmul.f32 %v8393_v27, %v10159_v30  ;;  %v3031_v63 = vpop.f32.mrf.mxu0  ;;  %v8886_v35 = vld [vmem:[%s4289_s28 + $0x108] sm:$0xff]  ;;  %v8920_v46 = vld [vmem:[%s4289_s28 + $0x118] sm:$0xff] }
 0x2e7   : > { %v2895_v10 = vmul.f32 %v6961_v54, %v2844_v50  ;;  %3204 = vst [vmem:[%s8788_s30 + $0x8] sm:$0xff] %v3159_v28  ;;  %3867 = vpow2.f32 %v3421_v1  ;;  %vm2758_vm9 = vweird.f32 %v8798_v3  ;;  %vm2759_vm8 = vweird.f32 %v3864_v38 }
 0x2e8   : > { %v2581_v13 = vsel %vm8839_vm6, %v3860_v49, %v2577_v22  ;;  %v2755_v60 = vsub.f32 1.0, %v2754_v25  ;;  %vm8861_vm11 = vcmp.eq.f32.partialorder %v2762_v43, 8.507059e+37  ;;  %v3097_v27 = vadd.f32 %v3096_v20, %v3031_v63  ;;  %vm8867_vm10 = vmor %vm2758_vm9, %vm2759_vm8 }
 0x2e9   : > { %v3866_v39 = vpop.eup %3865  ;;  %v2943_v29 = vadd.f32 %v2895_v10, %v1884_v9  ;;  %v2586_v44 = vsel %vm8844_vm7, %v2585_v4, %v2581_v13  ;;  %v2765_v40 = vor.u32 1.1754944e-38, %v2764_v12  ;;  %vm2803_vm14 = vweird.f32 %v8822_v11  ;;  %v10165_v9 = vld [vmem:[#allocation70_spill] sm:$0xff] }
 0x2ea   : > { %v2845_v51 = vmul.f32 %v8658_v33, %v2586_v44  ;;  %v2756_v55 = vmul.f32 %v3864_v38, %v2755_v60  ;;  %v2799_v49 = vmul.f32 %v3866_v39, %v8822_v11  ;;  %v2807_v61 = vand.u32 2147483647, %v8822_v11  ;;  %v3164_v28 = vpop.f32.mrf.mxu2 }
 0x2eb   : > { %3119 = vmatmul.f32.gmra.mxu1 %v2943_v29  ;;  %v2809_v34 = vand.u32 2147483648, %v8822_v11  ;;  %v3162_v48 = vadd.f32 %v3161_v56, %v3097_v27  ;;  %vm2804_vm15 = vweird.f32 %v3866_v39  ;;  %v10164_v0 = vsub.f32 %v8318_v62, %v6874_v53  ;;  %v3099_v12 = vpop.f32.mrf.mxu1  ;;  %v3989_v56 = vld [vmem:[%s4289_s28 + $0x160] sm:$0xff]  ;;  %v10170_v11 = vld [vmem:[#allocation53_spill] sm:$0xff] }
 0x2ec   : > { %v2896_v33 = vmul.f32 %v7170_v26, %v2845_v51  ;;  %v2757_v2 = vadd.f32 %v3864_v38, %v2756_v55  ;;  %v2800_v21 = vsub.f32 1.0, %v2799_v49  ;;  %v1603_v41 = vsel %vm673_vm12, %v8322_v45, %v10165_v9  ;;  %vm8900_vm13 = vmor %vm2803_vm14, %vm2804_vm15 }
 0x2ed   : > { %v3868_v14 = vpop.eup %3867  ;;  %v1804_v1 = vmul.f32 %v6876_v6, %v10164_v0  ;;  %v1897_v37 = vadd.f32 %v8229_v47, %v1699_v24  ;;  %3205 = vst [vmem:[%s8788_s30 + $0x10] sm:$0xff] %v3162_v48  ;;  %v3420_v17 = vmul.f32 -1.442695, %v8886_v35  ;;  %v8891_v43 = vpop.f32.mrf.mxu3  ;;  %vm8904_vm0 = vcmp.eq.f32.partialorder %v2807_v61, 8.507059e+37  ;;  %v10172_v0 = vld [vmem:[#allocation12_spill] sm:$0xff] }
 0x2ee   : > { %v2944_v50 = vadd.f32 %v2896_v33, %v1885_v18  ;;  %v2761_v16 = vsel %vm8867_vm10, %v3864_v38, %v2757_v2  ;;  %v2801_v4 = vmul.f32 %v3866_v39, %v2800_v21  ;;  %v8893_v22 = vadd.f32 1.0, %v3868_v14  ;;  %v3034_v25 = vpop.f32.mrf.mxu0 }
 0x2ef   : > { %v2766_v45 = vsel %vm8861_vm11, %v2765_v40, %v2761_v16  ;;  %v2810_v38 = vor.u32 1.1754944e-38, %v2809_v34  ;;  %3869 = vpow2.f32 %v3420_v17  ;;  %v3100_v30 = vadd.f32 %v3099_v12, %v3034_v25  ;;  %v8925_v40 = vpop.permute.xlu1 %1546 }
 0x2f0   : > { %3184 = vmatmul.f32.gmra.mxu2 %v2944_v50  ;;  %v2857_v10 = vmul.f32 %v3989_v56, %v2766_v45  ;;  %v2802_v18 = vadd.f32 %v3866_v39, %v2801_v4  ;;  %3871 = vrcp.f32 %v8893_v22  ;;  %v1654_v24 = vmul.f32 %v6456_v58, %v10170_v11 }
 0x2f1   : > { %v3165_v13 = vadd.f32 %v3164_v28, %v3100_v30  ;;  %v1740_v60 = vsub.f32 %v8830_v32, %v10054_v7  ;;  %v1852_v29 = vmul.f32 %v1804_v1, %v1603_v41  ;;  %v3422_v27 = vmul.f32 -1.442695, %v8920_v46  ;;  %v1515_v7 = vpop.permute.xlu2 %1514 }
 0x2f2   : > { %v2908_v63 = vmul.f32 %v7170_v26, %v2857_v10  ;;  %v2806_v20 = vsel %vm8900_vm13, %v3866_v39, %v2802_v18  ;;  %v10171_v39 = vld [vmem:[#allocation100_spill] sm:$0xff]  ;;  %v1641_v1 = vmul.f32 %v9921_v8, %v10172_v0  ;;  %v3167_v17 = vpop.f32.mrf.mxu2  ;;  %vm2608_vm1 = vweird.f32 %v8893_v22  ;;  %v1483_v10 = vpop.permute.xlu0 %1482 }
 0x2f3   : > { %v2811_v44 = vsel %vm8904_vm0, %v2810_v38, %v2806_v20  ;;  %3206 = vst [vmem:[%s8788_s30 + $0x18] sm:$0xff] %v3165_v13  ;;  %v1702_v3 = vmul.f32 %v1654_v24, %v10171_v39  ;;  %3873 = vpow2.f32 %v3422_v27  ;;  %v1791_v34 = vmul.f32 %v10059_v5, %v1740_v60  ;;  %v3102_v14 = vpop.f32.mrf.mxu1  ;;  %v10173_v38 = vld [vmem:[#allocation57_spill] sm:$0xff] }
 0x2f4   : > { %v2956_v51 = vadd.f32 %v2908_v63, %v1897_v37  ;;  %v2860_v55 = vmul.f32 %v8318_v62, %v2811_v44  ;;  %v1567_v62 = vsel %vm673_vm12, %v1515_v7, %v8925_v40  ;;  %v2614_v5 = vand.u32 2147483648, %v8893_v22 }
 0x2f5   : > { %v3870_v49 = vpop.eup %3869  ;;  %v8929_v48 = vpop.f32.mrf.mxu3  ;;  %v1900_v2 = vadd.f32 %v1852_v29, %v1702_v3  ;;  %v2612_v16 = vand.u32 2147483647, %v8893_v22  ;;  %v1839_v4 = vmul.f32 %v1791_v34, %v1567_v62  ;;  %v1739_v47 = vsub.f32 %v8886_v35, %v10056_v15 }
 0x2f6   : > { %v3872_v61 = vpop.eup %3871  ;;  %3196 = vmatmul.f32.gmra.mxu3 %v2956_v51  ;;  %v2078_v33 = vadd.f32 1.0, %v3870_v49  ;;  %v3037_v21 = vpop.f32.mrf.mxu0  ;;  %v2911_v41 = vmul.f32 %v7170_v26, %v2860_v55  ;;  %v1689_v25 = vmul.f32 %v1641_v1, %v10173_v38  ;;  %v2615_v56 = vor.u32 1.1754944e-38, %v2614_v5 }
 0x2f7   : > { %v2604_v9 = vmul.f32 %v3872_v61, %v8893_v22  ;;  %v3103_v37 = vadd.f32 %v3102_v14, %v3037_v21  ;;  %vm2609_vm2 = vweird.f32 %v3872_v61  ;;  %vm2613_vm4 = vcmp.eq.f32.partialorder %v2612_v16, 8.507059e+37 }
 0x2f8   : > { %3875 = vrcp.f32 %v2078_v33  ;;  %v2959_v19 = vadd.f32 %v2911_v41, %v1900_v2  ;;  %vm8945_vm3 = vmor %vm2608_vm1, %vm2609_vm2  ;;  %v1887_v11 = vadd.f32 %v1839_v4, %v1689_v25  ;;  %v1790_v24 = vmul.f32 %v10061_v59, %v1739_v47  ;;  %v10180_v4 = vld [vmem:[#allocation86_spill] sm:$0xff] }
 0x2f9   : > { %v2605_v50 = vsub.f32 1.0, %v2604_v9  ;;  %v3168_v28 = vadd.f32 %v3167_v17, %v3103_v37  ;;  %v3874_v45 = vpop.eup %3873  ;;  %v1583_v63 = vsel %vm673_vm12, %v1483_v10, %v1515_v7  ;;  %vm2593_vm5 = vweird.f32 %v2078_v33 }
 0x2fa   : > { %v2080_v18 = vadd.f32 1.0, %v3874_v45  ;;  %v2599_v44 = vand.u32 2147483648, %v2078_v33  ;;  %v2597_v39 = vand.u32 2147483647, %v2078_v33  ;;  %v3170_v3 = vpop.f32.mrf.mxu2  ;;  %v1741_v59 = vsub.f32 %v8920_v46, %v6874_v53 }
 0x2fb   : > { %v2606_v8 = vmul.f32 %v3872_v61, %v2605_v50  ;;  %3207 = vst [vmem:[%s8788_s30 + $0x20] sm:$0xff] %v3168_v28  ;;  %v3105_v60 = vpop.f32.mrf.mxu1  ;;  %v1838_v14 = vmul.f32 %v1790_v24, %v1583_v63  ;;  %v1599_v50 = vsel %vm673_vm12, %v8925_v40, %v1483_v10  ;;  %v1642_v28 = vmul.f32 %v6456_v58, %v10180_v4  ;;  %v10181_v40 = vld [vmem:[#allocation102_spill] sm:$0xff] }
 0x2fc   : > { %3877 = vrcp.f32 %v2080_v18  ;;  %vm2598_vm9 = vcmp.eq.f32.partialorder %v2597_v39, 8.507059e+37  ;;  %v1792_v41 = vmul.f32 %v6876_v6, %v1741_v59  ;;  %vm2623_vm8 = vweird.f32 %v2080_v18 }
 0x2fd   : > { %v2607_v30 = vadd.f32 %v3872_v61, %v2606_v8  ;;  %v8954_v27 = vpop.f32.mrf.mxu3  ;;  %v2627_v17 = vand.u32 2147483647, %v2080_v18  ;;  %v1690_v10 = vmul.f32 %v1642_v28, %v10181_v40 }
 0x2fe   : > { %v3876_v22 = vpop.eup %3875  ;;  %3199 = vmatmul.f32.gmra.mxu3 %v2959_v19  ;;  %v3040_v13 = vpop.f32.mrf.mxu0  ;;  %v1840_v25 = vmul.f32 %v1792_v41, %v1599_v50 }
 0x2ff   : > { %v2611_v15 = vsel %vm8945_vm3, %v3872_v61, %v2607_v30  ;;  %v2589_v20 = vmul.f32 %v3876_v22, %v2078_v33  ;;  %v3106_v51 = vadd.f32 %v3105_v60, %v3040_v13  ;;  %vm2594_vm6 = vweird.f32 %v3876_v22  ;;  %v10176_v61 = vld [vmem:[#allocation56_spill] sm:$0xff] }
 0x300   : > { %v2616_v29 = vsel %vm2613_vm4, %v2615_v56, %v2611_v15  ;;  %v1640_v7 = vmul.f32 %v6550_v52, %v10176_v61  ;;  %vm8963_vm7 = vmor %vm2593_vm5, %vm2594_vm6  ;;  %v10179_v52 = vld [vmem:[#allocation106_spill] sm:$0xff]  ;;  %vm2628_vm14 = vcmp.eq.f32.partialorder %v2627_v17, 8.507059e+37 }
 0x301   : > { %v2847_v55 = vmul.f32 %v8830_v32, %v2616_v29  ;;  %v2590_v49 = vsub.f32 1.0, %v2589_v20  ;;  %v3171_v34 = vadd.f32 %v3170_v3, %v3106_v51  ;;  %v2600_v32 = vor.u32 1.1754944e-38, %v2599_v44 }
 0x302   : > { %v3878_v21 = vpop.eup %3877  ;;  %v1688_v37 = vmul.f32 %v1640_v7, %v10179_v52 }
 0x303   : > { %v2898_v2 = vmul.f32 %v6961_v54, %v2847_v55  ;;  %v2591_v62 = vmul.f32 %v3876_v22, %v2590_v49  ;;  %3208 = vst [vmem:[%s8788_s30 + $0x28] sm:$0xff] %v3171_v34  ;;  %v2619_v53 = vmul.f32 %v3878_v21, %v2080_v18  ;;  %v2629_v54 = vand.u32 2147483648, %v2080_v18 }
 0x304   : > { %vm2624_vm11 = vweird.f32 %v3878_v21  ;;  %v1886_v45 = vadd.f32 %v1838_v14, %v1688_v37 }
 0x305   : > { %v2946_v1 = vadd.f32 %v2898_v2, %v1887_v11  ;;  %v2592_v9 = vadd.f32 %v3876_v22, %v2591_v62  ;;  %v2620_v5 = vsub.f32 1.0, %v2619_v53  ;;  %vm2625_vm10 = vmor %vm2623_vm8, %vm2624_vm11  ;;  %v2630_v38 = vor.u32 1.1754944e-38, %v2629_v54 }
 0x307   : > { %3122 = vmatmul.f32.gmra.mxu1 %v2946_v1  ;;  %v2596_v33 = vsel %vm8963_vm7, %v3876_v22, %v2592_v9  ;;  %v2621_v47 = vmul.f32 %v3878_v21, %v2620_v5  ;;  %v1888_v22 = vadd.f32 %v1840_v25, %v1690_v10 }
 0x308   : > { %v2601_v16 = vsel %vm2598_vm9, %v2600_v32, %v2596_v33 }
 0x309   : > { %v2846_v8 = vmul.f32 %v8886_v35, %v2601_v16  ;;  %v2622_v56 = vadd.f32 %v3878_v21, %v2621_v47 }
 0x30a   : > { %v3132_v6 = vpop.f32.mrf.mxu3 }
 0x30b   : > { %v3133_v19 = vadd.f32 %v3132_v6, %v8850_v31  ;;  %v2897_v12 = vmul.f32 %v6938_v42, %v2846_v8  ;;  %v2626_v58 = vsel %vm2625_vm10, %v3878_v21, %v2622_v56 }
 0x30c   : > { %v2631_v30 = vsel %vm2628_vm14, %v2630_v38, %v2626_v58 }
 0x30d   : > { %v2945_v23 = vadd.f32 %v2897_v12, %v1886_v45  ;;  %v2848_v35 = vmul.f32 %v8920_v46, %v2631_v30 }
 0x30e   : > { %v3173_v24 = vpop.f32.mrf.mxu2 }
 0x30f   : > { %3057 = vmatmul.f32.gmra.mxu0 %v2945_v23  ;;  %v2899_v31 = vmul.f32 %v7170_v26, %v2848_v35  ;;  %v3127_v26 = vadd.f32 %v8929_v48, %v8759_v57  ;;  %v3130_v57 = vadd.f32 %v8954_v27, %v8802_v36 }
 0x311   : > { %v2947_v18 = vadd.f32 %v2899_v31, %v1888_v22 }
 0x312   : > { %v3108_v11 = vpop.f32.mrf.mxu1 }
 0x313   : > { %3187 = vmatmul.f32.gmra.mxu2 %v2947_v18 }
 0x31a   : > { %v3043_v15 = vpop.f32.mrf.mxu0 }
 0x31b   : > { %v3109_v42 = vadd.f32 %v3108_v11, %v3043_v15 }
 0x31d   : > { %v3174_v63 = vadd.f32 %v3173_v24, %v3109_v42  ;;  %v3176_v44 = vpop.f32.mrf.mxu2 }
 0x31f   : > { %3209 = vst [vmem:[%s8788_s30 + $0x30] sm:$0xff] %v3174_v63 }
 0x327   : > { %v3111_v20 = vpop.f32.mrf.mxu1 }
 0x32f   : > { %v3046_v13 = vpop.f32.mrf.mxu0 }
 0x330   : > { %v3112_v60 = vadd.f32 %v3111_v20, %v3046_v13  ;;  %v3135_v29 = vpop.f32.mrf.mxu3 }
 0x331   : > { %v3136_v46 = vadd.f32 %v3135_v29, %v8891_v43 }
 0x332   : > { %v3177_v51 = vadd.f32 %v3176_v44, %v3112_v60 }
 0x334   : > { %3210 = vst [vmem:[%s8788_s30 + $0x38] sm:$0xff] %v3177_v51 }
 0x338   : > { %v3191_v55 = vpop.f32.mrf.mxu3 }
 0x339   : > { %v3192_v49 = vadd.f32 %v3191_v55, %v3127_v26 }
 0x33b   : > { %3215 = vst [vmem:[%s8788_s30 + $0x60] sm:$0xff] %v3192_v49  ;;  %v3114_v39 = vpop.f32.mrf.mxu1 }
 0x342   : > { %v3049_v3 = vpop.f32.mrf.mxu0 }
 0x343   : > { %v3115_v59 = vadd.f32 %v3114_v39, %v3049_v3 }
 0x344   : > { %v3179_v61 = vpop.f32.mrf.mxu2 }
 0x345   : > { %v3180_v7 = vadd.f32 %v3179_v61, %v3115_v59 }
 0x347   : > { %3211 = vst [vmem:[%s8788_s30 + $0x40] sm:$0xff] %v3180_v7 }
 0x34f   : > { %v3052_v34 = vpop.f32.mrf.mxu0 }
 0x352   : > { %v3117_v2 = vpop.f32.mrf.mxu1 }
 0x353   : > { %v3118_v43 = vadd.f32 %v3117_v2, %v3052_v34 }
 0x35c   : > { %v3182_v62 = vpop.f32.mrf.mxu2 }
 0x35d   : > { %v3183_v21 = vadd.f32 %v3182_v62, %v3118_v43 }
 0x35f   : > { %3212 = vst [vmem:[%s8788_s30 + $0x48] sm:$0xff] %v3183_v21 }
 0x360   : > { %v3194_v48 = vpop.f32.mrf.mxu3 }
 0x361   : > { %v3195_v14 = vadd.f32 %v3194_v48, %v3130_v57 }
 0x362   : > { %v3055_v0 = vpop.f32.mrf.mxu0 }
 0x363   : > { %3216 = vst [vmem:[%s8788_s30 + $0x68] sm:$0xff] %v3195_v14 }
 0x368   : > { %v3120_v32 = vpop.f32.mrf.mxu1 }
 0x369   : > { %v3121_v1 = vadd.f32 %v3120_v32, %v3055_v0 }
 0x373   : > { %v3185_v9 = vpop.f32.mrf.mxu2 }
 0x374   : > { %v3186_v53 = vadd.f32 %v3185_v9, %v3121_v1 }
 0x376   : > { %3213 = vst [vmem:[%s8788_s30 + $0x50] sm:$0xff] %v3186_v53 }
 0x379   : > { %v3197_v41 = vpop.f32.mrf.mxu3 }
 0x37a   : > { %v3198_v52 = vadd.f32 %v3197_v41, %v3133_v19 }
 0x37c   : > { %3217 = vst [vmem:[%s8788_s30 + $0x70] sm:$0xff] %v3198_v52 }
 0x381   : > { %v3200_v37 = vpop.f32.mrf.mxu3 }
 0x382   : > { %v3201_v36 = vadd.f32 %v3200_v37, %v3136_v46 }
 0x384   : > { %3218 = vst [vmem:[%s8788_s30 + $0x78] sm:$0xff] %v3201_v36  ;;  %v3123_v54 = vpop.f32.mrf.mxu1 }
 0x38c   : > { %v3058_v27 = vpop.f32.mrf.mxu0 }
 0x38d   : > { %v3124_v33 = vadd.f32 %v3123_v54, %v3058_v27 }
 0x396   : > { %v3188_v5 = vpop.f32.mrf.mxu2 }
 0x397   : > { %v3189_v17 = vadd.f32 %v3188_v5, %v3124_v33 }
 0x399   : > { %3214 = vst [vmem:[%s8788_s30 + $0x58] sm:$0xff] %v3189_v17 }
 0x39a   : > { %4108 = shalt.err (!%p4105_p10)
}
 0x39b   : > { %s4161_s29 = smov 128   ;;  %s4162_s28 = smov 8  }
 0x39c   : > { %3502 = dma.vmem_to_hbm [thread:$0]  (%p4255_p5), %s3233_s7, 2048, %s3235_s9, %s3220_s10, %s4161_s29, %s4161_s29, %s4162_s28  }
 0x39d PF: > { %s3249_s18 = sand.u32 1, %s4139_s12   ;;  %p10182_p12 = scmp.ge.s32.totalorder %s4151_s15, 2 }
 0x39e   : > { %s3250_s23 = scalar_lea.sflag [#allocation4], %s3249_s18 }
 0x39f   : > { %p3516_p13 = pnand %p10182_p12, %p4218_p6 }
 0x3a1   : > { %p3517_p0 = pneg %p3516_p13 }
 0x3a3   : > { %4134 = dma.done.wait (%p3517_p0), %s3250_s23, 2048  }
 0x3a4   : > { %4136 = vsyncadd (%p3517_p0), %s3250_s23, 4294965248  ;;  %p17_p3 = scmp.ge.s32.totalorder %s4242_s8, 4   ;;  %s10183_s12 = smov %s4143_s13 }
 0x3a5   : > { %s10184_s13 = smov %s4147_s14  ;;  %s10185_s14 = smov %s4251_s11 }
 0x3a6   : > { %s10186_s15 = smov %s4242_s8  ;;  %19 = sbr.rel (!%p17_p3) target bundleno = 6 (0x6), region = 85 }
 0x3ab   :  { %3256 = vsyncpa [#allocation3], 1 }
 0x3ac   :  { %3258 = vsyncpa [#allocation3 + $0x1], 1 }
 0x3ad   :  { %3259 = vsyncpa [#allocation6], 1 }
 0x3ae   :  { %3260 = vsyncpa [#allocation4], 1 }
 0x3af   :  { %3262 = vsyncpa [#allocation4 + $0x1], 1 }

</bundles_post_ra>
